<compile_context>
chip_gen: v7x
topology: tpu7x:2x2x1
jax: 0.10.0
libtpu: 0.0.40
codegen_flags: <defaults>
</compile_context>

<pallas_src>
import jax
import jax.numpy as jnp
from jax.experimental import pallas as pl
from jax.experimental.pallas import tpu as pltpu


# ----------------------------------------------------------------------------
# Kernel bodies
# ----------------------------------------------------------------------------
def _deconv_s2_bn_kernel(r0_ref, r1_ref, r2_ref, w_ref, out_ref, sum_ref, sq_ref):
    """ConvTranspose2d(k=4, s=2, p=1) for one (image, input-row) grid step.

    r*_ref : (1, 1, W+2, Cin) bf16   padded input rows m, m+1, m+2
    w_ref  : (16, Cin, Cout)  bf16   phase/tap weights (ry, rx, ty, tx)
    out_ref: (1, 2, 2, W, Cout) f32  phase-split output rows 2m, 2m+1
    sum_ref, sq_ref: (1, Cout) f32   running per-channel BN sums
    """
    @pl.when(jnp.logical_and(pl.program_id(0) == 0, pl.program_id(1) == 0))
    def _():
        sum_ref[...] = jnp.zeros_like(sum_ref)
        sq_ref[...] = jnp.zeros_like(sq_ref)

    W = out_ref.shape[3]
    Cout = out_ref.shape[4]
    rows = (r0_ref, r1_ref, r2_ref)

    for ry in range(2):                       # output row parity
        for rx in range(2):                   # output column parity
            acc = jnp.zeros((W, Cout), jnp.float32)
            for ty in range(2):               # 2x2 tap over un-dilated input
                src = rows[ry + ty]
                for tx in range(2):
                    c0 = rx + tx
                    tap = ((ry * 2 + rx) * 2 + ty) * 2 + tx
                    acc += jnp.dot(src[0, 0, c0:c0 + W, :], w_ref[tap],
                                   preferred_element_type=jnp.float32)
            out_ref[0, ry, rx, :, :] = acc
            sum_ref[...] += jnp.sum(acc, axis=0, keepdims=True)
            sq_ref[...] += jnp.sum(acc * acc, axis=0, keepdims=True)


def _deconv_s2_tanh_kernel(r0_ref, r1_ref, r2_ref, w_ref, b_ref, out_ref):
    """Final ConvTranspose2d(k=4, s=2, p=1) with bias + Tanh fused in-kernel."""
    W = out_ref.shape[3]
    Cout = out_ref.shape[4]
    rows = (r0_ref, r1_ref, r2_ref)
    bias = b_ref[...]                         # (1, Cout) f32

    for ry in range(2):
        for rx in range(2):
            acc = jnp.zeros((W, Cout), jnp.float32)
            for ty in range(2):
                src = rows[ry + ty]
                for tx in range(2):
                    c0 = rx + tx
                    tap = ((ry * 2 + rx) * 2 + ty) * 2 + tx
                    acc += jnp.dot(src[0, 0, c0:c0 + W, :], w_ref[tap],
                                   preferred_element_type=jnp.float32)
            out_ref[0, ry, rx, :, :] = jnp.tanh(acc + bias)


def _deconv_s1_bn_kernel(r0_ref, r1_ref, r2_ref, r3_ref, w_ref,
                         out_ref, sum_ref, sq_ref):
    """ConvTranspose2d(k=4, s=1) as a direct 4x4 conv over the padded input.

    r*_ref : (1, 1, Wp, Cin) bf16   padded input rows oy .. oy+3
    w_ref  : (16, Cin, Cout) bf16   flipped kernel taps (ky*4 + kx)
    out_ref: (1, 1, OW, Cout) f32
    """
    @pl.when(jnp.logical_and(pl.program_id(0) == 0, pl.program_id(1) == 0))
    def _():
        sum_ref[...] = jnp.zeros_like(sum_ref)
        sq_ref[...] = jnp.zeros_like(sq_ref)

    OW = out_ref.shape[2]
    Cout = out_ref.shape[3]
    rows = (r0_ref, r1_ref, r2_ref, r3_ref)

    acc = jnp.zeros((OW, Cout), jnp.float32)
    for ky in range(4):
        src = rows[ky]
        for kx in range(4):
            acc += jnp.dot(src[0, 0, kx:kx + OW, :], w_ref[ky * 4 + kx],
                           preferred_element_type=jnp.float32)
    out_ref[0, 0, :, :] = acc
    sum_ref[...] += jnp.sum(acc, axis=0, keepdims=True)
    sq_ref[...] += jnp.sum(acc * acc, axis=0, keepdims=True)


def _bn_relu_kernel(x_ref, scale_ref, shift_ref, o_ref):
    y = jnp.maximum(x_ref[...] * scale_ref[...] + shift_ref[...], 0.0)
    o_ref[...] = y.astype(o_ref.dtype)


# ----------------------------------------------------------------------------
# Weight repackaging (trace-time glue, tiny)
# ----------------------------------------------------------------------------
def _phase_weights_s2(w):
    """PyTorch ConvTranspose2d weight (Cin, Cout, 4, 4) -> (16, Cin, Cout) bf16.

    tap index = ((ry*2+rx)*2+ty)*2+tx  with element  w[:, :, 3-(2ty+ry), 3-(2tx+rx)].
    """
    taps = []
    for ry in range(2):
        for rx in range(2):
            for ty in range(2):
                for tx in range(2):
                    taps.append(w[:, :, 3 - (2 * ty + ry), 3 - (2 * tx + rx)])
    return jnp.stack(taps, axis=0).astype(jnp.bfloat16)


def _flip_weights_s1(w):
    """(Cin, Cout, 4, 4) -> (16, Cin, Cout) bf16, tap ky*4+kx = w[:, :, 3-ky, 3-kx]."""
    taps = []
    for ky in range(4):
        for kx in range(4):
            taps.append(w[:, :, 3 - ky, 3 - kx])
    return jnp.stack(taps, axis=0).astype(jnp.bfloat16)


# ----------------------------------------------------------------------------
# pallas_call wrappers
# ----------------------------------------------------------------------------
def deconv_s2_bn(x, w):
    """ConvTranspose2d(k=4, s=2, p=1) (bias folded into BN), fused BN sums.

    x: (N, H, W, Cin) bf16.  Returns (out5 (N, 2H, 2, W, Cout) f32, sum, sumsq).
    """
    N, H, W, Cin = x.shape
    Cout = w.shape[1]
    OH = 2 * H
    xpad = jnp.pad(x, ((0, 0), (1, 1), (1, 1), (0, 0)))          # (N, H+2, W+2, Cin)
    w_taps = _phase_weights_s2(w)

    def row_spec(j):
        return pl.BlockSpec((1, 1, W + 2, Cin), lambda n, m, j=j: (n, m + j, 0, 0))

    out5, s, sq = pl.pallas_call(
        _deconv_s2_bn_kernel,
        out_shape=(jax.ShapeDtypeStruct((N, OH, 2, W, Cout), jnp.float32),
                   jax.ShapeDtypeStruct((1, Cout), jnp.float32),
                   jax.ShapeDtypeStruct((1, Cout), jnp.float32)),
        grid_spec=pltpu.PrefetchScalarGridSpec(
            num_scalar_prefetch=0,
            grid=(N, H),
            in_specs=[row_spec(0), row_spec(1), row_spec(2),
                      pl.BlockSpec((16, Cin, Cout), lambda n, m: (0, 0, 0))],
            out_specs=(
                pl.BlockSpec((1, 2, 2, W, Cout), lambda n, m: (n, m, 0, 0, 0)),
                pl.BlockSpec((1, Cout), lambda n, m: (0, 0)),
                pl.BlockSpec((1, Cout), lambda n, m: (0, 0)),
            )),
        compiler_params=pltpu.CompilerParams(
            dimension_semantics=("arbitrary", "arbitrary")),
    )(xpad, xpad, xpad, w_taps)
    return out5, s, sq


def deconv_s2_tanh(x, w, b):
    """Final ConvTranspose2d(k=4, s=2, p=1) + bias + Tanh.  Returns NCHW f32."""
    N, H, W, Cin = x.shape
    Cout = w.shape[1]
    OH = 2 * H
    xpad = jnp.pad(x, ((0, 0), (1, 1), (1, 1), (0, 0)))
    w_taps = _phase_weights_s2(w)

    def row_spec(j):
        return pl.BlockSpec((1, 1, W + 2, Cin), lambda n, m, j=j: (n, m + j, 0, 0))

    out5 = pl.pallas_call(
        _deconv_s2_tanh_kernel,
        out_shape=jax.ShapeDtypeStruct((N, OH, 2, W, Cout), jnp.float32),
        grid_spec=pltpu.PrefetchScalarGridSpec(
            num_scalar_prefetch=0,
            grid=(N, H),
            in_specs=[row_spec(0), row_spec(1), row_spec(2),
                      pl.BlockSpec((16, Cin, Cout), lambda n, m: (0, 0, 0)),
                      pl.BlockSpec((1, Cout), lambda n, m: (0, 0))],
            out_specs=pl.BlockSpec((1, 2, 2, W, Cout),
                                   lambda n, m: (n, m, 0, 0, 0))),
        compiler_params=pltpu.CompilerParams(
            dimension_semantics=("parallel", "parallel")),
    )(xpad, xpad, xpad, w_taps, b.reshape(1, Cout).astype(jnp.float32))

    # phase-split (N, OH, 2, W, C) -> NCHW (N, C, OH, 2W); ow = 2*w + rx
    return jnp.transpose(out5, (0, 4, 1, 3, 2)).reshape(N, Cout, OH, 2 * W)


def deconv_s1_bn(x, w, padding):
    """ConvTranspose2d(k=4, s=1, p=padding) (bias folded into BN), fused BN sums."""
    N, H, W, Cin = x.shape
    Cout = w.shape[1]
    p = 3 - padding
    OH, OW = H + 3 - 2 * padding, W + 3 - 2 * padding
    Wp = W + 2 * p
    xpad = jnp.pad(x, ((0, 0), (p, p), (p, p), (0, 0)))
    w_taps = _flip_weights_s1(w)

    def row_spec(j):
        return pl.BlockSpec((1, 1, Wp, Cin), lambda n, m, j=j: (n, m + j, 0, 0))

    out, s, sq = pl.pallas_call(
        _deconv_s1_bn_kernel,
        out_shape=(jax.ShapeDtypeStruct((N, OH, OW, Cout), jnp.float32),
                   jax.ShapeDtypeStruct((1, Cout), jnp.float32),
                   jax.ShapeDtypeStruct((1, Cout), jnp.float32)),
        grid_spec=pltpu.PrefetchScalarGridSpec(
            num_scalar_prefetch=0,
            grid=(N, OH),
            in_specs=[row_spec(0), row_spec(1), row_spec(2), row_spec(3),
                      pl.BlockSpec((16, Cin, Cout), lambda n, m: (0, 0, 0))],
            out_specs=(
                pl.BlockSpec((1, 1, OW, Cout), lambda n, m: (n, m, 0, 0)),
                pl.BlockSpec((1, Cout), lambda n, m: (0, 0)),
                pl.BlockSpec((1, Cout), lambda n, m: (0, 0)),
            )),
        compiler_params=pltpu.CompilerParams(
            dimension_semantics=("arbitrary", "arbitrary")),
    )(xpad, xpad, xpad, xpad, w_taps)
    return out, s, sq


def _row_tile(M, cap=1024):
    if M <= cap:
        return M
    t = (cap // 8) * 8
    while t >= 8:
        if M % t == 0:
            return t
        t -= 8
    return M


def batchnorm_relu_2d(x2d, s, sq, gamma, beta, eps=1e-5):
    """Training-mode BatchNorm2d (biased batch variance) + ReLU.  bf16 output."""
    M, C = x2d.shape
    mean = s[0] / M
    var = jnp.maximum(sq[0] / M - mean * mean, 0.0)
    scale = gamma * jax.lax.rsqrt(var + eps)
    shift = beta - mean * scale
    tm = _row_tile(M)
    return pl.pallas_call(
        _bn_relu_kernel,
        out_shape=jax.ShapeDtypeStruct((M, C), jnp.bfloat16),
        grid_spec=pltpu.PrefetchScalarGridSpec(
            num_scalar_prefetch=0,
            grid=(M // tm,),
            in_specs=[pl.BlockSpec((tm, C), lambda i: (i, 0)),
                      pl.BlockSpec((1, C), lambda i: (0, 0)),
                      pl.BlockSpec((1, C), lambda i: (0, 0))],
            out_specs=pl.BlockSpec((tm, C), lambda i: (i, 0))),
        compiler_params=pltpu.CompilerParams(dimension_semantics=("parallel",)),
    )(x2d, scale.reshape(1, C), shift.reshape(1, C))


# ----------------------------------------------------------------------------
# Generator parameters + forward
# ----------------------------------------------------------------------------
def init_generator_params(key, inputsize, hiddensize, outputsize):
    chans = [inputsize, hiddensize * 8, hiddensize * 4,
             hiddensize * 2, hiddensize, outputsize]
    convs, gammas, betas = [], [], []
    for li in range(5):
        cin, cout = chans[li], chans[li + 1]
        key, kw, kb = jax.random.split(key, 3)
        w = 0.02 * jax.random.normal(kw, (cin, cout, 4, 4), jnp.float32)
        b = 0.01 * jax.random.normal(kb, (cout,), jnp.float32)
        convs.append(dict(w=w, b=b))
        if li < 4:  # BatchNorm after the first 4 deconvs (gamma=1, beta=0)
            gammas.append(jnp.ones((cout,), jnp.float32))
            betas.append(jnp.zeros((cout,), jnp.float32))
    return dict(convs=convs, bn_gamma=gammas, bn_beta=betas)


@jax.jit
def generator_forward(params, x_nchw):
    convs = params["convs"]
    x = jnp.transpose(x_nchw, (0, 2, 3, 1)).astype(jnp.bfloat16)   # NCHW -> NHWC

    # Layer 1: ConvTranspose2d(k=4, s=1, p=0) + BN + ReLU.
    # (conv bias is cancelled exactly by training-mode BN mean subtraction)
    out, s, sq = deconv_s1_bn(x, convs[0]["w"], padding=0)
    N, OH, OW, C = out.shape
    y = batchnorm_relu_2d(out.reshape(-1, C), s, sq,
                          params["bn_gamma"][0], params["bn_beta"][0])
    x = y.reshape(N, OH, OW, C)

    # Layers 2-4: ConvTranspose2d(k=4, s=2, p=1) + BN + ReLU.
    for li in (1, 2, 3):
        out5, s, sq = deconv_s2_bn(x, convs[li]["w"])
        N, OH, _, W, C = out5.shape
        y = batchnorm_relu_2d(out5.reshape(-1, C), s, sq,
                              params["bn_gamma"][li], params["bn_beta"][li])
        # un-interleave phase-split layout back to NHWC (ow = 2*w + rx)
        x = y.reshape(N, OH, 2, W, C).transpose(0, 1, 3, 2, 4).reshape(N, OH, 2 * W, C)

    # Layer 5: ConvTranspose2d(k=4, s=2, p=1) + bias + Tanh (fused), NCHW out.
    return deconv_s2_tanh(x, convs[4]["w"], convs[4]["b"])


# ----------------------------------------------------------------------------
if __name__ == "__main__":
    inputsize, hiddensize, outputsize = 8, 4, 3
    batch = 2

    key = jax.random.PRNGKey(0)
    key, kx = jax.random.split(key)
    params = init_generator_params(key, inputsize, hiddensize, outputsize)

    # DCGAN generator input: latent vector as (N, nz, 1, 1)
    x = jax.random.normal(kx, (batch, inputsize, 1, 1), jnp.float32)

    out = generator_forward(params, x)
    out = jax.block_until_ready(out)

    assert out.shape == (batch, outputsize, 64, 64), out.shape
    assert bool(jnp.all(jnp.isfinite(out)))
    assert bool(jnp.all(jnp.abs(out) <= 1.0))  # tanh range
    print("KERNEL_OK")
</pallas_src>

<mosaic_0001>
module attributes {stable_mosaic.version = 11 : i64} {
  func.func @_bn_relu_kernel(%arg0: i32, %arg1: memref<32x32xf32, #tpu.memory_space<vmem>>, %arg2: memref<1x32xf32, #tpu.memory_space<vmem>>, %arg3: memref<1x32xf32, #tpu.memory_space<vmem>>, %arg4: memref<32x32xbf16, #tpu.memory_space<vmem>>) attributes {dimension_semantics = [#tpu.dimension_semantics<parallel>], iteration_bounds = array<i64: 1>, scalar_prefetch = 0 : i64, scratch_operands = 0 : i64, tpu.core_type = #tpu.core_type<tc>, window_params = [{transform_indices = @transform_0, window_bounds = array<i64: 32, 32>}, {pipeline_mode = #tpu.pipeline_mode<synchronous>, transform_indices = @transform_1, window_bounds = array<i64: 1, 32>}, {pipeline_mode = #tpu.pipeline_mode<synchronous>, transform_indices = @transform_2, window_bounds = array<i64: 1, 32>}, {transform_indices = @transform_3, window_bounds = array<i64: 32, 32>}]} {
    %c0 = arith.constant 0 : index
    %c0_0 = arith.constant 0 : index
    %0 = vector.load %arg1[%c0, %c0_0] : memref<32x32xf32, #tpu.memory_space<vmem>>, vector<32x32xf32>
    %c0_1 = arith.constant 0 : index
    %c0_2 = arith.constant 0 : index
    %1 = vector.load %arg2[%c0_1, %c0_2] : memref<1x32xf32, #tpu.memory_space<vmem>>, vector<1x32xf32>
    %2 = vector.broadcast %1 : vector<1x32xf32> to vector<32x32xf32>
    %3 = arith.mulf %0, %2 : vector<32x32xf32>
    %c0_3 = arith.constant 0 : index
    %c0_4 = arith.constant 0 : index
    %4 = vector.load %arg3[%c0_3, %c0_4] : memref<1x32xf32, #tpu.memory_space<vmem>>, vector<1x32xf32>
    %5 = vector.broadcast %4 : vector<1x32xf32> to vector<32x32xf32>
    %6 = arith.addf %3, %5 : vector<32x32xf32>
    %cst = arith.constant 0.000000e+00 : f32
    %7 = vector.broadcast %cst : f32 to vector<32x32xf32>
    %8 = arith.maximumf %6, %7 : vector<32x32xf32>
    %9 = arith.truncf %8 : vector<32x32xf32> to vector<32x32xbf16>
    %c0_5 = arith.constant 0 : index
    %c0_6 = arith.constant 0 : index
    %10 = vector.load %arg4[%c0_5, %c0_6] : memref<32x32xbf16, #tpu.memory_space<vmem>>, vector<32x32xbf16>
    tpu.vector_store %arg4[%c0_5, %c0_6], %9 {strides = array<i32>} : memref<32x32xbf16, #tpu.memory_space<vmem>>, vector<32x32xbf16>,
    return
  }
  func.func @transform_0(%arg0: i32) -> (i32, i32) {
    %c0_i32 = arith.constant 0 : i32
    %c0_i32_0 = arith.constant 0 : i32
    return %arg0, %c0_i32 : i32, i32
  }
  func.func @transform_1(%arg0: i32) -> (i32, i32) {
    %c0_i32 = arith.constant 0 : i32
    %c0_i32_0 = arith.constant 0 : i32
    %c0_i32_1 = arith.constant 0 : i32
    return %c0_i32, %c0_i32_0 : i32, i32
  }
  func.func @transform_2(%arg0: i32) -> (i32, i32) {
    %c0_i32 = arith.constant 0 : i32
    %c0_i32_0 = arith.constant 0 : i32
    %c0_i32_1 = arith.constant 0 : i32
    return %c0_i32, %c0_i32_0 : i32, i32
  }
  func.func @transform_3(%arg0: i32) -> (i32, i32) {
    %c0_i32 = arith.constant 0 : i32
    %c0_i32_0 = arith.constant 0 : i32
    return %arg0, %c0_i32 : i32, i32
  }
}

module attributes {stable_mosaic.version = 11 : i64} {
  func.func @_deconv_s1_bn_kernel(%arg0: i32, %arg1: i32, %arg2: memref<1x1x7x8xbf16, #tpu.memory_space<vmem>>, %arg3: memref<1x1x7x8xbf16, #tpu.memory_space<vmem>>, %arg4: memref<1x1x7x8xbf16, #tpu.memory_space<vmem>>, %arg5: memref<1x1x7x8xbf16, #tpu.memory_space<vmem>>, %arg6: memref<16x8x32xbf16, #tpu.memory_space<vmem>>, %arg7: memref<1x1x4x32xf32, #tpu.memory_space<vmem>>, %arg8: memref<1x32xf32, #tpu.memory_space<vmem>>, %arg9: memref<1x32xf32, #tpu.memory_space<vmem>>) attributes {dimension_semantics = [#tpu.dimension_semantics<arbitrary>, #tpu.dimension_semantics<arbitrary>], iteration_bounds = array<i64: 2, 4>, scalar_prefetch = 0 : i64, scratch_operands = 0 : i64, tpu.core_type = #tpu.core_type<tc>, window_params = [{transform_indices = @transform_0, window_bounds = array<i64: 1, 1, 7, 8>}, {transform_indices = @transform_1, window_bounds = array<i64: 1, 1, 7, 8>}, {transform_indices = @transform_2, window_bounds = array<i64: 1, 1, 7, 8>}, {transform_indices = @transform_3, window_bounds = array<i64: 1, 1, 7, 8>}, {pipeline_mode = #tpu.pipeline_mode<synchronous>, transform_indices = @transform_4, window_bounds = array<i64: 16, 8, 32>}, {transform_indices = @transform_5, window_bounds = array<i64: 1, 1, 4, 32>}, {pipeline_mode = #tpu.pipeline_mode<synchronous>, transform_indices = @transform_6, window_bounds = array<i64: 1, 32>}, {pipeline_mode = #tpu.pipeline_mode<synchronous>, transform_indices = @transform_7, window_bounds = array<i64: 1, 32>}]} {
    %c0_i32 = arith.constant 0 : i32
    %0 = arith.cmpi eq, %arg0, %c0_i32 : i32
    %c0_i32_0 = arith.constant 0 : i32
    %1 = arith.cmpi eq, %arg1, %c0_i32_0 : i32
    %2 = arith.andi %0, %1 : i1
    %3 = arith.extui %2 : i1 to i32
    %c0_i32_1 = arith.constant 0 : i32
    %4 = arith.cmpi ne, %3, %c0_i32_1 : i32
    scf.if %4 {
      %cst_128 = arith.constant 0.000000e+00 : f32
      %116 = vector.broadcast %cst_128 : f32 to vector<1x32xf32>
      %c0_129 = arith.constant 0 : index
      %c0_130 = arith.constant 0 : index
      %117 = vector.load %arg8[%c0_129, %c0_130] : memref<1x32xf32, #tpu.memory_space<vmem>>, vector<1x32xf32>
      tpu.vector_store %arg8[%c0_129, %c0_130], %116 {strides = array<i32>} : memref<1x32xf32, #tpu.memory_space<vmem>>, vector<1x32xf32>,
      %cst_131 = arith.constant 0.000000e+00 : f32
      %118 = vector.broadcast %cst_131 : f32 to vector<1x32xf32>
      %c0_132 = arith.constant 0 : index
      %c0_133 = arith.constant 0 : index
      %119 = vector.load %arg9[%c0_132, %c0_133] : memref<1x32xf32, #tpu.memory_space<vmem>>, vector<1x32xf32>
      tpu.vector_store %arg9[%c0_132, %c0_133], %118 {strides = array<i32>} : memref<1x32xf32, #tpu.memory_space<vmem>>, vector<1x32xf32>,
    } else {
    }
    %cst = arith.constant 0.000000e+00 : f32
    %5 = vector.broadcast %cst : f32 to vector<4x32xf32>
    %c0 = arith.constant 0 : index
    %c0_2 = arith.constant 0 : index
    %c0_3 = arith.constant 0 : index
    %c0_4 = arith.constant 0 : index
    %6 = vector.load %arg2[%c0, %c0_2, %c0_3, %c0_4] : memref<1x1x7x8xbf16, #tpu.memory_space<vmem>>, vector<1x1x4x8xbf16>
    %7 = vector.shape_cast %6 : vector<1x1x4x8xbf16> to vector<4x8xbf16>
    %c0_5 = arith.constant 0 : index
    %c0_6 = arith.constant 0 : index
    %c0_7 = arith.constant 0 : index
    %8 = vector.load %arg6[%c0_5, %c0_6, %c0_7] : memref<16x8x32xbf16, #tpu.memory_space<vmem>>, vector<1x8x32xbf16>
    %9 = vector.shape_cast %8 : vector<1x8x32xbf16> to vector<8x32xbf16>
    %cst_8 = arith.constant dense<0.000000e+00> : vector<4x32xf32>
    %10 = tpu.matmul %7, %9, %cst_8 {dimension_numbers = #tpu.dot_dimension_numbers<[1], [0], [0], [1], [0, 0, 1, 1], [], []>} : vector<4x8xbf16>, vector<8x32xbf16>, vector<4x32xf32> -> vector<4x32xf32>
    %11 = arith.addf %5, %10 : vector<4x32xf32>
    %c0_9 = arith.constant 0 : index
    %c0_10 = arith.constant 0 : index
    %c1 = arith.constant 1 : index
    %c0_11 = arith.constant 0 : index
    %12 = vector.load %arg2[%c0_9, %c0_10, %c1, %c0_11] : memref<1x1x7x8xbf16, #tpu.memory_space<vmem>>, vector<1x1x4x8xbf16>
    %13 = vector.shape_cast %12 : vector<1x1x4x8xbf16> to vector<4x8xbf16>
    %c1_12 = arith.constant 1 : index
    %c0_13 = arith.constant 0 : index
    %c0_14 = arith.constant 0 : index
    %14 = vector.load %arg6[%c1_12, %c0_13, %c0_14] : memref<16x8x32xbf16, #tpu.memory_space<vmem>>, vector<1x8x32xbf16>
    %15 = vector.shape_cast %14 : vector<1x8x32xbf16> to vector<8x32xbf16>
    %cst_15 = arith.constant dense<0.000000e+00> : vector<4x32xf32>
    %16 = tpu.matmul %13, %15, %cst_15 {dimension_numbers = #tpu.dot_dimension_numbers<[1], [0], [0], [1], [0, 0, 1, 1], [], []>} : vector<4x8xbf16>, vector<8x32xbf16>, vector<4x32xf32> -> vector<4x32xf32>
    %17 = arith.addf %11, %16 : vector<4x32xf32>
    %c0_16 = arith.constant 0 : index
    %c0_17 = arith.constant 0 : index
    %c2 = arith.constant 2 : index
    %c0_18 = arith.constant 0 : index
    %18 = vector.load %arg2[%c0_16, %c0_17, %c2, %c0_18] : memref<1x1x7x8xbf16, #tpu.memory_space<vmem>>, vector<1x1x4x8xbf16>
    %19 = vector.shape_cast %18 : vector<1x1x4x8xbf16> to vector<4x8xbf16>
    %c2_19 = arith.constant 2 : index
    %c0_20 = arith.constant 0 : index
    %c0_21 = arith.constant 0 : index
    %20 = vector.load %arg6[%c2_19, %c0_20, %c0_21] : memref<16x8x32xbf16, #tpu.memory_space<vmem>>, vector<1x8x32xbf16>
    %21 = vector.shape_cast %20 : vector<1x8x32xbf16> to vector<8x32xbf16>
    %cst_22 = arith.constant dense<0.000000e+00> : vector<4x32xf32>
    %22 = tpu.matmul %19, %21, %cst_22 {dimension_numbers = #tpu.dot_dimension_numbers<[1], [0], [0], [1], [0, 0, 1, 1], [], []>} : vector<4x8xbf16>, vector<8x32xbf16>, vector<4x32xf32> -> vector<4x32xf32>
    %23 = arith.addf %17, %22 : vector<4x32xf32>
    %c0_23 = arith.constant 0 : index
    %c0_24 = arith.constant 0 : index
    %c3 = arith.constant 3 : index
    %c0_25 = arith.constant 0 : index
    %24 = vector.load %arg2[%c0_23, %c0_24, %c3, %c0_25] : memref<1x1x7x8xbf16, #tpu.memory_space<vmem>>, vector<1x1x4x8xbf16>
    %25 = vector.shape_cast %24 : vector<1x1x4x8xbf16> to vector<4x8xbf16>
    %c3_26 = arith.constant 3 : index
    %c0_27 = arith.constant 0 : index
    %c0_28 = arith.constant 0 : index
    %26 = vector.load %arg6[%c3_26, %c0_27, %c0_28] : memref<16x8x32xbf16, #tpu.memory_space<vmem>>, vector<1x8x32xbf16>
    %27 = vector.shape_cast %26 : vector<1x8x32xbf16> to vector<8x32xbf16>
    %cst_29 = arith.constant dense<0.000000e+00> : vector<4x32xf32>
    %28 = tpu.matmul %25, %27, %cst_29 {dimension_numbers = #tpu.dot_dimension_numbers<[1], [0], [0], [1], [0, 0, 1, 1], [], []>} : vector<4x8xbf16>, vector<8x32xbf16>, vector<4x32xf32> -> vector<4x32xf32>
    %29 = arith.addf %23, %28 : vector<4x32xf32>
    %c0_30 = arith.constant 0 : index
    %c0_31 = arith.constant 0 : index
    %c0_32 = arith.constant 0 : index
    %c0_33 = arith.constant 0 : index
    %30 = vector.load %arg3[%c0_30, %c0_31, %c0_32, %c0_33] : memref<1x1x7x8xbf16, #tpu.memory_space<vmem>>, vector<1x1x4x8xbf16>
    %31 = vector.shape_cast %30 : vector<1x1x4x8xbf16> to vector<4x8xbf16>
    %c4 = arith.constant 4 : index
    %c0_34 = arith.constant 0 : index
    %c0_35 = arith.constant 0 : index
    %32 = vector.load %arg6[%c4, %c0_34, %c0_35] : memref<16x8x32xbf16, #tpu.memory_space<vmem>>, vector<1x8x32xbf16>
    %33 = vector.shape_cast %32 : vector<1x8x32xbf16> to vector<8x32xbf16>
    %cst_36 = arith.constant dense<0.000000e+00> : vector<4x32xf32>
    %34 = tpu.matmul %31, %33, %cst_36 {dimension_numbers = #tpu.dot_dimension_numbers<[1], [0], [0], [1], [0, 0, 1, 1], [], []>} : vector<4x8xbf16>, vector<8x32xbf16>, vector<4x32xf32> -> vector<4x32xf32>
    %35 = arith.addf %29, %34 : vector<4x32xf32>
    %c0_37 = arith.constant 0 : index
    %c0_38 = arith.constant 0 : index
    %c1_39 = arith.constant 1 : index
    %c0_40 = arith.constant 0 : index
    %36 = vector.load %arg3[%c0_37, %c0_38, %c1_39, %c0_40] : memref<1x1x7x8xbf16, #tpu.memory_space<vmem>>, vector<1x1x4x8xbf16>
    %37 = vector.shape_cast %36 : vector<1x1x4x8xbf16> to vector<4x8xbf16>
    %c5 = arith.constant 5 : index
    %c0_41 = arith.constant 0 : index
    %c0_42 = arith.constant 0 : index
    %38 = vector.load %arg6[%c5, %c0_41, %c0_42] : memref<16x8x32xbf16, #tpu.memory_space<vmem>>, vector<1x8x32xbf16>
    %39 = vector.shape_cast %38 : vector<1x8x32xbf16> to vector<8x32xbf16>
    %cst_43 = arith.constant dense<0.000000e+00> : vector<4x32xf32>
    %40 = tpu.matmul %37, %39, %cst_43 {dimension_numbers = #tpu.dot_dimension_numbers<[1], [0], [0], [1], [0, 0, 1, 1], [], []>} : vector<4x8xbf16>, vector<8x32xbf16>, vector<4x32xf32> -> vector<4x32xf32>
    %41 = arith.addf %35, %40 : vector<4x32xf32>
    %c0_44 = arith.constant 0 : index
    %c0_45 = arith.constant 0 : index
    %c2_46 = arith.constant 2 : index
    %c0_47 = arith.constant 0 : index
    %42 = vector.load %arg3[%c0_44, %c0_45, %c2_46, %c0_47] : memref<1x1x7x8xbf16, #tpu.memory_space<vmem>>, vector<1x1x4x8xbf16>
    %43 = vector.shape_cast %42 : vector<1x1x4x8xbf16> to vector<4x8xbf16>
    %c6 = arith.constant 6 : index
    %c0_48 = arith.constant 0 : index
    %c0_49 = arith.constant 0 : index
    %44 = vector.load %arg6[%c6, %c0_48, %c0_49] : memref<16x8x32xbf16, #tpu.memory_space<vmem>>, vector<1x8x32xbf16>
    %45 = vector.shape_cast %44 : vector<1x8x32xbf16> to vector<8x32xbf16>
    %cst_50 = arith.constant dense<0.000000e+00> : vector<4x32xf32>
    %46 = tpu.matmul %43, %45, %cst_50 {dimension_numbers = #tpu.dot_dimension_numbers<[1], [0], [0], [1], [0, 0, 1, 1], [], []>} : vector<4x8xbf16>, vector<8x32xbf16>, vector<4x32xf32> -> vector<4x32xf32>
    %47 = arith.addf %41, %46 : vector<4x32xf32>
    %c0_51 = arith.constant 0 : index
    %c0_52 = arith.constant 0 : index
    %c3_53 = arith.constant 3 : index
    %c0_54 = arith.constant 0 : index
    %48 = vector.load %arg3[%c0_51, %c0_52, %c3_53, %c0_54] : memref<1x1x7x8xbf16, #tpu.memory_space<vmem>>, vector<1x1x4x8xbf16>
    %49 = vector.shape_cast %48 : vector<1x1x4x8xbf16> to vector<4x8xbf16>
    %c7 = arith.constant 7 : index
    %c0_55 = arith.constant 0 : index
    %c0_56 = arith.constant 0 : index
    %50 = vector.load %arg6[%c7, %c0_55, %c0_56] : memref<16x8x32xbf16, #tpu.memory_space<vmem>>, vector<1x8x32xbf16>
    %51 = vector.shape_cast %50 : vector<1x8x32xbf16> to vector<8x32xbf16>
    %cst_57 = arith.constant dense<0.000000e+00> : vector<4x32xf32>
    %52 = tpu.matmul %49, %51, %cst_57 {dimension_numbers = #tpu.dot_dimension_numbers<[1], [0], [0], [1], [0, 0, 1, 1], [], []>} : vector<4x8xbf16>, vector<8x32xbf16>, vector<4x32xf32> -> vector<4x32xf32>
    %53 = arith.addf %47, %52 : vector<4x32xf32>
    %c0_58 = arith.constant 0 : index
    %c0_59 = arith.constant 0 : index
    %c0_60 = arith.constant 0 : index
    %c0_61 = arith.constant 0 : index
    %54 = vector.load %arg4[%c0_58, %c0_59, %c0_60, %c0_61] : memref<1x1x7x8xbf16, #tpu.memory_space<vmem>>, vector<1x1x4x8xbf16>
    %55 = vector.shape_cast %54 : vector<1x1x4x8xbf16> to vector<4x8xbf16>
    %c8 = arith.constant 8 : index
    %c0_62 = arith.constant 0 : index
    %c0_63 = arith.constant 0 : index
    %56 = vector.load %arg6[%c8, %c0_62, %c0_63] : memref<16x8x32xbf16, #tpu.memory_space<vmem>>, vector<1x8x32xbf16>
    %57 = vector.shape_cast %56 : vector<1x8x32xbf16> to vector<8x32xbf16>
    %cst_64 = arith.constant dense<0.000000e+00> : vector<4x32xf32>
    %58 = tpu.matmul %55, %57, %cst_64 {dimension_numbers = #tpu.dot_dimension_numbers<[1], [0], [0], [1], [0, 0, 1, 1], [], []>} : vector<4x8xbf16>, vector<8x32xbf16>, vector<4x32xf32> -> vector<4x32xf32>
    %59 = arith.addf %53, %58 : vector<4x32xf32>
    %c0_65 = arith.constant 0 : index
    %c0_66 = arith.constant 0 : index
    %c1_67 = arith.constant 1 : index
    %c0_68 = arith.constant 0 : index
    %60 = vector.load %arg4[%c0_65, %c0_66, %c1_67, %c0_68] : memref<1x1x7x8xbf16, #tpu.memory_space<vmem>>, vector<1x1x4x8xbf16>
    %61 = vector.shape_cast %60 : vector<1x1x4x8xbf16> to vector<4x8xbf16>
    %c9 = arith.constant 9 : index
    %c0_69 = arith.constant 0 : index
    %c0_70 = arith.constant 0 : index
    %62 = vector.load %arg6[%c9, %c0_69, %c0_70] : memref<16x8x32xbf16, #tpu.memory_space<vmem>>, vector<1x8x32xbf16>
    %63 = vector.shape_cast %62 : vector<1x8x32xbf16> to vector<8x32xbf16>
    %cst_71 = arith.constant dense<0.000000e+00> : vector<4x32xf32>
    %64 = tpu.matmul %61, %63, %cst_71 {dimension_numbers = #tpu.dot_dimension_numbers<[1], [0], [0], [1], [0, 0, 1, 1], [], []>} : vector<4x8xbf16>, vector<8x32xbf16>, vector<4x32xf32> -> vector<4x32xf32>
    %65 = arith.addf %59, %64 : vector<4x32xf32>
    %c0_72 = arith.constant 0 : index
    %c0_73 = arith.constant 0 : index
    %c2_74 = arith.constant 2 : index
    %c0_75 = arith.constant 0 : index
    %66 = vector.load %arg4[%c0_72, %c0_73, %c2_74, %c0_75] : memref<1x1x7x8xbf16, #tpu.memory_space<vmem>>, vector<1x1x4x8xbf16>
    %67 = vector.shape_cast %66 : vector<1x1x4x8xbf16> to vector<4x8xbf16>
    %c10 = arith.constant 10 : index
    %c0_76 = arith.constant 0 : index
    %c0_77 = arith.constant 0 : index
    %68 = vector.load %arg6[%c10, %c0_76, %c0_77] : memref<16x8x32xbf16, #tpu.memory_space<vmem>>, vector<1x8x32xbf16>
    %69 = vector.shape_cast %68 : vector<1x8x32xbf16> to vector<8x32xbf16>
    %cst_78 = arith.constant dense<0.000000e+00> : vector<4x32xf32>
    %70 = tpu.matmul %67, %69, %cst_78 {dimension_numbers = #tpu.dot_dimension_numbers<[1], [0], [0], [1], [0, 0, 1, 1], [], []>} : vector<4x8xbf16>, vector<8x32xbf16>, vector<4x32xf32> -> vector<4x32xf32>
    %71 = arith.addf %65, %70 : vector<4x32xf32>
    %c0_79 = arith.constant 0 : index
    %c0_80 = arith.constant 0 : index
    %c3_81 = arith.constant 3 : index
    %c0_82 = arith.constant 0 : index
    %72 = vector.load %arg4[%c0_79, %c0_80, %c3_81, %c0_82] : memref<1x1x7x8xbf16, #tpu.memory_space<vmem>>, vector<1x1x4x8xbf16>
    %73 = vector.shape_cast %72 : vector<1x1x4x8xbf16> to vector<4x8xbf16>
    %c11 = arith.constant 11 : index
    %c0_83 = arith.constant 0 : index
    %c0_84 = arith.constant 0 : index
    %74 = vector.load %arg6[%c11, %c0_83, %c0_84] : memref<16x8x32xbf16, #tpu.memory_space<vmem>>, vector<1x8x32xbf16>
    %75 = vector.shape_cast %74 : vector<1x8x32xbf16> to vector<8x32xbf16>
    %cst_85 = arith.constant dense<0.000000e+00> : vector<4x32xf32>
    %76 = tpu.matmul %73, %75, %cst_85 {dimension_numbers = #tpu.dot_dimension_numbers<[1], [0], [0], [1], [0, 0, 1, 1], [], []>} : vector<4x8xbf16>, vector<8x32xbf16>, vector<4x32xf32> -> vector<4x32xf32>
    %77 = arith.addf %71, %76 : vector<4x32xf32>
    %c0_86 = arith.constant 0 : index
    %c0_87 = arith.constant 0 : index
    %c0_88 = arith.constant 0 : index
    %c0_89 = arith.constant 0 : index
    %78 = vector.load %arg5[%c0_86, %c0_87, %c0_88, %c0_89] : memref<1x1x7x8xbf16, #tpu.memory_space<vmem>>, vector<1x1x4x8xbf16>
    %79 = vector.shape_cast %78 : vector<1x1x4x8xbf16> to vector<4x8xbf16>
    %c12 = arith.constant 12 : index
    %c0_90 = arith.constant 0 : index
    %c0_91 = arith.constant 0 : index
    %80 = vector.load %arg6[%c12, %c0_90, %c0_91] : memref<16x8x32xbf16, #tpu.memory_space<vmem>>, vector<1x8x32xbf16>
    %81 = vector.shape_cast %80 : vector<1x8x32xbf16> to vector<8x32xbf16>
    %cst_92 = arith.constant dense<0.000000e+00> : vector<4x32xf32>
    %82 = tpu.matmul %79, %81, %cst_92 {dimension_numbers = #tpu.dot_dimension_numbers<[1], [0], [0], [1], [0, 0, 1, 1], [], []>} : vector<4x8xbf16>, vector<8x32xbf16>, vector<4x32xf32> -> vector<4x32xf32>
    %83 = arith.addf %77, %82 : vector<4x32xf32>
    %c0_93 = arith.constant 0 : index
    %c0_94 = arith.constant 0 : index
    %c1_95 = arith.constant 1 : index
    %c0_96 = arith.constant 0 : index
    %84 = vector.load %arg5[%c0_93, %c0_94, %c1_95, %c0_96] : memref<1x1x7x8xbf16, #tpu.memory_space<vmem>>, vector<1x1x4x8xbf16>
    %85 = vector.shape_cast %84 : vector<1x1x4x8xbf16> to vector<4x8xbf16>
    %c13 = arith.constant 13 : index
    %c0_97 = arith.constant 0 : index
    %c0_98 = arith.constant 0 : index
    %86 = vector.load %arg6[%c13, %c0_97, %c0_98] : memref<16x8x32xbf16, #tpu.memory_space<vmem>>, vector<1x8x32xbf16>
    %87 = vector.shape_cast %86 : vector<1x8x32xbf16> to vector<8x32xbf16>
    %cst_99 = arith.constant dense<0.000000e+00> : vector<4x32xf32>
    %88 = tpu.matmul %85, %87, %cst_99 {dimension_numbers = #tpu.dot_dimension_numbers<[1], [0], [0], [1], [0, 0, 1, 1], [], []>} : vector<4x8xbf16>, vector<8x32xbf16>, vector<4x32xf32> -> vector<4x32xf32>
    %89 = arith.addf %83, %88 : vector<4x32xf32>
    %c0_100 = arith.constant 0 : index
    %c0_101 = arith.constant 0 : index
    %c2_102 = arith.constant 2 : index
    %c0_103 = arith.constant 0 : index
    %90 = vector.load %arg5[%c0_100, %c0_101, %c2_102, %c0_103] : memref<1x1x7x8xbf16, #tpu.memory_space<vmem>>, vector<1x1x4x8xbf16>
    %91 = vector.shape_cast %90 : vector<1x1x4x8xbf16> to vector<4x8xbf16>
    %c14 = arith.constant 14 : index
    %c0_104 = arith.constant 0 : index
    %c0_105 = arith.constant 0 : index
    %92 = vector.load %arg6[%c14, %c0_104, %c0_105] : memref<16x8x32xbf16, #tpu.memory_space<vmem>>, vector<1x8x32xbf16>
    %93 = vector.shape_cast %92 : vector<1x8x32xbf16> to vector<8x32xbf16>
    %cst_106 = arith.constant dense<0.000000e+00> : vector<4x32xf32>
    %94 = tpu.matmul %91, %93, %cst_106 {dimension_numbers = #tpu.dot_dimension_numbers<[1], [0], [0], [1], [0, 0, 1, 1], [], []>} : vector<4x8xbf16>, vector<8x32xbf16>, vector<4x32xf32> -> vector<4x32xf32>
    %95 = arith.addf %89, %94 : vector<4x32xf32>
    %c0_107 = arith.constant 0 : index
    %c0_108 = arith.constant 0 : index
    %c3_109 = arith.constant 3 : index
    %c0_110 = arith.constant 0 : index
    %96 = vector.load %arg5[%c0_107, %c0_108, %c3_109, %c0_110] : memref<1x1x7x8xbf16, #tpu.memory_space<vmem>>, vector<1x1x4x8xbf16>
    %97 = vector.shape_cast %96 : vector<1x1x4x8xbf16> to vector<4x8xbf16>
    %c15 = arith.constant 15 : index
    %c0_111 = arith.constant 0 : index
    %c0_112 = arith.constant 0 : index
    %98 = vector.load %arg6[%c15, %c0_111, %c0_112] : memref<16x8x32xbf16, #tpu.memory_space<vmem>>, vector<1x8x32xbf16>
    %99 = vector.shape_cast %98 : vector<1x8x32xbf16> to vector<8x32xbf16>
    %cst_113 = arith.constant dense<0.000000e+00> : vector<4x32xf32>
    %100 = tpu.matmul %97, %99, %cst_113 {dimension_numbers = #tpu.dot_dimension_numbers<[1], [0], [0], [1], [0, 0, 1, 1], [], []>} : vector<4x8xbf16>, vector<8x32xbf16>, vector<4x32xf32> -> vector<4x32xf32>
    %101 = arith.addf %95, %100 : vector<4x32xf32>
    %c0_114 = arith.constant 0 : index
    %c0_115 = arith.constant 0 : index
    %c0_116 = arith.constant 0 : index
    %c0_117 = arith.constant 0 : index
    %102 = vector.load %arg7[%c0_114, %c0_115, %c0_116, %c0_117] : memref<1x1x4x32xf32, #tpu.memory_space<vmem>>, vector<1x1x4x32xf32>
    %103 = vector.shape_cast %102 : vector<1x1x4x32xf32> to vector<4x32xf32>
    %104 = vector.shape_cast %101 : vector<4x32xf32> to vector<1x1x4x32xf32>
    tpu.vector_store %arg7[%c0_114, %c0_115, %c0_116, %c0_117], %104 {strides = array<i32>} : memref<1x1x4x32xf32, #tpu.memory_space<vmem>>, vector<1x1x4x32xf32>,
    %c0_118 = arith.constant 0 : index
    %c0_119 = arith.constant 0 : index
    %105 = vector.load %arg8[%c0_118, %c0_119] : memref<1x32xf32, #tpu.memory_space<vmem>>, vector<1x32xf32>
    %cst_120 = arith.constant dense<0.000000e+00> : vector<32xf32>
    %106 = vector.multi_reduction <add>, %101, %cst_120 [0] : vector<4x32xf32> to vector<32xf32>
    %107 = vector.shape_cast %106 : vector<32xf32> to vector<1x32xf32>
    %108 = arith.addf %105, %107 : vector<1x32xf32>
    %c0_121 = arith.constant 0 : index
    %c0_122 = arith.constant 0 : index
    %109 = vector.load %arg8[%c0_121, %c0_122] : memref<1x32xf32, #tpu.memory_space<vmem>>, vector<1x32xf32>
    tpu.vector_store %arg8[%c0_121, %c0_122], %108 {strides = array<i32>} : memref<1x32xf32, #tpu.memory_space<vmem>>, vector<1x32xf32>,
    %c0_123 = arith.constant 0 : index
    %c0_124 = arith.constant 0 : index
    %110 = vector.load %arg9[%c0_123, %c0_124] : memref<1x32xf32, #tpu.memory_space<vmem>>, vector<1x32xf32>
    %111 = arith.mulf %101, %101 : vector<4x32xf32>
    %cst_125 = arith.constant dense<0.000000e+00> : vector<32xf32>
    %112 = vector.multi_reduction <add>, %111, %cst_125 [0] : vector<4x32xf32> to vector<32xf32>
    %113 = vector.shape_cast %112 : vector<32xf32> to vector<1x32xf32>
    %114 = arith.addf %110, %113 : vector<1x32xf32>
    %c0_126 = arith.constant 0 : index
    %c0_127 = arith.constant 0 : index
    %115 = vector.load %arg9[%c0_126, %c0_127] : memref<1x32xf32, #tpu.memory_space<vmem>>, vector<1x32xf32>
    tpu.vector_store %arg9[%c0_126, %c0_127], %114 {strides = array<i32>} : memref<1x32xf32, #tpu.memory_space<vmem>>, vector<1x32xf32>,
    return
  }
  func.func @transform_0(%arg0: i32, %arg1: i32) -> (i32, i32, i32, i32) {
    %c0_i32 = arith.constant 0 : i32
    %0 = arith.addi %arg1, %c0_i32 : i32
    %c0_i32_0 = arith.constant 0 : i32
    %c0_i32_1 = arith.constant 0 : i32
    %c0_i32_2 = arith.constant 0 : i32
    return %arg0, %0, %c0_i32_0, %c0_i32_1 : i32, i32, i32, i32
  }
  func.func @transform_1(%arg0: i32, %arg1: i32) -> (i32, i32, i32, i32) {
    %c1_i32 = arith.constant 1 : i32
    %0 = arith.addi %arg1, %c1_i32 : i32
    %c0_i32 = arith.constant 0 : i32
    %c0_i32_0 = arith.constant 0 : i32
    %c0_i32_1 = arith.constant 0 : i32
    return %arg0, %0, %c0_i32, %c0_i32_0 : i32, i32, i32, i32
  }
  func.func @transform_2(%arg0: i32, %arg1: i32) -> (i32, i32, i32, i32) {
    %c2_i32 = arith.constant 2 : i32
    %0 = arith.addi %arg1, %c2_i32 : i32
    %c0_i32 = arith.constant 0 : i32
    %c0_i32_0 = arith.constant 0 : i32
    %c0_i32_1 = arith.constant 0 : i32
    return %arg0, %0, %c0_i32, %c0_i32_0 : i32, i32, i32, i32
  }
  func.func @transform_3(%arg0: i32, %arg1: i32) -> (i32, i32, i32, i32) {
    %c3_i32 = arith.constant 3 : i32
    %0 = arith.addi %arg1, %c3_i32 : i32
    %c0_i32 = arith.constant 0 : i32
    %c0_i32_0 = arith.constant 0 : i32
    %c0_i32_1 = arith.constant 0 : i32
    return %arg0, %0, %c0_i32, %c0_i32_0 : i32, i32, i32, i32
  }
  func.func @transform_4(%arg0: i32, %arg1: i32) -> (i32, i32, i32) {
    %c0_i32 = arith.constant 0 : i32
    %c0_i32_0 = arith.constant 0 : i32
    %c0_i32_1 = arith.constant 0 : i32
    %c0_i32_2 = arith.constant 0 : i32
    return %c0_i32, %c0_i32_0, %c0_i32_1 : i32, i32, i32
  }
  func.func @transform_5(%arg0: i32, %arg1: i32) -> (i32, i32, i32, i32) {
    %c0_i32 = arith.constant 0 : i32
    %c0_i32_0 = arith.constant 0 : i32
    %c0_i32_1 = arith.constant 0 : i32
    return %arg0, %arg1, %c0_i32, %c0_i32_0 : i32, i32, i32, i32
  }
  func.func @transform_6(%arg0: i32, %arg1: i32) -> (i32, i32) {
    %c0_i32 = arith.constant 0 : i32
    %c0_i32_0 = arith.constant 0 : i32
    %c0_i32_1 = arith.constant 0 : i32
    return %c0_i32, %c0_i32_0 : i32, i32
  }
  func.func @transform_7(%arg0: i32, %arg1: i32) -> (i32, i32) {
    %c0_i32 = arith.constant 0 : i32
    %c0_i32_0 = arith.constant 0 : i32
    %c0_i32_1 = arith.constant 0 : i32
    return %c0_i32, %c0_i32_0 : i32, i32
  }
}

module attributes {stable_mosaic.version = 11 : i64} {
  func.func @_bn_relu_kernel(%arg0: i32, %arg1: memref<128x16xf32, #tpu.memory_space<vmem>>, %arg2: memref<1x16xf32, #tpu.memory_space<vmem>>, %arg3: memref<1x16xf32, #tpu.memory_space<vmem>>, %arg4: memref<128x16xbf16, #tpu.memory_space<vmem>>) attributes {dimension_semantics = [#tpu.dimension_semantics<parallel>], iteration_bounds = array<i64: 1>, scalar_prefetch = 0 : i64, scratch_operands = 0 : i64, tpu.core_type = #tpu.core_type<tc>, window_params = [{transform_indices = @transform_0, window_bounds = array<i64: 128, 16>}, {pipeline_mode = #tpu.pipeline_mode<synchronous>, transform_indices = @transform_1, window_bounds = array<i64: 1, 16>}, {pipeline_mode = #tpu.pipeline_mode<synchronous>, transform_indices = @transform_2, window_bounds = array<i64: 1, 16>}, {transform_indices = @transform_3, window_bounds = array<i64: 128, 16>}]} {
    %c0 = arith.constant 0 : index
    %c0_0 = arith.constant 0 : index
    %0 = vector.load %arg1[%c0, %c0_0] : memref<128x16xf32, #tpu.memory_space<vmem>>, vector<128x16xf32>
    %c0_1 = arith.constant 0 : index
    %c0_2 = arith.constant 0 : index
    %1 = vector.load %arg2[%c0_1, %c0_2] : memref<1x16xf32, #tpu.memory_space<vmem>>, vector<1x16xf32>
    %2 = vector.broadcast %1 : vector<1x16xf32> to vector<128x16xf32>
    %3 = arith.mulf %0, %2 : vector<128x16xf32>
    %c0_3 = arith.constant 0 : index
    %c0_4 = arith.constant 0 : index
    %4 = vector.load %arg3[%c0_3, %c0_4] : memref<1x16xf32, #tpu.memory_space<vmem>>, vector<1x16xf32>
    %5 = vector.broadcast %4 : vector<1x16xf32> to vector<128x16xf32>
    %6 = arith.addf %3, %5 : vector<128x16xf32>
    %cst = arith.constant 0.000000e+00 : f32
    %7 = vector.broadcast %cst : f32 to vector<128x16xf32>
    %8 = arith.maximumf %6, %7 : vector<128x16xf32>
    %9 = arith.truncf %8 : vector<128x16xf32> to vector<128x16xbf16>
    %c0_5 = arith.constant 0 : index
    %c0_6 = arith.constant 0 : index
    %10 = vector.load %arg4[%c0_5, %c0_6] : memref<128x16xbf16, #tpu.memory_space<vmem>>, vector<128x16xbf16>
    tpu.vector_store %arg4[%c0_5, %c0_6], %9 {strides = array<i32>} : memref<128x16xbf16, #tpu.memory_space<vmem>>, vector<128x16xbf16>,
    return
  }
  func.func @transform_0(%arg0: i32) -> (i32, i32) {
    %c0_i32 = arith.constant 0 : i32
    %c0_i32_0 = arith.constant 0 : i32
    return %arg0, %c0_i32 : i32, i32
  }
  func.func @transform_1(%arg0: i32) -> (i32, i32) {
    %c0_i32 = arith.constant 0 : i32
    %c0_i32_0 = arith.constant 0 : i32
    %c0_i32_1 = arith.constant 0 : i32
    return %c0_i32, %c0_i32_0 : i32, i32
  }
  func.func @transform_2(%arg0: i32) -> (i32, i32) {
    %c0_i32 = arith.constant 0 : i32
    %c0_i32_0 = arith.constant 0 : i32
    %c0_i32_1 = arith.constant 0 : i32
    return %c0_i32, %c0_i32_0 : i32, i32
  }
  func.func @transform_3(%arg0: i32) -> (i32, i32) {
    %c0_i32 = arith.constant 0 : i32
    %c0_i32_0 = arith.constant 0 : i32
    return %arg0, %c0_i32 : i32, i32
  }
}

module attributes {stable_mosaic.version = 11 : i64} {
  func.func @_deconv_s2_bn_kernel(%arg0: i32, %arg1: i32, %arg2: memref<1x1x10x16xbf16, #tpu.memory_space<vmem>>, %arg3: memref<1x1x10x16xbf16, #tpu.memory_space<vmem>>, %arg4: memref<1x1x10x16xbf16, #tpu.memory_space<vmem>>, %arg5: memref<16x16x8xbf16, #tpu.memory_space<vmem>>, %arg6: memref<1x2x2x8x8xf32, #tpu.memory_space<vmem>>, %arg7: memref<1x8xf32, #tpu.memory_space<vmem>>, %arg8: memref<1x8xf32, #tpu.memory_space<vmem>>) attributes {dimension_semantics = [#tpu.dimension_semantics<arbitrary>, #tpu.dimension_semantics<arbitrary>], iteration_bounds = array<i64: 2, 8>, scalar_prefetch = 0 : i64, scratch_operands = 0 : i64, tpu.core_type = #tpu.core_type<tc>, window_params = [{transform_indices = @transform_0, window_bounds = array<i64: 1, 1, 10, 16>}, {transform_indices = @transform_1, window_bounds = array<i64: 1, 1, 10, 16>}, {transform_indices = @transform_2, window_bounds = array<i64: 1, 1, 10, 16>}, {pipeline_mode = #tpu.pipeline_mode<synchronous>, transform_indices = @transform_3, window_bounds = array<i64: 16, 16, 8>}, {transform_indices = @transform_4, window_bounds = array<i64: 1, 2, 2, 8, 8>}, {pipeline_mode = #tpu.pipeline_mode<synchronous>, transform_indices = @transform_5, window_bounds = array<i64: 1, 8>}, {pipeline_mode = #tpu.pipeline_mode<synchronous>, transform_indices = @transform_6, window_bounds = array<i64: 1, 8>}]} {
    %c0_i32 = arith.constant 0 : i32
    %0 = arith.cmpi eq, %arg0, %c0_i32 : i32
    %c0_i32_0 = arith.constant 0 : i32
    %1 = arith.cmpi eq, %arg1, %c0_i32_0 : i32
    %2 = arith.andi %0, %1 : i1
    %3 = arith.extui %2 : i1 to i32
    %c0_i32_1 = arith.constant 0 : i32
    %4 = arith.cmpi ne, %3, %c0_i32_1 : i32
    scf.if %4 {
      %cst_177 = arith.constant 0.000000e+00 : f32
      %161 = vector.broadcast %cst_177 : f32 to vector<1x8xf32>
      %c0_178 = arith.constant 0 : index
      %c0_179 = arith.constant 0 : index
      %162 = vector.load %arg7[%c0_178, %c0_179] : memref<1x8xf32, #tpu.memory_space<vmem>>, vector<1x8xf32>
      tpu.vector_store %arg7[%c0_178, %c0_179], %161 {strides = array<i32>} : memref<1x8xf32, #tpu.memory_space<vmem>>, vector<1x8xf32>,
      %cst_180 = arith.constant 0.000000e+00 : f32
      %163 = vector.broadcast %cst_180 : f32 to vector<1x8xf32>
      %c0_181 = arith.constant 0 : index
      %c0_182 = arith.constant 0 : index
      %164 = vector.load %arg8[%c0_181, %c0_182] : memref<1x8xf32, #tpu.memory_space<vmem>>, vector<1x8xf32>
      tpu.vector_store %arg8[%c0_181, %c0_182], %163 {strides = array<i32>} : memref<1x8xf32, #tpu.memory_space<vmem>>, vector<1x8xf32>,
    } else {
    }
    %cst = arith.constant 0.000000e+00 : f32
    %5 = vector.broadcast %cst : f32 to vector<8x8xf32>
    %c0 = arith.constant 0 : index
    %c0_2 = arith.constant 0 : index
    %c0_3 = arith.constant 0 : index
    %c0_4 = arith.constant 0 : index
    %6 = vector.load %arg2[%c0, %c0_2, %c0_3, %c0_4] : memref<1x1x10x16xbf16, #tpu.memory_space<vmem>>, vector<1x1x8x16xbf16>
    %7 = vector.shape_cast %6 : vector<1x1x8x16xbf16> to vector<8x16xbf16>
    %c0_5 = arith.constant 0 : index
    %c0_6 = arith.constant 0 : index
    %c0_7 = arith.constant 0 : index
    %8 = vector.load %arg5[%c0_5, %c0_6, %c0_7] : memref<16x16x8xbf16, #tpu.memory_space<vmem>>, vector<1x16x8xbf16>
    %9 = vector.shape_cast %8 : vector<1x16x8xbf16> to vector<16x8xbf16>
    %cst_8 = arith.constant dense<0.000000e+00> : vector<8x8xf32>
    %10 = tpu.matmul %7, %9, %cst_8 {dimension_numbers = #tpu.dot_dimension_numbers<[1], [0], [0], [1], [0, 0, 1, 1], [], []>} : vector<8x16xbf16>, vector<16x8xbf16>, vector<8x8xf32> -> vector<8x8xf32>
    %11 = arith.addf %5, %10 : vector<8x8xf32>
    %c0_9 = arith.constant 0 : index
    %c0_10 = arith.constant 0 : index
    %c1 = arith.constant 1 : index
    %c0_11 = arith.constant 0 : index
    %12 = vector.load %arg2[%c0_9, %c0_10, %c1, %c0_11] : memref<1x1x10x16xbf16, #tpu.memory_space<vmem>>, vector<1x1x8x16xbf16>
    %13 = vector.shape_cast %12 : vector<1x1x8x16xbf16> to vector<8x16xbf16>
    %c1_12 = arith.constant 1 : index
    %c0_13 = arith.constant 0 : index
    %c0_14 = arith.constant 0 : index
    %14 = vector.load %arg5[%c1_12, %c0_13, %c0_14] : memref<16x16x8xbf16, #tpu.memory_space<vmem>>, vector<1x16x8xbf16>
    %15 = vector.shape_cast %14 : vector<1x16x8xbf16> to vector<16x8xbf16>
    %cst_15 = arith.constant dense<0.000000e+00> : vector<8x8xf32>
    %16 = tpu.matmul %13, %15, %cst_15 {dimension_numbers = #tpu.dot_dimension_numbers<[1], [0], [0], [1], [0, 0, 1, 1], [], []>} : vector<8x16xbf16>, vector<16x8xbf16>, vector<8x8xf32> -> vector<8x8xf32>
    %17 = arith.addf %11, %16 : vector<8x8xf32>
    %c0_16 = arith.constant 0 : index
    %c0_17 = arith.constant 0 : index
    %c0_18 = arith.constant 0 : index
    %c0_19 = arith.constant 0 : index
    %18 = vector.load %arg3[%c0_16, %c0_17, %c0_18, %c0_19] : memref<1x1x10x16xbf16, #tpu.memory_space<vmem>>, vector<1x1x8x16xbf16>
    %19 = vector.shape_cast %18 : vector<1x1x8x16xbf16> to vector<8x16xbf16>
    %c2 = arith.constant 2 : index
    %c0_20 = arith.constant 0 : index
    %c0_21 = arith.constant 0 : index
    %20 = vector.load %arg5[%c2, %c0_20, %c0_21] : memref<16x16x8xbf16, #tpu.memory_space<vmem>>, vector<1x16x8xbf16>
    %21 = vector.shape_cast %20 : vector<1x16x8xbf16> to vector<16x8xbf16>
    %cst_22 = arith.constant dense<0.000000e+00> : vector<8x8xf32>
    %22 = tpu.matmul %19, %21, %cst_22 {dimension_numbers = #tpu.dot_dimension_numbers<[1], [0], [0], [1], [0, 0, 1, 1], [], []>} : vector<8x16xbf16>, vector<16x8xbf16>, vector<8x8xf32> -> vector<8x8xf32>
    %23 = arith.addf %17, %22 : vector<8x8xf32>
    %c0_23 = arith.constant 0 : index
    %c0_24 = arith.constant 0 : index
    %c1_25 = arith.constant 1 : index
    %c0_26 = arith.constant 0 : index
    %24 = vector.load %arg3[%c0_23, %c0_24, %c1_25, %c0_26] : memref<1x1x10x16xbf16, #tpu.memory_space<vmem>>, vector<1x1x8x16xbf16>
    %25 = vector.shape_cast %24 : vector<1x1x8x16xbf16> to vector<8x16xbf16>
    %c3 = arith.constant 3 : index
    %c0_27 = arith.constant 0 : index
    %c0_28 = arith.constant 0 : index
    %26 = vector.load %arg5[%c3, %c0_27, %c0_28] : memref<16x16x8xbf16, #tpu.memory_space<vmem>>, vector<1x16x8xbf16>
    %27 = vector.shape_cast %26 : vector<1x16x8xbf16> to vector<16x8xbf16>
    %cst_29 = arith.constant dense<0.000000e+00> : vector<8x8xf32>
    %28 = tpu.matmul %25, %27, %cst_29 {dimension_numbers = #tpu.dot_dimension_numbers<[1], [0], [0], [1], [0, 0, 1, 1], [], []>} : vector<8x16xbf16>, vector<16x8xbf16>, vector<8x8xf32> -> vector<8x8xf32>
    %29 = arith.addf %23, %28 : vector<8x8xf32>
    %c0_30 = arith.constant 0 : index
    %c0_31 = arith.constant 0 : index
    %c0_32 = arith.constant 0 : index
    %c0_33 = arith.constant 0 : index
    %c0_34 = arith.constant 0 : index
    %30 = vector.load %arg6[%c0_30, %c0_31, %c0_32, %c0_33, %c0_34] : memref<1x2x2x8x8xf32, #tpu.memory_space<vmem>>, vector<1x1x1x8x8xf32>
    %31 = vector.shape_cast %30 : vector<1x1x1x8x8xf32> to vector<8x8xf32>
    %32 = vector.shape_cast %29 : vector<8x8xf32> to vector<1x1x1x8x8xf32>
    tpu.vector_store %arg6[%c0_30, %c0_31, %c0_32, %c0_33, %c0_34], %32 {strides = array<i32>} : memref<1x2x2x8x8xf32, #tpu.memory_space<vmem>>, vector<1x1x1x8x8xf32>,
    %c0_35 = arith.constant 0 : index
    %c0_36 = arith.constant 0 : index
    %33 = vector.load %arg7[%c0_35, %c0_36] : memref<1x8xf32, #tpu.memory_space<vmem>>, vector<1x8xf32>
    %cst_37 = arith.constant dense<0.000000e+00> : vector<8xf32>
    %34 = vector.multi_reduction <add>, %29, %cst_37 [0] : vector<8x8xf32> to vector<8xf32>
    %35 = vector.shape_cast %34 : vector<8xf32> to vector<1x8xf32>
    %36 = arith.addf %33, %35 : vector<1x8xf32>
    %c0_38 = arith.constant 0 : index
    %c0_39 = arith.constant 0 : index
    %37 = vector.load %arg7[%c0_38, %c0_39] : memref<1x8xf32, #tpu.memory_space<vmem>>, vector<1x8xf32>
    tpu.vector_store %arg7[%c0_38, %c0_39], %36 {strides = array<i32>} : memref<1x8xf32, #tpu.memory_space<vmem>>, vector<1x8xf32>,
    %c0_40 = arith.constant 0 : index
    %c0_41 = arith.constant 0 : index
    %38 = vector.load %arg8[%c0_40, %c0_41] : memref<1x8xf32, #tpu.memory_space<vmem>>, vector<1x8xf32>
    %39 = arith.mulf %29, %29 : vector<8x8xf32>
    %cst_42 = arith.constant dense<0.000000e+00> : vector<8xf32>
    %40 = vector.multi_reduction <add>, %39, %cst_42 [0] : vector<8x8xf32> to vector<8xf32>
    %41 = vector.shape_cast %40 : vector<8xf32> to vector<1x8xf32>
    %42 = arith.addf %38, %41 : vector<1x8xf32>
    %c0_43 = arith.constant 0 : index
    %c0_44 = arith.constant 0 : index
    %43 = vector.load %arg8[%c0_43, %c0_44] : memref<1x8xf32, #tpu.memory_space<vmem>>, vector<1x8xf32>
    tpu.vector_store %arg8[%c0_43, %c0_44], %42 {strides = array<i32>} : memref<1x8xf32, #tpu.memory_space<vmem>>, vector<1x8xf32>,
    %cst_45 = arith.constant 0.000000e+00 : f32
    %44 = vector.broadcast %cst_45 : f32 to vector<8x8xf32>
    %c0_46 = arith.constant 0 : index
    %c0_47 = arith.constant 0 : index
    %c1_48 = arith.constant 1 : index
    %c0_49 = arith.constant 0 : index
    %45 = vector.load %arg2[%c0_46, %c0_47, %c1_48, %c0_49] : memref<1x1x10x16xbf16, #tpu.memory_space<vmem>>, vector<1x1x8x16xbf16>
    %46 = vector.shape_cast %45 : vector<1x1x8x16xbf16> to vector<8x16xbf16>
    %c4 = arith.constant 4 : index
    %c0_50 = arith.constant 0 : index
    %c0_51 = arith.constant 0 : index
    %47 = vector.load %arg5[%c4, %c0_50, %c0_51] : memref<16x16x8xbf16, #tpu.memory_space<vmem>>, vector<1x16x8xbf16>
    %48 = vector.shape_cast %47 : vector<1x16x8xbf16> to vector<16x8xbf16>
    %cst_52 = arith.constant dense<0.000000e+00> : vector<8x8xf32>
    %49 = tpu.matmul %46, %48, %cst_52 {dimension_numbers = #tpu.dot_dimension_numbers<[1], [0], [0], [1], [0, 0, 1, 1], [], []>} : vector<8x16xbf16>, vector<16x8xbf16>, vector<8x8xf32> -> vector<8x8xf32>
    %50 = arith.addf %44, %49 : vector<8x8xf32>
    %c0_53 = arith.constant 0 : index
    %c0_54 = arith.constant 0 : index
    %c2_55 = arith.constant 2 : index
    %c0_56 = arith.constant 0 : index
    %51 = vector.load %arg2[%c0_53, %c0_54, %c2_55, %c0_56] : memref<1x1x10x16xbf16, #tpu.memory_space<vmem>>, vector<1x1x8x16xbf16>
    %52 = vector.shape_cast %51 : vector<1x1x8x16xbf16> to vector<8x16xbf16>
    %c5 = arith.constant 5 : index
    %c0_57 = arith.constant 0 : index
    %c0_58 = arith.constant 0 : index
    %53 = vector.load %arg5[%c5, %c0_57, %c0_58] : memref<16x16x8xbf16, #tpu.memory_space<vmem>>, vector<1x16x8xbf16>
    %54 = vector.shape_cast %53 : vector<1x16x8xbf16> to vector<16x8xbf16>
    %cst_59 = arith.constant dense<0.000000e+00> : vector<8x8xf32>
    %55 = tpu.matmul %52, %54, %cst_59 {dimension_numbers = #tpu.dot_dimension_numbers<[1], [0], [0], [1], [0, 0, 1, 1], [], []>} : vector<8x16xbf16>, vector<16x8xbf16>, vector<8x8xf32> -> vector<8x8xf32>
    %56 = arith.addf %50, %55 : vector<8x8xf32>
    %c0_60 = arith.constant 0 : index
    %c0_61 = arith.constant 0 : index
    %c1_62 = arith.constant 1 : index
    %c0_63 = arith.constant 0 : index
    %57 = vector.load %arg3[%c0_60, %c0_61, %c1_62, %c0_63] : memref<1x1x10x16xbf16, #tpu.memory_space<vmem>>, vector<1x1x8x16xbf16>
    %58 = vector.shape_cast %57 : vector<1x1x8x16xbf16> to vector<8x16xbf16>
    %c6 = arith.constant 6 : index
    %c0_64 = arith.constant 0 : index
    %c0_65 = arith.constant 0 : index
    %59 = vector.load %arg5[%c6, %c0_64, %c0_65] : memref<16x16x8xbf16, #tpu.memory_space<vmem>>, vector<1x16x8xbf16>
    %60 = vector.shape_cast %59 : vector<1x16x8xbf16> to vector<16x8xbf16>
    %cst_66 = arith.constant dense<0.000000e+00> : vector<8x8xf32>
    %61 = tpu.matmul %58, %60, %cst_66 {dimension_numbers = #tpu.dot_dimension_numbers<[1], [0], [0], [1], [0, 0, 1, 1], [], []>} : vector<8x16xbf16>, vector<16x8xbf16>, vector<8x8xf32> -> vector<8x8xf32>
    %62 = arith.addf %56, %61 : vector<8x8xf32>
    %c0_67 = arith.constant 0 : index
    %c0_68 = arith.constant 0 : index
    %c2_69 = arith.constant 2 : index
    %c0_70 = arith.constant 0 : index
    %63 = vector.load %arg3[%c0_67, %c0_68, %c2_69, %c0_70] : memref<1x1x10x16xbf16, #tpu.memory_space<vmem>>, vector<1x1x8x16xbf16>
    %64 = vector.shape_cast %63 : vector<1x1x8x16xbf16> to vector<8x16xbf16>
    %c7 = arith.constant 7 : index
    %c0_71 = arith.constant 0 : index
    %c0_72 = arith.constant 0 : index
    %65 = vector.load %arg5[%c7, %c0_71, %c0_72] : memref<16x16x8xbf16, #tpu.memory_space<vmem>>, vector<1x16x8xbf16>
    %66 = vector.shape_cast %65 : vector<1x16x8xbf16> to vector<16x8xbf16>
    %cst_73 = arith.constant dense<0.000000e+00> : vector<8x8xf32>
    %67 = tpu.matmul %64, %66, %cst_73 {dimension_numbers = #tpu.dot_dimension_numbers<[1], [0], [0], [1], [0, 0, 1, 1], [], []>} : vector<8x16xbf16>, vector<16x8xbf16>, vector<8x8xf32> -> vector<8x8xf32>
    %68 = arith.addf %62, %67 : vector<8x8xf32>
    %c0_74 = arith.constant 0 : index
    %c0_75 = arith.constant 0 : index
    %c1_76 = arith.constant 1 : index
    %c0_77 = arith.constant 0 : index
    %c0_78 = arith.constant 0 : index
    %69 = vector.load %arg6[%c0_74, %c0_75, %c1_76, %c0_77, %c0_78] : memref<1x2x2x8x8xf32, #tpu.memory_space<vmem>>, vector<1x1x1x8x8xf32>
    %70 = vector.shape_cast %69 : vector<1x1x1x8x8xf32> to vector<8x8xf32>
    %71 = vector.shape_cast %68 : vector<8x8xf32> to vector<1x1x1x8x8xf32>
    tpu.vector_store %arg6[%c0_74, %c0_75, %c1_76, %c0_77, %c0_78], %71 {strides = array<i32>} : memref<1x2x2x8x8xf32, #tpu.memory_space<vmem>>, vector<1x1x1x8x8xf32>,
    %c0_79 = arith.constant 0 : index
    %c0_80 = arith.constant 0 : index
    %72 = vector.load %arg7[%c0_79, %c0_80] : memref<1x8xf32, #tpu.memory_space<vmem>>, vector<1x8xf32>
    %cst_81 = arith.constant dense<0.000000e+00> : vector<8xf32>
    %73 = vector.multi_reduction <add>, %68, %cst_81 [0] : vector<8x8xf32> to vector<8xf32>
    %74 = vector.shape_cast %73 : vector<8xf32> to vector<1x8xf32>
    %75 = arith.addf %72, %74 : vector<1x8xf32>
    %c0_82 = arith.constant 0 : index
    %c0_83 = arith.constant 0 : index
    %76 = vector.load %arg7[%c0_82, %c0_83] : memref<1x8xf32, #tpu.memory_space<vmem>>, vector<1x8xf32>
    tpu.vector_store %arg7[%c0_82, %c0_83], %75 {strides = array<i32>} : memref<1x8xf32, #tpu.memory_space<vmem>>, vector<1x8xf32>,
    %c0_84 = arith.constant 0 : index
    %c0_85 = arith.constant 0 : index
    %77 = vector.load %arg8[%c0_84, %c0_85] : memref<1x8xf32, #tpu.memory_space<vmem>>, vector<1x8xf32>
    %78 = arith.mulf %68, %68 : vector<8x8xf32>
    %cst_86 = arith.constant dense<0.000000e+00> : vector<8xf32>
    %79 = vector.multi_reduction <add>, %78, %cst_86 [0] : vector<8x8xf32> to vector<8xf32>
    %80 = vector.shape_cast %79 : vector<8xf32> to vector<1x8xf32>
    %81 = arith.addf %77, %80 : vector<1x8xf32>
    %c0_87 = arith.constant 0 : index
    %c0_88 = arith.constant 0 : index
    %82 = vector.load %arg8[%c0_87, %c0_88] : memref<1x8xf32, #tpu.memory_space<vmem>>, vector<1x8xf32>
    tpu.vector_store %arg8[%c0_87, %c0_88], %81 {strides = array<i32>} : memref<1x8xf32, #tpu.memory_space<vmem>>, vector<1x8xf32>,
    %cst_89 = arith.constant 0.000000e+00 : f32
    %83 = vector.broadcast %cst_89 : f32 to vector<8x8xf32>
    %c0_90 = arith.constant 0 : index
    %c0_91 = arith.constant 0 : index
    %c0_92 = arith.constant 0 : index
    %c0_93 = arith.constant 0 : index
    %84 = vector.load %arg3[%c0_90, %c0_91, %c0_92, %c0_93] : memref<1x1x10x16xbf16, #tpu.memory_space<vmem>>, vector<1x1x8x16xbf16>
    %85 = vector.shape_cast %84 : vector<1x1x8x16xbf16> to vector<8x16xbf16>
    %c8 = arith.constant 8 : index
    %c0_94 = arith.constant 0 : index
    %c0_95 = arith.constant 0 : index
    %86 = vector.load %arg5[%c8, %c0_94, %c0_95] : memref<16x16x8xbf16, #tpu.memory_space<vmem>>, vector<1x16x8xbf16>
    %87 = vector.shape_cast %86 : vector<1x16x8xbf16> to vector<16x8xbf16>
    %cst_96 = arith.constant dense<0.000000e+00> : vector<8x8xf32>
    %88 = tpu.matmul %85, %87, %cst_96 {dimension_numbers = #tpu.dot_dimension_numbers<[1], [0], [0], [1], [0, 0, 1, 1], [], []>} : vector<8x16xbf16>, vector<16x8xbf16>, vector<8x8xf32> -> vector<8x8xf32>
    %89 = arith.addf %83, %88 : vector<8x8xf32>
    %c0_97 = arith.constant 0 : index
    %c0_98 = arith.constant 0 : index
    %c1_99 = arith.constant 1 : index
    %c0_100 = arith.constant 0 : index
    %90 = vector.load %arg3[%c0_97, %c0_98, %c1_99, %c0_100] : memref<1x1x10x16xbf16, #tpu.memory_space<vmem>>, vector<1x1x8x16xbf16>
    %91 = vector.shape_cast %90 : vector<1x1x8x16xbf16> to vector<8x16xbf16>
    %c9 = arith.constant 9 : index
    %c0_101 = arith.constant 0 : index
    %c0_102 = arith.constant 0 : index
    %92 = vector.load %arg5[%c9, %c0_101, %c0_102] : memref<16x16x8xbf16, #tpu.memory_space<vmem>>, vector<1x16x8xbf16>
    %93 = vector.shape_cast %92 : vector<1x16x8xbf16> to vector<16x8xbf16>
    %cst_103 = arith.constant dense<0.000000e+00> : vector<8x8xf32>
    %94 = tpu.matmul %91, %93, %cst_103 {dimension_numbers = #tpu.dot_dimension_numbers<[1], [0], [0], [1], [0, 0, 1, 1], [], []>} : vector<8x16xbf16>, vector<16x8xbf16>, vector<8x8xf32> -> vector<8x8xf32>
    %95 = arith.addf %89, %94 : vector<8x8xf32>
    %c0_104 = arith.constant 0 : index
    %c0_105 = arith.constant 0 : index
    %c0_106 = arith.constant 0 : index
    %c0_107 = arith.constant 0 : index
    %96 = vector.load %arg4[%c0_104, %c0_105, %c0_106, %c0_107] : memref<1x1x10x16xbf16, #tpu.memory_space<vmem>>, vector<1x1x8x16xbf16>
    %97 = vector.shape_cast %96 : vector<1x1x8x16xbf16> to vector<8x16xbf16>
    %c10 = arith.constant 10 : index
    %c0_108 = arith.constant 0 : index
    %c0_109 = arith.constant 0 : index
    %98 = vector.load %arg5[%c10, %c0_108, %c0_109] : memref<16x16x8xbf16, #tpu.memory_space<vmem>>, vector<1x16x8xbf16>
    %99 = vector.shape_cast %98 : vector<1x16x8xbf16> to vector<16x8xbf16>
    %cst_110 = arith.constant dense<0.000000e+00> : vector<8x8xf32>
    %100 = tpu.matmul %97, %99, %cst_110 {dimension_numbers = #tpu.dot_dimension_numbers<[1], [0], [0], [1], [0, 0, 1, 1], [], []>} : vector<8x16xbf16>, vector<16x8xbf16>, vector<8x8xf32> -> vector<8x8xf32>
    %101 = arith.addf %95, %100 : vector<8x8xf32>
    %c0_111 = arith.constant 0 : index
    %c0_112 = arith.constant 0 : index
    %c1_113 = arith.constant 1 : index
    %c0_114 = arith.constant 0 : index
    %102 = vector.load %arg4[%c0_111, %c0_112, %c1_113, %c0_114] : memref<1x1x10x16xbf16, #tpu.memory_space<vmem>>, vector<1x1x8x16xbf16>
    %103 = vector.shape_cast %102 : vector<1x1x8x16xbf16> to vector<8x16xbf16>
    %c11 = arith.constant 11 : index
    %c0_115 = arith.constant 0 : index
    %c0_116 = arith.constant 0 : index
    %104 = vector.load %arg5[%c11, %c0_115, %c0_116] : memref<16x16x8xbf16, #tpu.memory_space<vmem>>, vector<1x16x8xbf16>
    %105 = vector.shape_cast %104 : vector<1x16x8xbf16> to vector<16x8xbf16>
    %cst_117 = arith.constant dense<0.000000e+00> : vector<8x8xf32>
    %106 = tpu.matmul %103, %105, %cst_117 {dimension_numbers = #tpu.dot_dimension_numbers<[1], [0], [0], [1], [0, 0, 1, 1], [], []>} : vector<8x16xbf16>, vector<16x8xbf16>, vector<8x8xf32> -> vector<8x8xf32>
    %107 = arith.addf %101, %106 : vector<8x8xf32>
    %c0_118 = arith.constant 0 : index
    %c1_119 = arith.constant 1 : index
    %c0_120 = arith.constant 0 : index
    %c0_121 = arith.constant 0 : index
    %c0_122 = arith.constant 0 : index
    %108 = vector.load %arg6[%c0_118, %c1_119, %c0_120, %c0_121, %c0_122] : memref<1x2x2x8x8xf32, #tpu.memory_space<vmem>>, vector<1x1x1x8x8xf32>
    %109 = vector.shape_cast %108 : vector<1x1x1x8x8xf32> to vector<8x8xf32>
    %110 = vector.shape_cast %107 : vector<8x8xf32> to vector<1x1x1x8x8xf32>
    tpu.vector_store %arg6[%c0_118, %c1_119, %c0_120, %c0_121, %c0_122], %110 {strides = array<i32>} : memref<1x2x2x8x8xf32, #tpu.memory_space<vmem>>, vector<1x1x1x8x8xf32>,
    %c0_123 = arith.constant 0 : index
    %c0_124 = arith.constant 0 : index
    %111 = vector.load %arg7[%c0_123, %c0_124] : memref<1x8xf32, #tpu.memory_space<vmem>>, vector<1x8xf32>
    %cst_125 = arith.constant dense<0.000000e+00> : vector<8xf32>
    %112 = vector.multi_reduction <add>, %107, %cst_125 [0] : vector<8x8xf32> to vector<8xf32>
    %113 = vector.shape_cast %112 : vector<8xf32> to vector<1x8xf32>
    %114 = arith.addf %111, %113 : vector<1x8xf32>
    %c0_126 = arith.constant 0 : index
    %c0_127 = arith.constant 0 : index
    %115 = vector.load %arg7[%c0_126, %c0_127] : memref<1x8xf32, #tpu.memory_space<vmem>>, vector<1x8xf32>
    tpu.vector_store %arg7[%c0_126, %c0_127], %114 {strides = array<i32>} : memref<1x8xf32, #tpu.memory_space<vmem>>, vector<1x8xf32>,
    %c0_128 = arith.constant 0 : index
    %c0_129 = arith.constant 0 : index
    %116 = vector.load %arg8[%c0_128, %c0_129] : memref<1x8xf32, #tpu.memory_space<vmem>>, vector<1x8xf32>
    %117 = arith.mulf %107, %107 : vector<8x8xf32>
    %cst_130 = arith.constant dense<0.000000e+00> : vector<8xf32>
    %118 = vector.multi_reduction <add>, %117, %cst_130 [0] : vector<8x8xf32> to vector<8xf32>
    %119 = vector.shape_cast %118 : vector<8xf32> to vector<1x8xf32>
    %120 = arith.addf %116, %119 : vector<1x8xf32>
    %c0_131 = arith.constant 0 : index
    %c0_132 = arith.constant 0 : index
    %121 = vector.load %arg8[%c0_131, %c0_132] : memref<1x8xf32, #tpu.memory_space<vmem>>, vector<1x8xf32>
    tpu.vector_store %arg8[%c0_131, %c0_132], %120 {strides = array<i32>} : memref<1x8xf32, #tpu.memory_space<vmem>>, vector<1x8xf32>,
    %cst_133 = arith.constant 0.000000e+00 : f32
    %122 = vector.broadcast %cst_133 : f32 to vector<8x8xf32>
    %c0_134 = arith.constant 0 : index
    %c0_135 = arith.constant 0 : index
    %c1_136 = arith.constant 1 : index
    %c0_137 = arith.constant 0 : index
    %123 = vector.load %arg3[%c0_134, %c0_135, %c1_136, %c0_137] : memref<1x1x10x16xbf16, #tpu.memory_space<vmem>>, vector<1x1x8x16xbf16>
    %124 = vector.shape_cast %123 : vector<1x1x8x16xbf16> to vector<8x16xbf16>
    %c12 = arith.constant 12 : index
    %c0_138 = arith.constant 0 : index
    %c0_139 = arith.constant 0 : index
    %125 = vector.load %arg5[%c12, %c0_138, %c0_139] : memref<16x16x8xbf16, #tpu.memory_space<vmem>>, vector<1x16x8xbf16>
    %126 = vector.shape_cast %125 : vector<1x16x8xbf16> to vector<16x8xbf16>
    %cst_140 = arith.constant dense<0.000000e+00> : vector<8x8xf32>
    %127 = tpu.matmul %124, %126, %cst_140 {dimension_numbers = #tpu.dot_dimension_numbers<[1], [0], [0], [1], [0, 0, 1, 1], [], []>} : vector<8x16xbf16>, vector<16x8xbf16>, vector<8x8xf32> -> vector<8x8xf32>
    %128 = arith.addf %122, %127 : vector<8x8xf32>
    %c0_141 = arith.constant 0 : index
    %c0_142 = arith.constant 0 : index
    %c2_143 = arith.constant 2 : index
    %c0_144 = arith.constant 0 : index
    %129 = vector.load %arg3[%c0_141, %c0_142, %c2_143, %c0_144] : memref<1x1x10x16xbf16, #tpu.memory_space<vmem>>, vector<1x1x8x16xbf16>
    %130 = vector.shape_cast %129 : vector<1x1x8x16xbf16> to vector<8x16xbf16>
    %c13 = arith.constant 13 : index
    %c0_145 = arith.constant 0 : index
    %c0_146 = arith.constant 0 : index
    %131 = vector.load %arg5[%c13, %c0_145, %c0_146] : memref<16x16x8xbf16, #tpu.memory_space<vmem>>, vector<1x16x8xbf16>
    %132 = vector.shape_cast %131 : vector<1x16x8xbf16> to vector<16x8xbf16>
    %cst_147 = arith.constant dense<0.000000e+00> : vector<8x8xf32>
    %133 = tpu.matmul %130, %132, %cst_147 {dimension_numbers = #tpu.dot_dimension_numbers<[1], [0], [0], [1], [0, 0, 1, 1], [], []>} : vector<8x16xbf16>, vector<16x8xbf16>, vector<8x8xf32> -> vector<8x8xf32>
    %134 = arith.addf %128, %133 : vector<8x8xf32>
    %c0_148 = arith.constant 0 : index
    %c0_149 = arith.constant 0 : index
    %c1_150 = arith.constant 1 : index
    %c0_151 = arith.constant 0 : index
    %135 = vector.load %arg4[%c0_148, %c0_149, %c1_150, %c0_151] : memref<1x1x10x16xbf16, #tpu.memory_space<vmem>>, vector<1x1x8x16xbf16>
    %136 = vector.shape_cast %135 : vector<1x1x8x16xbf16> to vector<8x16xbf16>
    %c14 = arith.constant 14 : index
    %c0_152 = arith.constant 0 : index
    %c0_153 = arith.constant 0 : index
    %137 = vector.load %arg5[%c14, %c0_152, %c0_153] : memref<16x16x8xbf16, #tpu.memory_space<vmem>>, vector<1x16x8xbf16>
    %138 = vector.shape_cast %137 : vector<1x16x8xbf16> to vector<16x8xbf16>
    %cst_154 = arith.constant dense<0.000000e+00> : vector<8x8xf32>
    %139 = tpu.matmul %136, %138, %cst_154 {dimension_numbers = #tpu.dot_dimension_numbers<[1], [0], [0], [1], [0, 0, 1, 1], [], []>} : vector<8x16xbf16>, vector<16x8xbf16>, vector<8x8xf32> -> vector<8x8xf32>
    %140 = arith.addf %134, %139 : vector<8x8xf32>
    %c0_155 = arith.constant 0 : index
    %c0_156 = arith.constant 0 : index
    %c2_157 = arith.constant 2 : index
    %c0_158 = arith.constant 0 : index
    %141 = vector.load %arg4[%c0_155, %c0_156, %c2_157, %c0_158] : memref<1x1x10x16xbf16, #tpu.memory_space<vmem>>, vector<1x1x8x16xbf16>
    %142 = vector.shape_cast %141 : vector<1x1x8x16xbf16> to vector<8x16xbf16>
    %c15 = arith.constant 15 : index
    %c0_159 = arith.constant 0 : index
    %c0_160 = arith.constant 0 : index
    %143 = vector.load %arg5[%c15, %c0_159, %c0_160] : memref<16x16x8xbf16, #tpu.memory_space<vmem>>, vector<1x16x8xbf16>
    %144 = vector.shape_cast %143 : vector<1x16x8xbf16> to vector<16x8xbf16>
    %cst_161 = arith.constant dense<0.000000e+00> : vector<8x8xf32>
    %145 = tpu.matmul %142, %144, %cst_161 {dimension_numbers = #tpu.dot_dimension_numbers<[1], [0], [0], [1], [0, 0, 1, 1], [], []>} : vector<8x16xbf16>, vector<16x8xbf16>, vector<8x8xf32> -> vector<8x8xf32>
    %146 = arith.addf %140, %145 : vector<8x8xf32>
    %c0_162 = arith.constant 0 : index
    %c1_163 = arith.constant 1 : index
    %c1_164 = arith.constant 1 : index
    %c0_165 = arith.constant 0 : index
    %c0_166 = arith.constant 0 : index
    %147 = vector.load %arg6[%c0_162, %c1_163, %c1_164, %c0_165, %c0_166] : memref<1x2x2x8x8xf32, #tpu.memory_space<vmem>>, vector<1x1x1x8x8xf32>
    %148 = vector.shape_cast %147 : vector<1x1x1x8x8xf32> to vector<8x8xf32>
    %149 = vector.shape_cast %146 : vector<8x8xf32> to vector<1x1x1x8x8xf32>
    tpu.vector_store %arg6[%c0_162, %c1_163, %c1_164, %c0_165, %c0_166], %149 {strides = array<i32>} : memref<1x2x2x8x8xf32, #tpu.memory_space<vmem>>, vector<1x1x1x8x8xf32>,
    %c0_167 = arith.constant 0 : index
    %c0_168 = arith.constant 0 : index
    %150 = vector.load %arg7[%c0_167, %c0_168] : memref<1x8xf32, #tpu.memory_space<vmem>>, vector<1x8xf32>
    %cst_169 = arith.constant dense<0.000000e+00> : vector<8xf32>
    %151 = vector.multi_reduction <add>, %146, %cst_169 [0] : vector<8x8xf32> to vector<8xf32>
    %152 = vector.shape_cast %151 : vector<8xf32> to vector<1x8xf32>
    %153 = arith.addf %150, %152 : vector<1x8xf32>
    %c0_170 = arith.constant 0 : index
    %c0_171 = arith.constant 0 : index
    %154 = vector.load %arg7[%c0_170, %c0_171] : memref<1x8xf32, #tpu.memory_space<vmem>>, vector<1x8xf32>
    tpu.vector_store %arg7[%c0_170, %c0_171], %153 {strides = array<i32>} : memref<1x8xf32, #tpu.memory_space<vmem>>, vector<1x8xf32>,
    %c0_172 = arith.constant 0 : index
    %c0_173 = arith.constant 0 : index
    %155 = vector.load %arg8[%c0_172, %c0_173] : memref<1x8xf32, #tpu.memory_space<vmem>>, vector<1x8xf32>
    %156 = arith.mulf %146, %146 : vector<8x8xf32>
    %cst_174 = arith.constant dense<0.000000e+00> : vector<8xf32>
    %157 = vector.multi_reduction <add>, %156, %cst_174 [0] : vector<8x8xf32> to vector<8xf32>
    %158 = vector.shape_cast %157 : vector<8xf32> to vector<1x8xf32>
    %159 = arith.addf %155, %158 : vector<1x8xf32>
    %c0_175 = arith.constant 0 : index
    %c0_176 = arith.constant 0 : index
    %160 = vector.load %arg8[%c0_175, %c0_176] : memref<1x8xf32, #tpu.memory_space<vmem>>, vector<1x8xf32>
    tpu.vector_store %arg8[%c0_175, %c0_176], %159 {strides = array<i32>} : memref<1x8xf32, #tpu.memory_space<vmem>>, vector<1x8xf32>,
    return
  }
  func.func @transform_0(%arg0: i32, %arg1: i32) -> (i32, i32, i32, i32) {
    %c0_i32 = arith.constant 0 : i32
    %0 = arith.addi %arg1, %c0_i32 : i32
    %c0_i32_0 = arith.constant 0 : i32
    %c0_i32_1 = arith.constant 0 : i32
    %c0_i32_2 = arith.constant 0 : i32
    return %arg0, %0, %c0_i32_0, %c0_i32_1 : i32, i32, i32, i32
  }
  func.func @transform_1(%arg0: i32, %arg1: i32) -> (i32, i32, i32, i32) {
    %c1_i32 = arith.constant 1 : i32
    %0 = arith.addi %arg1, %c1_i32 : i32
    %c0_i32 = arith.constant 0 : i32
    %c0_i32_0 = arith.constant 0 : i32
    %c0_i32_1 = arith.constant 0 : i32
    return %arg0, %0, %c0_i32, %c0_i32_0 : i32, i32, i32, i32
  }
  func.func @transform_2(%arg0: i32, %arg1: i32) -> (i32, i32, i32, i32) {
    %c2_i32 = arith.constant 2 : i32
    %0 = arith.addi %arg1, %c2_i32 : i32
    %c0_i32 = arith.constant 0 : i32
    %c0_i32_0 = arith.constant 0 : i32
    %c0_i32_1 = arith.constant 0 : i32
    return %arg0, %0, %c0_i32, %c0_i32_0 : i32, i32, i32, i32
  }
  func.func @transform_3(%arg0: i32, %arg1: i32) -> (i32, i32, i32) {
    %c0_i32 = arith.constant 0 : i32
    %c0_i32_0 = arith.constant 0 : i32
    %c0_i32_1 = arith.constant 0 : i32
    %c0_i32_2 = arith.constant 0 : i32
    return %c0_i32, %c0_i32_0, %c0_i32_1 : i32, i32, i32
  }
  func.func @transform_4(%arg0: i32, %arg1: i32) -> (i32, i32, i32, i32, i32) {
    %c0_i32 = arith.constant 0 : i32
    %c0_i32_0 = arith.constant 0 : i32
    %c0_i32_1 = arith.constant 0 : i32
    %c0_i32_2 = arith.constant 0 : i32
    return %arg0, %arg1, %c0_i32, %c0_i32_0, %c0_i32_1 : i32, i32, i32, i32, i32
  }
  func.func @transform_5(%arg0: i32, %arg1: i32) -> (i32, i32) {
    %c0_i32 = arith.constant 0 : i32
    %c0_i32_0 = arith.constant 0 : i32
    %c0_i32_1 = arith.constant 0 : i32
    return %c0_i32, %c0_i32_0 : i32, i32
  }
  func.func @transform_6(%arg0: i32, %arg1: i32) -> (i32, i32) {
    %c0_i32 = arith.constant 0 : i32
    %c0_i32_0 = arith.constant 0 : i32
    %c0_i32_1 = arith.constant 0 : i32
    return %c0_i32, %c0_i32_0 : i32, i32
  }
}

module attributes {stable_mosaic.version = 11 : i64} {
  func.func @_bn_relu_kernel(%arg0: i32, %arg1: memref<512x8xf32, #tpu.memory_space<vmem>>, %arg2: memref<1x8xf32, #tpu.memory_space<vmem>>, %arg3: memref<1x8xf32, #tpu.memory_space<vmem>>, %arg4: memref<512x8xbf16, #tpu.memory_space<vmem>>) attributes {dimension_semantics = [#tpu.dimension_semantics<parallel>], iteration_bounds = array<i64: 1>, scalar_prefetch = 0 : i64, scratch_operands = 0 : i64, tpu.core_type = #tpu.core_type<tc>, window_params = [{transform_indices = @transform_0, window_bounds = array<i64: 512, 8>}, {pipeline_mode = #tpu.pipeline_mode<synchronous>, transform_indices = @transform_1, window_bounds = array<i64: 1, 8>}, {pipeline_mode = #tpu.pipeline_mode<synchronous>, transform_indices = @transform_2, window_bounds = array<i64: 1, 8>}, {transform_indices = @transform_3, window_bounds = array<i64: 512, 8>}]} {
    %c0 = arith.constant 0 : index
    %c0_0 = arith.constant 0 : index
    %0 = vector.load %arg1[%c0, %c0_0] : memref<512x8xf32, #tpu.memory_space<vmem>>, vector<512x8xf32>
    %c0_1 = arith.constant 0 : index
    %c0_2 = arith.constant 0 : index
    %1 = vector.load %arg2[%c0_1, %c0_2] : memref<1x8xf32, #tpu.memory_space<vmem>>, vector<1x8xf32>
    %2 = vector.broadcast %1 : vector<1x8xf32> to vector<512x8xf32>
    %3 = arith.mulf %0, %2 : vector<512x8xf32>
    %c0_3 = arith.constant 0 : index
    %c0_4 = arith.constant 0 : index
    %4 = vector.load %arg3[%c0_3, %c0_4] : memref<1x8xf32, #tpu.memory_space<vmem>>, vector<1x8xf32>
    %5 = vector.broadcast %4 : vector<1x8xf32> to vector<512x8xf32>
    %6 = arith.addf %3, %5 : vector<512x8xf32>
    %cst = arith.constant 0.000000e+00 : f32
    %7 = vector.broadcast %cst : f32 to vector<512x8xf32>
    %8 = arith.maximumf %6, %7 : vector<512x8xf32>
    %9 = arith.truncf %8 : vector<512x8xf32> to vector<512x8xbf16>
    %c0_5 = arith.constant 0 : index
    %c0_6 = arith.constant 0 : index
    %10 = vector.load %arg4[%c0_5, %c0_6] : memref<512x8xbf16, #tpu.memory_space<vmem>>, vector<512x8xbf16>
    tpu.vector_store %arg4[%c0_5, %c0_6], %9 {strides = array<i32>} : memref<512x8xbf16, #tpu.memory_space<vmem>>, vector<512x8xbf16>,
    return
  }
  func.func @transform_0(%arg0: i32) -> (i32, i32) {
    %c0_i32 = arith.constant 0 : i32
    %c0_i32_0 = arith.constant 0 : i32
    return %arg0, %c0_i32 : i32, i32
  }
  func.func @transform_1(%arg0: i32) -> (i32, i32) {
    %c0_i32 = arith.constant 0 : i32
    %c0_i32_0 = arith.constant 0 : i32
    %c0_i32_1 = arith.constant 0 : i32
    return %c0_i32, %c0_i32_0 : i32, i32
  }
  func.func @transform_2(%arg0: i32) -> (i32, i32) {
    %c0_i32 = arith.constant 0 : i32
    %c0_i32_0 = arith.constant 0 : i32
    %c0_i32_1 = arith.constant 0 : i32
    return %c0_i32, %c0_i32_0 : i32, i32
  }
  func.func @transform_3(%arg0: i32) -> (i32, i32) {
    %c0_i32 = arith.constant 0 : i32
    %c0_i32_0 = arith.constant 0 : i32
    return %arg0, %c0_i32 : i32, i32
  }
}

module attributes {stable_mosaic.version = 11 : i64} {
  func.func @_deconv_s2_bn_kernel(%arg0: i32, %arg1: i32, %arg2: memref<1x1x6x32xbf16, #tpu.memory_space<vmem>>, %arg3: memref<1x1x6x32xbf16, #tpu.memory_space<vmem>>, %arg4: memref<1x1x6x32xbf16, #tpu.memory_space<vmem>>, %arg5: memref<16x32x16xbf16, #tpu.memory_space<vmem>>, %arg6: memref<1x2x2x4x16xf32, #tpu.memory_space<vmem>>, %arg7: memref<1x16xf32, #tpu.memory_space<vmem>>, %arg8: memref<1x16xf32, #tpu.memory_space<vmem>>) attributes {dimension_semantics = [#tpu.dimension_semantics<arbitrary>, #tpu.dimension_semantics<arbitrary>], iteration_bounds = array<i64: 2, 4>, scalar_prefetch = 0 : i64, scratch_operands = 0 : i64, tpu.core_type = #tpu.core_type<tc>, window_params = [{transform_indices = @transform_0, window_bounds = array<i64: 1, 1, 6, 32>}, {transform_indices = @transform_1, window_bounds = array<i64: 1, 1, 6, 32>}, {transform_indices = @transform_2, window_bounds = array<i64: 1, 1, 6, 32>}, {pipeline_mode = #tpu.pipeline_mode<synchronous>, transform_indices = @transform_3, window_bounds = array<i64: 16, 32, 16>}, {transform_indices = @transform_4, window_bounds = array<i64: 1, 2, 2, 4, 16>}, {pipeline_mode = #tpu.pipeline_mode<synchronous>, transform_indices = @transform_5, window_bounds = array<i64: 1, 16>}, {pipeline_mode = #tpu.pipeline_mode<synchronous>, transform_indices = @transform_6, window_bounds = array<i64: 1, 16>}]} {
    %c0_i32 = arith.constant 0 : i32
    %0 = arith.cmpi eq, %arg0, %c0_i32 : i32
    %c0_i32_0 = arith.constant 0 : i32
    %1 = arith.cmpi eq, %arg1, %c0_i32_0 : i32
    %2 = arith.andi %0, %1 : i1
    %3 = arith.extui %2 : i1 to i32
    %c0_i32_1 = arith.constant 0 : i32
    %4 = arith.cmpi ne, %3, %c0_i32_1 : i32
    scf.if %4 {
      %cst_177 = arith.constant 0.000000e+00 : f32
      %161 = vector.broadcast %cst_177 : f32 to vector<1x16xf32>
      %c0_178 = arith.constant 0 : index
      %c0_179 = arith.constant 0 : index
      %162 = vector.load %arg7[%c0_178, %c0_179] : memref<1x16xf32, #tpu.memory_space<vmem>>, vector<1x16xf32>
      tpu.vector_store %arg7[%c0_178, %c0_179], %161 {strides = array<i32>} : memref<1x16xf32, #tpu.memory_space<vmem>>, vector<1x16xf32>,
      %cst_180 = arith.constant 0.000000e+00 : f32
      %163 = vector.broadcast %cst_180 : f32 to vector<1x16xf32>
      %c0_181 = arith.constant 0 : index
      %c0_182 = arith.constant 0 : index
      %164 = vector.load %arg8[%c0_181, %c0_182] : memref<1x16xf32, #tpu.memory_space<vmem>>, vector<1x16xf32>
      tpu.vector_store %arg8[%c0_181, %c0_182], %163 {strides = array<i32>} : memref<1x16xf32, #tpu.memory_space<vmem>>, vector<1x16xf32>,
    } else {
    }
    %cst = arith.constant 0.000000e+00 : f32
    %5 = vector.broadcast %cst : f32 to vector<4x16xf32>
    %c0 = arith.constant 0 : index
    %c0_2 = arith.constant 0 : index
    %c0_3 = arith.constant 0 : index
    %c0_4 = arith.constant 0 : index
    %6 = vector.load %arg2[%c0, %c0_2, %c0_3, %c0_4] : memref<1x1x6x32xbf16, #tpu.memory_space<vmem>>, vector<1x1x4x32xbf16>
    %7 = vector.shape_cast %6 : vector<1x1x4x32xbf16> to vector<4x32xbf16>
    %c0_5 = arith.constant 0 : index
    %c0_6 = arith.constant 0 : index
    %c0_7 = arith.constant 0 : index
    %8 = vector.load %arg5[%c0_5, %c0_6, %c0_7] : memref<16x32x16xbf16, #tpu.memory_space<vmem>>, vector<1x32x16xbf16>
    %9 = vector.shape_cast %8 : vector<1x32x16xbf16> to vector<32x16xbf16>
    %cst_8 = arith.constant dense<0.000000e+00> : vector<4x16xf32>
    %10 = tpu.matmul %7, %9, %cst_8 {dimension_numbers = #tpu.dot_dimension_numbers<[1], [0], [0], [1], [0, 0, 1, 1], [], []>} : vector<4x32xbf16>, vector<32x16xbf16>, vector<4x16xf32> -> vector<4x16xf32>
    %11 = arith.addf %5, %10 : vector<4x16xf32>
    %c0_9 = arith.constant 0 : index
    %c0_10 = arith.constant 0 : index
    %c1 = arith.constant 1 : index
    %c0_11 = arith.constant 0 : index
    %12 = vector.load %arg2[%c0_9, %c0_10, %c1, %c0_11] : memref<1x1x6x32xbf16, #tpu.memory_space<vmem>>, vector<1x1x4x32xbf16>
    %13 = vector.shape_cast %12 : vector<1x1x4x32xbf16> to vector<4x32xbf16>
    %c1_12 = arith.constant 1 : index
    %c0_13 = arith.constant 0 : index
    %c0_14 = arith.constant 0 : index
    %14 = vector.load %arg5[%c1_12, %c0_13, %c0_14] : memref<16x32x16xbf16, #tpu.memory_space<vmem>>, vector<1x32x16xbf16>
    %15 = vector.shape_cast %14 : vector<1x32x16xbf16> to vector<32x16xbf16>
    %cst_15 = arith.constant dense<0.000000e+00> : vector<4x16xf32>
    %16 = tpu.matmul %13, %15, %cst_15 {dimension_numbers = #tpu.dot_dimension_numbers<[1], [0], [0], [1], [0, 0, 1, 1], [], []>} : vector<4x32xbf16>, vector<32x16xbf16>, vector<4x16xf32> -> vector<4x16xf32>
    %17 = arith.addf %11, %16 : vector<4x16xf32>
    %c0_16 = arith.constant 0 : index
    %c0_17 = arith.constant 0 : index
    %c0_18 = arith.constant 0 : index
    %c0_19 = arith.constant 0 : index
    %18 = vector.load %arg3[%c0_16, %c0_17, %c0_18, %c0_19] : memref<1x1x6x32xbf16, #tpu.memory_space<vmem>>, vector<1x1x4x32xbf16>
    %19 = vector.shape_cast %18 : vector<1x1x4x32xbf16> to vector<4x32xbf16>
    %c2 = arith.constant 2 : index
    %c0_20 = arith.constant 0 : index
    %c0_21 = arith.constant 0 : index
    %20 = vector.load %arg5[%c2, %c0_20, %c0_21] : memref<16x32x16xbf16, #tpu.memory_space<vmem>>, vector<1x32x16xbf16>
    %21 = vector.shape_cast %20 : vector<1x32x16xbf16> to vector<32x16xbf16>
    %cst_22 = arith.constant dense<0.000000e+00> : vector<4x16xf32>
    %22 = tpu.matmul %19, %21, %cst_22 {dimension_numbers = #tpu.dot_dimension_numbers<[1], [0], [0], [1], [0, 0, 1, 1], [], []>} : vector<4x32xbf16>, vector<32x16xbf16>, vector<4x16xf32> -> vector<4x16xf32>
    %23 = arith.addf %17, %22 : vector<4x16xf32>
    %c0_23 = arith.constant 0 : index
    %c0_24 = arith.constant 0 : index
    %c1_25 = arith.constant 1 : index
    %c0_26 = arith.constant 0 : index
    %24 = vector.load %arg3[%c0_23, %c0_24, %c1_25, %c0_26] : memref<1x1x6x32xbf16, #tpu.memory_space<vmem>>, vector<1x1x4x32xbf16>
    %25 = vector.shape_cast %24 : vector<1x1x4x32xbf16> to vector<4x32xbf16>
    %c3 = arith.constant 3 : index
    %c0_27 = arith.constant 0 : index
    %c0_28 = arith.constant 0 : index
    %26 = vector.load %arg5[%c3, %c0_27, %c0_28] : memref<16x32x16xbf16, #tpu.memory_space<vmem>>, vector<1x32x16xbf16>
    %27 = vector.shape_cast %26 : vector<1x32x16xbf16> to vector<32x16xbf16>
    %cst_29 = arith.constant dense<0.000000e+00> : vector<4x16xf32>
    %28 = tpu.matmul %25, %27, %cst_29 {dimension_numbers = #tpu.dot_dimension_numbers<[1], [0], [0], [1], [0, 0, 1, 1], [], []>} : vector<4x32xbf16>, vector<32x16xbf16>, vector<4x16xf32> -> vector<4x16xf32>
    %29 = arith.addf %23, %28 : vector<4x16xf32>
    %c0_30 = arith.constant 0 : index
    %c0_31 = arith.constant 0 : index
    %c0_32 = arith.constant 0 : index
    %c0_33 = arith.constant 0 : index
    %c0_34 = arith.constant 0 : index
    %30 = vector.load %arg6[%c0_30, %c0_31, %c0_32, %c0_33, %c0_34] : memref<1x2x2x4x16xf32, #tpu.memory_space<vmem>>, vector<1x1x1x4x16xf32>
    %31 = vector.shape_cast %30 : vector<1x1x1x4x16xf32> to vector<4x16xf32>
    %32 = vector.shape_cast %29 : vector<4x16xf32> to vector<1x1x1x4x16xf32>
    tpu.vector_store %arg6[%c0_30, %c0_31, %c0_32, %c0_33, %c0_34], %32 {strides = array<i32>} : memref<1x2x2x4x16xf32, #tpu.memory_space<vmem>>, vector<1x1x1x4x16xf32>,
    %c0_35 = arith.constant 0 : index
    %c0_36 = arith.constant 0 : index
    %33 = vector.load %arg7[%c0_35, %c0_36] : memref<1x16xf32, #tpu.memory_space<vmem>>, vector<1x16xf32>
    %cst_37 = arith.constant dense<0.000000e+00> : vector<16xf32>
    %34 = vector.multi_reduction <add>, %29, %cst_37 [0] : vector<4x16xf32> to vector<16xf32>
    %35 = vector.shape_cast %34 : vector<16xf32> to vector<1x16xf32>
    %36 = arith.addf %33, %35 : vector<1x16xf32>
    %c0_38 = arith.constant 0 : index
    %c0_39 = arith.constant 0 : index
    %37 = vector.load %arg7[%c0_38, %c0_39] : memref<1x16xf32, #tpu.memory_space<vmem>>, vector<1x16xf32>
    tpu.vector_store %arg7[%c0_38, %c0_39], %36 {strides = array<i32>} : memref<1x16xf32, #tpu.memory_space<vmem>>, vector<1x16xf32>,
    %c0_40 = arith.constant 0 : index
    %c0_41 = arith.constant 0 : index
    %38 = vector.load %arg8[%c0_40, %c0_41] : memref<1x16xf32, #tpu.memory_space<vmem>>, vector<1x16xf32>
    %39 = arith.mulf %29, %29 : vector<4x16xf32>
    %cst_42 = arith.constant dense<0.000000e+00> : vector<16xf32>
    %40 = vector.multi_reduction <add>, %39, %cst_42 [0] : vector<4x16xf32> to vector<16xf32>
    %41 = vector.shape_cast %40 : vector<16xf32> to vector<1x16xf32>
    %42 = arith.addf %38, %41 : vector<1x16xf32>
    %c0_43 = arith.constant 0 : index
    %c0_44 = arith.constant 0 : index
    %43 = vector.load %arg8[%c0_43, %c0_44] : memref<1x16xf32, #tpu.memory_space<vmem>>, vector<1x16xf32>
    tpu.vector_store %arg8[%c0_43, %c0_44], %42 {strides = array<i32>} : memref<1x16xf32, #tpu.memory_space<vmem>>, vector<1x16xf32>,
    %cst_45 = arith.constant 0.000000e+00 : f32
    %44 = vector.broadcast %cst_45 : f32 to vector<4x16xf32>
    %c0_46 = arith.constant 0 : index
    %c0_47 = arith.constant 0 : index
    %c1_48 = arith.constant 1 : index
    %c0_49 = arith.constant 0 : index
    %45 = vector.load %arg2[%c0_46, %c0_47, %c1_48, %c0_49] : memref<1x1x6x32xbf16, #tpu.memory_space<vmem>>, vector<1x1x4x32xbf16>
    %46 = vector.shape_cast %45 : vector<1x1x4x32xbf16> to vector<4x32xbf16>
    %c4 = arith.constant 4 : index
    %c0_50 = arith.constant 0 : index
    %c0_51 = arith.constant 0 : index
    %47 = vector.load %arg5[%c4, %c0_50, %c0_51] : memref<16x32x16xbf16, #tpu.memory_space<vmem>>, vector<1x32x16xbf16>
    %48 = vector.shape_cast %47 : vector<1x32x16xbf16> to vector<32x16xbf16>
    %cst_52 = arith.constant dense<0.000000e+00> : vector<4x16xf32>
    %49 = tpu.matmul %46, %48, %cst_52 {dimension_numbers = #tpu.dot_dimension_numbers<[1], [0], [0], [1], [0, 0, 1, 1], [], []>} : vector<4x32xbf16>, vector<32x16xbf16>, vector<4x16xf32> -> vector<4x16xf32>
    %50 = arith.addf %44, %49 : vector<4x16xf32>
    %c0_53 = arith.constant 0 : index
    %c0_54 = arith.constant 0 : index
    %c2_55 = arith.constant 2 : index
    %c0_56 = arith.constant 0 : index
    %51 = vector.load %arg2[%c0_53, %c0_54, %c2_55, %c0_56] : memref<1x1x6x32xbf16, #tpu.memory_space<vmem>>, vector<1x1x4x32xbf16>
    %52 = vector.shape_cast %51 : vector<1x1x4x32xbf16> to vector<4x32xbf16>
    %c5 = arith.constant 5 : index
    %c0_57 = arith.constant 0 : index
    %c0_58 = arith.constant 0 : index
    %53 = vector.load %arg5[%c5, %c0_57, %c0_58] : memref<16x32x16xbf16, #tpu.memory_space<vmem>>, vector<1x32x16xbf16>
    %54 = vector.shape_cast %53 : vector<1x32x16xbf16> to vector<32x16xbf16>
    %cst_59 = arith.constant dense<0.000000e+00> : vector<4x16xf32>
    %55 = tpu.matmul %52, %54, %cst_59 {dimension_numbers = #tpu.dot_dimension_numbers<[1], [0], [0], [1], [0, 0, 1, 1], [], []>} : vector<4x32xbf16>, vector<32x16xbf16>, vector<4x16xf32> -> vector<4x16xf32>
    %56 = arith.addf %50, %55 : vector<4x16xf32>
    %c0_60 = arith.constant 0 : index
    %c0_61 = arith.constant 0 : index
    %c1_62 = arith.constant 1 : index
    %c0_63 = arith.constant 0 : index
    %57 = vector.load %arg3[%c0_60, %c0_61, %c1_62, %c0_63] : memref<1x1x6x32xbf16, #tpu.memory_space<vmem>>, vector<1x1x4x32xbf16>
    %58 = vector.shape_cast %57 : vector<1x1x4x32xbf16> to vector<4x32xbf16>
    %c6 = arith.constant 6 : index
    %c0_64 = arith.constant 0 : index
    %c0_65 = arith.constant 0 : index
    %59 = vector.load %arg5[%c6, %c0_64, %c0_65] : memref<16x32x16xbf16, #tpu.memory_space<vmem>>, vector<1x32x16xbf16>
    %60 = vector.shape_cast %59 : vector<1x32x16xbf16> to vector<32x16xbf16>
    %cst_66 = arith.constant dense<0.000000e+00> : vector<4x16xf32>
    %61 = tpu.matmul %58, %60, %cst_66 {dimension_numbers = #tpu.dot_dimension_numbers<[1], [0], [0], [1], [0, 0, 1, 1], [], []>} : vector<4x32xbf16>, vector<32x16xbf16>, vector<4x16xf32> -> vector<4x16xf32>
    %62 = arith.addf %56, %61 : vector<4x16xf32>
    %c0_67 = arith.constant 0 : index
    %c0_68 = arith.constant 0 : index
    %c2_69 = arith.constant 2 : index
    %c0_70 = arith.constant 0 : index
    %63 = vector.load %arg3[%c0_67, %c0_68, %c2_69, %c0_70] : memref<1x1x6x32xbf16, #tpu.memory_space<vmem>>, vector<1x1x4x32xbf16>
    %64 = vector.shape_cast %63 : vector<1x1x4x32xbf16> to vector<4x32xbf16>
    %c7 = arith.constant 7 : index
    %c0_71 = arith.constant 0 : index
    %c0_72 = arith.constant 0 : index
    %65 = vector.load %arg5[%c7, %c0_71, %c0_72] : memref<16x32x16xbf16, #tpu.memory_space<vmem>>, vector<1x32x16xbf16>
    %66 = vector.shape_cast %65 : vector<1x32x16xbf16> to vector<32x16xbf16>
    %cst_73 = arith.constant dense<0.000000e+00> : vector<4x16xf32>
    %67 = tpu.matmul %64, %66, %cst_73 {dimension_numbers = #tpu.dot_dimension_numbers<[1], [0], [0], [1], [0, 0, 1, 1], [], []>} : vector<4x32xbf16>, vector<32x16xbf16>, vector<4x16xf32> -> vector<4x16xf32>
    %68 = arith.addf %62, %67 : vector<4x16xf32>
    %c0_74 = arith.constant 0 : index
    %c0_75 = arith.constant 0 : index
    %c1_76 = arith.constant 1 : index
    %c0_77 = arith.constant 0 : index
    %c0_78 = arith.constant 0 : index
    %69 = vector.load %arg6[%c0_74, %c0_75, %c1_76, %c0_77, %c0_78] : memref<1x2x2x4x16xf32, #tpu.memory_space<vmem>>, vector<1x1x1x4x16xf32>
    %70 = vector.shape_cast %69 : vector<1x1x1x4x16xf32> to vector<4x16xf32>
    %71 = vector.shape_cast %68 : vector<4x16xf32> to vector<1x1x1x4x16xf32>
    tpu.vector_store %arg6[%c0_74, %c0_75, %c1_76, %c0_77, %c0_78], %71 {strides = array<i32>} : memref<1x2x2x4x16xf32, #tpu.memory_space<vmem>>, vector<1x1x1x4x16xf32>,
    %c0_79 = arith.constant 0 : index
    %c0_80 = arith.constant 0 : index
    %72 = vector.load %arg7[%c0_79, %c0_80] : memref<1x16xf32, #tpu.memory_space<vmem>>, vector<1x16xf32>
    %cst_81 = arith.constant dense<0.000000e+00> : vector<16xf32>
    %73 = vector.multi_reduction <add>, %68, %cst_81 [0] : vector<4x16xf32> to vector<16xf32>
    %74 = vector.shape_cast %73 : vector<16xf32> to vector<1x16xf32>
    %75 = arith.addf %72, %74 : vector<1x16xf32>
    %c0_82 = arith.constant 0 : index
    %c0_83 = arith.constant 0 : index
    %76 = vector.load %arg7[%c0_82, %c0_83] : memref<1x16xf32, #tpu.memory_space<vmem>>, vector<1x16xf32>
    tpu.vector_store %arg7[%c0_82, %c0_83], %75 {strides = array<i32>} : memref<1x16xf32, #tpu.memory_space<vmem>>, vector<1x16xf32>,
    %c0_84 = arith.constant 0 : index
    %c0_85 = arith.constant 0 : index
    %77 = vector.load %arg8[%c0_84, %c0_85] : memref<1x16xf32, #tpu.memory_space<vmem>>, vector<1x16xf32>
    %78 = arith.mulf %68, %68 : vector<4x16xf32>
    %cst_86 = arith.constant dense<0.000000e+00> : vector<16xf32>
    %79 = vector.multi_reduction <add>, %78, %cst_86 [0] : vector<4x16xf32> to vector<16xf32>
    %80 = vector.shape_cast %79 : vector<16xf32> to vector<1x16xf32>
    %81 = arith.addf %77, %80 : vector<1x16xf32>
    %c0_87 = arith.constant 0 : index
    %c0_88 = arith.constant 0 : index
    %82 = vector.load %arg8[%c0_87, %c0_88] : memref<1x16xf32, #tpu.memory_space<vmem>>, vector<1x16xf32>
    tpu.vector_store %arg8[%c0_87, %c0_88], %81 {strides = array<i32>} : memref<1x16xf32, #tpu.memory_space<vmem>>, vector<1x16xf32>,
    %cst_89 = arith.constant 0.000000e+00 : f32
    %83 = vector.broadcast %cst_89 : f32 to vector<4x16xf32>
    %c0_90 = arith.constant 0 : index
    %c0_91 = arith.constant 0 : index
    %c0_92 = arith.constant 0 : index
    %c0_93 = arith.constant 0 : index
    %84 = vector.load %arg3[%c0_90, %c0_91, %c0_92, %c0_93] : memref<1x1x6x32xbf16, #tpu.memory_space<vmem>>, vector<1x1x4x32xbf16>
    %85 = vector.shape_cast %84 : vector<1x1x4x32xbf16> to vector<4x32xbf16>
    %c8 = arith.constant 8 : index
    %c0_94 = arith.constant 0 : index
    %c0_95 = arith.constant 0 : index
    %86 = vector.load %arg5[%c8, %c0_94, %c0_95] : memref<16x32x16xbf16, #tpu.memory_space<vmem>>, vector<1x32x16xbf16>
    %87 = vector.shape_cast %86 : vector<1x32x16xbf16> to vector<32x16xbf16>
    %cst_96 = arith.constant dense<0.000000e+00> : vector<4x16xf32>
    %88 = tpu.matmul %85, %87, %cst_96 {dimension_numbers = #tpu.dot_dimension_numbers<[1], [0], [0], [1], [0, 0, 1, 1], [], []>} : vector<4x32xbf16>, vector<32x16xbf16>, vector<4x16xf32> -> vector<4x16xf32>
    %89 = arith.addf %83, %88 : vector<4x16xf32>
    %c0_97 = arith.constant 0 : index
    %c0_98 = arith.constant 0 : index
    %c1_99 = arith.constant 1 : index
    %c0_100 = arith.constant 0 : index
    %90 = vector.load %arg3[%c0_97, %c0_98, %c1_99, %c0_100] : memref<1x1x6x32xbf16, #tpu.memory_space<vmem>>, vector<1x1x4x32xbf16>
    %91 = vector.shape_cast %90 : vector<1x1x4x32xbf16> to vector<4x32xbf16>
    %c9 = arith.constant 9 : index
    %c0_101 = arith.constant 0 : index
    %c0_102 = arith.constant 0 : index
    %92 = vector.load %arg5[%c9, %c0_101, %c0_102] : memref<16x32x16xbf16, #tpu.memory_space<vmem>>, vector<1x32x16xbf16>
    %93 = vector.shape_cast %92 : vector<1x32x16xbf16> to vector<32x16xbf16>
    %cst_103 = arith.constant dense<0.000000e+00> : vector<4x16xf32>
    %94 = tpu.matmul %91, %93, %cst_103 {dimension_numbers = #tpu.dot_dimension_numbers<[1], [0], [0], [1], [0, 0, 1, 1], [], []>} : vector<4x32xbf16>, vector<32x16xbf16>, vector<4x16xf32> -> vector<4x16xf32>
    %95 = arith.addf %89, %94 : vector<4x16xf32>
    %c0_104 = arith.constant 0 : index
    %c0_105 = arith.constant 0 : index
    %c0_106 = arith.constant 0 : index
    %c0_107 = arith.constant 0 : index
    %96 = vector.load %arg4[%c0_104, %c0_105, %c0_106, %c0_107] : memref<1x1x6x32xbf16, #tpu.memory_space<vmem>>, vector<1x1x4x32xbf16>
    %97 = vector.shape_cast %96 : vector<1x1x4x32xbf16> to vector<4x32xbf16>
    %c10 = arith.constant 10 : index
    %c0_108 = arith.constant 0 : index
    %c0_109 = arith.constant 0 : index
    %98 = vector.load %arg5[%c10, %c0_108, %c0_109] : memref<16x32x16xbf16, #tpu.memory_space<vmem>>, vector<1x32x16xbf16>
    %99 = vector.shape_cast %98 : vector<1x32x16xbf16> to vector<32x16xbf16>
    %cst_110 = arith.constant dense<0.000000e+00> : vector<4x16xf32>
    %100 = tpu.matmul %97, %99, %cst_110 {dimension_numbers = #tpu.dot_dimension_numbers<[1], [0], [0], [1], [0, 0, 1, 1], [], []>} : vector<4x32xbf16>, vector<32x16xbf16>, vector<4x16xf32> -> vector<4x16xf32>
    %101 = arith.addf %95, %100 : vector<4x16xf32>
    %c0_111 = arith.constant 0 : index
    %c0_112 = arith.constant 0 : index
    %c1_113 = arith.constant 1 : index
    %c0_114 = arith.constant 0 : index
    %102 = vector.load %arg4[%c0_111, %c0_112, %c1_113, %c0_114] : memref<1x1x6x32xbf16, #tpu.memory_space<vmem>>, vector<1x1x4x32xbf16>
    %103 = vector.shape_cast %102 : vector<1x1x4x32xbf16> to vector<4x32xbf16>
    %c11 = arith.constant 11 : index
    %c0_115 = arith.constant 0 : index
    %c0_116 = arith.constant 0 : index
    %104 = vector.load %arg5[%c11, %c0_115, %c0_116] : memref<16x32x16xbf16, #tpu.memory_space<vmem>>, vector<1x32x16xbf16>
    %105 = vector.shape_cast %104 : vector<1x32x16xbf16> to vector<32x16xbf16>
    %cst_117 = arith.constant dense<0.000000e+00> : vector<4x16xf32>
    %106 = tpu.matmul %103, %105, %cst_117 {dimension_numbers = #tpu.dot_dimension_numbers<[1], [0], [0], [1], [0, 0, 1, 1], [], []>} : vector<4x32xbf16>, vector<32x16xbf16>, vector<4x16xf32> -> vector<4x16xf32>
    %107 = arith.addf %101, %106 : vector<4x16xf32>
    %c0_118 = arith.constant 0 : index
    %c1_119 = arith.constant 1 : index
    %c0_120 = arith.constant 0 : index
    %c0_121 = arith.constant 0 : index
    %c0_122 = arith.constant 0 : index
    %108 = vector.load %arg6[%c0_118, %c1_119, %c0_120, %c0_121, %c0_122] : memref<1x2x2x4x16xf32, #tpu.memory_space<vmem>>, vector<1x1x1x4x16xf32>
    %109 = vector.shape_cast %108 : vector<1x1x1x4x16xf32> to vector<4x16xf32>
    %110 = vector.shape_cast %107 : vector<4x16xf32> to vector<1x1x1x4x16xf32>
    tpu.vector_store %arg6[%c0_118, %c1_119, %c0_120, %c0_121, %c0_122], %110 {strides = array<i32>} : memref<1x2x2x4x16xf32, #tpu.memory_space<vmem>>, vector<1x1x1x4x16xf32>,
    %c0_123 = arith.constant 0 : index
    %c0_124 = arith.constant 0 : index
    %111 = vector.load %arg7[%c0_123, %c0_124] : memref<1x16xf32, #tpu.memory_space<vmem>>, vector<1x16xf32>
    %cst_125 = arith.constant dense<0.000000e+00> : vector<16xf32>
    %112 = vector.multi_reduction <add>, %107, %cst_125 [0] : vector<4x16xf32> to vector<16xf32>
    %113 = vector.shape_cast %112 : vector<16xf32> to vector<1x16xf32>
    %114 = arith.addf %111, %113 : vector<1x16xf32>
    %c0_126 = arith.constant 0 : index
    %c0_127 = arith.constant 0 : index
    %115 = vector.load %arg7[%c0_126, %c0_127] : memref<1x16xf32, #tpu.memory_space<vmem>>, vector<1x16xf32>
    tpu.vector_store %arg7[%c0_126, %c0_127], %114 {strides = array<i32>} : memref<1x16xf32, #tpu.memory_space<vmem>>, vector<1x16xf32>,
    %c0_128 = arith.constant 0 : index
    %c0_129 = arith.constant 0 : index
    %116 = vector.load %arg8[%c0_128, %c0_129] : memref<1x16xf32, #tpu.memory_space<vmem>>, vector<1x16xf32>
    %117 = arith.mulf %107, %107 : vector<4x16xf32>
    %cst_130 = arith.constant dense<0.000000e+00> : vector<16xf32>
    %118 = vector.multi_reduction <add>, %117, %cst_130 [0] : vector<4x16xf32> to vector<16xf32>
    %119 = vector.shape_cast %118 : vector<16xf32> to vector<1x16xf32>
    %120 = arith.addf %116, %119 : vector<1x16xf32>
    %c0_131 = arith.constant 0 : index
    %c0_132 = arith.constant 0 : index
    %121 = vector.load %arg8[%c0_131, %c0_132] : memref<1x16xf32, #tpu.memory_space<vmem>>, vector<1x16xf32>
    tpu.vector_store %arg8[%c0_131, %c0_132], %120 {strides = array<i32>} : memref<1x16xf32, #tpu.memory_space<vmem>>, vector<1x16xf32>,
    %cst_133 = arith.constant 0.000000e+00 : f32
    %122 = vector.broadcast %cst_133 : f32 to vector<4x16xf32>
    %c0_134 = arith.constant 0 : index
    %c0_135 = arith.constant 0 : index
    %c1_136 = arith.constant 1 : index
    %c0_137 = arith.constant 0 : index
    %123 = vector.load %arg3[%c0_134, %c0_135, %c1_136, %c0_137] : memref<1x1x6x32xbf16, #tpu.memory_space<vmem>>, vector<1x1x4x32xbf16>
    %124 = vector.shape_cast %123 : vector<1x1x4x32xbf16> to vector<4x32xbf16>
    %c12 = arith.constant 12 : index
    %c0_138 = arith.constant 0 : index
    %c0_139 = arith.constant 0 : index
    %125 = vector.load %arg5[%c12, %c0_138, %c0_139] : memref<16x32x16xbf16, #tpu.memory_space<vmem>>, vector<1x32x16xbf16>
    %126 = vector.shape_cast %125 : vector<1x32x16xbf16> to vector<32x16xbf16>
    %cst_140 = arith.constant dense<0.000000e+00> : vector<4x16xf32>
    %127 = tpu.matmul %124, %126, %cst_140 {dimension_numbers = #tpu.dot_dimension_numbers<[1], [0], [0], [1], [0, 0, 1, 1], [], []>} : vector<4x32xbf16>, vector<32x16xbf16>, vector<4x16xf32> -> vector<4x16xf32>
    %128 = arith.addf %122, %127 : vector<4x16xf32>
    %c0_141 = arith.constant 0 : index
    %c0_142 = arith.constant 0 : index
    %c2_143 = arith.constant 2 : index
    %c0_144 = arith.constant 0 : index
    %129 = vector.load %arg3[%c0_141, %c0_142, %c2_143, %c0_144] : memref<1x1x6x32xbf16, #tpu.memory_space<vmem>>, vector<1x1x4x32xbf16>
    %130 = vector.shape_cast %129 : vector<1x1x4x32xbf16> to vector<4x32xbf16>
    %c13 = arith.constant 13 : index
    %c0_145 = arith.constant 0 : index
    %c0_146 = arith.constant 0 : index
    %131 = vector.load %arg5[%c13, %c0_145, %c0_146] : memref<16x32x16xbf16, #tpu.memory_space<vmem>>, vector<1x32x16xbf16>
    %132 = vector.shape_cast %131 : vector<1x32x16xbf16> to vector<32x16xbf16>
    %cst_147 = arith.constant dense<0.000000e+00> : vector<4x16xf32>
    %133 = tpu.matmul %130, %132, %cst_147 {dimension_numbers = #tpu.dot_dimension_numbers<[1], [0], [0], [1], [0, 0, 1, 1], [], []>} : vector<4x32xbf16>, vector<32x16xbf16>, vector<4x16xf32> -> vector<4x16xf32>
    %134 = arith.addf %128, %133 : vector<4x16xf32>
    %c0_148 = arith.constant 0 : index
    %c0_149 = arith.constant 0 : index
    %c1_150 = arith.constant 1 : index
    %c0_151 = arith.constant 0 : index
    %135 = vector.load %arg4[%c0_148, %c0_149, %c1_150, %c0_151] : memref<1x1x6x32xbf16, #tpu.memory_space<vmem>>, vector<1x1x4x32xbf16>
    %136 = vector.shape_cast %135 : vector<1x1x4x32xbf16> to vector<4x32xbf16>
    %c14 = arith.constant 14 : index
    %c0_152 = arith.constant 0 : index
    %c0_153 = arith.constant 0 : index
    %137 = vector.load %arg5[%c14, %c0_152, %c0_153] : memref<16x32x16xbf16, #tpu.memory_space<vmem>>, vector<1x32x16xbf16>
    %138 = vector.shape_cast %137 : vector<1x32x16xbf16> to vector<32x16xbf16>
    %cst_154 = arith.constant dense<0.000000e+00> : vector<4x16xf32>
    %139 = tpu.matmul %136, %138, %cst_154 {dimension_numbers = #tpu.dot_dimension_numbers<[1], [0], [0], [1], [0, 0, 1, 1], [], []>} : vector<4x32xbf16>, vector<32x16xbf16>, vector<4x16xf32> -> vector<4x16xf32>
    %140 = arith.addf %134, %139 : vector<4x16xf32>
    %c0_155 = arith.constant 0 : index
    %c0_156 = arith.constant 0 : index
    %c2_157 = arith.constant 2 : index
    %c0_158 = arith.constant 0 : index
    %141 = vector.load %arg4[%c0_155, %c0_156, %c2_157, %c0_158] : memref<1x1x6x32xbf16, #tpu.memory_space<vmem>>, vector<1x1x4x32xbf16>
    %142 = vector.shape_cast %141 : vector<1x1x4x32xbf16> to vector<4x32xbf16>
    %c15 = arith.constant 15 : index
    %c0_159 = arith.constant 0 : index
    %c0_160 = arith.constant 0 : index
    %143 = vector.load %arg5[%c15, %c0_159, %c0_160] : memref<16x32x16xbf16, #tpu.memory_space<vmem>>, vector<1x32x16xbf16>
    %144 = vector.shape_cast %143 : vector<1x32x16xbf16> to vector<32x16xbf16>
    %cst_161 = arith.constant dense<0.000000e+00> : vector<4x16xf32>
    %145 = tpu.matmul %142, %144, %cst_161 {dimension_numbers = #tpu.dot_dimension_numbers<[1], [0], [0], [1], [0, 0, 1, 1], [], []>} : vector<4x32xbf16>, vector<32x16xbf16>, vector<4x16xf32> -> vector<4x16xf32>
    %146 = arith.addf %140, %145 : vector<4x16xf32>
    %c0_162 = arith.constant 0 : index
    %c1_163 = arith.constant 1 : index
    %c1_164 = arith.constant 1 : index
    %c0_165 = arith.constant 0 : index
    %c0_166 = arith.constant 0 : index
    %147 = vector.load %arg6[%c0_162, %c1_163, %c1_164, %c0_165, %c0_166] : memref<1x2x2x4x16xf32, #tpu.memory_space<vmem>>, vector<1x1x1x4x16xf32>
    %148 = vector.shape_cast %147 : vector<1x1x1x4x16xf32> to vector<4x16xf32>
    %149 = vector.shape_cast %146 : vector<4x16xf32> to vector<1x1x1x4x16xf32>
    tpu.vector_store %arg6[%c0_162, %c1_163, %c1_164, %c0_165, %c0_166], %149 {strides = array<i32>} : memref<1x2x2x4x16xf32, #tpu.memory_space<vmem>>, vector<1x1x1x4x16xf32>,
    %c0_167 = arith.constant 0 : index
    %c0_168 = arith.constant 0 : index
    %150 = vector.load %arg7[%c0_167, %c0_168] : memref<1x16xf32, #tpu.memory_space<vmem>>, vector<1x16xf32>
    %cst_169 = arith.constant dense<0.000000e+00> : vector<16xf32>
    %151 = vector.multi_reduction <add>, %146, %cst_169 [0] : vector<4x16xf32> to vector<16xf32>
    %152 = vector.shape_cast %151 : vector<16xf32> to vector<1x16xf32>
    %153 = arith.addf %150, %152 : vector<1x16xf32>
    %c0_170 = arith.constant 0 : index
    %c0_171 = arith.constant 0 : index
    %154 = vector.load %arg7[%c0_170, %c0_171] : memref<1x16xf32, #tpu.memory_space<vmem>>, vector<1x16xf32>
    tpu.vector_store %arg7[%c0_170, %c0_171], %153 {strides = array<i32>} : memref<1x16xf32, #tpu.memory_space<vmem>>, vector<1x16xf32>,
    %c0_172 = arith.constant 0 : index
    %c0_173 = arith.constant 0 : index
    %155 = vector.load %arg8[%c0_172, %c0_173] : memref<1x16xf32, #tpu.memory_space<vmem>>, vector<1x16xf32>
    %156 = arith.mulf %146, %146 : vector<4x16xf32>
    %cst_174 = arith.constant dense<0.000000e+00> : vector<16xf32>
    %157 = vector.multi_reduction <add>, %156, %cst_174 [0] : vector<4x16xf32> to vector<16xf32>
    %158 = vector.shape_cast %157 : vector<16xf32> to vector<1x16xf32>
    %159 = arith.addf %155, %158 : vector<1x16xf32>
    %c0_175 = arith.constant 0 : index
    %c0_176 = arith.constant 0 : index
    %160 = vector.load %arg8[%c0_175, %c0_176] : memref<1x16xf32, #tpu.memory_space<vmem>>, vector<1x16xf32>
    tpu.vector_store %arg8[%c0_175, %c0_176], %159 {strides = array<i32>} : memref<1x16xf32, #tpu.memory_space<vmem>>, vector<1x16xf32>,
    return
  }
  func.func @transform_0(%arg0: i32, %arg1: i32) -> (i32, i32, i32, i32) {
    %c0_i32 = arith.constant 0 : i32
    %0 = arith.addi %arg1, %c0_i32 : i32
    %c0_i32_0 = arith.constant 0 : i32
    %c0_i32_1 = arith.constant 0 : i32
    %c0_i32_2 = arith.constant 0 : i32
    return %arg0, %0, %c0_i32_0, %c0_i32_1 : i32, i32, i32, i32
  }
  func.func @transform_1(%arg0: i32, %arg1: i32) -> (i32, i32, i32, i32) {
    %c1_i32 = arith.constant 1 : i32
    %0 = arith.addi %arg1, %c1_i32 : i32
    %c0_i32 = arith.constant 0 : i32
    %c0_i32_0 = arith.constant 0 : i32
    %c0_i32_1 = arith.constant 0 : i32
    return %arg0, %0, %c0_i32, %c0_i32_0 : i32, i32, i32, i32
  }
  func.func @transform_2(%arg0: i32, %arg1: i32) -> (i32, i32, i32, i32) {
    %c2_i32 = arith.constant 2 : i32
    %0 = arith.addi %arg1, %c2_i32 : i32
    %c0_i32 = arith.constant 0 : i32
    %c0_i32_0 = arith.constant 0 : i32
    %c0_i32_1 = arith.constant 0 : i32
    return %arg0, %0, %c0_i32, %c0_i32_0 : i32, i32, i32, i32
  }
  func.func @transform_3(%arg0: i32, %arg1: i32) -> (i32, i32, i32) {
    %c0_i32 = arith.constant 0 : i32
    %c0_i32_0 = arith.constant 0 : i32
    %c0_i32_1 = arith.constant 0 : i32
    %c0_i32_2 = arith.constant 0 : i32
    return %c0_i32, %c0_i32_0, %c0_i32_1 : i32, i32, i32
  }
  func.func @transform_4(%arg0: i32, %arg1: i32) -> (i32, i32, i32, i32, i32) {
    %c0_i32 = arith.constant 0 : i32
    %c0_i32_0 = arith.constant 0 : i32
    %c0_i32_1 = arith.constant 0 : i32
    %c0_i32_2 = arith.constant 0 : i32
    return %arg0, %arg1, %c0_i32, %c0_i32_0, %c0_i32_1 : i32, i32, i32, i32, i32
  }
  func.func @transform_5(%arg0: i32, %arg1: i32) -> (i32, i32) {
    %c0_i32 = arith.constant 0 : i32
    %c0_i32_0 = arith.constant 0 : i32
    %c0_i32_1 = arith.constant 0 : i32
    return %c0_i32, %c0_i32_0 : i32, i32
  }
  func.func @transform_6(%arg0: i32, %arg1: i32) -> (i32, i32) {
    %c0_i32 = arith.constant 0 : i32
    %c0_i32_0 = arith.constant 0 : i32
    %c0_i32_1 = arith.constant 0 : i32
    return %c0_i32, %c0_i32_0 : i32, i32
  }
}

module attributes {stable_mosaic.version = 11 : i64} {
  func.func @_bn_relu_kernel(%arg0: i32, %arg1: memref<1024x4xf32, #tpu.memory_space<vmem>>, %arg2: memref<1x4xf32, #tpu.memory_space<vmem>>, %arg3: memref<1x4xf32, #tpu.memory_space<vmem>>, %arg4: memref<1024x4xbf16, #tpu.memory_space<vmem>>) attributes {dimension_semantics = [#tpu.dimension_semantics<parallel>], iteration_bounds = array<i64: 2>, scalar_prefetch = 0 : i64, scratch_operands = 0 : i64, tpu.core_type = #tpu.core_type<tc>, window_params = [{transform_indices = @transform_0, window_bounds = array<i64: 1024, 4>}, {pipeline_mode = #tpu.pipeline_mode<synchronous>, transform_indices = @transform_1, window_bounds = array<i64: 1, 4>}, {pipeline_mode = #tpu.pipeline_mode<synchronous>, transform_indices = @transform_2, window_bounds = array<i64: 1, 4>}, {transform_indices = @transform_3, window_bounds = array<i64: 1024, 4>}]} {
    %c0 = arith.constant 0 : index
    %c0_0 = arith.constant 0 : index
    %0 = vector.load %arg1[%c0, %c0_0] : memref<1024x4xf32, #tpu.memory_space<vmem>>, vector<1024x4xf32>
    %c0_1 = arith.constant 0 : index
    %c0_2 = arith.constant 0 : index
    %1 = vector.load %arg2[%c0_1, %c0_2] : memref<1x4xf32, #tpu.memory_space<vmem>>, vector<1x4xf32>
    %2 = vector.broadcast %1 : vector<1x4xf32> to vector<1024x4xf32>
    %3 = arith.mulf %0, %2 : vector<1024x4xf32>
    %c0_3 = arith.constant 0 : index
    %c0_4 = arith.constant 0 : index
    %4 = vector.load %arg3[%c0_3, %c0_4] : memref<1x4xf32, #tpu.memory_space<vmem>>, vector<1x4xf32>
    %5 = vector.broadcast %4 : vector<1x4xf32> to vector<1024x4xf32>
    %6 = arith.addf %3, %5 : vector<1024x4xf32>
    %cst = arith.constant 0.000000e+00 : f32
    %7 = vector.broadcast %cst : f32 to vector<1024x4xf32>
    %8 = arith.maximumf %6, %7 : vector<1024x4xf32>
    %9 = arith.truncf %8 : vector<1024x4xf32> to vector<1024x4xbf16>
    %c0_5 = arith.constant 0 : index
    %c0_6 = arith.constant 0 : index
    %10 = vector.load %arg4[%c0_5, %c0_6] : memref<1024x4xbf16, #tpu.memory_space<vmem>>, vector<1024x4xbf16>
    tpu.vector_store %arg4[%c0_5, %c0_6], %9 {strides = array<i32>} : memref<1024x4xbf16, #tpu.memory_space<vmem>>, vector<1024x4xbf16>,
    return
  }
  func.func @transform_0(%arg0: i32) -> (i32, i32) {
    %c0_i32 = arith.constant 0 : i32
    %c0_i32_0 = arith.constant 0 : i32
    return %arg0, %c0_i32 : i32, i32
  }
  func.func @transform_1(%arg0: i32) -> (i32, i32) {
    %c0_i32 = arith.constant 0 : i32
    %c0_i32_0 = arith.constant 0 : i32
    %c0_i32_1 = arith.constant 0 : i32
    return %c0_i32, %c0_i32_0 : i32, i32
  }
  func.func @transform_2(%arg0: i32) -> (i32, i32) {
    %c0_i32 = arith.constant 0 : i32
    %c0_i32_0 = arith.constant 0 : i32
    %c0_i32_1 = arith.constant 0 : i32
    return %c0_i32, %c0_i32_0 : i32, i32
  }
  func.func @transform_3(%arg0: i32) -> (i32, i32) {
    %c0_i32 = arith.constant 0 : i32
    %c0_i32_0 = arith.constant 0 : i32
    return %arg0, %c0_i32 : i32, i32
  }
}

module attributes {stable_mosaic.version = 11 : i64} {
  func.func @_deconv_s2_bn_kernel(%arg0: i32, %arg1: i32, %arg2: memref<1x1x18x8xbf16, #tpu.memory_space<vmem>>, %arg3: memref<1x1x18x8xbf16, #tpu.memory_space<vmem>>, %arg4: memref<1x1x18x8xbf16, #tpu.memory_space<vmem>>, %arg5: memref<16x8x4xbf16, #tpu.memory_space<vmem>>, %arg6: memref<1x2x2x16x4xf32, #tpu.memory_space<vmem>>, %arg7: memref<1x4xf32, #tpu.memory_space<vmem>>, %arg8: memref<1x4xf32, #tpu.memory_space<vmem>>) attributes {dimension_semantics = [#tpu.dimension_semantics<arbitrary>, #tpu.dimension_semantics<arbitrary>], iteration_bounds = array<i64: 2, 16>, scalar_prefetch = 0 : i64, scratch_operands = 0 : i64, tpu.core_type = #tpu.core_type<tc>, window_params = [{transform_indices = @transform_0, window_bounds = array<i64: 1, 1, 18, 8>}, {transform_indices = @transform_1, window_bounds = array<i64: 1, 1, 18, 8>}, {transform_indices = @transform_2, window_bounds = array<i64: 1, 1, 18, 8>}, {pipeline_mode = #tpu.pipeline_mode<synchronous>, transform_indices = @transform_3, window_bounds = array<i64: 16, 8, 4>}, {transform_indices = @transform_4, window_bounds = array<i64: 1, 2, 2, 16, 4>}, {pipeline_mode = #tpu.pipeline_mode<synchronous>, transform_indices = @transform_5, window_bounds = array<i64: 1, 4>}, {pipeline_mode = #tpu.pipeline_mode<synchronous>, transform_indices = @transform_6, window_bounds = array<i64: 1, 4>}]} {
    %c0_i32 = arith.constant 0 : i32
    %0 = arith.cmpi eq, %arg0, %c0_i32 : i32
    %c0_i32_0 = arith.constant 0 : i32
    %1 = arith.cmpi eq, %arg1, %c0_i32_0 : i32
    %2 = arith.andi %0, %1 : i1
    %3 = arith.extui %2 : i1 to i32
    %c0_i32_1 = arith.constant 0 : i32
    %4 = arith.cmpi ne, %3, %c0_i32_1 : i32
    scf.if %4 {
      %cst_177 = arith.constant 0.000000e+00 : f32
      %161 = vector.broadcast %cst_177 : f32 to vector<1x4xf32>
      %c0_178 = arith.constant 0 : index
      %c0_179 = arith.constant 0 : index
      %162 = vector.load %arg7[%c0_178, %c0_179] : memref<1x4xf32, #tpu.memory_space<vmem>>, vector<1x4xf32>
      tpu.vector_store %arg7[%c0_178, %c0_179], %161 {strides = array<i32>} : memref<1x4xf32, #tpu.memory_space<vmem>>, vector<1x4xf32>,
      %cst_180 = arith.constant 0.000000e+00 : f32
      %163 = vector.broadcast %cst_180 : f32 to vector<1x4xf32>
      %c0_181 = arith.constant 0 : index
      %c0_182 = arith.constant 0 : index
      %164 = vector.load %arg8[%c0_181, %c0_182] : memref<1x4xf32, #tpu.memory_space<vmem>>, vector<1x4xf32>
      tpu.vector_store %arg8[%c0_181, %c0_182], %163 {strides = array<i32>} : memref<1x4xf32, #tpu.memory_space<vmem>>, vector<1x4xf32>,
    } else {
    }
    %cst = arith.constant 0.000000e+00 : f32
    %5 = vector.broadcast %cst : f32 to vector<16x4xf32>
    %c0 = arith.constant 0 : index
    %c0_2 = arith.constant 0 : index
    %c0_3 = arith.constant 0 : index
    %c0_4 = arith.constant 0 : index
    %6 = vector.load %arg2[%c0, %c0_2, %c0_3, %c0_4] : memref<1x1x18x8xbf16, #tpu.memory_space<vmem>>, vector<1x1x16x8xbf16>
    %7 = vector.shape_cast %6 : vector<1x1x16x8xbf16> to vector<16x8xbf16>
    %c0_5 = arith.constant 0 : index
    %c0_6 = arith.constant 0 : index
    %c0_7 = arith.constant 0 : index
    %8 = vector.load %arg5[%c0_5, %c0_6, %c0_7] : memref<16x8x4xbf16, #tpu.memory_space<vmem>>, vector<1x8x4xbf16>
    %9 = vector.shape_cast %8 : vector<1x8x4xbf16> to vector<8x4xbf16>
    %cst_8 = arith.constant dense<0.000000e+00> : vector<16x4xf32>
    %10 = tpu.matmul %7, %9, %cst_8 {dimension_numbers = #tpu.dot_dimension_numbers<[1], [0], [0], [1], [0, 0, 1, 1], [], []>} : vector<16x8xbf16>, vector<8x4xbf16>, vector<16x4xf32> -> vector<16x4xf32>
    %11 = arith.addf %5, %10 : vector<16x4xf32>
    %c0_9 = arith.constant 0 : index
    %c0_10 = arith.constant 0 : index
    %c1 = arith.constant 1 : index
    %c0_11 = arith.constant 0 : index
    %12 = vector.load %arg2[%c0_9, %c0_10, %c1, %c0_11] : memref<1x1x18x8xbf16, #tpu.memory_space<vmem>>, vector<1x1x16x8xbf16>
    %13 = vector.shape_cast %12 : vector<1x1x16x8xbf16> to vector<16x8xbf16>
    %c1_12 = arith.constant 1 : index
    %c0_13 = arith.constant 0 : index
    %c0_14 = arith.constant 0 : index
    %14 = vector.load %arg5[%c1_12, %c0_13, %c0_14] : memref<16x8x4xbf16, #tpu.memory_space<vmem>>, vector<1x8x4xbf16>
    %15 = vector.shape_cast %14 : vector<1x8x4xbf16> to vector<8x4xbf16>
    %cst_15 = arith.constant dense<0.000000e+00> : vector<16x4xf32>
    %16 = tpu.matmul %13, %15, %cst_15 {dimension_numbers = #tpu.dot_dimension_numbers<[1], [0], [0], [1], [0, 0, 1, 1], [], []>} : vector<16x8xbf16>, vector<8x4xbf16>, vector<16x4xf32> -> vector<16x4xf32>
    %17 = arith.addf %11, %16 : vector<16x4xf32>
    %c0_16 = arith.constant 0 : index
    %c0_17 = arith.constant 0 : index
    %c0_18 = arith.constant 0 : index
    %c0_19 = arith.constant 0 : index
    %18 = vector.load %arg3[%c0_16, %c0_17, %c0_18, %c0_19] : memref<1x1x18x8xbf16, #tpu.memory_space<vmem>>, vector<1x1x16x8xbf16>
    %19 = vector.shape_cast %18 : vector<1x1x16x8xbf16> to vector<16x8xbf16>
    %c2 = arith.constant 2 : index
    %c0_20 = arith.constant 0 : index
    %c0_21 = arith.constant 0 : index
    %20 = vector.load %arg5[%c2, %c0_20, %c0_21] : memref<16x8x4xbf16, #tpu.memory_space<vmem>>, vector<1x8x4xbf16>
    %21 = vector.shape_cast %20 : vector<1x8x4xbf16> to vector<8x4xbf16>
    %cst_22 = arith.constant dense<0.000000e+00> : vector<16x4xf32>
    %22 = tpu.matmul %19, %21, %cst_22 {dimension_numbers = #tpu.dot_dimension_numbers<[1], [0], [0], [1], [0, 0, 1, 1], [], []>} : vector<16x8xbf16>, vector<8x4xbf16>, vector<16x4xf32> -> vector<16x4xf32>
    %23 = arith.addf %17, %22 : vector<16x4xf32>
    %c0_23 = arith.constant 0 : index
    %c0_24 = arith.constant 0 : index
    %c1_25 = arith.constant 1 : index
    %c0_26 = arith.constant 0 : index
    %24 = vector.load %arg3[%c0_23, %c0_24, %c1_25, %c0_26] : memref<1x1x18x8xbf16, #tpu.memory_space<vmem>>, vector<1x1x16x8xbf16>
    %25 = vector.shape_cast %24 : vector<1x1x16x8xbf16> to vector<16x8xbf16>
    %c3 = arith.constant 3 : index
    %c0_27 = arith.constant 0 : index
    %c0_28 = arith.constant 0 : index
    %26 = vector.load %arg5[%c3, %c0_27, %c0_28] : memref<16x8x4xbf16, #tpu.memory_space<vmem>>, vector<1x8x4xbf16>
    %27 = vector.shape_cast %26 : vector<1x8x4xbf16> to vector<8x4xbf16>
    %cst_29 = arith.constant dense<0.000000e+00> : vector<16x4xf32>
    %28 = tpu.matmul %25, %27, %cst_29 {dimension_numbers = #tpu.dot_dimension_numbers<[1], [0], [0], [1], [0, 0, 1, 1], [], []>} : vector<16x8xbf16>, vector<8x4xbf16>, vector<16x4xf32> -> vector<16x4xf32>
    %29 = arith.addf %23, %28 : vector<16x4xf32>
    %c0_30 = arith.constant 0 : index
    %c0_31 = arith.constant 0 : index
    %c0_32 = arith.constant 0 : index
    %c0_33 = arith.constant 0 : index
    %c0_34 = arith.constant 0 : index
    %30 = vector.load %arg6[%c0_30, %c0_31, %c0_32, %c0_33, %c0_34] : memref<1x2x2x16x4xf32, #tpu.memory_space<vmem>>, vector<1x1x1x16x4xf32>
    %31 = vector.shape_cast %30 : vector<1x1x1x16x4xf32> to vector<16x4xf32>
    %32 = vector.shape_cast %29 : vector<16x4xf32> to vector<1x1x1x16x4xf32>
    tpu.vector_store %arg6[%c0_30, %c0_31, %c0_32, %c0_33, %c0_34], %32 {strides = array<i32>} : memref<1x2x2x16x4xf32, #tpu.memory_space<vmem>>, vector<1x1x1x16x4xf32>,
    %c0_35 = arith.constant 0 : index
    %c0_36 = arith.constant 0 : index
    %33 = vector.load %arg7[%c0_35, %c0_36] : memref<1x4xf32, #tpu.memory_space<vmem>>, vector<1x4xf32>
    %cst_37 = arith.constant dense<0.000000e+00> : vector<4xf32>
    %34 = vector.multi_reduction <add>, %29, %cst_37 [0] : vector<16x4xf32> to vector<4xf32>
    %35 = vector.shape_cast %34 : vector<4xf32> to vector<1x4xf32>
    %36 = arith.addf %33, %35 : vector<1x4xf32>
    %c0_38 = arith.constant 0 : index
    %c0_39 = arith.constant 0 : index
    %37 = vector.load %arg7[%c0_38, %c0_39] : memref<1x4xf32, #tpu.memory_space<vmem>>, vector<1x4xf32>
    tpu.vector_store %arg7[%c0_38, %c0_39], %36 {strides = array<i32>} : memref<1x4xf32, #tpu.memory_space<vmem>>, vector<1x4xf32>,
    %c0_40 = arith.constant 0 : index
    %c0_41 = arith.constant 0 : index
    %38 = vector.load %arg8[%c0_40, %c0_41] : memref<1x4xf32, #tpu.memory_space<vmem>>, vector<1x4xf32>
    %39 = arith.mulf %29, %29 : vector<16x4xf32>
    %cst_42 = arith.constant dense<0.000000e+00> : vector<4xf32>
    %40 = vector.multi_reduction <add>, %39, %cst_42 [0] : vector<16x4xf32> to vector<4xf32>
    %41 = vector.shape_cast %40 : vector<4xf32> to vector<1x4xf32>
    %42 = arith.addf %38, %41 : vector<1x4xf32>
    %c0_43 = arith.constant 0 : index
    %c0_44 = arith.constant 0 : index
    %43 = vector.load %arg8[%c0_43, %c0_44] : memref<1x4xf32, #tpu.memory_space<vmem>>, vector<1x4xf32>
    tpu.vector_store %arg8[%c0_43, %c0_44], %42 {strides = array<i32>} : memref<1x4xf32, #tpu.memory_space<vmem>>, vector<1x4xf32>,
    %cst_45 = arith.constant 0.000000e+00 : f32
    %44 = vector.broadcast %cst_45 : f32 to vector<16x4xf32>
    %c0_46 = arith.constant 0 : index
    %c0_47 = arith.constant 0 : index
    %c1_48 = arith.constant 1 : index
    %c0_49 = arith.constant 0 : index
    %45 = vector.load %arg2[%c0_46, %c0_47, %c1_48, %c0_49] : memref<1x1x18x8xbf16, #tpu.memory_space<vmem>>, vector<1x1x16x8xbf16>
    %46 = vector.shape_cast %45 : vector<1x1x16x8xbf16> to vector<16x8xbf16>
    %c4 = arith.constant 4 : index
    %c0_50 = arith.constant 0 : index
    %c0_51 = arith.constant 0 : index
    %47 = vector.load %arg5[%c4, %c0_50, %c0_51] : memref<16x8x4xbf16, #tpu.memory_space<vmem>>, vector<1x8x4xbf16>
    %48 = vector.shape_cast %47 : vector<1x8x4xbf16> to vector<8x4xbf16>
    %cst_52 = arith.constant dense<0.000000e+00> : vector<16x4xf32>
    %49 = tpu.matmul %46, %48, %cst_52 {dimension_numbers = #tpu.dot_dimension_numbers<[1], [0], [0], [1], [0, 0, 1, 1], [], []>} : vector<16x8xbf16>, vector<8x4xbf16>, vector<16x4xf32> -> vector<16x4xf32>
    %50 = arith.addf %44, %49 : vector<16x4xf32>
    %c0_53 = arith.constant 0 : index
    %c0_54 = arith.constant 0 : index
    %c2_55 = arith.constant 2 : index
    %c0_56 = arith.constant 0 : index
    %51 = vector.load %arg2[%c0_53, %c0_54, %c2_55, %c0_56] : memref<1x1x18x8xbf16, #tpu.memory_space<vmem>>, vector<1x1x16x8xbf16>
    %52 = vector.shape_cast %51 : vector<1x1x16x8xbf16> to vector<16x8xbf16>
    %c5 = arith.constant 5 : index
    %c0_57 = arith.constant 0 : index
    %c0_58 = arith.constant 0 : index
    %53 = vector.load %arg5[%c5, %c0_57, %c0_58] : memref<16x8x4xbf16, #tpu.memory_space<vmem>>, vector<1x8x4xbf16>
    %54 = vector.shape_cast %53 : vector<1x8x4xbf16> to vector<8x4xbf16>
    %cst_59 = arith.constant dense<0.000000e+00> : vector<16x4xf32>
    %55 = tpu.matmul %52, %54, %cst_59 {dimension_numbers = #tpu.dot_dimension_numbers<[1], [0], [0], [1], [0, 0, 1, 1], [], []>} : vector<16x8xbf16>, vector<8x4xbf16>, vector<16x4xf32> -> vector<16x4xf32>
    %56 = arith.addf %50, %55 : vector<16x4xf32>
    %c0_60 = arith.constant 0 : index
    %c0_61 = arith.constant 0 : index
    %c1_62 = arith.constant 1 : index
    %c0_63 = arith.constant 0 : index
    %57 = vector.load %arg3[%c0_60, %c0_61, %c1_62, %c0_63] : memref<1x1x18x8xbf16, #tpu.memory_space<vmem>>, vector<1x1x16x8xbf16>
    %58 = vector.shape_cast %57 : vector<1x1x16x8xbf16> to vector<16x8xbf16>
    %c6 = arith.constant 6 : index
    %c0_64 = arith.constant 0 : index
    %c0_65 = arith.constant 0 : index
    %59 = vector.load %arg5[%c6, %c0_64, %c0_65] : memref<16x8x4xbf16, #tpu.memory_space<vmem>>, vector<1x8x4xbf16>
    %60 = vector.shape_cast %59 : vector<1x8x4xbf16> to vector<8x4xbf16>
    %cst_66 = arith.constant dense<0.000000e+00> : vector<16x4xf32>
    %61 = tpu.matmul %58, %60, %cst_66 {dimension_numbers = #tpu.dot_dimension_numbers<[1], [0], [0], [1], [0, 0, 1, 1], [], []>} : vector<16x8xbf16>, vector<8x4xbf16>, vector<16x4xf32> -> vector<16x4xf32>
    %62 = arith.addf %56, %61 : vector<16x4xf32>
    %c0_67 = arith.constant 0 : index
    %c0_68 = arith.constant 0 : index
    %c2_69 = arith.constant 2 : index
    %c0_70 = arith.constant 0 : index
    %63 = vector.load %arg3[%c0_67, %c0_68, %c2_69, %c0_70] : memref<1x1x18x8xbf16, #tpu.memory_space<vmem>>, vector<1x1x16x8xbf16>
    %64 = vector.shape_cast %63 : vector<1x1x16x8xbf16> to vector<16x8xbf16>
    %c7 = arith.constant 7 : index
    %c0_71 = arith.constant 0 : index
    %c0_72 = arith.constant 0 : index
    %65 = vector.load %arg5[%c7, %c0_71, %c0_72] : memref<16x8x4xbf16, #tpu.memory_space<vmem>>, vector<1x8x4xbf16>
    %66 = vector.shape_cast %65 : vector<1x8x4xbf16> to vector<8x4xbf16>
    %cst_73 = arith.constant dense<0.000000e+00> : vector<16x4xf32>
    %67 = tpu.matmul %64, %66, %cst_73 {dimension_numbers = #tpu.dot_dimension_numbers<[1], [0], [0], [1], [0, 0, 1, 1], [], []>} : vector<16x8xbf16>, vector<8x4xbf16>, vector<16x4xf32> -> vector<16x4xf32>
    %68 = arith.addf %62, %67 : vector<16x4xf32>
    %c0_74 = arith.constant 0 : index
    %c0_75 = arith.constant 0 : index
    %c1_76 = arith.constant 1 : index
    %c0_77 = arith.constant 0 : index
    %c0_78 = arith.constant 0 : index
    %69 = vector.load %arg6[%c0_74, %c0_75, %c1_76, %c0_77, %c0_78] : memref<1x2x2x16x4xf32, #tpu.memory_space<vmem>>, vector<1x1x1x16x4xf32>
    %70 = vector.shape_cast %69 : vector<1x1x1x16x4xf32> to vector<16x4xf32>
    %71 = vector.shape_cast %68 : vector<16x4xf32> to vector<1x1x1x16x4xf32>
    tpu.vector_store %arg6[%c0_74, %c0_75, %c1_76, %c0_77, %c0_78], %71 {strides = array<i32>} : memref<1x2x2x16x4xf32, #tpu.memory_space<vmem>>, vector<1x1x1x16x4xf32>,
    %c0_79 = arith.constant 0 : index
    %c0_80 = arith.constant 0 : index
    %72 = vector.load %arg7[%c0_79, %c0_80] : memref<1x4xf32, #tpu.memory_space<vmem>>, vector<1x4xf32>
    %cst_81 = arith.constant dense<0.000000e+00> : vector<4xf32>
    %73 = vector.multi_reduction <add>, %68, %cst_81 [0] : vector<16x4xf32> to vector<4xf32>
    %74 = vector.shape_cast %73 : vector<4xf32> to vector<1x4xf32>
    %75 = arith.addf %72, %74 : vector<1x4xf32>
    %c0_82 = arith.constant 0 : index
    %c0_83 = arith.constant 0 : index
    %76 = vector.load %arg7[%c0_82, %c0_83] : memref<1x4xf32, #tpu.memory_space<vmem>>, vector<1x4xf32>
    tpu.vector_store %arg7[%c0_82, %c0_83], %75 {strides = array<i32>} : memref<1x4xf32, #tpu.memory_space<vmem>>, vector<1x4xf32>,
    %c0_84 = arith.constant 0 : index
    %c0_85 = arith.constant 0 : index
    %77 = vector.load %arg8[%c0_84, %c0_85] : memref<1x4xf32, #tpu.memory_space<vmem>>, vector<1x4xf32>
    %78 = arith.mulf %68, %68 : vector<16x4xf32>
    %cst_86 = arith.constant dense<0.000000e+00> : vector<4xf32>
    %79 = vector.multi_reduction <add>, %78, %cst_86 [0] : vector<16x4xf32> to vector<4xf32>
    %80 = vector.shape_cast %79 : vector<4xf32> to vector<1x4xf32>
    %81 = arith.addf %77, %80 : vector<1x4xf32>
    %c0_87 = arith.constant 0 : index
    %c0_88 = arith.constant 0 : index
    %82 = vector.load %arg8[%c0_87, %c0_88] : memref<1x4xf32, #tpu.memory_space<vmem>>, vector<1x4xf32>
    tpu.vector_store %arg8[%c0_87, %c0_88], %81 {strides = array<i32>} : memref<1x4xf32, #tpu.memory_space<vmem>>, vector<1x4xf32>,
    %cst_89 = arith.constant 0.000000e+00 : f32
    %83 = vector.broadcast %cst_89 : f32 to vector<16x4xf32>
    %c0_90 = arith.constant 0 : index
    %c0_91 = arith.constant 0 : index
    %c0_92 = arith.constant 0 : index
    %c0_93 = arith.constant 0 : index
    %84 = vector.load %arg3[%c0_90, %c0_91, %c0_92, %c0_93] : memref<1x1x18x8xbf16, #tpu.memory_space<vmem>>, vector<1x1x16x8xbf16>
    %85 = vector.shape_cast %84 : vector<1x1x16x8xbf16> to vector<16x8xbf16>
    %c8 = arith.constant 8 : index
    %c0_94 = arith.constant 0 : index
    %c0_95 = arith.constant 0 : index
    %86 = vector.load %arg5[%c8, %c0_94, %c0_95] : memref<16x8x4xbf16, #tpu.memory_space<vmem>>, vector<1x8x4xbf16>
    %87 = vector.shape_cast %86 : vector<1x8x4xbf16> to vector<8x4xbf16>
    %cst_96 = arith.constant dense<0.000000e+00> : vector<16x4xf32>
    %88 = tpu.matmul %85, %87, %cst_96 {dimension_numbers = #tpu.dot_dimension_numbers<[1], [0], [0], [1], [0, 0, 1, 1], [], []>} : vector<16x8xbf16>, vector<8x4xbf16>, vector<16x4xf32> -> vector<16x4xf32>
    %89 = arith.addf %83, %88 : vector<16x4xf32>
    %c0_97 = arith.constant 0 : index
    %c0_98 = arith.constant 0 : index
    %c1_99 = arith.constant 1 : index
    %c0_100 = arith.constant 0 : index
    %90 = vector.load %arg3[%c0_97, %c0_98, %c1_99, %c0_100] : memref<1x1x18x8xbf16, #tpu.memory_space<vmem>>, vector<1x1x16x8xbf16>
    %91 = vector.shape_cast %90 : vector<1x1x16x8xbf16> to vector<16x8xbf16>
    %c9 = arith.constant 9 : index
    %c0_101 = arith.constant 0 : index
    %c0_102 = arith.constant 0 : index
    %92 = vector.load %arg5[%c9, %c0_101, %c0_102] : memref<16x8x4xbf16, #tpu.memory_space<vmem>>, vector<1x8x4xbf16>
    %93 = vector.shape_cast %92 : vector<1x8x4xbf16> to vector<8x4xbf16>
    %cst_103 = arith.constant dense<0.000000e+00> : vector<16x4xf32>
    %94 = tpu.matmul %91, %93, %cst_103 {dimension_numbers = #tpu.dot_dimension_numbers<[1], [0], [0], [1], [0, 0, 1, 1], [], []>} : vector<16x8xbf16>, vector<8x4xbf16>, vector<16x4xf32> -> vector<16x4xf32>
    %95 = arith.addf %89, %94 : vector<16x4xf32>
    %c0_104 = arith.constant 0 : index
    %c0_105 = arith.constant 0 : index
    %c0_106 = arith.constant 0 : index
    %c0_107 = arith.constant 0 : index
    %96 = vector.load %arg4[%c0_104, %c0_105, %c0_106, %c0_107] : memref<1x1x18x8xbf16, #tpu.memory_space<vmem>>, vector<1x1x16x8xbf16>
    %97 = vector.shape_cast %96 : vector<1x1x16x8xbf16> to vector<16x8xbf16>
    %c10 = arith.constant 10 : index
    %c0_108 = arith.constant 0 : index
    %c0_109 = arith.constant 0 : index
    %98 = vector.load %arg5[%c10, %c0_108, %c0_109] : memref<16x8x4xbf16, #tpu.memory_space<vmem>>, vector<1x8x4xbf16>
    %99 = vector.shape_cast %98 : vector<1x8x4xbf16> to vector<8x4xbf16>
    %cst_110 = arith.constant dense<0.000000e+00> : vector<16x4xf32>
    %100 = tpu.matmul %97, %99, %cst_110 {dimension_numbers = #tpu.dot_dimension_numbers<[1], [0], [0], [1], [0, 0, 1, 1], [], []>} : vector<16x8xbf16>, vector<8x4xbf16>, vector<16x4xf32> -> vector<16x4xf32>
    %101 = arith.addf %95, %100 : vector<16x4xf32>
    %c0_111 = arith.constant 0 : index
    %c0_112 = arith.constant 0 : index
    %c1_113 = arith.constant 1 : index
    %c0_114 = arith.constant 0 : index
    %102 = vector.load %arg4[%c0_111, %c0_112, %c1_113, %c0_114] : memref<1x1x18x8xbf16, #tpu.memory_space<vmem>>, vector<1x1x16x8xbf16>
    %103 = vector.shape_cast %102 : vector<1x1x16x8xbf16> to vector<16x8xbf16>
    %c11 = arith.constant 11 : index
    %c0_115 = arith.constant 0 : index
    %c0_116 = arith.constant 0 : index
    %104 = vector.load %arg5[%c11, %c0_115, %c0_116] : memref<16x8x4xbf16, #tpu.memory_space<vmem>>, vector<1x8x4xbf16>
    %105 = vector.shape_cast %104 : vector<1x8x4xbf16> to vector<8x4xbf16>
    %cst_117 = arith.constant dense<0.000000e+00> : vector<16x4xf32>
    %106 = tpu.matmul %103, %105, %cst_117 {dimension_numbers = #tpu.dot_dimension_numbers<[1], [0], [0], [1], [0, 0, 1, 1], [], []>} : vector<16x8xbf16>, vector<8x4xbf16>, vector<16x4xf32> -> vector<16x4xf32>
    %107 = arith.addf %101, %106 : vector<16x4xf32>
    %c0_118 = arith.constant 0 : index
    %c1_119 = arith.constant 1 : index
    %c0_120 = arith.constant 0 : index
    %c0_121 = arith.constant 0 : index
    %c0_122 = arith.constant 0 : index
    %108 = vector.load %arg6[%c0_118, %c1_119, %c0_120, %c0_121, %c0_122] : memref<1x2x2x16x4xf32, #tpu.memory_space<vmem>>, vector<1x1x1x16x4xf32>
    %109 = vector.shape_cast %108 : vector<1x1x1x16x4xf32> to vector<16x4xf32>
    %110 = vector.shape_cast %107 : vector<16x4xf32> to vector<1x1x1x16x4xf32>
    tpu.vector_store %arg6[%c0_118, %c1_119, %c0_120, %c0_121, %c0_122], %110 {strides = array<i32>} : memref<1x2x2x16x4xf32, #tpu.memory_space<vmem>>, vector<1x1x1x16x4xf32>,
    %c0_123 = arith.constant 0 : index
    %c0_124 = arith.constant 0 : index
    %111 = vector.load %arg7[%c0_123, %c0_124] : memref<1x4xf32, #tpu.memory_space<vmem>>, vector<1x4xf32>
    %cst_125 = arith.constant dense<0.000000e+00> : vector<4xf32>
    %112 = vector.multi_reduction <add>, %107, %cst_125 [0] : vector<16x4xf32> to vector<4xf32>
    %113 = vector.shape_cast %112 : vector<4xf32> to vector<1x4xf32>
    %114 = arith.addf %111, %113 : vector<1x4xf32>
    %c0_126 = arith.constant 0 : index
    %c0_127 = arith.constant 0 : index
    %115 = vector.load %arg7[%c0_126, %c0_127] : memref<1x4xf32, #tpu.memory_space<vmem>>, vector<1x4xf32>
    tpu.vector_store %arg7[%c0_126, %c0_127], %114 {strides = array<i32>} : memref<1x4xf32, #tpu.memory_space<vmem>>, vector<1x4xf32>,
    %c0_128 = arith.constant 0 : index
    %c0_129 = arith.constant 0 : index
    %116 = vector.load %arg8[%c0_128, %c0_129] : memref<1x4xf32, #tpu.memory_space<vmem>>, vector<1x4xf32>
    %117 = arith.mulf %107, %107 : vector<16x4xf32>
    %cst_130 = arith.constant dense<0.000000e+00> : vector<4xf32>
    %118 = vector.multi_reduction <add>, %117, %cst_130 [0] : vector<16x4xf32> to vector<4xf32>
    %119 = vector.shape_cast %118 : vector<4xf32> to vector<1x4xf32>
    %120 = arith.addf %116, %119 : vector<1x4xf32>
    %c0_131 = arith.constant 0 : index
    %c0_132 = arith.constant 0 : index
    %121 = vector.load %arg8[%c0_131, %c0_132] : memref<1x4xf32, #tpu.memory_space<vmem>>, vector<1x4xf32>
    tpu.vector_store %arg8[%c0_131, %c0_132], %120 {strides = array<i32>} : memref<1x4xf32, #tpu.memory_space<vmem>>, vector<1x4xf32>,
    %cst_133 = arith.constant 0.000000e+00 : f32
    %122 = vector.broadcast %cst_133 : f32 to vector<16x4xf32>
    %c0_134 = arith.constant 0 : index
    %c0_135 = arith.constant 0 : index
    %c1_136 = arith.constant 1 : index
    %c0_137 = arith.constant 0 : index
    %123 = vector.load %arg3[%c0_134, %c0_135, %c1_136, %c0_137] : memref<1x1x18x8xbf16, #tpu.memory_space<vmem>>, vector<1x1x16x8xbf16>
    %124 = vector.shape_cast %123 : vector<1x1x16x8xbf16> to vector<16x8xbf16>
    %c12 = arith.constant 12 : index
    %c0_138 = arith.constant 0 : index
    %c0_139 = arith.constant 0 : index
    %125 = vector.load %arg5[%c12, %c0_138, %c0_139] : memref<16x8x4xbf16, #tpu.memory_space<vmem>>, vector<1x8x4xbf16>
    %126 = vector.shape_cast %125 : vector<1x8x4xbf16> to vector<8x4xbf16>
    %cst_140 = arith.constant dense<0.000000e+00> : vector<16x4xf32>
    %127 = tpu.matmul %124, %126, %cst_140 {dimension_numbers = #tpu.dot_dimension_numbers<[1], [0], [0], [1], [0, 0, 1, 1], [], []>} : vector<16x8xbf16>, vector<8x4xbf16>, vector<16x4xf32> -> vector<16x4xf32>
    %128 = arith.addf %122, %127 : vector<16x4xf32>
    %c0_141 = arith.constant 0 : index
    %c0_142 = arith.constant 0 : index
    %c2_143 = arith.constant 2 : index
    %c0_144 = arith.constant 0 : index
    %129 = vector.load %arg3[%c0_141, %c0_142, %c2_143, %c0_144] : memref<1x1x18x8xbf16, #tpu.memory_space<vmem>>, vector<1x1x16x8xbf16>
    %130 = vector.shape_cast %129 : vector<1x1x16x8xbf16> to vector<16x8xbf16>
    %c13 = arith.constant 13 : index
    %c0_145 = arith.constant 0 : index
    %c0_146 = arith.constant 0 : index
    %131 = vector.load %arg5[%c13, %c0_145, %c0_146] : memref<16x8x4xbf16, #tpu.memory_space<vmem>>, vector<1x8x4xbf16>
    %132 = vector.shape_cast %131 : vector<1x8x4xbf16> to vector<8x4xbf16>
    %cst_147 = arith.constant dense<0.000000e+00> : vector<16x4xf32>
    %133 = tpu.matmul %130, %132, %cst_147 {dimension_numbers = #tpu.dot_dimension_numbers<[1], [0], [0], [1], [0, 0, 1, 1], [], []>} : vector<16x8xbf16>, vector<8x4xbf16>, vector<16x4xf32> -> vector<16x4xf32>
    %134 = arith.addf %128, %133 : vector<16x4xf32>
    %c0_148 = arith.constant 0 : index
    %c0_149 = arith.constant 0 : index
    %c1_150 = arith.constant 1 : index
    %c0_151 = arith.constant 0 : index
    %135 = vector.load %arg4[%c0_148, %c0_149, %c1_150, %c0_151] : memref<1x1x18x8xbf16, #tpu.memory_space<vmem>>, vector<1x1x16x8xbf16>
    %136 = vector.shape_cast %135 : vector<1x1x16x8xbf16> to vector<16x8xbf16>
    %c14 = arith.constant 14 : index
    %c0_152 = arith.constant 0 : index
    %c0_153 = arith.constant 0 : index
    %137 = vector.load %arg5[%c14, %c0_152, %c0_153] : memref<16x8x4xbf16, #tpu.memory_space<vmem>>, vector<1x8x4xbf16>
    %138 = vector.shape_cast %137 : vector<1x8x4xbf16> to vector<8x4xbf16>
    %cst_154 = arith.constant dense<0.000000e+00> : vector<16x4xf32>
    %139 = tpu.matmul %136, %138, %cst_154 {dimension_numbers = #tpu.dot_dimension_numbers<[1], [0], [0], [1], [0, 0, 1, 1], [], []>} : vector<16x8xbf16>, vector<8x4xbf16>, vector<16x4xf32> -> vector<16x4xf32>
    %140 = arith.addf %134, %139 : vector<16x4xf32>
    %c0_155 = arith.constant 0 : index
    %c0_156 = arith.constant 0 : index
    %c2_157 = arith.constant 2 : index
    %c0_158 = arith.constant 0 : index
    %141 = vector.load %arg4[%c0_155, %c0_156, %c2_157, %c0_158] : memref<1x1x18x8xbf16, #tpu.memory_space<vmem>>, vector<1x1x16x8xbf16>
    %142 = vector.shape_cast %141 : vector<1x1x16x8xbf16> to vector<16x8xbf16>
    %c15 = arith.constant 15 : index
    %c0_159 = arith.constant 0 : index
    %c0_160 = arith.constant 0 : index
    %143 = vector.load %arg5[%c15, %c0_159, %c0_160] : memref<16x8x4xbf16, #tpu.memory_space<vmem>>, vector<1x8x4xbf16>
    %144 = vector.shape_cast %143 : vector<1x8x4xbf16> to vector<8x4xbf16>
    %cst_161 = arith.constant dense<0.000000e+00> : vector<16x4xf32>
    %145 = tpu.matmul %142, %144, %cst_161 {dimension_numbers = #tpu.dot_dimension_numbers<[1], [0], [0], [1], [0, 0, 1, 1], [], []>} : vector<16x8xbf16>, vector<8x4xbf16>, vector<16x4xf32> -> vector<16x4xf32>
    %146 = arith.addf %140, %145 : vector<16x4xf32>
    %c0_162 = arith.constant 0 : index
    %c1_163 = arith.constant 1 : index
    %c1_164 = arith.constant 1 : index
    %c0_165 = arith.constant 0 : index
    %c0_166 = arith.constant 0 : index
    %147 = vector.load %arg6[%c0_162, %c1_163, %c1_164, %c0_165, %c0_166] : memref<1x2x2x16x4xf32, #tpu.memory_space<vmem>>, vector<1x1x1x16x4xf32>
    %148 = vector.shape_cast %147 : vector<1x1x1x16x4xf32> to vector<16x4xf32>
    %149 = vector.shape_cast %146 : vector<16x4xf32> to vector<1x1x1x16x4xf32>
    tpu.vector_store %arg6[%c0_162, %c1_163, %c1_164, %c0_165, %c0_166], %149 {strides = array<i32>} : memref<1x2x2x16x4xf32, #tpu.memory_space<vmem>>, vector<1x1x1x16x4xf32>,
    %c0_167 = arith.constant 0 : index
    %c0_168 = arith.constant 0 : index
    %150 = vector.load %arg7[%c0_167, %c0_168] : memref<1x4xf32, #tpu.memory_space<vmem>>, vector<1x4xf32>
    %cst_169 = arith.constant dense<0.000000e+00> : vector<4xf32>
    %151 = vector.multi_reduction <add>, %146, %cst_169 [0] : vector<16x4xf32> to vector<4xf32>
    %152 = vector.shape_cast %151 : vector<4xf32> to vector<1x4xf32>
    %153 = arith.addf %150, %152 : vector<1x4xf32>
    %c0_170 = arith.constant 0 : index
    %c0_171 = arith.constant 0 : index
    %154 = vector.load %arg7[%c0_170, %c0_171] : memref<1x4xf32, #tpu.memory_space<vmem>>, vector<1x4xf32>
    tpu.vector_store %arg7[%c0_170, %c0_171], %153 {strides = array<i32>} : memref<1x4xf32, #tpu.memory_space<vmem>>, vector<1x4xf32>,
    %c0_172 = arith.constant 0 : index
    %c0_173 = arith.constant 0 : index
    %155 = vector.load %arg8[%c0_172, %c0_173] : memref<1x4xf32, #tpu.memory_space<vmem>>, vector<1x4xf32>
    %156 = arith.mulf %146, %146 : vector<16x4xf32>
    %cst_174 = arith.constant dense<0.000000e+00> : vector<4xf32>
    %157 = vector.multi_reduction <add>, %156, %cst_174 [0] : vector<16x4xf32> to vector<4xf32>
    %158 = vector.shape_cast %157 : vector<4xf32> to vector<1x4xf32>
    %159 = arith.addf %155, %158 : vector<1x4xf32>
    %c0_175 = arith.constant 0 : index
    %c0_176 = arith.constant 0 : index
    %160 = vector.load %arg8[%c0_175, %c0_176] : memref<1x4xf32, #tpu.memory_space<vmem>>, vector<1x4xf32>
    tpu.vector_store %arg8[%c0_175, %c0_176], %159 {strides = array<i32>} : memref<1x4xf32, #tpu.memory_space<vmem>>, vector<1x4xf32>,
    return
  }
  func.func @transform_0(%arg0: i32, %arg1: i32) -> (i32, i32, i32, i32) {
    %c0_i32 = arith.constant 0 : i32
    %0 = arith.addi %arg1, %c0_i32 : i32
    %c0_i32_0 = arith.constant 0 : i32
    %c0_i32_1 = arith.constant 0 : i32
    %c0_i32_2 = arith.constant 0 : i32
    return %arg0, %0, %c0_i32_0, %c0_i32_1 : i32, i32, i32, i32
  }
  func.func @transform_1(%arg0: i32, %arg1: i32) -> (i32, i32, i32, i32) {
    %c1_i32 = arith.constant 1 : i32
    %0 = arith.addi %arg1, %c1_i32 : i32
    %c0_i32 = arith.constant 0 : i32
    %c0_i32_0 = arith.constant 0 : i32
    %c0_i32_1 = arith.constant 0 : i32
    return %arg0, %0, %c0_i32, %c0_i32_0 : i32, i32, i32, i32
  }
  func.func @transform_2(%arg0: i32, %arg1: i32) -> (i32, i32, i32, i32) {
    %c2_i32 = arith.constant 2 : i32
    %0 = arith.addi %arg1, %c2_i32 : i32
    %c0_i32 = arith.constant 0 : i32
    %c0_i32_0 = arith.constant 0 : i32
    %c0_i32_1 = arith.constant 0 : i32
    return %arg0, %0, %c0_i32, %c0_i32_0 : i32, i32, i32, i32
  }
  func.func @transform_3(%arg0: i32, %arg1: i32) -> (i32, i32, i32) {
    %c0_i32 = arith.constant 0 : i32
    %c0_i32_0 = arith.constant 0 : i32
    %c0_i32_1 = arith.constant 0 : i32
    %c0_i32_2 = arith.constant 0 : i32
    return %c0_i32, %c0_i32_0, %c0_i32_1 : i32, i32, i32
  }
  func.func @transform_4(%arg0: i32, %arg1: i32) -> (i32, i32, i32, i32, i32) {
    %c0_i32 = arith.constant 0 : i32
    %c0_i32_0 = arith.constant 0 : i32
    %c0_i32_1 = arith.constant 0 : i32
    %c0_i32_2 = arith.constant 0 : i32
    return %arg0, %arg1, %c0_i32, %c0_i32_0, %c0_i32_1 : i32, i32, i32, i32, i32
  }
  func.func @transform_5(%arg0: i32, %arg1: i32) -> (i32, i32) {
    %c0_i32 = arith.constant 0 : i32
    %c0_i32_0 = arith.constant 0 : i32
    %c0_i32_1 = arith.constant 0 : i32
    return %c0_i32, %c0_i32_0 : i32, i32
  }
  func.func @transform_6(%arg0: i32, %arg1: i32) -> (i32, i32) {
    %c0_i32 = arith.constant 0 : i32
    %c0_i32_0 = arith.constant 0 : i32
    %c0_i32_1 = arith.constant 0 : i32
    return %c0_i32, %c0_i32_0 : i32, i32
  }
}

module attributes {stable_mosaic.version = 11 : i64} {
  func.func @_deconv_s2_tanh_kernel(%arg0: i32, %arg1: i32, %arg2: memref<1x1x34x4xbf16, #tpu.memory_space<vmem>>, %arg3: memref<1x1x34x4xbf16, #tpu.memory_space<vmem>>, %arg4: memref<1x1x34x4xbf16, #tpu.memory_space<vmem>>, %arg5: memref<16x4x3xbf16, #tpu.memory_space<vmem>>, %arg6: memref<1x3xf32, #tpu.memory_space<vmem>>, %arg7: memref<1x2x2x32x3xf32, #tpu.memory_space<vmem>>) attributes {dimension_semantics = [#tpu.dimension_semantics<parallel>, #tpu.dimension_semantics<parallel>], iteration_bounds = array<i64: 2, 32>, scalar_prefetch = 0 : i64, scratch_operands = 0 : i64, tpu.core_type = #tpu.core_type<tc>, window_params = [{transform_indices = @transform_0, window_bounds = array<i64: 1, 1, 34, 4>}, {transform_indices = @transform_1, window_bounds = array<i64: 1, 1, 34, 4>}, {transform_indices = @transform_2, window_bounds = array<i64: 1, 1, 34, 4>}, {pipeline_mode = #tpu.pipeline_mode<synchronous>, transform_indices = @transform_3, window_bounds = array<i64: 16, 4, 3>}, {pipeline_mode = #tpu.pipeline_mode<synchronous>, transform_indices = @transform_4, window_bounds = array<i64: 1, 3>}, {transform_indices = @transform_5, window_bounds = array<i64: 1, 2, 2, 32, 3>}]} {
    %c0 = arith.constant 0 : index
    %c0_0 = arith.constant 0 : index
    %0 = vector.load %arg6[%c0, %c0_0] : memref<1x3xf32, #tpu.memory_space<vmem>>, vector<1x3xf32>
    %cst = arith.constant 0.000000e+00 : f32
    %1 = vector.broadcast %cst : f32 to vector<32x3xf32>
    %c0_1 = arith.constant 0 : index
    %c0_2 = arith.constant 0 : index
    %c0_3 = arith.constant 0 : index
    %c0_4 = arith.constant 0 : index
    %2 = vector.load %arg2[%c0_1, %c0_2, %c0_3, %c0_4] : memref<1x1x34x4xbf16, #tpu.memory_space<vmem>>, vector<1x1x32x4xbf16>
    %3 = vector.shape_cast %2 : vector<1x1x32x4xbf16> to vector<32x4xbf16>
    %c0_5 = arith.constant 0 : index
    %c0_6 = arith.constant 0 : index
    %c0_7 = arith.constant 0 : index
    %4 = vector.load %arg5[%c0_5, %c0_6, %c0_7] : memref<16x4x3xbf16, #tpu.memory_space<vmem>>, vector<1x4x3xbf16>
    %5 = vector.shape_cast %4 : vector<1x4x3xbf16> to vector<4x3xbf16>
    %cst_8 = arith.constant dense<0.000000e+00> : vector<32x3xf32>
    %6 = tpu.matmul %3, %5, %cst_8 {dimension_numbers = #tpu.dot_dimension_numbers<[1], [0], [0], [1], [0, 0, 1, 1], [], []>} : vector<32x4xbf16>, vector<4x3xbf16>, vector<32x3xf32> -> vector<32x3xf32>
    %7 = arith.addf %1, %6 : vector<32x3xf32>
    %c0_9 = arith.constant 0 : index
    %c0_10 = arith.constant 0 : index
    %c1 = arith.constant 1 : index
    %c0_11 = arith.constant 0 : index
    %8 = vector.load %arg2[%c0_9, %c0_10, %c1, %c0_11] : memref<1x1x34x4xbf16, #tpu.memory_space<vmem>>, vector<1x1x32x4xbf16>
    %9 = vector.shape_cast %8 : vector<1x1x32x4xbf16> to vector<32x4xbf16>
    %c1_12 = arith.constant 1 : index
    %c0_13 = arith.constant 0 : index
    %c0_14 = arith.constant 0 : index
    %10 = vector.load %arg5[%c1_12, %c0_13, %c0_14] : memref<16x4x3xbf16, #tpu.memory_space<vmem>>, vector<1x4x3xbf16>
    %11 = vector.shape_cast %10 : vector<1x4x3xbf16> to vector<4x3xbf16>
    %cst_15 = arith.constant dense<0.000000e+00> : vector<32x3xf32>
    %12 = tpu.matmul %9, %11, %cst_15 {dimension_numbers = #tpu.dot_dimension_numbers<[1], [0], [0], [1], [0, 0, 1, 1], [], []>} : vector<32x4xbf16>, vector<4x3xbf16>, vector<32x3xf32> -> vector<32x3xf32>
    %13 = arith.addf %7, %12 : vector<32x3xf32>
    %c0_16 = arith.constant 0 : index
    %c0_17 = arith.constant 0 : index
    %c0_18 = arith.constant 0 : index
    %c0_19 = arith.constant 0 : index
    %14 = vector.load %arg3[%c0_16, %c0_17, %c0_18, %c0_19] : memref<1x1x34x4xbf16, #tpu.memory_space<vmem>>, vector<1x1x32x4xbf16>
    %15 = vector.shape_cast %14 : vector<1x1x32x4xbf16> to vector<32x4xbf16>
    %c2 = arith.constant 2 : index
    %c0_20 = arith.constant 0 : index
    %c0_21 = arith.constant 0 : index
    %16 = vector.load %arg5[%c2, %c0_20, %c0_21] : memref<16x4x3xbf16, #tpu.memory_space<vmem>>, vector<1x4x3xbf16>
    %17 = vector.shape_cast %16 : vector<1x4x3xbf16> to vector<4x3xbf16>
    %cst_22 = arith.constant dense<0.000000e+00> : vector<32x3xf32>
    %18 = tpu.matmul %15, %17, %cst_22 {dimension_numbers = #tpu.dot_dimension_numbers<[1], [0], [0], [1], [0, 0, 1, 1], [], []>} : vector<32x4xbf16>, vector<4x3xbf16>, vector<32x3xf32> -> vector<32x3xf32>
    %19 = arith.addf %13, %18 : vector<32x3xf32>
    %c0_23 = arith.constant 0 : index
    %c0_24 = arith.constant 0 : index
    %c1_25 = arith.constant 1 : index
    %c0_26 = arith.constant 0 : index
    %20 = vector.load %arg3[%c0_23, %c0_24, %c1_25, %c0_26] : memref<1x1x34x4xbf16, #tpu.memory_space<vmem>>, vector<1x1x32x4xbf16>
    %21 = vector.shape_cast %20 : vector<1x1x32x4xbf16> to vector<32x4xbf16>
    %c3 = arith.constant 3 : index
    %c0_27 = arith.constant 0 : index
    %c0_28 = arith.constant 0 : index
    %22 = vector.load %arg5[%c3, %c0_27, %c0_28] : memref<16x4x3xbf16, #tpu.memory_space<vmem>>, vector<1x4x3xbf16>
    %23 = vector.shape_cast %22 : vector<1x4x3xbf16> to vector<4x3xbf16>
    %cst_29 = arith.constant dense<0.000000e+00> : vector<32x3xf32>
    %24 = tpu.matmul %21, %23, %cst_29 {dimension_numbers = #tpu.dot_dimension_numbers<[1], [0], [0], [1], [0, 0, 1, 1], [], []>} : vector<32x4xbf16>, vector<4x3xbf16>, vector<32x3xf32> -> vector<32x3xf32>
    %25 = arith.addf %19, %24 : vector<32x3xf32>
    %26 = vector.broadcast %0 : vector<1x3xf32> to vector<32x3xf32>
    %27 = arith.addf %25, %26 : vector<32x3xf32>
    %28 = math.tanh %27 : vector<32x3xf32>
    %c0_30 = arith.constant 0 : index
    %c0_31 = arith.constant 0 : index
    %c0_32 = arith.constant 0 : index
    %c0_33 = arith.constant 0 : index
    %c0_34 = arith.constant 0 : index
    %29 = vector.load %arg7[%c0_30, %c0_31, %c0_32, %c0_33, %c0_34] : memref<1x2x2x32x3xf32, #tpu.memory_space<vmem>>, vector<1x1x1x32x3xf32>
    %30 = vector.shape_cast %29 : vector<1x1x1x32x3xf32> to vector<32x3xf32>
    %31 = vector.shape_cast %28 : vector<32x3xf32> to vector<1x1x1x32x3xf32>
    tpu.vector_store %arg7[%c0_30, %c0_31, %c0_32, %c0_33, %c0_34], %31 {strides = array<i32>} : memref<1x2x2x32x3xf32, #tpu.memory_space<vmem>>, vector<1x1x1x32x3xf32>,
    %cst_35 = arith.constant 0.000000e+00 : f32
    %32 = vector.broadcast %cst_35 : f32 to vector<32x3xf32>
    %c0_36 = arith.constant 0 : index
    %c0_37 = arith.constant 0 : index
    %c1_38 = arith.constant 1 : index
    %c0_39 = arith.constant 0 : index
    %33 = vector.load %arg2[%c0_36, %c0_37, %c1_38, %c0_39] : memref<1x1x34x4xbf16, #tpu.memory_space<vmem>>, vector<1x1x32x4xbf16>
    %34 = vector.shape_cast %33 : vector<1x1x32x4xbf16> to vector<32x4xbf16>
    %c4 = arith.constant 4 : index
    %c0_40 = arith.constant 0 : index
    %c0_41 = arith.constant 0 : index
    %35 = vector.load %arg5[%c4, %c0_40, %c0_41] : memref<16x4x3xbf16, #tpu.memory_space<vmem>>, vector<1x4x3xbf16>
    %36 = vector.shape_cast %35 : vector<1x4x3xbf16> to vector<4x3xbf16>
    %cst_42 = arith.constant dense<0.000000e+00> : vector<32x3xf32>
    %37 = tpu.matmul %34, %36, %cst_42 {dimension_numbers = #tpu.dot_dimension_numbers<[1], [0], [0], [1], [0, 0, 1, 1], [], []>} : vector<32x4xbf16>, vector<4x3xbf16>, vector<32x3xf32> -> vector<32x3xf32>
    %38 = arith.addf %32, %37 : vector<32x3xf32>
    %c0_43 = arith.constant 0 : index
    %c0_44 = arith.constant 0 : index
    %c2_45 = arith.constant 2 : index
    %c0_46 = arith.constant 0 : index
    %39 = vector.load %arg2[%c0_43, %c0_44, %c2_45, %c0_46] : memref<1x1x34x4xbf16, #tpu.memory_space<vmem>>, vector<1x1x32x4xbf16>
    %40 = vector.shape_cast %39 : vector<1x1x32x4xbf16> to vector<32x4xbf16>
    %c5 = arith.constant 5 : index
    %c0_47 = arith.constant 0 : index
    %c0_48 = arith.constant 0 : index
    %41 = vector.load %arg5[%c5, %c0_47, %c0_48] : memref<16x4x3xbf16, #tpu.memory_space<vmem>>, vector<1x4x3xbf16>
    %42 = vector.shape_cast %41 : vector<1x4x3xbf16> to vector<4x3xbf16>
    %cst_49 = arith.constant dense<0.000000e+00> : vector<32x3xf32>
    %43 = tpu.matmul %40, %42, %cst_49 {dimension_numbers = #tpu.dot_dimension_numbers<[1], [0], [0], [1], [0, 0, 1, 1], [], []>} : vector<32x4xbf16>, vector<4x3xbf16>, vector<32x3xf32> -> vector<32x3xf32>
    %44 = arith.addf %38, %43 : vector<32x3xf32>
    %c0_50 = arith.constant 0 : index
    %c0_51 = arith.constant 0 : index
    %c1_52 = arith.constant 1 : index
    %c0_53 = arith.constant 0 : index
    %45 = vector.load %arg3[%c0_50, %c0_51, %c1_52, %c0_53] : memref<1x1x34x4xbf16, #tpu.memory_space<vmem>>, vector<1x1x32x4xbf16>
    %46 = vector.shape_cast %45 : vector<1x1x32x4xbf16> to vector<32x4xbf16>
    %c6 = arith.constant 6 : index
    %c0_54 = arith.constant 0 : index
    %c0_55 = arith.constant 0 : index
    %47 = vector.load %arg5[%c6, %c0_54, %c0_55] : memref<16x4x3xbf16, #tpu.memory_space<vmem>>, vector<1x4x3xbf16>
    %48 = vector.shape_cast %47 : vector<1x4x3xbf16> to vector<4x3xbf16>
    %cst_56 = arith.constant dense<0.000000e+00> : vector<32x3xf32>
    %49 = tpu.matmul %46, %48, %cst_56 {dimension_numbers = #tpu.dot_dimension_numbers<[1], [0], [0], [1], [0, 0, 1, 1], [], []>} : vector<32x4xbf16>, vector<4x3xbf16>, vector<32x3xf32> -> vector<32x3xf32>
    %50 = arith.addf %44, %49 : vector<32x3xf32>
    %c0_57 = arith.constant 0 : index
    %c0_58 = arith.constant 0 : index
    %c2_59 = arith.constant 2 : index
    %c0_60 = arith.constant 0 : index
    %51 = vector.load %arg3[%c0_57, %c0_58, %c2_59, %c0_60] : memref<1x1x34x4xbf16, #tpu.memory_space<vmem>>, vector<1x1x32x4xbf16>
    %52 = vector.shape_cast %51 : vector<1x1x32x4xbf16> to vector<32x4xbf16>
    %c7 = arith.constant 7 : index
    %c0_61 = arith.constant 0 : index
    %c0_62 = arith.constant 0 : index
    %53 = vector.load %arg5[%c7, %c0_61, %c0_62] : memref<16x4x3xbf16, #tpu.memory_space<vmem>>, vector<1x4x3xbf16>
    %54 = vector.shape_cast %53 : vector<1x4x3xbf16> to vector<4x3xbf16>
    %cst_63 = arith.constant dense<0.000000e+00> : vector<32x3xf32>
    %55 = tpu.matmul %52, %54, %cst_63 {dimension_numbers = #tpu.dot_dimension_numbers<[1], [0], [0], [1], [0, 0, 1, 1], [], []>} : vector<32x4xbf16>, vector<4x3xbf16>, vector<32x3xf32> -> vector<32x3xf32>
    %56 = arith.addf %50, %55 : vector<32x3xf32>
    %57 = vector.broadcast %0 : vector<1x3xf32> to vector<32x3xf32>
    %58 = arith.addf %56, %57 : vector<32x3xf32>
    %59 = math.tanh %58 : vector<32x3xf32>
    %c0_64 = arith.constant 0 : index
    %c0_65 = arith.constant 0 : index
    %c1_66 = arith.constant 1 : index
    %c0_67 = arith.constant 0 : index
    %c0_68 = arith.constant 0 : index
    %60 = vector.load %arg7[%c0_64, %c0_65, %c1_66, %c0_67, %c0_68] : memref<1x2x2x32x3xf32, #tpu.memory_space<vmem>>, vector<1x1x1x32x3xf32>
    %61 = vector.shape_cast %60 : vector<1x1x1x32x3xf32> to vector<32x3xf32>
    %62 = vector.shape_cast %59 : vector<32x3xf32> to vector<1x1x1x32x3xf32>
    tpu.vector_store %arg7[%c0_64, %c0_65, %c1_66, %c0_67, %c0_68], %62 {strides = array<i32>} : memref<1x2x2x32x3xf32, #tpu.memory_space<vmem>>, vector<1x1x1x32x3xf32>,
    %cst_69 = arith.constant 0.000000e+00 : f32
    %63 = vector.broadcast %cst_69 : f32 to vector<32x3xf32>
    %c0_70 = arith.constant 0 : index
    %c0_71 = arith.constant 0 : index
    %c0_72 = arith.constant 0 : index
    %c0_73 = arith.constant 0 : index
    %64 = vector.load %arg3[%c0_70, %c0_71, %c0_72, %c0_73] : memref<1x1x34x4xbf16, #tpu.memory_space<vmem>>, vector<1x1x32x4xbf16>
    %65 = vector.shape_cast %64 : vector<1x1x32x4xbf16> to vector<32x4xbf16>
    %c8 = arith.constant 8 : index
    %c0_74 = arith.constant 0 : index
    %c0_75 = arith.constant 0 : index
    %66 = vector.load %arg5[%c8, %c0_74, %c0_75] : memref<16x4x3xbf16, #tpu.memory_space<vmem>>, vector<1x4x3xbf16>
    %67 = vector.shape_cast %66 : vector<1x4x3xbf16> to vector<4x3xbf16>
    %cst_76 = arith.constant dense<0.000000e+00> : vector<32x3xf32>
    %68 = tpu.matmul %65, %67, %cst_76 {dimension_numbers = #tpu.dot_dimension_numbers<[1], [0], [0], [1], [0, 0, 1, 1], [], []>} : vector<32x4xbf16>, vector<4x3xbf16>, vector<32x3xf32> -> vector<32x3xf32>
    %69 = arith.addf %63, %68 : vector<32x3xf32>
    %c0_77 = arith.constant 0 : index
    %c0_78 = arith.constant 0 : index
    %c1_79 = arith.constant 1 : index
    %c0_80 = arith.constant 0 : index
    %70 = vector.load %arg3[%c0_77, %c0_78, %c1_79, %c0_80] : memref<1x1x34x4xbf16, #tpu.memory_space<vmem>>, vector<1x1x32x4xbf16>
    %71 = vector.shape_cast %70 : vector<1x1x32x4xbf16> to vector<32x4xbf16>
    %c9 = arith.constant 9 : index
    %c0_81 = arith.constant 0 : index
    %c0_82 = arith.constant 0 : index
    %72 = vector.load %arg5[%c9, %c0_81, %c0_82] : memref<16x4x3xbf16, #tpu.memory_space<vmem>>, vector<1x4x3xbf16>
    %73 = vector.shape_cast %72 : vector<1x4x3xbf16> to vector<4x3xbf16>
    %cst_83 = arith.constant dense<0.000000e+00> : vector<32x3xf32>
    %74 = tpu.matmul %71, %73, %cst_83 {dimension_numbers = #tpu.dot_dimension_numbers<[1], [0], [0], [1], [0, 0, 1, 1], [], []>} : vector<32x4xbf16>, vector<4x3xbf16>, vector<32x3xf32> -> vector<32x3xf32>
    %75 = arith.addf %69, %74 : vector<32x3xf32>
    %c0_84 = arith.constant 0 : index
    %c0_85 = arith.constant 0 : index
    %c0_86 = arith.constant 0 : index
    %c0_87 = arith.constant 0 : index
    %76 = vector.load %arg4[%c0_84, %c0_85, %c0_86, %c0_87] : memref<1x1x34x4xbf16, #tpu.memory_space<vmem>>, vector<1x1x32x4xbf16>
    %77 = vector.shape_cast %76 : vector<1x1x32x4xbf16> to vector<32x4xbf16>
    %c10 = arith.constant 10 : index
    %c0_88 = arith.constant 0 : index
    %c0_89 = arith.constant 0 : index
    %78 = vector.load %arg5[%c10, %c0_88, %c0_89] : memref<16x4x3xbf16, #tpu.memory_space<vmem>>, vector<1x4x3xbf16>
    %79 = vector.shape_cast %78 : vector<1x4x3xbf16> to vector<4x3xbf16>
    %cst_90 = arith.constant dense<0.000000e+00> : vector<32x3xf32>
    %80 = tpu.matmul %77, %79, %cst_90 {dimension_numbers = #tpu.dot_dimension_numbers<[1], [0], [0], [1], [0, 0, 1, 1], [], []>} : vector<32x4xbf16>, vector<4x3xbf16>, vector<32x3xf32> -> vector<32x3xf32>
    %81 = arith.addf %75, %80 : vector<32x3xf32>
    %c0_91 = arith.constant 0 : index
    %c0_92 = arith.constant 0 : index
    %c1_93 = arith.constant 1 : index
    %c0_94 = arith.constant 0 : index
    %82 = vector.load %arg4[%c0_91, %c0_92, %c1_93, %c0_94] : memref<1x1x34x4xbf16, #tpu.memory_space<vmem>>, vector<1x1x32x4xbf16>
    %83 = vector.shape_cast %82 : vector<1x1x32x4xbf16> to vector<32x4xbf16>
    %c11 = arith.constant 11 : index
    %c0_95 = arith.constant 0 : index
    %c0_96 = arith.constant 0 : index
    %84 = vector.load %arg5[%c11, %c0_95, %c0_96] : memref<16x4x3xbf16, #tpu.memory_space<vmem>>, vector<1x4x3xbf16>
    %85 = vector.shape_cast %84 : vector<1x4x3xbf16> to vector<4x3xbf16>
    %cst_97 = arith.constant dense<0.000000e+00> : vector<32x3xf32>
    %86 = tpu.matmul %83, %85, %cst_97 {dimension_numbers = #tpu.dot_dimension_numbers<[1], [0], [0], [1], [0, 0, 1, 1], [], []>} : vector<32x4xbf16>, vector<4x3xbf16>, vector<32x3xf32> -> vector<32x3xf32>
    %87 = arith.addf %81, %86 : vector<32x3xf32>
    %88 = vector.broadcast %0 : vector<1x3xf32> to vector<32x3xf32>
    %89 = arith.addf %87, %88 : vector<32x3xf32>
    %90 = math.tanh %89 : vector<32x3xf32>
    %c0_98 = arith.constant 0 : index
    %c1_99 = arith.constant 1 : index
    %c0_100 = arith.constant 0 : index
    %c0_101 = arith.constant 0 : index
    %c0_102 = arith.constant 0 : index
    %91 = vector.load %arg7[%c0_98, %c1_99, %c0_100, %c0_101, %c0_102] : memref<1x2x2x32x3xf32, #tpu.memory_space<vmem>>, vector<1x1x1x32x3xf32>
    %92 = vector.shape_cast %91 : vector<1x1x1x32x3xf32> to vector<32x3xf32>
    %93 = vector.shape_cast %90 : vector<32x3xf32> to vector<1x1x1x32x3xf32>
    tpu.vector_store %arg7[%c0_98, %c1_99, %c0_100, %c0_101, %c0_102], %93 {strides = array<i32>} : memref<1x2x2x32x3xf32, #tpu.memory_space<vmem>>, vector<1x1x1x32x3xf32>,
    %cst_103 = arith.constant 0.000000e+00 : f32
    %94 = vector.broadcast %cst_103 : f32 to vector<32x3xf32>
    %c0_104 = arith.constant 0 : index
    %c0_105 = arith.constant 0 : index
    %c1_106 = arith.constant 1 : index
    %c0_107 = arith.constant 0 : index
    %95 = vector.load %arg3[%c0_104, %c0_105, %c1_106, %c0_107] : memref<1x1x34x4xbf16, #tpu.memory_space<vmem>>, vector<1x1x32x4xbf16>
    %96 = vector.shape_cast %95 : vector<1x1x32x4xbf16> to vector<32x4xbf16>
    %c12 = arith.constant 12 : index
    %c0_108 = arith.constant 0 : index
    %c0_109 = arith.constant 0 : index
    %97 = vector.load %arg5[%c12, %c0_108, %c0_109] : memref<16x4x3xbf16, #tpu.memory_space<vmem>>, vector<1x4x3xbf16>
    %98 = vector.shape_cast %97 : vector<1x4x3xbf16> to vector<4x3xbf16>
    %cst_110 = arith.constant dense<0.000000e+00> : vector<32x3xf32>
    %99 = tpu.matmul %96, %98, %cst_110 {dimension_numbers = #tpu.dot_dimension_numbers<[1], [0], [0], [1], [0, 0, 1, 1], [], []>} : vector<32x4xbf16>, vector<4x3xbf16>, vector<32x3xf32> -> vector<32x3xf32>
    %100 = arith.addf %94, %99 : vector<32x3xf32>
    %c0_111 = arith.constant 0 : index
    %c0_112 = arith.constant 0 : index
    %c2_113 = arith.constant 2 : index
    %c0_114 = arith.constant 0 : index
    %101 = vector.load %arg3[%c0_111, %c0_112, %c2_113, %c0_114] : memref<1x1x34x4xbf16, #tpu.memory_space<vmem>>, vector<1x1x32x4xbf16>
    %102 = vector.shape_cast %101 : vector<1x1x32x4xbf16> to vector<32x4xbf16>
    %c13 = arith.constant 13 : index
    %c0_115 = arith.constant 0 : index
    %c0_116 = arith.constant 0 : index
    %103 = vector.load %arg5[%c13, %c0_115, %c0_116] : memref<16x4x3xbf16, #tpu.memory_space<vmem>>, vector<1x4x3xbf16>
    %104 = vector.shape_cast %103 : vector<1x4x3xbf16> to vector<4x3xbf16>
    %cst_117 = arith.constant dense<0.000000e+00> : vector<32x3xf32>
    %105 = tpu.matmul %102, %104, %cst_117 {dimension_numbers = #tpu.dot_dimension_numbers<[1], [0], [0], [1], [0, 0, 1, 1], [], []>} : vector<32x4xbf16>, vector<4x3xbf16>, vector<32x3xf32> -> vector<32x3xf32>
    %106 = arith.addf %100, %105 : vector<32x3xf32>
    %c0_118 = arith.constant 0 : index
    %c0_119 = arith.constant 0 : index
    %c1_120 = arith.constant 1 : index
    %c0_121 = arith.constant 0 : index
    %107 = vector.load %arg4[%c0_118, %c0_119, %c1_120, %c0_121] : memref<1x1x34x4xbf16, #tpu.memory_space<vmem>>, vector<1x1x32x4xbf16>
    %108 = vector.shape_cast %107 : vector<1x1x32x4xbf16> to vector<32x4xbf16>
    %c14 = arith.constant 14 : index
    %c0_122 = arith.constant 0 : index
    %c0_123 = arith.constant 0 : index
    %109 = vector.load %arg5[%c14, %c0_122, %c0_123] : memref<16x4x3xbf16, #tpu.memory_space<vmem>>, vector<1x4x3xbf16>
    %110 = vector.shape_cast %109 : vector<1x4x3xbf16> to vector<4x3xbf16>
    %cst_124 = arith.constant dense<0.000000e+00> : vector<32x3xf32>
    %111 = tpu.matmul %108, %110, %cst_124 {dimension_numbers = #tpu.dot_dimension_numbers<[1], [0], [0], [1], [0, 0, 1, 1], [], []>} : vector<32x4xbf16>, vector<4x3xbf16>, vector<32x3xf32> -> vector<32x3xf32>
    %112 = arith.addf %106, %111 : vector<32x3xf32>
    %c0_125 = arith.constant 0 : index
    %c0_126 = arith.constant 0 : index
    %c2_127 = arith.constant 2 : index
    %c0_128 = arith.constant 0 : index
    %113 = vector.load %arg4[%c0_125, %c0_126, %c2_127, %c0_128] : memref<1x1x34x4xbf16, #tpu.memory_space<vmem>>, vector<1x1x32x4xbf16>
    %114 = vector.shape_cast %113 : vector<1x1x32x4xbf16> to vector<32x4xbf16>
    %c15 = arith.constant 15 : index
    %c0_129 = arith.constant 0 : index
    %c0_130 = arith.constant 0 : index
    %115 = vector.load %arg5[%c15, %c0_129, %c0_130] : memref<16x4x3xbf16, #tpu.memory_space<vmem>>, vector<1x4x3xbf16>
    %116 = vector.shape_cast %115 : vector<1x4x3xbf16> to vector<4x3xbf16>
    %cst_131 = arith.constant dense<0.000000e+00> : vector<32x3xf32>
    %117 = tpu.matmul %114, %116, %cst_131 {dimension_numbers = #tpu.dot_dimension_numbers<[1], [0], [0], [1], [0, 0, 1, 1], [], []>} : vector<32x4xbf16>, vector<4x3xbf16>, vector<32x3xf32> -> vector<32x3xf32>
    %118 = arith.addf %112, %117 : vector<32x3xf32>
    %119 = vector.broadcast %0 : vector<1x3xf32> to vector<32x3xf32>
    %120 = arith.addf %118, %119 : vector<32x3xf32>
    %121 = math.tanh %120 : vector<32x3xf32>
    %c0_132 = arith.constant 0 : index
    %c1_133 = arith.constant 1 : index
    %c1_134 = arith.constant 1 : index
    %c0_135 = arith.constant 0 : index
    %c0_136 = arith.constant 0 : index
    %122 = vector.load %arg7[%c0_132, %c1_133, %c1_134, %c0_135, %c0_136] : memref<1x2x2x32x3xf32, #tpu.memory_space<vmem>>, vector<1x1x1x32x3xf32>
    %123 = vector.shape_cast %122 : vector<1x1x1x32x3xf32> to vector<32x3xf32>
    %124 = vector.shape_cast %121 : vector<32x3xf32> to vector<1x1x1x32x3xf32>
    tpu.vector_store %arg7[%c0_132, %c1_133, %c1_134, %c0_135, %c0_136], %124 {strides = array<i32>} : memref<1x2x2x32x3xf32, #tpu.memory_space<vmem>>, vector<1x1x1x32x3xf32>,
    return
  }
  func.func @transform_0(%arg0: i32, %arg1: i32) -> (i32, i32, i32, i32) {
    %c0_i32 = arith.constant 0 : i32
    %0 = arith.addi %arg1, %c0_i32 : i32
    %c0_i32_0 = arith.constant 0 : i32
    %c0_i32_1 = arith.constant 0 : i32
    %c0_i32_2 = arith.constant 0 : i32
    return %arg0, %0, %c0_i32_0, %c0_i32_1 : i32, i32, i32, i32
  }
  func.func @transform_1(%arg0: i32, %arg1: i32) -> (i32, i32, i32, i32) {
    %c1_i32 = arith.constant 1 : i32
    %0 = arith.addi %arg1, %c1_i32 : i32
    %c0_i32 = arith.constant 0 : i32
    %c0_i32_0 = arith.constant 0 : i32
    %c0_i32_1 = arith.constant 0 : i32
    return %arg0, %0, %c0_i32, %c0_i32_0 : i32, i32, i32, i32
  }
  func.func @transform_2(%arg0: i32, %arg1: i32) -> (i32, i32, i32, i32) {
    %c2_i32 = arith.constant 2 : i32
    %0 = arith.addi %arg1, %c2_i32 : i32
    %c0_i32 = arith.constant 0 : i32
    %c0_i32_0 = arith.constant 0 : i32
    %c0_i32_1 = arith.constant 0 : i32
    return %arg0, %0, %c0_i32, %c0_i32_0 : i32, i32, i32, i32
  }
  func.func @transform_3(%arg0: i32, %arg1: i32) -> (i32, i32, i32) {
    %c0_i32 = arith.constant 0 : i32
    %c0_i32_0 = arith.constant 0 : i32
    %c0_i32_1 = arith.constant 0 : i32
    %c0_i32_2 = arith.constant 0 : i32
    return %c0_i32, %c0_i32_0, %c0_i32_1 : i32, i32, i32
  }
  func.func @transform_4(%arg0: i32, %arg1: i32) -> (i32, i32) {
    %c0_i32 = arith.constant 0 : i32
    %c0_i32_0 = arith.constant 0 : i32
    %c0_i32_1 = arith.constant 0 : i32
    return %c0_i32, %c0_i32_0 : i32, i32
  }
  func.func @transform_5(%arg0: i32, %arg1: i32) -> (i32, i32, i32, i32, i32) {
    %c0_i32 = arith.constant 0 : i32
    %c0_i32_0 = arith.constant 0 : i32
    %c0_i32_1 = arith.constant 0 : i32
    %c0_i32_2 = arith.constant 0 : i32
    return %arg0, %arg1, %c0_i32, %c0_i32_0, %c0_i32_1 : i32, i32, i32, i32, i32
  }
}

</mosaic_0001>

<bundles_post_ra>
// kernel: generator_forward.10
= control target key start
LH: loop header
LB: loop body
LE: loop exit
PB: predicated region body
PF: predicated region fallthrough
CT: control target
= control target key end

     0   :  { %vm60_vm0 = vcmask 257024   ;;  %s129_s0 = inlined_call_operand.vmem [shape: f32[32,32], index: 0, kind: input, shape index: {}]   ;;  %s130_s1 = inlined_call_operand.vmem [shape: f32[1,32], index: 1, kind: input, shape index: {}]   ;;  %s131_s2 = inlined_call_operand.vmem [shape: f32[1,32], index: 2, kind: input, shape index: {}]   ;;  %s132_s3 = inlined_call_operand.vmem [shape: bf16[32,32], index: 3, kind: output, shape index: {}]  }
   0x1   :  { %v14_v0 = vld [vmem:[%s129_s0] sm:$0xff]  ;;  %v15_v4 = vld [vmem:[%s129_s0 + $0x8] sm:$0xff]  ;;  %v16_v5 = vld [vmem:[%s129_s0 + $0x10] sm:$0xff] }
   0x2   :  { %v69_v1 = vld [vmem:[%s130_s1] ss:$0 sm:$0xff]  ;;  %v17_v6 = vld [vmem:[%s129_s0 + $0x18] sm:$0xff] }
   0x3   :  { %v70_v2 = vld [vmem:[%s131_s2] ss:$0 sm:$0xff]  ;;  %v25_v3 = vmul.f32 %v69_v1, %v14_v0  ;;  %v26_v7 = vmul.f32 %v69_v1, %v15_v4  ;;  %v27_v8 = vmul.f32 %v69_v1, %v16_v5  ;;  %v28_v9 = vmul.f32 %v69_v1, %v17_v6 }
   0x5   :  { %v36_v10 = vadd.f32 %v70_v2, %v25_v3  ;;  %v37_v11 = vadd.f32 %v70_v2, %v26_v7  ;;  %v38_v12 = vadd.f32 %v70_v2, %v27_v8  ;;  %v39_v13 = vadd.f32 %v70_v2, %v28_v9 }
   0x7   :  { %v40_v14 = vmax.f32 %v36_v10, 0.0  ;;  %v41_v15 = vmax.f32 %v37_v11, 0.0  ;;  %v42_v16 = vmax.f32 %v38_v12, 0.0  ;;  %v43_v17 = vmax.f32 %v39_v13, 0.0 }
   0x9   :  { %v75_v18 = vpack.c.bf16 %v40_v14, %v40_v14  ;;  %v76_v19 = vpack.c.bf16 %v41_v15, %v41_v15  ;;  %v77_v20 = vpack.c.bf16 %v42_v16, %v42_v16  ;;  %v78_v21 = vpack.c.bf16 %v43_v17, %v43_v17 }
   0xb   :  { %61 = vst.msk [vmem:[%s132_s3] sm:$0xf] %vm60_vm0, %v75_v18  ;;  %62 = vst.msk [vmem:[%s132_s3 + $0x4] sm:$0xf] %vm60_vm0, %v76_v19 }
   0xc   :  { %63 = vst.msk [vmem:[%s132_s3 + $0x8] sm:$0xf] %vm60_vm0, %v77_v20  ;;  %64 = vst.msk [vmem:[%s132_s3 + $0xc] sm:$0xf] %vm60_vm0, %v78_v21 }

// kernel: generator_forward.9
= control target key start
LH: loop header
LB: loop body
LE: loop exit
PB: predicated region body
PF: predicated region fallthrough
CT: control target
= control target key end

     0   :  { %s1884_s24 = smov 0   ;;  %s1886_s25 = smov 0   ;;  %s2140_s0 = inlined_call_operand.vmem [shape: bf16[2,7,7,8], index: 0, kind: input, shape index: {}, may-alias: {0,1,2,3}]   ;;  %s2141_s1 = inlined_call_operand.vmem [shape: bf16[2,7,7,8], index: 1, kind: input, shape index: {}, may-alias: {0,1,2,3}]   ;;  %s2142_s2 = inlined_call_operand.vmem [shape: bf16[2,7,7,8], index: 2, kind: input, shape index: {}, may-alias: {0,1,2,3}]   ;;  %s2143_s3 = inlined_call_operand.vmem [shape: bf16[2,7,7,8], index: 3, kind: input, shape index: {}, may-alias: {0,1,2,3}]   ;;  %s2144_s4 = inlined_call_operand.vmem [shape: bf16[16,8,32], index: 4, kind: input, shape index: {}]   ;;  %s2145_s5 = inlined_call_operand.vmem [shape: f32[2,4,4,32], index: 5, kind: output, shape index: {0}]   ;;  %s2146_s6 = inlined_call_operand.vmem [shape: f32[1,32], index: 6, kind: output, shape index: {1}]   ;;  %s2147_s7 = inlined_call_operand.vmem [shape: f32[1,32], index: 7, kind: output, shape index: {2}]  }
   0x1   :  { %s1888_s26 = smov 0   ;;  %s1890_s27 = smov 0  }
   0x2   :  { %s1892_s28 = smov 0  }
   0x3 LB: > { %2151 = sst [smem:[#allocation2_spill]] %s1831_s26  ;;  %s27_s29 = sadd.s32 1, %s1831_s26  ;;  %s1839_s28 = sphi %s1892_s28, %s18_s28   ;;  %s1835_s27 = sphi %s1890_s27, %s2161_s27   ;;  %s1831_s26 = sphi %s1888_s26, %s2160_s26   ;;  %s1827_s25 = sphi %s1886_s25, %s2159_s25   ;;  %s1823_s24 = sphi %s1884_s24, %s2158_s24  }
   0x4   : > { %2152 = sst [smem:[#allocation3_spill]] %s1835_s27  ;;  %s30_s30 = sadd.s32 1, %s1835_s27 }
   0x5   : > { %2153 = sst [smem:[#allocation4_spill]] %s1839_s28  ;;  %p28_p0 = scmp.ge.s32.totalorder %s27_s29, 4 }
   0x6   : > { %p1508_p1 = scmp.ge.s32.totalorder %s1839_s28, 1  ;;  %p308_p2 = scmp.lt.s32.totalorder %s1839_s28, 9 }
   0x7   : > { %s2163_s29 = smov (%p28_p0, %s27_s29), 0  ;;  %s2165_s30 = smov (!%p28_p0, %s30_s30), %s1835_s27 }
   0x8   : > { %2154 = sst [smem:[#allocation5_spill]] %s2163_s29  ;;  %p309_p3 = pnand %p1508_p1, %p308_p2 }
   0x9   : > { %p32_p4 = scmp.ge.s32.totalorder %s2165_s30, 2  ;;  %p373_p5 = scmp.lt.s32.totalorder (!%p309_p3), %s1827_s25, 1 }
   0xa   : > { %312 = sbr.rel (%p309_p3) target bundleno = 361 (0x169), region = 40  ;;  %p375_p6 = scmp.lt.s32.totalorder (!%p309_p3), %s1823_s24, 6 }
   0xb   : > { %s2167_s30 = smov (%p32_p4, %s2165_s30), 0  ;;  %s381_s8 = sadd.s32 (!%p309_p3), 1, %s1823_s24 }
   0xc   : > { %2155 = sst [smem:[#allocation6_spill]] %s2167_s30  ;;  %s391_s9 = sadd.s32 (!%p309_p3), 2, %s1823_s24 }
   0xd   : > { %p384_p7 = scmp.lt.s32.totalorder (!%p309_p3), %s381_s8, 6  ;;  %p394_p8 = scmp.lt.s32.totalorder (!%p309_p3), %s391_s9, 6 }
   0xe   : > { %s401_s13 = sadd.s32 (!%p309_p3), 3, %s1823_s24  ;;  %p413_p10 = scmp.lt.s32.totalorder (!%p309_p3), %s1823_s24, 3 }
   0xf   : > { %p1925_p9 = scmp.lt.s32.totalorder (!%p309_p3), %s401_s13, 6  ;;  %p420_p11 = scmp.eq.s32.totalorder (!%p309_p3), %s1827_s25, 0 }
  0x10   : > { %p421_p12 = scmp.eq.s32.totalorder (!%p309_p3), %s1823_s24, 0 }
  0x11   : > { %s374_s10 = scalar_select %p373_p5, %s1827_s25, 1 }
  0x12   : > { %s376_s11 = scalar_select %p375_p6, %s1823_s24, 6 }
  0x13   : > { %s1745_s12 = smul.u32 7, %s374_s10  ;;  %s1513_s20 = sshll.u32 %s374_s10, 2 }
  0x14   : > { %s2169_s8 = smov (!%p384_p7, %s381_s8), 6  ;;  %s2171_s9 = smov (!%p394_p8, %s391_s9), 6 }
  0x15   : > { %s378_s14 = sadd.s32 %s1745_s12, %s376_s11  ;;  %s387_s21 = sadd.s32 %s1745_s12, %s2169_s8 }
  0x16   : > { %s1509_s16 = sshll.u32 %s378_s14, 2  ;;  %s1510_s22 = sshll.u32 %s387_s21, 2 }
  0x17   : > { %s1933_s19 = scalar_lea.vmem %s2140_s0, %s1509_s16  ;;  %s397_s23 = sadd.s32 %s1745_s12, %s2171_s9 }
  0x18   : > { %s1939_s29 = scalar_lea.vmem %s2141_s1, %s1510_s22  ;;  %s1511_s27 = sshll.u32 %s397_s23, 2 }
  0x19   : > { %s1944_s28 = scalar_lea.vmem %s2142_s2, %s1511_s27  ;;  %s2173_s13 = smov (!%p1925_p9, %s401_s13), 6 }
  0x1a   : > { %s2175_s24 = smov (!%p413_p10, %s1823_s24), 3  ;;  %s407_s8 = sadd.s32 %s1745_s12, %s2173_s13 }
  0x1b   : > { %p422_p13 = pnand %p421_p12, %p420_p11  ;;  %s1512_s25 = sshll.u32 %s407_s8, 2 }
  0x1c   : > { %s416_s9 = sadd.s32 %s1513_s20, %s2175_s24  ;;  %s1955_s30 = scalar_lea.vmem %s2143_s3, %s1512_s25  ;;  %vm426_vm0 = vcmask (!%p422_p13), 253952   ;;  %v1841_v0 = vmov (!%p422_p13), 0.0  }
  0x1d   : > { %s1514_s17 = sshll.u32 %s416_s9, 2  ;;  %425 = sbr.rel (%p422_p13) target bundleno = 36 (0x24), region = 44  ;;  %427 = vst.msk [vmem:[%s2146_s6] sm:$0x1] (!%p422_p13), %vm426_vm0, %v1841_v0  ;;  %428 = vst.msk [vmem:[%s2147_s7] sm:$0x1] (!%p422_p13), %vm426_vm0, %v1841_v0 }
  0x1e   : > { %s1960_s26 = scalar_lea.vmem %s2145_s5, %s1514_s17 }
  0x24 PF: > { %vm448_vm1 = vcmask 1043456   ;;  %v1536_v1 = vld [vmem:[%s2144_s4 + $0x20] sm:$0xf]  ;;  %v1842_v2 = vmov 0.0   ;;  %v1515_v4 = vld [vmem:[%s2144_s4 + $0x4] sm:$0xf] }
  0x25   : > { %1640 = vmatprep.subr.bf16.mxu0 %v1842_v2  ;;  %v885_v3 = vsel %vm448_vm1, %v1536_v1, 0  ;;  %1592 = vmatprep.subr.bf16.mxu1 %v1842_v2  ;;  %vm444_vm2 = vcmask 64512   ;;  %v878_v5 = vld [vmem:[%s1944_s28] sm:$0x3]  ;;  %vm1843_vm3 = vmmov 0   ;;  %v450_v6 = vsel %vm448_vm1, %v1515_v4, 0 }
  0x26   : > { %1641 = vmatpush3.bf16.msra.mxu0 %v885_v3  ;;  %1642 = vmatprep.mubr.msk.bf16.mxu0 %vm1843_vm3, %v1842_v2  ;;  %v1789_v7 = vld [vmem:[%s1933_s19] ss:$0 sps:$4 sm:$0x77]   ;;  %v1538_v8 = vld [vmem:[%s2144_s4 + $0x24] sm:$0xf]  ;;  %vm1328_vm4 = vcmask 257024  }
  0x27   : > { %1593 = vmatpush3.bf16.msra.mxu1 %v450_v6  ;;  %1594 = vmatprep.mubr.msk.bf16.mxu1 %vm1843_vm3, %v1842_v2  ;;  %v438_v9 = vshrl.u32 %v1789_v7, 16  ;;  %v440_v10 = vshll.u32 %v1789_v7, 16  ;;  %v945_v11 = vsel %vm448_vm1, %v1538_v8, 0  ;;  %v430_v12 = vld [vmem:[%s2144_s4] sm:$0xf]  ;;  %vm1339_vm5 = vcmask 253952  }
  0x28   : > { %1598 = vmatprep.subr.bf16.mxu1 %v1842_v2  ;;  %1646 = vmatprep.subr.bf16.mxu0 %v1842_v2  ;;  %v1790_v13 = vld [vmem:[%s1944_s28] ss:$0 sps:$4 sm:$0x77]   ;;  %v496_v17 = vsel %vm448_vm1, %v430_v12, 0  ;;  %v1541_v20 = vld [vmem:[%s2144_s4 + $0x28] sm:$0xf] }
  0x29   : > { %1643 = vmatmul.mubr.msk.bf16.vlgmr.msra.gmra.mrb[0].mxu0 %vm444_vm2, %v878_v5  ;;  %v442_v14 = vrot.slane %v440_v10, 1  ;;  %v937_v15 = vshll.u32 %v1790_v13, 16  ;;  %v935_v18 = vshrl.u32 %v1790_v13, 16  ;;  %v999_v22 = vsel %vm448_vm1, %v1541_v20, 0  ;;  %v1519_v23 = vld [vmem:[%s2144_s4 + $0x8] sm:$0xf] }
  0x2a   : > { %1647 = vmatpush3.bf16.msra.mxu0 %v945_v11  ;;  %1648 = vmatprep.mubr.msk.bf16.mxu0 %vm1843_vm3, %v1842_v2  ;;  %v429_v24 = vld [vmem:[%s1933_s19] sm:$0x3]  ;;  %v549_v25 = vsel %vm448_vm1, %v1519_v23, 0  ;;  %v1544_v27 = vld [vmem:[%s2144_s4 + $0x2c] sm:$0xf] }
  0x2b   : > { %1652 = vmatprep.subr.bf16.mxu0 %v1842_v2  ;;  %v443_v16 = vor.u32 %v442_v14, %v438_v9  ;;  %v939_v19 = vrot.slane %v937_v15, 1  ;;  %v1791_v26 = vld [vmem:[%s1944_s28] ss:$0 sps:$4 sm:$0x66]   ;;  %v1060_v31 = vsel %vm448_vm1, %v1544_v27, 0 }
  0x2c   : > { %v994_v28 = vrot.slane %v1791_v26, 1  ;;  %v1793_v29 = vld [vmem:[%s1944_s28] ss:$0 sps:$4 sm:$0xee]   ;;  %v1522_v32 = vld [vmem:[%s2144_s4 + $0xc] sm:$0xf] }
  0x2d   : > { %1595 = vmatmul.mubr.msk.bf16.vlgmr.msra.gmra.mrb[0].mxu1 %vm444_vm2, %v443_v16  ;;  %v940_v21 = vor.u32 %v939_v19, %v935_v18  ;;  %v1792_v30 = vld [vmem:[%s1933_s19] ss:$0 sps:$4 sm:$0x66]   ;;  %v1049_v33 = vshrl.u32 %v1793_v29, 16  ;;  %v1052_v34 = vshll.u32 %v1793_v29, 16  ;;  %v610_v37 = vsel %vm448_vm1, %v1522_v32, 0 }
  0x2e   : > { %1599 = vmatpush3.bf16.msra.mxu1 %v496_v17  ;;  %1600 = vmatprep.mubr.msk.bf16.mxu1 %vm1843_vm3, %v1842_v2  ;;  %v544_v35 = vrot.slane %v1792_v30, 1  ;;  %v1794_v36 = vld [vmem:[%s1933_s19] ss:$0 sps:$4 sm:$0xee]   ;;  %v1547_v42 = vld [vmem:[%s2144_s4 + $0x30] sm:$0xf] }
  0x2f   : > { %1604 = vmatprep.subr.bf16.mxu1 %v1842_v2  ;;  %v1051_v38 = vrot.slane %v1049_v33, 1  ;;  %v1054_v39 = vrot.slane %v1052_v34, 2  ;;  %v599_v40 = vshrl.u32 %v1794_v36, 16  ;;  %v602_v41 = vshll.u32 %v1794_v36, 16  ;;  %v1525_v47 = vld [vmem:[%s2144_s4 + $0x10] sm:$0xf] }
  0x30   : > { %v1110_v46 = vsel %vm448_vm1, %v1547_v42, 0  ;;  %v660_v49 = vsel %vm448_vm1, %v1525_v47, 0  ;;  %v1549_v50 = vld [vmem:[%s2144_s4 + $0x34] sm:$0xf]  ;;  %v1103_v52 = vld [vmem:[%s1955_s30] sm:$0x3] }
  0x31   : > { %v1055_v43 = vor.u32 %v1054_v39, %v1051_v38  ;;  %v601_v44 = vrot.slane %v599_v40, 1  ;;  %v604_v45 = vrot.slane %v602_v41, 2  ;;  %v1795_v51 = vld [vmem:[%s1955_s30] ss:$0 sps:$4 sm:$0x77]   ;;  %v1170_v53 = vsel %vm448_vm1, %v1549_v50, 0 }
  0x32   : > { %v1527_v54 = vld [vmem:[%s2144_s4 + $0x14] sm:$0xf]  ;;  %v1162_v55 = vshll.u32 %v1795_v51, 16  ;;  %v1796_v56 = vld [vmem:[%s1939_s29] ss:$0 sps:$4 sm:$0x77]  }
  0x33   : > { %v605_v48 = vor.u32 %v604_v45, %v601_v44  ;;  %v653_v57 = vld [vmem:[%s1939_s29] sm:$0x3]  ;;  %v720_v58 = vsel %vm448_vm1, %v1527_v54, 0  ;;  %v1160_v59 = vshrl.u32 %v1795_v51, 16  ;;  %v712_v61 = vshll.u32 %v1796_v56, 16 }
  0x34   : > { %v1164_v60 = vrot.slane %v1162_v55, 1  ;;  %v1552_v62 = vld [vmem:[%s2144_s4 + $0x38] sm:$0xf]  ;;  %v710_v0 = vshrl.u32 %v1796_v56, 16  ;;  %v1555_v8 = vld [vmem:[%s2144_s4 + $0x3c] sm:$0xf] }
  0x35   : > { %1649 = vmatmul.mubr.msk.bf16.vlgmr.msra.gmra.mrb[0].mxu0 %vm444_vm2, %v940_v21  ;;  %v714_v1 = vrot.slane %v712_v61, 1  ;;  %v1224_v3 = vsel %vm448_vm1, %v1552_v62, 0  ;;  %v1530_v4 = vld [vmem:[%s2144_s4 + $0x18] sm:$0xf]  ;;  %v1285_v12 = vsel %vm448_vm1, %v1555_v8, 0 }
  0x36   : > { %1653 = vmatpush3.bf16.msra.mxu0 %v999_v22  ;;  %1654 = vmatprep.mubr.msk.bf16.mxu0 %vm1843_vm3, %v1842_v2  ;;  %v1165_v63 = vor.u32 %v1164_v60, %v1160_v59  ;;  %v774_v6 = vsel %vm448_vm1, %v1530_v4, 0  ;;  %v1797_v7 = vld [vmem:[%s1955_s30] ss:$0 sps:$4 sm:$0x66]   ;;  %v1533_v13 = vld [vmem:[%s2144_s4 + $0x1c] sm:$0xf] }
  0x37   : > { %1658 = vmatprep.subr.bf16.mxu0 %v1842_v2  ;;  %v715_v5 = vor.u32 %v714_v1, %v710_v0  ;;  %v1219_v9 = vrot.slane %v1797_v7, 1  ;;  %v1799_v10 = vld [vmem:[%s1955_s30] ss:$0 sps:$4 sm:$0xee]   ;;  %v835_v18 = vsel %vm448_vm1, %v1533_v13, 0 }
  0x38   : > { %v1798_v11 = vld [vmem:[%s1939_s29] ss:$0 sps:$4 sm:$0x66]   ;;  %v1274_v14 = vshrl.u32 %v1799_v10, 16  ;;  %v1277_v15 = vshll.u32 %v1799_v10, 16 }
  0x39   : > { %1601 = vmatmul.mubr.msk.bf16.vlgmr.msra.gmra.mrb[0].mxu1 %vm444_vm2, %v429_v24  ;;  %v769_v16 = vrot.slane %v1798_v11, 1  ;;  %v1800_v17 = vld [vmem:[%s1939_s29] ss:$0 sps:$4 sm:$0xee]  }
  0x3a   : > { %1605 = vmatpush3.bf16.msra.mxu1 %v549_v25  ;;  %1606 = vmatprep.mubr.msk.bf16.mxu1 %vm1843_vm3, %v1842_v2  ;;  %v1276_v19 = vrot.slane %v1274_v14, 1  ;;  %v1279_v20 = vrot.slane %v1277_v15, 2  ;;  %v824_v21 = vshrl.u32 %v1800_v17, 16  ;;  %v827_v22 = vshll.u32 %v1800_v17, 16  ;;  %v1330_v47 = vld [vmem:[%s2146_s6] sm:$0x1] }
  0x3b   : > { %1610 = vmatprep.subr.bf16.mxu1 %v1842_v2  ;;  %v1341_v50 = vld [vmem:[%s2147_s7] sm:$0x1] }
  0x3c   : > { %v1280_v23 = vor.u32 %v1279_v20, %v1276_v19  ;;  %v826_v24 = vrot.slane %v824_v21, 1  ;;  %v829_v25 = vrot.slane %v827_v22, 2 }
  0x3e   : > { %v830_v26 = vor.u32 %v829_v25, %v826_v24 }
  0x41   : > { %1655 = vmatmul.mubr.msk.bf16.vlgmr.msra.gmra.mrb[0].mxu0 %vm444_vm2, %v994_v28 }
  0x42   : > { %1659 = vmatpush3.bf16.msra.mxu0 %v1060_v31  ;;  %1660 = vmatprep.mubr.msk.bf16.mxu0 %vm1843_vm3, %v1842_v2 }
  0x43   : > { %1664 = vmatprep.subr.bf16.mxu0 %v1842_v2 }
  0x45   : > { %1607 = vmatmul.mubr.msk.bf16.vlgmr.msra.gmra.mrb[0].mxu1 %vm444_vm2, %v544_v35 }
  0x46   : > { %1611 = vmatpush3.bf16.msra.mxu1 %v610_v37  ;;  %1612 = vmatprep.mubr.msk.bf16.mxu1 %vm1843_vm3, %v1842_v2 }
  0x47   : > { %1616 = vmatprep.subr.bf16.mxu1 %v1842_v2 }
  0x4d   : > { %1661 = vmatmul.mubr.msk.bf16.vlgmr.msra.gmra.mrb[0].mxu0 %vm444_vm2, %v1055_v43 }
  0x4e   : > { %1665 = vmatpush3.bf16.msra.mxu0 %v1110_v46  ;;  %1666 = vmatprep.mubr.msk.bf16.mxu0 %vm1843_vm3, %v1842_v2 }
  0x4f   : > { %1670 = vmatprep.subr.bf16.mxu0 %v1842_v2 }
  0x51   : > { %1613 = vmatmul.mubr.msk.bf16.vlgmr.msra.gmra.mrb[0].mxu1 %vm444_vm2, %v605_v48 }
  0x52   : > { %1617 = vmatpush3.bf16.msra.mxu1 %v660_v49  ;;  %1618 = vmatprep.mubr.msk.bf16.mxu1 %vm1843_vm3, %v1842_v2 }
  0x53   : > { %1622 = vmatprep.subr.bf16.mxu1 %v1842_v2 }
  0x59   : > { %1667 = vmatmul.mubr.msk.bf16.vlgmr.msra.gmra.mrb[0].mxu0 %vm444_vm2, %v1103_v52 }
  0x5a   : > { %1671 = vmatpush3.bf16.msra.mxu0 %v1170_v53  ;;  %1672 = vmatprep.mubr.msk.bf16.mxu0 %vm1843_vm3, %v1842_v2 }
  0x5b   : > { %1676 = vmatprep.subr.bf16.mxu0 %v1842_v2 }
  0x5d   : > { %1619 = vmatmul.mubr.msk.bf16.vlgmr.msra.gmra.mrb[0].mxu1 %vm444_vm2, %v653_v57 }
  0x5e   : > { %1623 = vmatpush3.bf16.msra.mxu1 %v720_v58  ;;  %1624 = vmatprep.mubr.msk.bf16.mxu1 %vm1843_vm3, %v1842_v2 }
  0x5f   : > { %1628 = vmatprep.subr.bf16.mxu1 %v1842_v2 }
  0x65   : > { %1673 = vmatmul.mubr.msk.bf16.vlgmr.msra.gmra.mrb[0].mxu0 %vm444_vm2, %v1165_v63 }
  0x66   : > { %1677 = vmatpush3.bf16.msra.mxu0 %v1224_v3  ;;  %1678 = vmatprep.mubr.msk.bf16.mxu0 %vm1843_vm3, %v1842_v2 }
  0x67   : > { %1682 = vmatprep.subr.bf16.mxu0 %v1842_v2 }
  0x69   : > { %1625 = vmatmul.mubr.msk.bf16.vlgmr.msra.gmra.mrb[0].mxu1 %vm444_vm2, %v715_v5 }
  0x6a   : > { %1629 = vmatpush3.bf16.msra.mxu1 %v774_v6  ;;  %1630 = vmatprep.mubr.msk.bf16.mxu1 %vm1843_vm3, %v1842_v2 }
  0x6b   : > { %1634 = vmatprep.subr.bf16.mxu1 %v1842_v2 }
  0x71   : > { %1679 = vmatmul.mubr.msk.bf16.vlgmr.msra.gmra.mrb[0].mxu0 %vm444_vm2, %v1219_v9 }
  0x72   : > { %1683 = vmatpush3.bf16.msra.mxu0 %v1285_v12  ;;  %1684 = vmatprep.mubr.msk.bf16.mxu0 %vm1843_vm3, %v1842_v2 }
  0x75   : > { %1631 = vmatmul.mubr.msk.bf16.vlgmr.msra.gmra.mrb[0].mxu1 %vm444_vm2, %v769_v16 }
  0x76   : > { %1635 = vmatpush3.bf16.msra.mxu1 %v835_v18  ;;  %1636 = vmatprep.mubr.msk.bf16.mxu1 %vm1843_vm3, %v1842_v2 }
  0x7d   : > { %1685 = vmatmul.mubr.msk.bf16.vlgmr.msra.gmra.mrb[0].mxu0 %vm444_vm2, %v1280_v23 }
  0x81   : > { %1637 = vmatmul.mubr.msk.bf16.vlgmr.msra.gmra.mrb[0].mxu1 %vm444_vm2, %v830_v26 }
 0x150   : > { %v1321_v27 = vpop.f32.mrb[0].mxu0 }
 0x151   : > { %v1686_v28 = vpop.f32.mrb[1].mxu0 }
 0x152   : > { %v1324_v29 = vpop.f32.mrb[2].mxu0 }
 0x153   : > { %v1687_v30 = vpop.f32.mrb[3].mxu0 }
 0x154   : > { %v871_v31 = vpop.f32.mrb[0].mxu1 }
 0x155   : > { %v1688_v32 = vadd.f32 %v1321_v27, %v871_v31  ;;  %v1638_v33 = vpop.f32.mrb[1].mxu1 }
 0x156   : > { %v874_v34 = vpop.f32.mrb[2].mxu1 }
 0x157   : > { %1329 = vst.msk [vmem:[%s1960_s26] sm:$0xf] %vm1328_vm4, %v1688_v32  ;;  %v1331_v2 = vsel %vm1328_vm4, %v1688_v32, 0.0  ;;  %v1342_v35 = vmul.f32 %v1688_v32, %v1688_v32  ;;  %v1639_v36 = vpop.f32.mrb[3].mxu1 }
 0x158   : > { %v1332_v37 = vrot.slane %v1331_v2, 4 }
 0x159   : > { %v1343_v38 = vsel %vm1328_vm4, %v1342_v35, 0.0 }
 0x15a   : > { %v1333_v39 = vadd.f32 %v1332_v37, %v1331_v2  ;;  %v1344_v40 = vrot.slane %v1343_v38, 4 }
 0x15c   : > { %v1334_v41 = vrot.slane %v1333_v39, 2  ;;  %v1345_v42 = vadd.f32 %v1344_v40, %v1343_v38 }
 0x15e   : > { %v1335_v43 = vadd.f32 %v1334_v41, %v1333_v39  ;;  %v1346_v44 = vrot.slane %v1345_v42, 2 }
 0x160   : > { %v1336_v45 = vrot.slane %v1335_v43, 1  ;;  %v1347_v46 = vadd.f32 %v1346_v44, %v1345_v42 }
 0x162   : > { %v1337_v48 = vadd.f32 %v1336_v45, %v1335_v43  ;;  %v1348_v49 = vrot.slane %v1347_v46, 1 }
 0x164   : > { %v1338_v51 = vadd.f32 %v1337_v48, %v1330_v47  ;;  %v1349_v52 = vadd.f32 %v1348_v49, %v1347_v46 }
 0x166   : > { %1340 = vst.msk [vmem:[%s2146_s6] sm:$0x1] %vm1339_vm5, %v1338_v51  ;;  %v1350_v53 = vadd.f32 %v1349_v52, %v1341_v50 }
 0x168   : > { %1351 = vst.msk [vmem:[%s2147_s7] sm:$0x1] %vm1339_vm5, %v1350_v53 }
 0x169 PF: > { %s2157_s12 = sld [smem:[#allocation4_spill]]  ;;  %s2158_s24 = sld [smem:[#allocation2_spill]] }
 0x16a   : > { %s2159_s25 = sld [smem:[#allocation3_spill]]  ;;  %s2160_s26 = sld [smem:[#allocation5_spill]] }
 0x16b   : > { %s2161_s27 = sld [smem:[#allocation6_spill]] }
 0x16f   : > { %s18_s28 = sadd.s32 1, %s2157_s12  }
 0x170   : > { %p15_p0 = scmp.ge.s32.totalorder %s18_s28, 10  }
 0x172   :  { %17 = sbr.rel (!%p15_p0) target bundleno = 3 (0x3), region = 114 }

// kernel: generator_forward.12
= control target key start
LH: loop header
LB: loop body
LE: loop exit
PB: predicated region body
PF: predicated region fallthrough
CT: control target
= control target key end

     0   :  { %vm156_vm0 = vcmask 125952   ;;  %s385_s0 = inlined_call_operand.vmem [shape: f32[128,16], index: 0, kind: input, shape index: {}]   ;;  %s386_s1 = inlined_call_operand.vmem [shape: f32[1,16], index: 1, kind: input, shape index: {}]   ;;  %s387_s2 = inlined_call_operand.vmem [shape: f32[1,16], index: 2, kind: input, shape index: {}]   ;;  %s388_s3 = inlined_call_operand.vmem [shape: bf16[128,16], index: 3, kind: output, shape index: {}]  }
   0x1   :  { %v14_v0 = vld [vmem:[%s385_s0] sm:$0xff]  ;;  %v15_v4 = vld [vmem:[%s385_s0 + $0x8] sm:$0xff]  ;;  %v16_v5 = vld [vmem:[%s385_s0 + $0x10] sm:$0xff] }
   0x2   :  { %v237_v1 = vld [vmem:[%s386_s1] ss:$0 sm:$0xff]  ;;  %v17_v6 = vld [vmem:[%s385_s0 + $0x18] sm:$0xff]  ;;  %v19_v11 = vld [vmem:[%s385_s0 + $0x28] sm:$0xff] }
   0x3   :  { %v242_v2 = vld [vmem:[%s387_s2] ss:$0 sm:$0xff]  ;;  %v37_v3 = vmul.f32 %v237_v1, %v14_v0  ;;  %v38_v7 = vmul.f32 %v237_v1, %v15_v4  ;;  %v39_v8 = vmul.f32 %v237_v1, %v16_v5  ;;  %v40_v9 = vmul.f32 %v237_v1, %v17_v6  ;;  %v20_v12 = vld [vmem:[%s385_s0 + $0x30] sm:$0xff]  ;;  %v21_v17 = vld [vmem:[%s385_s0 + $0x38] sm:$0xff] }
   0x4   :  { %v18_v10 = vld [vmem:[%s385_s0 + $0x20] sm:$0xff]  ;;  %v42_v15 = vmul.f32 %v237_v1, %v19_v11  ;;  %v43_v16 = vmul.f32 %v237_v1, %v20_v12  ;;  %v44_v21 = vmul.f32 %v237_v1, %v21_v17  ;;  %v23_v35 = vld [vmem:[%s385_s0 + $0x48] sm:$0xff]  ;;  %v24_v36 = vld [vmem:[%s385_s0 + $0x50] sm:$0xff] }
   0x5   :  { %v60_v13 = vadd.f32 %v242_v2, %v37_v3  ;;  %v41_v14 = vmul.f32 %v237_v1, %v18_v10  ;;  %v61_v18 = vadd.f32 %v242_v2, %v38_v7  ;;  %v62_v19 = vadd.f32 %v242_v2, %v39_v8  ;;  %v22_v30 = vld [vmem:[%s385_s0 + $0x40] sm:$0xff]  ;;  %v25_v37 = vld [vmem:[%s385_s0 + $0x58] sm:$0xff]  ;;  %v27_v43 = vld [vmem:[%s385_s0 + $0x68] sm:$0xff] }
   0x6   :  { %v63_v20 = vadd.f32 %v242_v2, %v40_v9  ;;  %v65_v24 = vadd.f32 %v242_v2, %v42_v15  ;;  %v66_v25 = vadd.f32 %v242_v2, %v43_v16  ;;  %v67_v29 = vadd.f32 %v242_v2, %v44_v21  ;;  %v26_v42 = vld [vmem:[%s385_s0 + $0x60] sm:$0xff]  ;;  %v28_v44 = vld [vmem:[%s385_s0 + $0x70] sm:$0xff]  ;;  %v29_v49 = vld [vmem:[%s385_s0 + $0x78] sm:$0xff] }
   0x7   :  { %v76_v22 = vmax.f32 %v60_v13, 0.0  ;;  %v64_v23 = vadd.f32 %v242_v2, %v41_v14  ;;  %v77_v26 = vmax.f32 %v61_v18, 0.0  ;;  %v78_v27 = vmax.f32 %v62_v19, 0.0 }
   0x8   :  { %v79_v28 = vmax.f32 %v63_v20, 0.0  ;;  %v81_v33 = vmax.f32 %v65_v24, 0.0  ;;  %v82_v34 = vmax.f32 %v66_v25, 0.0  ;;  %v83_v41 = vmax.f32 %v67_v29, 0.0 }
   0x9   :  { %v195_v31 = vpack.c.bf16 %v76_v22, %v76_v22  ;;  %v80_v32 = vmax.f32 %v64_v23, 0.0  ;;  %v196_v38 = vpack.c.bf16 %v77_v26, %v77_v26  ;;  %v197_v39 = vpack.c.bf16 %v78_v27, %v78_v27 }
   0xa   :  { %v198_v40 = vpack.c.bf16 %v79_v28, %v79_v28  ;;  %v200_v46 = vpack.c.bf16 %v81_v33, %v81_v33  ;;  %v201_v47 = vpack.c.bf16 %v82_v34, %v82_v34  ;;  %v45_v48 = vmul.f32 %v237_v1, %v22_v30 }
   0xb   :  { %157 = vst.msk [vmem:[%s388_s3] sm:$0xf] %vm156_vm0, %v195_v31  ;;  %v199_v45 = vpack.c.bf16 %v80_v32, %v80_v32  ;;  %158 = vst.msk [vmem:[%s388_s3 + $0x4] sm:$0xf] %vm156_vm0, %v196_v38  ;;  %v202_v50 = vpack.c.bf16 %v83_v41, %v83_v41  ;;  %v46_v51 = vmul.f32 %v237_v1, %v23_v35 }
   0xc   :  { %159 = vst.msk [vmem:[%s388_s3 + $0x8] sm:$0xf] %vm156_vm0, %v197_v39  ;;  %160 = vst.msk [vmem:[%s388_s3 + $0xc] sm:$0xf] %vm156_vm0, %v198_v40  ;;  %v47_v52 = vmul.f32 %v237_v1, %v24_v36  ;;  %v48_v53 = vmul.f32 %v237_v1, %v25_v37  ;;  %v68_v54 = vadd.f32 %v242_v2, %v45_v48 }
   0xd   :  { %161 = vst.msk [vmem:[%s388_s3 + $0x10] sm:$0xf] %vm156_vm0, %v199_v45  ;;  %162 = vst.msk [vmem:[%s388_s3 + $0x14] sm:$0xf] %vm156_vm0, %v200_v46  ;;  %v49_v55 = vmul.f32 %v237_v1, %v26_v42  ;;  %v50_v56 = vmul.f32 %v237_v1, %v27_v43  ;;  %v51_v57 = vmul.f32 %v237_v1, %v28_v44 }
   0xe   :  { %163 = vst.msk [vmem:[%s388_s3 + $0x18] sm:$0xf] %vm156_vm0, %v201_v47  ;;  %164 = vst.msk [vmem:[%s388_s3 + $0x1c] sm:$0xf] %vm156_vm0, %v202_v50  ;;  %v69_v58 = vadd.f32 %v242_v2, %v46_v51  ;;  %v70_v59 = vadd.f32 %v242_v2, %v47_v52  ;;  %v71_v60 = vadd.f32 %v242_v2, %v48_v53  ;;  %v84_v62 = vmax.f32 %v68_v54, 0.0 }
   0xf   :  { %v52_v61 = vmul.f32 %v237_v1, %v29_v49  ;;  %v72_v63 = vadd.f32 %v242_v2, %v49_v55  ;;  %v73_v0 = vadd.f32 %v242_v2, %v50_v56  ;;  %v74_v3 = vadd.f32 %v242_v2, %v51_v57 }
  0x10   :  { %v85_v4 = vmax.f32 %v69_v58, 0.0  ;;  %v86_v5 = vmax.f32 %v70_v59, 0.0  ;;  %v87_v6 = vmax.f32 %v71_v60, 0.0  ;;  %v203_v8 = vpack.c.bf16 %v84_v62, %v84_v62 }
  0x11   :  { %v75_v7 = vadd.f32 %v242_v2, %v52_v61  ;;  %v88_v9 = vmax.f32 %v72_v63, 0.0  ;;  %v89_v10 = vmax.f32 %v73_v0, 0.0  ;;  %v90_v11 = vmax.f32 %v74_v3, 0.0 }
  0x12   :  { %v204_v12 = vpack.c.bf16 %v85_v4, %v85_v4  ;;  %v205_v13 = vpack.c.bf16 %v86_v5, %v86_v5  ;;  %v206_v14 = vpack.c.bf16 %v87_v6, %v87_v6  ;;  %165 = vst.msk [vmem:[%s388_s3 + $0x20] sm:$0xf] %vm156_vm0, %v203_v8 }
  0x13   :  { %v91_v1 = vmax.f32 %v75_v7, 0.0  ;;  %v207_v15 = vpack.c.bf16 %v88_v9, %v88_v9  ;;  %v208_v16 = vpack.c.bf16 %v89_v10, %v89_v10  ;;  %v209_v17 = vpack.c.bf16 %v90_v11, %v90_v11 }
  0x14   :  { %166 = vst.msk [vmem:[%s388_s3 + $0x24] sm:$0xf] %vm156_vm0, %v204_v12  ;;  %167 = vst.msk [vmem:[%s388_s3 + $0x28] sm:$0xf] %vm156_vm0, %v205_v13 }
  0x15   :  { %168 = vst.msk [vmem:[%s388_s3 + $0x2c] sm:$0xf] %vm156_vm0, %v206_v14  ;;  %v210_v2 = vpack.c.bf16 %v91_v1, %v91_v1  ;;  %169 = vst.msk [vmem:[%s388_s3 + $0x30] sm:$0xf] %vm156_vm0, %v207_v15 }
  0x16   :  { %170 = vst.msk [vmem:[%s388_s3 + $0x34] sm:$0xf] %vm156_vm0, %v208_v16  ;;  %171 = vst.msk [vmem:[%s388_s3 + $0x38] sm:$0xf] %vm156_vm0, %v209_v17 }
  0x17   :  { %172 = vst.msk [vmem:[%s388_s3 + $0x3c] sm:$0xf] %vm156_vm0, %v210_v2 }

// kernel: generator_forward.14
= control target key start
LH: loop header
LB: loop body
LE: loop exit
PB: predicated region body
PF: predicated region fallthrough
CT: control target
= control target key end

     0   :  { %vm540_vm0 = vcmask 60416   ;;  %s1345_s0 = inlined_call_operand.vmem [shape: f32[512,8], index: 0, kind: input, shape index: {}]   ;;  %s1346_s1 = inlined_call_operand.vmem [shape: f32[1,8], index: 1, kind: input, shape index: {}]   ;;  %s1347_s2 = inlined_call_operand.vmem [shape: f32[1,8], index: 2, kind: input, shape index: {}]   ;;  %s1348_s3 = inlined_call_operand.vmem [shape: bf16[512,8], index: 3, kind: output, shape index: {}]  }
   0x1   :  { %v14_v0 = vld [vmem:[%s1345_s0] sm:$0xff]  ;;  %v15_v4 = vld [vmem:[%s1345_s0 + $0x8] sm:$0xff]  ;;  %v16_v5 = vld [vmem:[%s1345_s0 + $0x10] sm:$0xff] }
   0x2   :  { %v765_v1 = vld [vmem:[%s1346_s1] ss:$0 sm:$0xff]  ;;  %v17_v6 = vld [vmem:[%s1345_s0 + $0x18] sm:$0xff]  ;;  %v19_v11 = vld [vmem:[%s1345_s0 + $0x28] sm:$0xff] }
   0x3   :  { %v770_v2 = vld [vmem:[%s1347_s2] ss:$0 sm:$0xff]  ;;  %v85_v3 = vmul.f32 %v765_v1, %v14_v0  ;;  %v86_v7 = vmul.f32 %v765_v1, %v15_v4  ;;  %v87_v8 = vmul.f32 %v765_v1, %v16_v5  ;;  %v88_v9 = vmul.f32 %v765_v1, %v17_v6  ;;  %v20_v12 = vld [vmem:[%s1345_s0 + $0x30] sm:$0xff]  ;;  %v21_v17 = vld [vmem:[%s1345_s0 + $0x38] sm:$0xff] }
   0x4   :  { %v18_v10 = vld [vmem:[%s1345_s0 + $0x20] sm:$0xff]  ;;  %v90_v15 = vmul.f32 %v765_v1, %v19_v11  ;;  %v91_v16 = vmul.f32 %v765_v1, %v20_v12  ;;  %v92_v21 = vmul.f32 %v765_v1, %v21_v17  ;;  %v23_v35 = vld [vmem:[%s1345_s0 + $0x48] sm:$0xff]  ;;  %v24_v36 = vld [vmem:[%s1345_s0 + $0x50] sm:$0xff] }
   0x5   :  { %v156_v13 = vadd.f32 %v770_v2, %v85_v3  ;;  %v89_v14 = vmul.f32 %v765_v1, %v18_v10  ;;  %v157_v18 = vadd.f32 %v770_v2, %v86_v7  ;;  %v158_v19 = vadd.f32 %v770_v2, %v87_v8  ;;  %v22_v30 = vld [vmem:[%s1345_s0 + $0x40] sm:$0xff]  ;;  %v25_v37 = vld [vmem:[%s1345_s0 + $0x58] sm:$0xff]  ;;  %v27_v43 = vld [vmem:[%s1345_s0 + $0x68] sm:$0xff] }
   0x6   :  { %v159_v20 = vadd.f32 %v770_v2, %v88_v9  ;;  %v161_v24 = vadd.f32 %v770_v2, %v90_v15  ;;  %v162_v25 = vadd.f32 %v770_v2, %v91_v16  ;;  %v163_v29 = vadd.f32 %v770_v2, %v92_v21  ;;  %v26_v42 = vld [vmem:[%s1345_s0 + $0x60] sm:$0xff]  ;;  %v28_v44 = vld [vmem:[%s1345_s0 + $0x70] sm:$0xff]  ;;  %v29_v49 = vld [vmem:[%s1345_s0 + $0x78] sm:$0xff] }
   0x7   :  { %v220_v22 = vmax.f32 %v156_v13, 0.0  ;;  %v160_v23 = vadd.f32 %v770_v2, %v89_v14  ;;  %v221_v26 = vmax.f32 %v157_v18, 0.0  ;;  %v222_v27 = vmax.f32 %v158_v19, 0.0  ;;  %v30_v8 = vld [vmem:[%s1345_s0 + $0x80] sm:$0xff]  ;;  %v31_v13 = vld [vmem:[%s1345_s0 + $0x88] sm:$0xff]  ;;  %v32_v14 = vld [vmem:[%s1345_s0 + $0x90] sm:$0xff] }
   0x8   :  { %v223_v28 = vmax.f32 %v159_v20, 0.0  ;;  %v225_v33 = vmax.f32 %v161_v24, 0.0  ;;  %v226_v34 = vmax.f32 %v162_v25, 0.0  ;;  %v227_v41 = vmax.f32 %v163_v29, 0.0  ;;  %v33_v15 = vld [vmem:[%s1345_s0 + $0x98] sm:$0xff]  ;;  %v34_v20 = vld [vmem:[%s1345_s0 + $0xa0] sm:$0xff] }
   0x9   :  { %v675_v31 = vpack.c.bf16 %v220_v22, %v220_v22  ;;  %v224_v32 = vmax.f32 %v160_v23, 0.0  ;;  %v676_v38 = vpack.c.bf16 %v221_v26, %v221_v26  ;;  %v677_v39 = vpack.c.bf16 %v222_v27, %v222_v27  ;;  %v35_v21 = vld [vmem:[%s1345_s0 + $0xa8] sm:$0xff]  ;;  %v36_v22 = vld [vmem:[%s1345_s0 + $0xb0] sm:$0xff]  ;;  %v37_v27 = vld [vmem:[%s1345_s0 + $0xb8] sm:$0xff] }
   0xa   :  { %v678_v40 = vpack.c.bf16 %v223_v28, %v223_v28  ;;  %v680_v46 = vpack.c.bf16 %v225_v33, %v225_v33  ;;  %v681_v47 = vpack.c.bf16 %v226_v34, %v226_v34  ;;  %v93_v48 = vmul.f32 %v765_v1, %v22_v30 }
   0xb   :  { %541 = vst.msk [vmem:[%s1348_s3] sm:$0xf] %vm540_vm0, %v675_v31  ;;  %v679_v45 = vpack.c.bf16 %v224_v32, %v224_v32  ;;  %542 = vst.msk [vmem:[%s1348_s3 + $0x4] sm:$0xf] %vm540_vm0, %v676_v38  ;;  %v682_v50 = vpack.c.bf16 %v227_v41, %v227_v41  ;;  %v94_v51 = vmul.f32 %v765_v1, %v23_v35 }
   0xc   :  { %543 = vst.msk [vmem:[%s1348_s3 + $0x8] sm:$0xf] %vm540_vm0, %v677_v39  ;;  %544 = vst.msk [vmem:[%s1348_s3 + $0xc] sm:$0xf] %vm540_vm0, %v678_v40  ;;  %v95_v52 = vmul.f32 %v765_v1, %v24_v36  ;;  %v96_v53 = vmul.f32 %v765_v1, %v25_v37  ;;  %v164_v54 = vadd.f32 %v770_v2, %v93_v48  ;;  %v38_v48 = vld [vmem:[%s1345_s0 + $0xc0] sm:$0xff] }
   0xd   :  { %545 = vst.msk [vmem:[%s1348_s3 + $0x10] sm:$0xf] %vm540_vm0, %v679_v45  ;;  %546 = vst.msk [vmem:[%s1348_s3 + $0x14] sm:$0xf] %vm540_vm0, %v680_v46  ;;  %v97_v55 = vmul.f32 %v765_v1, %v26_v42  ;;  %v98_v56 = vmul.f32 %v765_v1, %v27_v43  ;;  %v99_v57 = vmul.f32 %v765_v1, %v28_v44 }
   0xe   :  { %547 = vst.msk [vmem:[%s1348_s3 + $0x18] sm:$0xf] %vm540_vm0, %v681_v47  ;;  %548 = vst.msk [vmem:[%s1348_s3 + $0x1c] sm:$0xf] %vm540_vm0, %v682_v50  ;;  %v165_v58 = vadd.f32 %v770_v2, %v94_v51  ;;  %v166_v59 = vadd.f32 %v770_v2, %v95_v52  ;;  %v167_v60 = vadd.f32 %v770_v2, %v96_v53  ;;  %v228_v62 = vmax.f32 %v164_v54, 0.0  ;;  %v39_v53 = vld [vmem:[%s1345_s0 + $0xc8] sm:$0xff] }
   0xf   :  { %v100_v61 = vmul.f32 %v765_v1, %v29_v49  ;;  %v168_v63 = vadd.f32 %v770_v2, %v97_v55  ;;  %v169_v0 = vadd.f32 %v770_v2, %v98_v56  ;;  %v170_v3 = vadd.f32 %v770_v2, %v99_v57  ;;  %v40_v54 = vld [vmem:[%s1345_s0 + $0xd0] sm:$0xff]  ;;  %v41_v55 = vld [vmem:[%s1345_s0 + $0xd8] sm:$0xff] }
  0x10   :  { %v229_v4 = vmax.f32 %v165_v58, 0.0  ;;  %v230_v5 = vmax.f32 %v166_v59, 0.0  ;;  %v231_v6 = vmax.f32 %v167_v60, 0.0  ;;  %v683_v9 = vpack.c.bf16 %v228_v62, %v228_v62  ;;  %v42_v60 = vld [vmem:[%s1345_s0 + $0xe0] sm:$0xff]  ;;  %v44_v62 = vld [vmem:[%s1345_s0 + $0xf0] sm:$0xff] }
  0x11   :  { %v171_v7 = vadd.f32 %v770_v2, %v100_v61  ;;  %v232_v10 = vmax.f32 %v168_v63, 0.0  ;;  %v233_v11 = vmax.f32 %v169_v0, 0.0  ;;  %v234_v12 = vmax.f32 %v170_v3, 0.0  ;;  %v43_v61 = vld [vmem:[%s1345_s0 + $0xe8] sm:$0xff] }
  0x12   :  { %v684_v16 = vpack.c.bf16 %v229_v4, %v229_v4  ;;  %v685_v17 = vpack.c.bf16 %v230_v5, %v230_v5  ;;  %v686_v18 = vpack.c.bf16 %v231_v6, %v231_v6  ;;  %549 = vst.msk [vmem:[%s1348_s3 + $0x20] sm:$0xf] %vm540_vm0, %v683_v9  ;;  %v101_v26 = vmul.f32 %v765_v1, %v30_v8  ;;  %v45_v5 = vld [vmem:[%s1345_s0 + $0xf8] sm:$0xff] }
  0x13   :  { %v235_v19 = vmax.f32 %v171_v7, 0.0  ;;  %v687_v23 = vpack.c.bf16 %v232_v10, %v232_v10  ;;  %v688_v24 = vpack.c.bf16 %v233_v11, %v233_v11  ;;  %v689_v25 = vpack.c.bf16 %v234_v12, %v234_v12 }
  0x14   :  { %550 = vst.msk [vmem:[%s1348_s3 + $0x24] sm:$0xf] %vm540_vm0, %v684_v16  ;;  %551 = vst.msk [vmem:[%s1348_s3 + $0x28] sm:$0xf] %vm540_vm0, %v685_v17  ;;  %v102_v29 = vmul.f32 %v765_v1, %v31_v13  ;;  %v103_v30 = vmul.f32 %v765_v1, %v32_v14  ;;  %v104_v31 = vmul.f32 %v765_v1, %v33_v15 }
  0x15   :  { %552 = vst.msk [vmem:[%s1348_s3 + $0x2c] sm:$0xf] %vm540_vm0, %v686_v18  ;;  %v690_v28 = vpack.c.bf16 %v235_v19, %v235_v19  ;;  %553 = vst.msk [vmem:[%s1348_s3 + $0x30] sm:$0xf] %vm540_vm0, %v687_v23  ;;  %v172_v32 = vadd.f32 %v770_v2, %v101_v26  ;;  %v105_v33 = vmul.f32 %v765_v1, %v34_v20  ;;  %v46_v26 = vld [vmem:[%s1345_s0 + $0x100] sm:$0xff] }
  0x16   :  { %554 = vst.msk [vmem:[%s1348_s3 + $0x34] sm:$0xf] %vm540_vm0, %v688_v24  ;;  %555 = vst.msk [vmem:[%s1348_s3 + $0x38] sm:$0xf] %vm540_vm0, %v689_v25  ;;  %v106_v34 = vmul.f32 %v765_v1, %v35_v21  ;;  %v107_v35 = vmul.f32 %v765_v1, %v36_v22  ;;  %v173_v36 = vadd.f32 %v770_v2, %v102_v29 }
  0x17   :  { %556 = vst.msk [vmem:[%s1348_s3 + $0x3c] sm:$0xf] %vm540_vm0, %v690_v28  ;;  %v174_v37 = vadd.f32 %v770_v2, %v103_v30  ;;  %v175_v38 = vadd.f32 %v770_v2, %v104_v31  ;;  %v108_v39 = vmul.f32 %v765_v1, %v37_v27  ;;  %v236_v40 = vmax.f32 %v172_v32, 0.0  ;;  %v47_v31 = vld [vmem:[%s1345_s0 + $0x108] sm:$0xff]  ;;  %v48_v32 = vld [vmem:[%s1345_s0 + $0x110] sm:$0xff] }
  0x18   :  { %v176_v41 = vadd.f32 %v770_v2, %v105_v33  ;;  %v177_v42 = vadd.f32 %v770_v2, %v106_v34  ;;  %v178_v43 = vadd.f32 %v770_v2, %v107_v35  ;;  %v237_v44 = vmax.f32 %v173_v36, 0.0  ;;  %v49_v33 = vld [vmem:[%s1345_s0 + $0x118] sm:$0xff] }
  0x19   :  { %v238_v45 = vmax.f32 %v174_v37, 0.0  ;;  %v239_v46 = vmax.f32 %v175_v38, 0.0  ;;  %v179_v47 = vadd.f32 %v770_v2, %v108_v39  ;;  %v691_v49 = vpack.c.bf16 %v236_v40, %v236_v40  ;;  %v50_v38 = vld [vmem:[%s1345_s0 + $0x120] sm:$0xff]  ;;  %v51_v39 = vld [vmem:[%s1345_s0 + $0x128] sm:$0xff]  ;;  %v52_v40 = vld [vmem:[%s1345_s0 + $0x130] sm:$0xff] }
  0x1a   :  { %v240_v50 = vmax.f32 %v176_v41, 0.0  ;;  %v241_v51 = vmax.f32 %v177_v42, 0.0  ;;  %v242_v52 = vmax.f32 %v178_v43, 0.0  ;;  %v692_v56 = vpack.c.bf16 %v237_v44, %v237_v44 }
  0x1b   :  { %v693_v57 = vpack.c.bf16 %v238_v45, %v238_v45  ;;  %v694_v58 = vpack.c.bf16 %v239_v46, %v239_v46  ;;  %v243_v59 = vmax.f32 %v179_v47, 0.0  ;;  %557 = vst.msk [vmem:[%s1348_s3 + $0x40] sm:$0xf] %vm540_vm0, %v691_v49  ;;  %v109_v4 = vmul.f32 %v765_v1, %v38_v48  ;;  %v53_v45 = vld [vmem:[%s1345_s0 + $0x138] sm:$0xff] }
  0x1c   :  { %v695_v63 = vpack.c.bf16 %v240_v50, %v240_v50  ;;  %v696_v0 = vpack.c.bf16 %v241_v51, %v241_v51  ;;  %v697_v3 = vpack.c.bf16 %v242_v52, %v242_v52  ;;  %558 = vst.msk [vmem:[%s1348_s3 + $0x44] sm:$0xf] %vm540_vm0, %v692_v56  ;;  %v110_v7 = vmul.f32 %v765_v1, %v39_v53 }
  0x1d   :  { %559 = vst.msk [vmem:[%s1348_s3 + $0x48] sm:$0xf] %vm540_vm0, %v693_v57  ;;  %560 = vst.msk [vmem:[%s1348_s3 + $0x4c] sm:$0xf] %vm540_vm0, %v694_v58  ;;  %v698_v6 = vpack.c.bf16 %v243_v59, %v243_v59  ;;  %v111_v8 = vmul.f32 %v765_v1, %v40_v54  ;;  %v112_v9 = vmul.f32 %v765_v1, %v41_v55 }
  0x1e   :  { %561 = vst.msk [vmem:[%s1348_s3 + $0x50] sm:$0xf] %vm540_vm0, %v695_v63  ;;  %562 = vst.msk [vmem:[%s1348_s3 + $0x54] sm:$0xf] %vm540_vm0, %v696_v0  ;;  %v180_v10 = vadd.f32 %v770_v2, %v109_v4  ;;  %v113_v11 = vmul.f32 %v765_v1, %v42_v60  ;;  %v114_v12 = vmul.f32 %v765_v1, %v43_v61  ;;  %v54_v4 = vld [vmem:[%s1345_s0 + $0x140] sm:$0xff] }
  0x1f   :  { %563 = vst.msk [vmem:[%s1348_s3 + $0x58] sm:$0xf] %vm540_vm0, %v697_v3  ;;  %v115_v13 = vmul.f32 %v765_v1, %v44_v62  ;;  %564 = vst.msk [vmem:[%s1348_s3 + $0x5c] sm:$0xf] %vm540_vm0, %v698_v6  ;;  %v181_v14 = vadd.f32 %v770_v2, %v110_v7  ;;  %v182_v15 = vadd.f32 %v770_v2, %v111_v8 }
  0x20   :  { %v183_v16 = vadd.f32 %v770_v2, %v112_v9  ;;  %v116_v17 = vmul.f32 %v765_v1, %v45_v5  ;;  %v244_v18 = vmax.f32 %v180_v10, 0.0  ;;  %v184_v19 = vadd.f32 %v770_v2, %v113_v11  ;;  %v55_v9 = vld [vmem:[%s1345_s0 + $0x148] sm:$0xff]  ;;  %v56_v10 = vld [vmem:[%s1345_s0 + $0x150] sm:$0xff]  ;;  %v57_v11 = vld [vmem:[%s1345_s0 + $0x158] sm:$0xff] }
  0x21   :  { %v185_v20 = vadd.f32 %v770_v2, %v114_v12  ;;  %v186_v21 = vadd.f32 %v770_v2, %v115_v13  ;;  %v245_v22 = vmax.f32 %v181_v14, 0.0  ;;  %v246_v23 = vmax.f32 %v182_v15, 0.0 }
  0x22   :  { %v247_v24 = vmax.f32 %v183_v16, 0.0  ;;  %v187_v25 = vadd.f32 %v770_v2, %v116_v17  ;;  %v699_v27 = vpack.c.bf16 %v244_v18, %v244_v18  ;;  %v248_v28 = vmax.f32 %v184_v19, 0.0  ;;  %v58_v16 = vld [vmem:[%s1345_s0 + $0x160] sm:$0xff]  ;;  %v59_v17 = vld [vmem:[%s1345_s0 + $0x168] sm:$0xff]  ;;  %v60_v18 = vld [vmem:[%s1345_s0 + $0x170] sm:$0xff] }
  0x23   :  { %v249_v29 = vmax.f32 %v185_v20, 0.0  ;;  %v250_v30 = vmax.f32 %v186_v21, 0.0  ;;  %v700_v34 = vpack.c.bf16 %v245_v22, %v245_v22  ;;  %v701_v35 = vpack.c.bf16 %v246_v23, %v246_v23  ;;  %v61_v23 = vld [vmem:[%s1345_s0 + $0x178] sm:$0xff] }
  0x24   :  { %v702_v36 = vpack.c.bf16 %v247_v24, %v247_v24  ;;  %v251_v37 = vmax.f32 %v187_v25, 0.0  ;;  %565 = vst.msk [vmem:[%s1348_s3 + $0x60] sm:$0xf] %vm540_vm0, %v699_v27  ;;  %v703_v41 = vpack.c.bf16 %v248_v28, %v248_v28  ;;  %v117_v44 = vmul.f32 %v765_v1, %v46_v26 }
  0x25   :  { %v704_v42 = vpack.c.bf16 %v249_v29, %v249_v29  ;;  %v705_v43 = vpack.c.bf16 %v250_v30, %v250_v30  ;;  %566 = vst.msk [vmem:[%s1348_s3 + $0x64] sm:$0xf] %vm540_vm0, %v700_v34  ;;  %567 = vst.msk [vmem:[%s1348_s3 + $0x68] sm:$0xf] %vm540_vm0, %v701_v35  ;;  %v118_v47 = vmul.f32 %v765_v1, %v47_v31 }
  0x26   :  { %568 = vst.msk [vmem:[%s1348_s3 + $0x6c] sm:$0xf] %vm540_vm0, %v702_v36  ;;  %v706_v46 = vpack.c.bf16 %v251_v37, %v251_v37  ;;  %v119_v48 = vmul.f32 %v765_v1, %v48_v32  ;;  %v120_v49 = vmul.f32 %v765_v1, %v49_v33  ;;  %569 = vst.msk [vmem:[%s1348_s3 + $0x70] sm:$0xf] %vm540_vm0, %v703_v41 }
  0x27   :  { %570 = vst.msk [vmem:[%s1348_s3 + $0x74] sm:$0xf] %vm540_vm0, %v704_v42  ;;  %571 = vst.msk [vmem:[%s1348_s3 + $0x78] sm:$0xf] %vm540_vm0, %v705_v43  ;;  %v188_v50 = vadd.f32 %v770_v2, %v117_v44  ;;  %v121_v51 = vmul.f32 %v765_v1, %v50_v38  ;;  %v122_v52 = vmul.f32 %v765_v1, %v51_v39  ;;  %v62_v44 = vld [vmem:[%s1345_s0 + $0x180] sm:$0xff] }
  0x28   :  { %v123_v53 = vmul.f32 %v765_v1, %v52_v40  ;;  %572 = vst.msk [vmem:[%s1348_s3 + $0x7c] sm:$0xf] %vm540_vm0, %v706_v46  ;;  %v189_v54 = vadd.f32 %v770_v2, %v118_v47  ;;  %v190_v55 = vadd.f32 %v770_v2, %v119_v48  ;;  %v191_v56 = vadd.f32 %v770_v2, %v120_v49  ;;  %v63_v49 = vld [vmem:[%s1345_s0 + $0x188] sm:$0xff] }
  0x29   :  { %v124_v57 = vmul.f32 %v765_v1, %v53_v45  ;;  %v252_v58 = vmax.f32 %v188_v50, 0.0  ;;  %v192_v59 = vadd.f32 %v770_v2, %v121_v51  ;;  %v193_v60 = vadd.f32 %v770_v2, %v122_v52  ;;  %v64_v50 = vld [vmem:[%s1345_s0 + $0x190] sm:$0xff]  ;;  %v65_v51 = vld [vmem:[%s1345_s0 + $0x198] sm:$0xff] }
  0x2a   :  { %v194_v61 = vadd.f32 %v770_v2, %v123_v53  ;;  %v253_v62 = vmax.f32 %v189_v54, 0.0  ;;  %v254_v63 = vmax.f32 %v190_v55, 0.0  ;;  %v255_v0 = vmax.f32 %v191_v56, 0.0  ;;  %v66_v56 = vld [vmem:[%s1345_s0 + $0x1a0] sm:$0xff] }
  0x2b   :  { %v195_v3 = vadd.f32 %v770_v2, %v124_v57  ;;  %v707_v5 = vpack.c.bf16 %v252_v58, %v252_v58  ;;  %v256_v6 = vmax.f32 %v192_v59, 0.0  ;;  %v257_v7 = vmax.f32 %v193_v60, 0.0  ;;  %v67_v57 = vld [vmem:[%s1345_s0 + $0x1a8] sm:$0xff]  ;;  %v68_v58 = vld [vmem:[%s1345_s0 + $0x1b0] sm:$0xff] }
  0x2c   :  { %v258_v8 = vmax.f32 %v194_v61, 0.0  ;;  %v708_v12 = vpack.c.bf16 %v253_v62, %v253_v62  ;;  %v709_v13 = vpack.c.bf16 %v254_v63, %v254_v63  ;;  %v710_v14 = vpack.c.bf16 %v255_v0, %v255_v0  ;;  %v69_v63 = vld [vmem:[%s1345_s0 + $0x1b8] sm:$0xff] }
  0x2d   :  { %v259_v15 = vmax.f32 %v195_v3, 0.0  ;;  %573 = vst.msk [vmem:[%s1348_s3 + $0x80] sm:$0xf] %vm540_vm0, %v707_v5  ;;  %v711_v19 = vpack.c.bf16 %v256_v6, %v256_v6  ;;  %v712_v20 = vpack.c.bf16 %v257_v7, %v257_v7  ;;  %v125_v22 = vmul.f32 %v765_v1, %v54_v4 }
  0x2e   :  { %v713_v21 = vpack.c.bf16 %v258_v8, %v258_v8  ;;  %574 = vst.msk [vmem:[%s1348_s3 + $0x84] sm:$0xf] %vm540_vm0, %v708_v12  ;;  %575 = vst.msk [vmem:[%s1348_s3 + $0x88] sm:$0xf] %vm540_vm0, %v709_v13  ;;  %v126_v25 = vmul.f32 %v765_v1, %v55_v9  ;;  %v127_v26 = vmul.f32 %v765_v1, %v56_v10 }
  0x2f   :  { %576 = vst.msk [vmem:[%s1348_s3 + $0x8c] sm:$0xf] %vm540_vm0, %v710_v14  ;;  %v714_v24 = vpack.c.bf16 %v259_v15, %v259_v15  ;;  %v128_v27 = vmul.f32 %v765_v1, %v57_v11  ;;  %577 = vst.msk [vmem:[%s1348_s3 + $0x90] sm:$0xf] %vm540_vm0, %v711_v19  ;;  %v196_v28 = vadd.f32 %v770_v2, %v125_v22  ;;  %v70_v22 = vld [vmem:[%s1345_s0 + $0x1c0] sm:$0xff] }
  0x30   :  { %578 = vst.msk [vmem:[%s1348_s3 + $0x94] sm:$0xf] %vm540_vm0, %v712_v20  ;;  %579 = vst.msk [vmem:[%s1348_s3 + $0x98] sm:$0xf] %vm540_vm0, %v713_v21  ;;  %v129_v29 = vmul.f32 %v765_v1, %v58_v16  ;;  %v130_v30 = vmul.f32 %v765_v1, %v59_v17  ;;  %v131_v31 = vmul.f32 %v765_v1, %v60_v18 }
  0x31   :  { %580 = vst.msk [vmem:[%s1348_s3 + $0x9c] sm:$0xf] %vm540_vm0, %v714_v24  ;;  %v197_v32 = vadd.f32 %v770_v2, %v126_v25  ;;  %v198_v33 = vadd.f32 %v770_v2, %v127_v26  ;;  %v199_v34 = vadd.f32 %v770_v2, %v128_v27  ;;  %v132_v35 = vmul.f32 %v765_v1, %v61_v23  ;;  %v71_v27 = vld [vmem:[%s1345_s0 + $0x1c8] sm:$0xff] }
  0x32   :  { %v260_v36 = vmax.f32 %v196_v28, 0.0  ;;  %v200_v37 = vadd.f32 %v770_v2, %v129_v29  ;;  %v201_v38 = vadd.f32 %v770_v2, %v130_v30  ;;  %v202_v39 = vadd.f32 %v770_v2, %v131_v31  ;;  %v72_v28 = vld [vmem:[%s1345_s0 + $0x1d0] sm:$0xff]  ;;  %v73_v29 = vld [vmem:[%s1345_s0 + $0x1d8] sm:$0xff] }
  0x33   :  { %v261_v40 = vmax.f32 %v197_v32, 0.0  ;;  %v262_v41 = vmax.f32 %v198_v33, 0.0  ;;  %v263_v42 = vmax.f32 %v199_v34, 0.0  ;;  %v203_v43 = vadd.f32 %v770_v2, %v132_v35  ;;  %v74_v34 = vld [vmem:[%s1345_s0 + $0x1e0] sm:$0xff]  ;;  %v75_v35 = vld [vmem:[%s1345_s0 + $0x1e8] sm:$0xff] }
  0x34   :  { %v715_v45 = vpack.c.bf16 %v260_v36, %v260_v36  ;;  %v264_v46 = vmax.f32 %v200_v37, 0.0  ;;  %v265_v47 = vmax.f32 %v201_v38, 0.0  ;;  %v266_v48 = vmax.f32 %v202_v39, 0.0  ;;  %v76_v36 = vld [vmem:[%s1345_s0 + $0x1f0] sm:$0xff] }
  0x35   :  { %v716_v52 = vpack.c.bf16 %v261_v40, %v261_v40  ;;  %v717_v53 = vpack.c.bf16 %v262_v41, %v262_v41  ;;  %v718_v54 = vpack.c.bf16 %v263_v42, %v263_v42  ;;  %v267_v55 = vmax.f32 %v203_v43, 0.0  ;;  %v77_v41 = vld [vmem:[%s1345_s0 + $0x1f8] sm:$0xff] }
  0x36   :  { %581 = vst.msk [vmem:[%s1348_s3 + $0xa0] sm:$0xf] %vm540_vm0, %v715_v45  ;;  %v719_v59 = vpack.c.bf16 %v264_v46, %v264_v46  ;;  %v720_v60 = vpack.c.bf16 %v265_v47, %v265_v47  ;;  %v721_v61 = vpack.c.bf16 %v266_v48, %v266_v48  ;;  %v133_v62 = vmul.f32 %v765_v1, %v62_v44 }
  0x37   :  { %582 = vst.msk [vmem:[%s1348_s3 + $0xa4] sm:$0xf] %vm540_vm0, %v716_v52  ;;  %583 = vst.msk [vmem:[%s1348_s3 + $0xa8] sm:$0xf] %vm540_vm0, %v717_v53  ;;  %v722_v0 = vpack.c.bf16 %v267_v55, %v267_v55  ;;  %v134_v3 = vmul.f32 %v765_v1, %v63_v49  ;;  %v135_v4 = vmul.f32 %v765_v1, %v64_v50 }
  0x38   :  { %584 = vst.msk [vmem:[%s1348_s3 + $0xac] sm:$0xf] %vm540_vm0, %v718_v54  ;;  %v136_v5 = vmul.f32 %v765_v1, %v65_v51  ;;  %585 = vst.msk [vmem:[%s1348_s3 + $0xb0] sm:$0xf] %vm540_vm0, %v719_v59  ;;  %v204_v6 = vadd.f32 %v770_v2, %v133_v62  ;;  %v137_v7 = vmul.f32 %v765_v1, %v66_v56 }
  0x39   :  { %586 = vst.msk [vmem:[%s1348_s3 + $0xb4] sm:$0xf] %vm540_vm0, %v720_v60  ;;  %587 = vst.msk [vmem:[%s1348_s3 + $0xb8] sm:$0xf] %vm540_vm0, %v721_v61  ;;  %v138_v8 = vmul.f32 %v765_v1, %v67_v57  ;;  %v139_v9 = vmul.f32 %v765_v1, %v68_v58  ;;  %v205_v10 = vadd.f32 %v770_v2, %v134_v3 }
  0x3a   :  { %588 = vst.msk [vmem:[%s1348_s3 + $0xbc] sm:$0xf] %vm540_vm0, %v722_v0  ;;  %v206_v11 = vadd.f32 %v770_v2, %v135_v4  ;;  %v207_v12 = vadd.f32 %v770_v2, %v136_v5  ;;  %v140_v13 = vmul.f32 %v765_v1, %v69_v63  ;;  %v268_v14 = vmax.f32 %v204_v6, 0.0 }
  0x3b   :  { %v208_v15 = vadd.f32 %v770_v2, %v137_v7  ;;  %v209_v16 = vadd.f32 %v770_v2, %v138_v8  ;;  %v210_v17 = vadd.f32 %v770_v2, %v139_v9  ;;  %v269_v18 = vmax.f32 %v205_v10, 0.0 }
  0x3c   :  { %v270_v19 = vmax.f32 %v206_v11, 0.0  ;;  %v271_v20 = vmax.f32 %v207_v12, 0.0  ;;  %v211_v21 = vadd.f32 %v770_v2, %v140_v13  ;;  %v723_v23 = vpack.c.bf16 %v268_v14, %v268_v14 }
  0x3d   :  { %v272_v24 = vmax.f32 %v208_v15, 0.0  ;;  %v273_v25 = vmax.f32 %v209_v16, 0.0  ;;  %v274_v26 = vmax.f32 %v210_v17, 0.0  ;;  %v724_v30 = vpack.c.bf16 %v269_v18, %v269_v18 }
  0x3e   :  { %v725_v31 = vpack.c.bf16 %v270_v19, %v270_v19  ;;  %v726_v32 = vpack.c.bf16 %v271_v20, %v271_v20  ;;  %v275_v33 = vmax.f32 %v211_v21, 0.0  ;;  %589 = vst.msk [vmem:[%s1348_s3 + $0xc0] sm:$0xf] %vm540_vm0, %v723_v23  ;;  %v141_v40 = vmul.f32 %v765_v1, %v70_v22 }
  0x3f   :  { %v727_v37 = vpack.c.bf16 %v272_v24, %v272_v24  ;;  %v728_v38 = vpack.c.bf16 %v273_v25, %v273_v25  ;;  %v729_v39 = vpack.c.bf16 %v274_v26, %v274_v26  ;;  %590 = vst.msk [vmem:[%s1348_s3 + $0xc4] sm:$0xf] %vm540_vm0, %v724_v30  ;;  %v142_v43 = vmul.f32 %v765_v1, %v71_v27 }
  0x40   :  { %591 = vst.msk [vmem:[%s1348_s3 + $0xc8] sm:$0xf] %vm540_vm0, %v725_v31  ;;  %592 = vst.msk [vmem:[%s1348_s3 + $0xcc] sm:$0xf] %vm540_vm0, %v726_v32  ;;  %v730_v42 = vpack.c.bf16 %v275_v33, %v275_v33  ;;  %v143_v44 = vmul.f32 %v765_v1, %v72_v28  ;;  %v144_v45 = vmul.f32 %v765_v1, %v73_v29 }
  0x41   :  { %593 = vst.msk [vmem:[%s1348_s3 + $0xd0] sm:$0xf] %vm540_vm0, %v727_v37  ;;  %594 = vst.msk [vmem:[%s1348_s3 + $0xd4] sm:$0xf] %vm540_vm0, %v728_v38  ;;  %v212_v46 = vadd.f32 %v770_v2, %v141_v40  ;;  %v145_v47 = vmul.f32 %v765_v1, %v74_v34  ;;  %v146_v48 = vmul.f32 %v765_v1, %v75_v35 }
  0x42   :  { %595 = vst.msk [vmem:[%s1348_s3 + $0xd8] sm:$0xf] %vm540_vm0, %v729_v39  ;;  %v147_v49 = vmul.f32 %v765_v1, %v76_v36  ;;  %596 = vst.msk [vmem:[%s1348_s3 + $0xdc] sm:$0xf] %vm540_vm0, %v730_v42  ;;  %v213_v50 = vadd.f32 %v770_v2, %v142_v43  ;;  %v214_v51 = vadd.f32 %v770_v2, %v143_v44 }
  0x43   :  { %v215_v52 = vadd.f32 %v770_v2, %v144_v45  ;;  %v148_v53 = vmul.f32 %v765_v1, %v77_v41  ;;  %v276_v54 = vmax.f32 %v212_v46, 0.0  ;;  %v216_v55 = vadd.f32 %v770_v2, %v145_v47 }
  0x44   :  { %v217_v56 = vadd.f32 %v770_v2, %v146_v48  ;;  %v218_v57 = vadd.f32 %v770_v2, %v147_v49  ;;  %v277_v58 = vmax.f32 %v213_v50, 0.0  ;;  %v278_v59 = vmax.f32 %v214_v51, 0.0 }
  0x45   :  { %v279_v60 = vmax.f32 %v215_v52, 0.0  ;;  %v219_v61 = vadd.f32 %v770_v2, %v148_v53  ;;  %v731_v62 = vpack.c.bf16 %v276_v54, %v276_v54  ;;  %v280_v63 = vmax.f32 %v216_v55, 0.0 }
  0x46   :  { %v281_v0 = vmax.f32 %v217_v56, 0.0  ;;  %v282_v3 = vmax.f32 %v218_v57, 0.0  ;;  %v732_v4 = vpack.c.bf16 %v277_v58, %v277_v58  ;;  %v733_v5 = vpack.c.bf16 %v278_v59, %v278_v59 }
  0x47   :  { %v734_v6 = vpack.c.bf16 %v279_v60, %v279_v60  ;;  %v283_v1 = vmax.f32 %v219_v61, 0.0  ;;  %597 = vst.msk [vmem:[%s1348_s3 + $0xe0] sm:$0xf] %vm540_vm0, %v731_v62  ;;  %v735_v7 = vpack.c.bf16 %v280_v63, %v280_v63 }
  0x48   :  { %v736_v8 = vpack.c.bf16 %v281_v0, %v281_v0  ;;  %v737_v9 = vpack.c.bf16 %v282_v3, %v282_v3  ;;  %598 = vst.msk [vmem:[%s1348_s3 + $0xe4] sm:$0xf] %vm540_vm0, %v732_v4  ;;  %599 = vst.msk [vmem:[%s1348_s3 + $0xe8] sm:$0xf] %vm540_vm0, %v733_v5 }
  0x49   :  { %600 = vst.msk [vmem:[%s1348_s3 + $0xec] sm:$0xf] %vm540_vm0, %v734_v6  ;;  %v738_v2 = vpack.c.bf16 %v283_v1, %v283_v1  ;;  %601 = vst.msk [vmem:[%s1348_s3 + $0xf0] sm:$0xf] %vm540_vm0, %v735_v7 }
  0x4a   :  { %602 = vst.msk [vmem:[%s1348_s3 + $0xf4] sm:$0xf] %vm540_vm0, %v736_v8  ;;  %603 = vst.msk [vmem:[%s1348_s3 + $0xf8] sm:$0xf] %vm540_vm0, %v737_v9 }
  0x4b   :  { %604 = vst.msk [vmem:[%s1348_s3 + $0xfc] sm:$0xf] %vm540_vm0, %v738_v2 }

// kernel: generator_forward.13
= control target key start
LH: loop header
LB: loop body
LE: loop exit
PB: predicated region body
PF: predicated region fallthrough
CT: control target
= control target key end

     0   :  { %s2018_s21 = smov 0   ;;  %s2020_s22 = smov 0   ;;  %s2312_s0 = inlined_call_operand.vmem [shape: bf16[2,10,10,16], index: 0, kind: input, shape index: {}, may-alias: {0,1,2}]   ;;  %s2313_s1 = inlined_call_operand.vmem [shape: bf16[2,10,10,16], index: 1, kind: input, shape index: {}, may-alias: {0,1,2}]   ;;  %s2314_s2 = inlined_call_operand.vmem [shape: bf16[2,10,10,16], index: 2, kind: input, shape index: {}, may-alias: {0,1,2}]   ;;  %s2315_s3 = inlined_call_operand.vmem [shape: bf16[16,16,8], index: 3, kind: input, shape index: {}]   ;;  %s2316_s4 = inlined_call_operand.vmem [shape: f32[2,16,2,8,8], index: 4, kind: output, shape index: {0}]   ;;  %s2317_s5 = inlined_call_operand.vmem [shape: f32[1,8], index: 5, kind: output, shape index: {1}]   ;;  %s2318_s6 = inlined_call_operand.vmem [shape: f32[1,8], index: 6, kind: output, shape index: {2}]  }
   0x1   :  { %s2022_s23 = smov 0   ;;  %s2024_s24 = smov 0  }
   0x2   :  { %s2026_s25 = smov 0  }
   0x3 LB: > { %2321 = sst [smem:[#allocation2_spill]] %s1970_s23  ;;  %s26_s26 = sadd.s32 1, %s1970_s23  ;;  %s1978_s25 = sphi %s2026_s25, %s17_s25   ;;  %s1974_s24 = sphi %s2024_s24, %s2329_s24   ;;  %s1970_s23 = sphi %s2022_s23, %s2328_s23   ;;  %s1966_s22 = sphi %s2020_s22, %s2327_s22   ;;  %s1962_s21 = sphi %s2018_s21, %s2326_s21  }
   0x4   : > { %2322 = sst [smem:[#allocation3_spill]] %s1974_s24  ;;  %s29_s27 = sadd.s32 1, %s1974_s24 }
   0x5   : > { %p27_p0 = scmp.ge.s32.totalorder %s26_s26, 8  ;;  %p1602_p1 = scmp.ge.s32.totalorder %s1978_s25, 1 }
   0x6   : > { %p267_p2 = scmp.lt.s32.totalorder %s1978_s25, 17 }
   0x7   : > { %s2331_s26 = smov (%p27_p0, %s26_s26), 0  ;;  %s2333_s27 = smov (!%p27_p0, %s29_s27), %s1974_s24 }
   0x8   : > { %2323 = sst [smem:[#allocation4_spill]] %s2331_s26  ;;  %p268_p3 = pnand %p1602_p1, %p267_p2 }
   0x9   : > { %p31_p4 = scmp.ge.s32.totalorder %s2333_s27, 2  ;;  %p326_p5 = scmp.lt.s32.totalorder (!%p268_p3), %s1966_s22, 1 }
   0xa   : > { %271 = sbr.rel (%p268_p3) target bundleno = 367 (0x16f), region = 36  ;;  %p328_p6 = scmp.lt.s32.totalorder (!%p268_p3), %s1962_s21, 9 }
   0xb   : > { %s2335_s27 = smov (%p31_p4, %s2333_s27), 0  ;;  %s335_s28 = sadd.s32 (!%p268_p3), 1, %s1962_s21 }
   0xc   : > { %2324 = sst [smem:[#allocation5_spill]] %s2335_s27  ;;  %s346_s29 = sadd.s32 (!%p268_p3), 2, %s1962_s21 }
   0xd   : > { %p338_p7 = scmp.lt.s32.totalorder (!%p268_p3), %s335_s28, 9  ;;  %p349_p8 = scmp.lt.s32.totalorder (!%p268_p3), %s346_s29, 9 }
   0xe   : > { %s1609_s11 = sshll.u32 (!%p268_p3), %s1962_s21, 1  ;;  %p369_p10 = scmp.eq.s32.totalorder (!%p268_p3), %s1966_s22, 0 }
   0xf   : > { %p2059_p9 = scmp.lt.s32.totalorder (!%p268_p3), %s1609_s11, 15  ;;  %p370_p11 = scmp.eq.s32.totalorder (!%p268_p3), %s1962_s21, 0 }
  0x11   : > { %s327_s30 = scalar_select %p326_p5, %s1966_s22, 1 }
  0x12   : > { %s329_s7 = scalar_select %p328_p6, %s1962_s21, 9 }
  0x13   : > { %s1868_s8 = smul.u32 20, %s327_s30  ;;  %s1611_s17 = sshll.u32 %s327_s30, 5 }
  0x14   : > { %s1603_s9 = sshll.u32 %s329_s7, 1  ;;  %s2337_s28 = smov (!%p338_p7, %s335_s28), 9 }
  0x15   : > { %s332_s10 = sadd.s32 %s1868_s8, %s1603_s9  ;;  %s2339_s29 = smov (!%p349_p8, %s346_s29), 9 }
  0x16   : > { %s1604_s12 = sshll.u32 %s332_s10, 2  ;;  %s1605_s18 = sshll.u32 %s2337_s28, 1 }
  0x17   : > { %s2066_s16 = scalar_lea.vmem %s2312_s0, %s1604_s12  ;;  %s342_s19 = sadd.s32 %s1868_s8, %s1605_s18 }
  0x18   : > { %s1607_s20 = sshll.u32 %s2339_s29, 1  ;;  %s1606_s7 = sshll.u32 %s342_s19, 2 }
  0x19   : > { %s353_s9 = sadd.s32 %s1868_s8, %s1607_s20  ;;  %s2072_s26 = scalar_lea.vmem %s2313_s1, %s1606_s7 }
  0x1a   : > { %s1608_s24 = sshll.u32 %s353_s9, 2  ;;  %s2341_s11 = smov (!%p2059_p9, %s1609_s11), 15 }
  0x1b   : > { %s2077_s12 = scalar_lea.vmem %s2314_s2, %s1608_s24  ;;  %p371_p12 = pnand %p370_p11, %p369_p10 }
  0x1c   : > { %s1610_s22 = sshll.u32 %s2341_s11, 1  ;;  %vm375_vm0 = vcmask (!%p371_p12), 57344   ;;  %v1980_v0 = vmov (!%p371_p12), 0.0  }
  0x1d   : > { %s364_s28 = sadd.s32 %s1611_s17, %s1610_s22  ;;  %374 = sbr.rel (%p371_p12) target bundleno = 36 (0x24), region = 40  ;;  %376 = vst.msk [vmem:[%s2317_s5] sm:$0x1] (!%p371_p12), %vm375_vm0, %v1980_v0  ;;  %377 = vst.msk [vmem:[%s2318_s6] sm:$0x1] (!%p371_p12), %vm375_vm0, %v1980_v0 }
  0x1e   : > { %s1612_s29 = sshll.u32 %s364_s28, 3 }
  0x1f   : > { %s2085_s15 = scalar_lea.vmem %s2316_s4, %s1612_s29 }
  0x24 PF: > { %v1912_v1 = vld [vmem:[%s2315_s3 + $0x28] sm:$0xff]   ;;  %v1981_v2 = vmov 0.0   ;;  %vm1982_vm1 = vmmov 0   ;;  %v641_v4 = vld [vmem:[%s2066_s16] sm:$0xf]  ;;  %vm403_vm2 = vcmask 130048  }
  0x25   : > { %1748 = vmatprep.subr.bf16.mxu1 %v1981_v2  ;;  %1724 = vmatprep.subr.bf16.mxu0 %v1981_v2  ;;  %v1913_v3 = vld [vmem:[%s2315_s3 + $0x8] sm:$0xff]   ;;  %v642_v5 = vld [vmem:[%s2066_s16 + $0x4] sm:$0x1]  ;;  %v646_v6 = vld [vmem:[%s2066_s16] sm:$0xe]  ;;  %vm617_vm3 = vcmask 64512  }
  0x26   : > { %1749 = vmatpush3.bf16.msra.mxu1 %v1912_v1  ;;  %1750 = vmatprep.mubr.msk.bf16.mxu1 %vm1982_vm1, %v1981_v2  ;;  %v378_v7 = vld [vmem:[%s2066_s16] sm:$0xf]  ;;  %v381_v8 = vld [vmem:[%s2066_s16 + $0x4] sm:$0x1]  ;;  %v1633_v9 = vcombine.low %v646_v6, %v642_v5  ;;  %v1636_v10 = vcombine.low %v641_v4, %v642_v5  ;;  %v1920_v26 = vld [vmem:[%s2315_s3 + $0x30] sm:$0xff]   ;;  %vm628_vm4 = vcmask 57344  }
  0x27   : > { %1725 = vmatpush3.bf16.msra.mxu0 %v1913_v3  ;;  %1726 = vmatprep.mubr.msk.bf16.mxu0 %vm1982_vm1, %v1981_v2  ;;  %v1615_v11 = vcombine.low %v378_v7, %v381_v8  ;;  %v1918_v12 = vld [vmem:[%s2315_s3 + $0x20] sm:$0xff]   ;;  %v1919_v28 = vld [vmem:[%s2315_s3 + $0x10] sm:$0xff]   ;;  %v1923_v32 = vld [vmem:[%s2315_s3 + $0x38] sm:$0xff]  }
  0x28   : > { %1730 = vmatprep.subr.bf16.mxu0 %v1981_v2  ;;  %1754 = vmatprep.subr.bf16.mxu1 %v1981_v2  ;;  %v655_v13 = vrot.slane %v1633_v9, 1  ;;  %v711_v16 = vshll.u32 %v1636_v10, 16  ;;  %v1917_v18 = vld [vmem:[%s2315_s3] sm:$0xff]   ;;  %v709_v20 = vshrl.u32 %v1636_v10, 16  ;;  %v1922_v35 = vld [vmem:[%s2315_s3 + $0x18] sm:$0xff]   ;;  %v1927_v45 = vld [vmem:[%s2315_s3 + $0x68] sm:$0xff]  }
  0x29   : > { %v391_v14 = vshrl.u32 %v1615_v11, 16  ;;  %v393_v15 = vshll.u32 %v1615_v11, 16  ;;  %v764_v22 = vld [vmem:[%s2072_s26] sm:$0xf]  ;;  %v765_v23 = vld [vmem:[%s2072_s26 + $0x4] sm:$0x1] }
  0x2a   : > { %1751 = vmatmul.mubr.msk.bf16.vlgmr.msra.gmra.mrb[0].mxu1 %vm403_vm2, %v655_v13  ;;  %v713_v21 = vrot.slane %v711_v16, 1  ;;  %v1641_v25 = vcombine.low %v764_v22, %v765_v23  ;;  %v1925_v33 = vld [vmem:[%s2072_s26] sm:$0x1f]   ;;  %v1926_v51 = vld [vmem:[%s2315_s3 + $0x48] sm:$0xff]   ;;  %v1934_v4 = vld [vmem:[%s2315_s3 + $0x70] sm:$0xff]  }
  0x2b   : > { %v395_v17 = vrot.slane %v393_v15, 1  ;;  %1755 = vmatpush3.bf16.msra.mxu1 %v1918_v12  ;;  %1756 = vmatprep.mubr.msk.bf16.mxu1 %vm1982_vm1, %v1981_v2  ;;  %v496_v34 = vld [vmem:[%s2072_s26] sm:$0xf]  ;;  %v563_v38 = vshll.u32 %v1925_v33, 16  ;;  %v916_v40 = vld [vmem:[%s2072_s26 + $0x4] sm:$0x1] }
  0x2c   : > { %1760 = vmatprep.subr.bf16.mxu1 %v1981_v2  ;;  %v714_v24 = vor.u32 %v713_v21, %v709_v20  ;;  %v777_v27 = vshll.u32 %v1641_v25, 16  ;;  %v775_v29 = vshrl.u32 %v1641_v25, 16  ;;  %v831_v36 = vld [vmem:[%s2072_s26] sm:$0xe]  ;;  %v561_v42 = vshrl.u32 %v1925_v33, 16  ;;  %v1933_v6 = vld [vmem:[%s2315_s3 + $0x50] sm:$0xff]  }
  0x2d   : > { %v396_v19 = vor.u32 %v395_v17, %v391_v14  ;;  %v1646_v37 = vcombine.low %v831_v36, %v765_v23  ;;  %v912_v39 = vld [vmem:[%s2072_s26] sm:$0xf]  ;;  %v565_v43 = vrot.slane %v563_v38, 1  ;;  %v1175_v46 = vld [vmem:[%s2072_s26 + $0x4] sm:$0x1]  ;;  %v1937_v10 = vld [vmem:[%s2315_s3 + $0x78] sm:$0xff]  }
  0x2e   : > { %v779_v30 = vrot.slane %v777_v27, 1  ;;  %v1654_v44 = vcombine.low %v912_v39, %v916_v40  ;;  %v1179_v47 = vld [vmem:[%s2072_s26] sm:$0xe]  ;;  %v1298_v0 = vld [vmem:[%s2077_s12 + $0x4] sm:$0x1]  ;;  %v1936_v13 = vld [vmem:[%s2315_s3 + $0x58] sm:$0xff]  }
  0x2f   : > { %1727 = vmatmul.mubr.msk.bf16.vlgmr.msra.gmra.mrb[0].mxu0 %vm403_vm2, %v396_v19  ;;  %v838_v41 = vrot.slane %v1646_v37, 1  ;;  %v566_v48 = vor.u32 %v565_v43, %v561_v42  ;;  %v1673_v49 = vcombine.low %v1179_v47, %v1175_v46  ;;  %v1174_v52 = vld [vmem:[%s2072_s26] sm:$0xf] }
  0x30   : > { %1731 = vmatpush3.bf16.msra.mxu0 %v1917_v18  ;;  %1732 = vmatprep.mubr.msk.bf16.mxu0 %vm1982_vm1, %v1981_v2  ;;  %v780_v31 = vor.u32 %v779_v30, %v775_v29  ;;  %v928_v50 = vshll.u32 %v1654_v44, 16  ;;  %v1676_v54 = vcombine.low %v1174_v52, %v1175_v46  ;;  %v926_v55 = vshrl.u32 %v1654_v44, 16  ;;  %v1932_v57 = vld [vmem:[%s2315_s3 + $0x60] sm:$0xff]  }
  0x31   : > { %1736 = vmatprep.subr.bf16.mxu0 %v1981_v2  ;;  %v1188_v53 = vrot.slane %v1673_v49, 1  ;;  %v1931_v60 = vld [vmem:[%s2315_s3 + $0x40] sm:$0xff]  }
  0x32   : > { %v930_v56 = vrot.slane %v928_v50, 1  ;;  %v1244_v59 = vshll.u32 %v1676_v54, 16  ;;  %v1242_v61 = vshrl.u32 %v1676_v54, 16  ;;  %v1297_v63 = vld [vmem:[%s2077_s12] sm:$0xf] }
  0x33   : > { %v1681_v3 = vcombine.low %v1297_v63, %v1298_v0  ;;  %v1939_v11 = vld [vmem:[%s2077_s12] sm:$0x1f]  }
  0x34   : > { %v931_v58 = vor.u32 %v930_v56, %v926_v55  ;;  %v1246_v62 = vrot.slane %v1244_v59, 1  ;;  %v1030_v12 = vld [vmem:[%s2077_s12] sm:$0xf]  ;;  %v1097_v16 = vshll.u32 %v1939_v11, 16  ;;  %v1095_v18 = vshrl.u32 %v1939_v11, 16 }
  0x35   : > { %v1310_v5 = vshll.u32 %v1681_v3, 16  ;;  %v1364_v14 = vld [vmem:[%s2077_s12] sm:$0xe]  ;;  %v630_v52 = vld [vmem:[%s2318_s6] sm:$0x1] }
  0x36   : > { %1757 = vmatmul.mubr.msk.bf16.vlgmr.msra.gmra.mrb[0].mxu1 %vm403_vm2, %v714_v24  ;;  %v1247_v1 = vor.u32 %v1246_v62, %v1242_v61  ;;  %v1686_v15 = vcombine.low %v1364_v14, %v1298_v0  ;;  %v1099_v19 = vrot.slane %v1097_v16, 1 }
  0x37   : > { %1761 = vmatpush3.bf16.msra.mxu1 %v1920_v26  ;;  %1762 = vmatprep.mubr.msk.bf16.mxu1 %vm1982_vm1, %v1981_v2  ;;  %v1312_v8 = vrot.slane %v1310_v5, 1 }
  0x38   : > { %1766 = vmatprep.subr.bf16.mxu1 %v1981_v2  ;;  %v1371_v17 = vrot.slane %v1686_v15, 1  ;;  %v1100_v20 = vor.u32 %v1099_v19, %v1095_v18 }
  0x3b   : > { %1733 = vmatmul.mubr.msk.bf16.vlgmr.msra.gmra.mrb[0].mxu0 %vm403_vm2, %v378_v7  ;;  %v1308_v7 = vshrl.u32 %v1681_v3, 16 }
  0x3c   : > { %1737 = vmatpush3.bf16.msra.mxu0 %v1919_v28  ;;  %1738 = vmatprep.mubr.msk.bf16.mxu0 %vm1982_vm1, %v1981_v2 }
  0x3d   : > { %1742 = vmatprep.subr.bf16.mxu0 %v1981_v2  ;;  %v1313_v9 = vor.u32 %v1312_v8, %v1308_v7 }
  0x42   : > { %1763 = vmatmul.mubr.msk.bf16.vlgmr.msra.gmra.mrb[0].mxu1 %vm403_vm2, %v780_v31 }
  0x43   : > { %1767 = vmatpush3.bf16.msra.mxu1 %v1923_v32  ;;  %1768 = vmatprep.mubr.msk.bf16.mxu1 %vm1982_vm1, %v1981_v2 }
  0x44   : > { %1796 = vmatprep.subr.bf16.mxu1 %v1981_v2 }
  0x47   : > { %1739 = vmatmul.mubr.msk.bf16.vlgmr.msra.gmra.mrb[0].mxu0 %vm403_vm2, %v496_v34 }
  0x48   : > { %1743 = vmatpush3.bf16.msra.mxu0 %v1922_v35  ;;  %1744 = vmatprep.mubr.msk.bf16.mxu0 %vm1982_vm1, %v1981_v2 }
  0x49   : > { %1772 = vmatprep.subr.bf16.mxu0 %v1981_v2 }
  0x4e   : > { %1769 = vmatmul.mubr.msk.bf16.vlgmr.msra.gmra.mrb[0].mxu1 %vm403_vm2, %v838_v41 }
  0x4f   : > { %1797 = vmatpush3.bf16.msra.mxu1 %v1927_v45  ;;  %1798 = vmatprep.mubr.msk.bf16.mxu1 %vm1982_vm1, %v1981_v2 }
  0x50   : > { %1802 = vmatprep.subr.bf16.mxu1 %v1981_v2 }
  0x53   : > { %1745 = vmatmul.mubr.msk.bf16.vlgmr.msra.gmra.mrb[0].mxu0 %vm403_vm2, %v566_v48  ;;  %v619_v48 = vld [vmem:[%s2317_s5] sm:$0x1] }
  0x54   : > { %1773 = vmatpush3.bf16.msra.mxu0 %v1926_v51  ;;  %1774 = vmatprep.mubr.msk.bf16.mxu0 %vm1982_vm1, %v1981_v2 }
  0x55   : > { %1778 = vmatprep.subr.bf16.mxu0 %v1981_v2 }
  0x56   : > { %1799 = vmatmul.mubr.msk.bf16.vlgmr.msra.gmra.mrb[4].mxu1 %vm403_vm2, %v1188_v53 }
  0x57   : > { %1803 = vmatpush3.bf16.msra.mxu1 %v1932_v57  ;;  %1804 = vmatprep.mubr.msk.bf16.mxu1 %vm1982_vm1, %v1981_v2 }
  0x58   : > { %1808 = vmatprep.subr.bf16.mxu1 %v1981_v2 }
  0x5b   : > { %1775 = vmatmul.mubr.msk.bf16.vlgmr.msra.gmra.mrb[4].mxu0 %vm403_vm2, %v931_v58 }
  0x5c   : > { %1779 = vmatpush3.bf16.msra.mxu0 %v1931_v60  ;;  %1780 = vmatprep.mubr.msk.bf16.mxu0 %vm1982_vm1, %v1981_v2 }
  0x5d   : > { %1784 = vmatprep.subr.bf16.mxu0 %v1981_v2 }
  0x62   : > { %1805 = vmatmul.mubr.msk.bf16.vlgmr.msra.gmra.mrb[4].mxu1 %vm403_vm2, %v1247_v1 }
  0x63   : > { %1809 = vmatpush3.bf16.msra.mxu1 %v1934_v4  ;;  %1810 = vmatprep.mubr.msk.bf16.mxu1 %vm1982_vm1, %v1981_v2 }
  0x64   : > { %1814 = vmatprep.subr.bf16.mxu1 %v1981_v2 }
  0x67   : > { %1781 = vmatmul.mubr.msk.bf16.vlgmr.msra.gmra.mrb[4].mxu0 %vm403_vm2, %v912_v39 }
  0x68   : > { %1785 = vmatpush3.bf16.msra.mxu0 %v1933_v6  ;;  %1786 = vmatprep.mubr.msk.bf16.mxu0 %vm1982_vm1, %v1981_v2 }
  0x69   : > { %1790 = vmatprep.subr.bf16.mxu0 %v1981_v2 }
  0x6e   : > { %1811 = vmatmul.mubr.msk.bf16.vlgmr.msra.gmra.mrb[4].mxu1 %vm403_vm2, %v1313_v9 }
  0x6f   : > { %1815 = vmatpush3.bf16.msra.mxu1 %v1937_v10  ;;  %1816 = vmatprep.mubr.msk.bf16.mxu1 %vm1982_vm1, %v1981_v2 }
  0x73   : > { %1787 = vmatmul.mubr.msk.bf16.vlgmr.msra.gmra.mrb[4].mxu0 %vm403_vm2, %v1030_v12 }
  0x74   : > { %1791 = vmatpush3.bf16.msra.mxu0 %v1936_v13  ;;  %1792 = vmatprep.mubr.msk.bf16.mxu0 %vm1982_vm1, %v1981_v2 }
  0x7a   : > { %1817 = vmatmul.mubr.msk.bf16.vlgmr.msra.gmra.mrb[4].mxu1 %vm403_vm2, %v1371_v17 }
  0x7f   : > { %1793 = vmatmul.mubr.msk.bf16.vlgmr.msra.gmra.mrb[4].mxu0 %vm403_vm2, %v1100_v20 }
 0x121   : > { %v882_v21 = vpop.f32.mrb[0].mxu1 }
 0x122   : > { %1649 = vst.msk [vmem:[%s2085_s15 + $0x8] sm:$0xff] %vm617_vm3, %v882_v21  ;;  %v902_v22 = vmul.f32 %v882_v21, %v882_v21  ;;  %v1770_v23 = vpop.f32.mrb[1].mxu1  ;;  %v892_v25 = vsel %vm617_vm3, %v882_v21, 0.0 }
 0x123   : > { %v885_v24 = vpop.f32.mrb[2].mxu1  ;;  %v893_v31 = vrot.slane %v892_v25, 4 }
 0x124   : > { %v1771_v26 = vpop.f32.mrb[3].mxu1  ;;  %v903_v27 = vsel %vm617_vm3, %v902_v22, 0.0 }
 0x125   : > { %v904_v36 = vrot.slane %v903_v27, 4  ;;  %v894_v39 = vadd.f32 %v893_v31, %v892_v25 }
 0x126   : > { %v610_v2 = vpop.f32.mrb[0].mxu0 }
 0x127   : > { %618 = vst.msk [vmem:[%s2085_s15] sm:$0xff] %vm617_vm3, %v610_v2  ;;  %v620_v28 = vsel %vm617_vm3, %v610_v2, 0.0  ;;  %v631_v29 = vmul.f32 %v610_v2, %v610_v2  ;;  %v1746_v30 = vpop.f32.mrb[1].mxu0  ;;  %v905_v42 = vadd.f32 %v904_v36, %v903_v27  ;;  %v895_v45 = vrot.slane %v894_v39, 2 }
 0x128   : > { %v621_v32 = vrot.slane %v620_v28, 4  ;;  %v613_v33 = vpop.f32.mrb[2].mxu0 }
 0x129   : > { %v632_v34 = vsel %vm617_vm3, %v631_v29, 0.0  ;;  %v1747_v35 = vpop.f32.mrb[3].mxu0  ;;  %v906_v49 = vrot.slane %v905_v42, 2  ;;  %v896_v53 = vadd.f32 %v895_v45, %v894_v39 }
 0x12a   : > { %v622_v37 = vadd.f32 %v621_v32, %v620_v28  ;;  %v633_v38 = vrot.slane %v632_v34, 4 }
 0x12b   : > { %v907_v56 = vadd.f32 %v906_v49, %v905_v42  ;;  %v897_v58 = vrot.slane %v896_v53, 1 }
 0x12c   : > { %v623_v40 = vrot.slane %v622_v37, 2  ;;  %v634_v41 = vadd.f32 %v633_v38, %v632_v34 }
 0x12d   : > { %v908_v59 = vrot.slane %v907_v56, 1  ;;  %v898_v60 = vadd.f32 %v897_v58, %v896_v53 }
 0x12e   : > { %v624_v43 = vadd.f32 %v623_v40, %v622_v37  ;;  %v635_v44 = vrot.slane %v634_v41, 2 }
 0x12f   : > { %v909_v62 = vadd.f32 %v908_v59, %v907_v56 }
 0x130   : > { %v625_v46 = vrot.slane %v624_v43, 1  ;;  %v636_v47 = vadd.f32 %v635_v44, %v634_v41 }
 0x132   : > { %v626_v50 = vadd.f32 %v625_v46, %v624_v43  ;;  %v637_v51 = vrot.slane %v636_v47, 1 }
 0x134   : > { %v627_v54 = vadd.f32 %v626_v50, %v619_v48  ;;  %v638_v55 = vadd.f32 %v637_v51, %v636_v47 }
 0x136   : > { %629 = vst.msk [vmem:[%s2317_s5] sm:$0x1] %vm628_vm4, %v627_v54  ;;  %v639_v57 = vadd.f32 %v638_v55, %v630_v52 }
 0x138   : > { %640 = vst.msk [vmem:[%s2318_s6] sm:$0x1] %vm628_vm4, %v639_v57 }
 0x13d   : > { %v891_v61 = vld [vmem:[%s2317_s5] sm:$0x1] }
 0x13e   : > { %v899_v63 = vadd.f32 %v898_v60, %v891_v61 }
 0x13f   : > { %v901_v0 = vld [vmem:[%s2318_s6] sm:$0x1] }
 0x140   : > { %900 = vst.msk [vmem:[%s2317_s5] sm:$0x1] %vm628_vm4, %v899_v63  ;;  %v910_v1 = vadd.f32 %v909_v62, %v901_v0 }
 0x142   : > { %911 = vst.msk [vmem:[%s2318_s6] sm:$0x1] %vm628_vm4, %v910_v1 }
 0x147   : > { %v1153_v33 = vld [vmem:[%s2317_s5] sm:$0x1] }
 0x149   : > { %v1163_v37 = vld [vmem:[%s2318_s6] sm:$0x1] }
 0x14d   : > { %v1415_v3 = vpop.f32.mrb[4].mxu1 }
 0x14e   : > { %1689 = vst.msk [vmem:[%s2085_s15 + $0x18] sm:$0xff] %vm617_vm3, %v1415_v3  ;;  %v1435_v4 = vmul.f32 %v1415_v3, %v1415_v3  ;;  %v1818_v5 = vpop.f32.mrb[5].mxu1  ;;  %v1425_v7 = vsel %vm617_vm3, %v1415_v3, 0.0 }
 0x14f   : > { %v1418_v6 = vpop.f32.mrb[6].mxu1  ;;  %v1426_v14 = vrot.slane %v1425_v7, 4 }
 0x150   : > { %v1819_v8 = vpop.f32.mrb[7].mxu1  ;;  %v1436_v10 = vsel %vm617_vm3, %v1435_v4, 0.0 }
 0x151   : > { %v1437_v19 = vrot.slane %v1436_v10, 4  ;;  %v1427_v22 = vadd.f32 %v1426_v14, %v1425_v7 }
 0x152   : > { %v1144_v9 = vpop.f32.mrb[4].mxu0 }
 0x153   : > { %1668 = vst.msk [vmem:[%s2085_s15 + $0x10] sm:$0xff] %vm617_vm3, %v1144_v9  ;;  %v1154_v11 = vsel %vm617_vm3, %v1144_v9, 0.0  ;;  %v1164_v12 = vmul.f32 %v1144_v9, %v1144_v9  ;;  %v1794_v13 = vpop.f32.mrb[5].mxu0  ;;  %v1438_v25 = vadd.f32 %v1437_v19, %v1436_v10  ;;  %v1428_v27 = vrot.slane %v1427_v22, 2 }
 0x154   : > { %v1155_v15 = vrot.slane %v1154_v11, 4  ;;  %v1147_v16 = vpop.f32.mrb[6].mxu0 }
 0x155   : > { %v1165_v17 = vsel %vm617_vm3, %v1164_v12, 0.0  ;;  %v1795_v18 = vpop.f32.mrb[7].mxu0  ;;  %v1439_v30 = vrot.slane %v1438_v25, 2  ;;  %v1429_v34 = vadd.f32 %v1428_v27, %v1427_v22 }
 0x156   : > { %v1156_v20 = vadd.f32 %v1155_v15, %v1154_v11  ;;  %v1166_v21 = vrot.slane %v1165_v17, 4 }
 0x157   : > { %v1440_v38 = vadd.f32 %v1439_v30, %v1438_v25  ;;  %v1430_v40 = vrot.slane %v1429_v34, 1 }
 0x158   : > { %v1157_v23 = vrot.slane %v1156_v20, 2  ;;  %v1167_v24 = vadd.f32 %v1166_v21, %v1165_v17 }
 0x159   : > { %v1441_v41 = vrot.slane %v1440_v38, 1  ;;  %v1431_v42 = vadd.f32 %v1430_v40, %v1429_v34 }
 0x15a   : > { %v1158_v26 = vadd.f32 %v1157_v23, %v1156_v20  ;;  %v1168_v2 = vrot.slane %v1167_v24, 2 }
 0x15b   : > { %v1442_v44 = vadd.f32 %v1441_v41, %v1440_v38 }
 0x15c   : > { %v1159_v28 = vrot.slane %v1158_v26, 1  ;;  %v1169_v29 = vadd.f32 %v1168_v2, %v1167_v24 }
 0x15e   : > { %v1160_v31 = vadd.f32 %v1159_v28, %v1158_v26  ;;  %v1170_v32 = vrot.slane %v1169_v29, 1 }
 0x160   : > { %v1161_v35 = vadd.f32 %v1160_v31, %v1153_v33  ;;  %v1171_v36 = vadd.f32 %v1170_v32, %v1169_v29 }
 0x162   : > { %1162 = vst.msk [vmem:[%s2317_s5] sm:$0x1] %vm628_vm4, %v1161_v35  ;;  %v1172_v39 = vadd.f32 %v1171_v36, %v1163_v37 }
 0x164   : > { %1173 = vst.msk [vmem:[%s2318_s6] sm:$0x1] %vm628_vm4, %v1172_v39 }
 0x169   : > { %v1424_v43 = vld [vmem:[%s2317_s5] sm:$0x1] }
 0x16a   : > { %v1432_v45 = vadd.f32 %v1431_v42, %v1424_v43 }
 0x16b   : > { %v1434_v46 = vld [vmem:[%s2318_s6] sm:$0x1] }
 0x16c   : > { %1433 = vst.msk [vmem:[%s2317_s5] sm:$0x1] %vm628_vm4, %v1432_v45  ;;  %v1443_v47 = vadd.f32 %v1442_v44, %v1434_v46 }
 0x16e   : > { %1444 = vst.msk [vmem:[%s2318_s6] sm:$0x1] %vm628_vm4, %v1443_v47 }
 0x16f PF: > { %s17_s25 = sadd.s32 1, %s1978_s25   ;;  %s2326_s21 = sld [smem:[#allocation2_spill]] }
 0x170   : > { %p14_p13 = scmp.ge.s32.totalorder %s17_s25, 18   ;;  %s2327_s22 = sld [smem:[#allocation3_spill]] }
 0x171   : > { %s2328_s23 = sld [smem:[#allocation4_spill]]  ;;  %s2329_s24 = sld [smem:[#allocation5_spill]] }
 0x172   :  { %16 = sbr.rel (!%p14_p13) target bundleno = 3 (0x3), region = 110 }

// kernel: generator_forward.11
= control target key start
LH: loop header
LB: loop body
LE: loop exit
PB: predicated region body
PF: predicated region fallthrough
CT: control target
= control target key end

     0   :  { %s2213_s21 = smov 0   ;;  %s2215_s22 = smov 0   ;;  %s2567_s0 = inlined_call_operand.vmem [shape: bf16[2,6,6,32], index: 0, kind: input, shape index: {}, may-alias: {0,1,2}]   ;;  %s2568_s1 = inlined_call_operand.vmem [shape: bf16[2,6,6,32], index: 1, kind: input, shape index: {}, may-alias: {0,1,2}]   ;;  %s2569_s2 = inlined_call_operand.vmem [shape: bf16[2,6,6,32], index: 2, kind: input, shape index: {}, may-alias: {0,1,2}]   ;;  %s2570_s3 = inlined_call_operand.vmem [shape: bf16[16,32,16], index: 3, kind: input, shape index: {}]   ;;  %s2571_s4 = inlined_call_operand.vmem [shape: f32[2,8,2,4,16], index: 4, kind: output, shape index: {0}]   ;;  %s2572_s5 = inlined_call_operand.vmem [shape: f32[1,16], index: 5, kind: output, shape index: {1}]   ;;  %s2573_s6 = inlined_call_operand.vmem [shape: f32[1,16], index: 6, kind: output, shape index: {2}]  }
   0x1   :  { %s2217_s23 = smov 0   ;;  %s2219_s24 = smov 0  }
   0x2   :  { %s2221_s25 = smov 0  }
   0x3 LB: > { %2575 = sst [smem:[#allocation2_spill]] %s2169_s24  ;;  %s26_s26 = sadd.s32 1, %s2165_s23  ;;  %s2173_s25 = sphi %s2221_s25, %s17_s25   ;;  %s2169_s24 = sphi %s2219_s24, %s2581_s24   ;;  %s2165_s23 = sphi %s2217_s23, %s2583_s23   ;;  %s2161_s22 = sphi %s2215_s22, %s2579_s22   ;;  %s2157_s21 = sphi %s2213_s21, %s2582_s21  }
   0x4   : > { %s29_s27 = sadd.s32 1, %s2169_s24  ;;  %p27_p0 = scmp.ge.s32.totalorder %s26_s26, 4 }
   0x5   : > { %p1690_p1 = scmp.ge.s32.totalorder %s2173_s25, 1  ;;  %p264_p2 = scmp.lt.s32.totalorder %s2173_s25, 9 }
   0x6   : > { %s2585_s26 = smov (%p27_p0, %s26_s26), 0  ;;  %s2587_s27 = smov (!%p27_p0, %s29_s27), %s2169_s24 }
   0x7   : > { %2576 = sst [smem:[#allocation3_spill]] %s2585_s26  ;;  %p265_p3 = pnand %p1690_p1, %p264_p2 }
   0x8   : > { %p31_p4 = scmp.ge.s32.totalorder %s2587_s27, 2  ;;  %p320_p5 = scmp.lt.s32.totalorder (!%p265_p3), %s2161_s22, 1 }
   0x9   : > { %268 = sbr.rel (%p265_p3) target bundleno = 362 (0x16a), region = 36  ;;  %p322_p6 = scmp.lt.s32.totalorder (!%p265_p3), %s2157_s21, 5 }
   0xa   : > { %s2589_s27 = smov (%p31_p4, %s2587_s27), 0  ;;  %s328_s28 = sadd.s32 (!%p265_p3), 1, %s2157_s21 }
   0xb   : > { %2577 = sst [smem:[#allocation4_spill]] %s2589_s27  ;;  %s338_s29 = sadd.s32 (!%p265_p3), 2, %s2157_s21 }
   0xc   : > { %p331_p7 = scmp.lt.s32.totalorder (!%p265_p3), %s328_s28, 5  ;;  %p341_p8 = scmp.lt.s32.totalorder (!%p265_p3), %s338_s29, 5 }
   0xd   : > { %s1694_s9 = sshll.u32 (!%p265_p3), %s2157_s21, 1  ;;  %p360_p10 = scmp.eq.s32.totalorder (!%p265_p3), %s2161_s22, 0 }
   0xe   : > { %p2254_p9 = scmp.lt.s32.totalorder (!%p265_p3), %s1694_s9, 7  ;;  %p361_p11 = scmp.eq.s32.totalorder (!%p265_p3), %s2157_s21, 0 }
  0x10   : > { %s321_s30 = scalar_select %p320_p5, %s2161_s22, 1 }
  0x11   : > { %s323_s7 = scalar_select %p322_p6, %s2157_s21, 5 }
  0x12   : > { %s2047_s8 = smul.u32 6, %s321_s30  ;;  %s1696_s13 = sshll.u32 %s321_s30, 4 }
  0x13   : > { %s2591_s28 = smov (!%p331_p7, %s328_s28), 5  ;;  %s2593_s29 = smov (!%p341_p8, %s338_s29), 5 }
  0x14   : > { %s325_s10 = sadd.s32 %s2047_s8, %s323_s7  ;;  %s334_s17 = sadd.s32 %s2047_s8, %s2591_s28 }
  0x15   : > { %s1691_s12 = sshll.u32 %s325_s10, 2  ;;  %s1692_s18 = sshll.u32 %s334_s17, 2 }
  0x16   : > { %s2261_s16 = scalar_lea.vmem %s2567_s0, %s1691_s12  ;;  %s344_s19 = sadd.s32 %s2047_s8, %s2593_s29 }
  0x17   : > { %s2268_s27 = scalar_lea.vmem %s2568_s1, %s1692_s18  ;;  %s1693_s26 = sshll.u32 %s344_s19, 2 }
  0x18   : > { %s2273_s24 = scalar_lea.vmem %s2569_s2, %s1693_s26  ;;  %p362_p12 = pnand %p361_p11, %p360_p10 }
  0x19   : > { %s2595_s9 = smov (!%p2254_p9, %s1694_s9), 7  ;;  %vm366_vm0 = vcmask (!%p362_p12), 122880   ;;  %v2175_v0 = vmov (!%p362_p12), 0.0  }
  0x1a   : > { %s1695_s22 = sshll.u32 %s2595_s9, 1  ;;  %365 = sbr.rel (%p362_p12) target bundleno = 33 (0x21), region = 40  ;;  %367 = vst.msk [vmem:[%s2572_s5] sm:$0x1] (!%p362_p12), %vm366_vm0, %v2175_v0  ;;  %368 = vst.msk [vmem:[%s2573_s6] sm:$0x1] (!%p362_p12), %vm366_vm0, %v2175_v0 }
  0x1b   : > { %s355_s12 = sadd.s32 %s1696_s13, %s1695_s22 }
  0x1c   : > { %s1697_s28 = sshll.u32 %s355_s12, 2 }
  0x1d   : > { %s2280_s29 = scalar_lea.vmem %s2571_s4, %s1697_s28 }
  0x21 PF: > { %v2091_v1 = vld [vmem:[%s2570_s3 + $0x10] sm:$0xff]   ;;  %v2176_v2 = vmov 0.0   ;;  %v2093_v4 = vld [vmem:[%s2570_s3 + $0x18] sm:$0xff]   ;;  %vm2177_vm1 = vmmov 0   ;;  %vm402_vm2 = vcmask 261120   ;;  %v2098_v11 = vld [vmem:[%s2570_s3 + $0x40] sm:$0xff]  }
  0x22   : > { %1871 = vmatprep.subr.bf16.mxu0 %v2176_v2  ;;  %1903 = vmatprep.subr.bf16.mxu1 %v2176_v2  ;;  %v2092_v3 = vld [vmem:[%s2570_s3 + $0x50] sm:$0xff]   ;;  %v2094_v5 = vld [vmem:[%s2570_s3 + $0x58] sm:$0xff]   ;;  %v2095_v6 = vld [vmem:[%s2261_s16] ss:$0 sps:$4 sm:$0x77]   ;;  %vm635_vm3 = vcmask 125952  }
  0x23   : > { %1872 = vmatpush3.bf16.msra.mxu0 %v2091_v1  ;;  %1875 = vmatprep.mubr.msk.bf16.mxu0 %vm2177_vm1, %v2176_v2  ;;  %v2096_v7 = vld [vmem:[%s2261_s16] ss:$0 sps:$4 sm:$0x66]   ;;  %v384_v8 = vshrl.u32 %v2095_v6, 16  ;;  %v386_v9 = vshll.u32 %v2095_v6, 16  ;;  %v2100_v15 = vld [vmem:[%s2570_s3 + $0x48] sm:$0xff]  }
  0x24   : > { %1904 = vmatpush3.bf16.msra.mxu1 %v2092_v3  ;;  %1873 = vmatprep.subr.bf16.mxu0 %v2176_v2  ;;  %v674_v10 = vrot.slane %v2096_v7, 1  ;;  %v2097_v13 = vld [vmem:[%s2570_s3] sm:$0xff]   ;;  %v2099_v17 = vld [vmem:[%s2570_s3 + $0x8] sm:$0xff]   ;;  %v2108_v33 = vld [vmem:[%s2570_s3 + $0x70] sm:$0xff]   ;;  %vm646_vm4 = vcmask 122880  }
  0x25   : > { %1905 = vmatprep.subr.bf16.mxu1 %v2176_v2  ;;  %1907 = vmatprep.mubr.msk.bf16.mxu1 %vm2177_vm1, %v2176_v2  ;;  %v388_v12 = vrot.slane %v386_v9, 1  ;;  %v2101_v16 = vld [vmem:[%s2261_s16] ss:$0 sps:$4 sm:$0x77]   ;;  %v2105_v27 = vld [vmem:[%s2570_s3 + $0x68] sm:$0xff]   ;;  %v2107_v35 = vld [vmem:[%s2570_s3 + $0x30] sm:$0xff]  }
  0x26   : > { %v736_v18 = vshll.u32 %v2101_v16, 16  ;;  %v734_v19 = vshrl.u32 %v2101_v16, 16  ;;  %v2106_v21 = vld [vmem:[%s2268_s27] ss:$0 sps:$4 sm:$0x77]   ;;  %v2104_v28 = vld [vmem:[%s2570_s3 + $0x28] sm:$0xff]  }
  0x27   : > { %1874 = vmatpush3.bf16.msra.mxu0 %v2093_v4  ;;  %v389_v14 = vor.u32 %v388_v12, %v384_v8  ;;  %v2103_v23 = vld [vmem:[%s2570_s3 + $0x60] sm:$0xff]   ;;  %v807_v26 = vshll.u32 %v2106_v21, 16  ;;  %v805_v29 = vshrl.u32 %v2106_v21, 16  ;;  %v2110_v36 = vld [vmem:[%s2570_s3 + $0x78] sm:$0xff]   ;;  %v2114_v44 = vld [vmem:[%s2570_s3 + $0xd0] sm:$0xff]  }
  0x28   : > { %1906 = vmatpush3.bf16.msra.mxu1 %v2094_v5  ;;  %1879 = vmatprep.subr.bf16.mxu0 %v2176_v2  ;;  %v738_v20 = vrot.slane %v736_v18, 1  ;;  %v369_v24 = vld [vmem:[%s2261_s16] sm:$0x3]  ;;  %v2109_v38 = vld [vmem:[%s2570_s3 + $0x38] sm:$0xff]   ;;  %v2113_v47 = vld [vmem:[%s2570_s3 + $0x90] sm:$0xff]  }
  0x29   : > { %1911 = vmatprep.subr.bf16.mxu1 %v2176_v2  ;;  %v2102_v25 = vld [vmem:[%s2570_s3 + $0x20] sm:$0xff]   ;;  %v809_v30 = vrot.slane %v807_v26, 1  ;;  %v2116_v49 = vld [vmem:[%s2570_s3 + $0xd8] sm:$0xff]   ;;  %v2122_v59 = vld [vmem:[%s2570_s3 + $0xc8] sm:$0xff]  }
  0x2a   : > { %1876 = vmatmul.mubr.msk.bf16.vlgmr.msra.gmra.mrb[0].mxu0 %vm402_vm2, %v389_v14  ;;  %v739_v22 = vor.u32 %v738_v20, %v734_v19  ;;  %v2111_v31 = vld [vmem:[%s2268_s27] ss:$0 sps:$4 sm:$0x77]   ;;  %v2115_v52 = vld [vmem:[%s2570_s3 + $0x98] sm:$0xff]   ;;  %v2121_v60 = vld [vmem:[%s2570_s3 + $0x88] sm:$0xff]  }
  0x2b   : > { %1908 = vmatmul.mubr.msk.bf16.vlgmr.msra.gmra.mrb[0].mxu1 %vm402_vm2, %v674_v10  ;;  %1880 = vmatpush3.bf16.msra.mxu0 %v2097_v13  ;;  %v810_v32 = vor.u32 %v809_v30, %v805_v29  ;;  %v501_v34 = vld [vmem:[%s2268_s27] sm:$0x3]  ;;  %v575_v37 = vshll.u32 %v2111_v31, 16  ;;  %v573_v39 = vshrl.u32 %v2111_v31, 16  ;;  %v2127_v6 = vld [vmem:[%s2570_s3 + $0xe8] sm:$0xff]   ;;  %v2129_v14 = vld [vmem:[%s2570_s3 + $0xb0] sm:$0xff]  }
  0x2c   : > { %1912 = vmatpush3.bf16.msra.mxu1 %v2098_v11  ;;  %1915 = vmatprep.mubr.msk.bf16.mxu1 %vm2177_vm1, %v2176_v2  ;;  %v2112_v40 = vld [vmem:[%s2268_s27] ss:$0 sps:$4 sm:$0x66]   ;;  %v2126_v7 = vld [vmem:[%s2570_s3 + $0xa8] sm:$0xff]   ;;  %v2130_v11 = vld [vmem:[%s2570_s3 + $0xf0] sm:$0xff]  }
  0x2d   : > { %1913 = vmatprep.subr.bf16.mxu1 %v2176_v2  ;;  %1883 = vmatprep.mubr.msk.bf16.mxu0 %vm2177_vm1, %v2176_v2  ;;  %v577_v41 = vrot.slane %v575_v37, 1  ;;  %v2117_v42 = vld [vmem:[%s2268_s27] ss:$0 sps:$4 sm:$0x77]   ;;  %v876_v43 = vrot.slane %v2112_v40, 1 }
  0x2e   : > { %1881 = vmatprep.subr.bf16.mxu0 %v2176_v2  ;;  %v974_v46 = vshll.u32 %v2117_v42, 16  ;;  %v2118_v48 = vld [vmem:[%s2268_s27] ss:$0 sps:$4 sm:$0x66]   ;;  %v972_v50 = vshrl.u32 %v2117_v42, 16 }
  0x2f   : > { %1882 = vmatpush3.bf16.msra.mxu0 %v2099_v17  ;;  %v578_v45 = vor.u32 %v577_v41, %v573_v39  ;;  %v1260_v53 = vrot.slane %v2118_v48, 1  ;;  %v2123_v54 = vld [vmem:[%s2268_s27] ss:$0 sps:$4 sm:$0x77]   ;;  %v2131_v17 = vld [vmem:[%s2570_s3 + $0xb8] sm:$0xff]  }
  0x30   : > { %1914 = vmatpush3.bf16.msra.mxu1 %v2100_v15  ;;  %1887 = vmatprep.subr.bf16.mxu0 %v2176_v2  ;;  %v976_v51 = vrot.slane %v974_v46, 1  ;;  %v2120_v55 = vld [vmem:[%s2570_s3 + $0xc0] sm:$0xff]   ;;  %v1322_v58 = vshll.u32 %v2123_v54, 16  ;;  %v1320_v61 = vshrl.u32 %v2123_v54, 16  ;;  %v2132_v15 = vld [vmem:[%s2570_s3 + $0xf8] sm:$0xff]  }
  0x31   : > { %1919 = vmatprep.subr.bf16.mxu1 %v2176_v2  ;;  %v2119_v57 = vld [vmem:[%s2570_s3 + $0x80] sm:$0xff]  }
  0x32   : > { %v977_v56 = vor.u32 %v976_v51, %v972_v50  ;;  %v1324_v62 = vrot.slane %v1322_v58, 1  ;;  %v2128_v0 = vld [vmem:[%s2273_s24] ss:$0 sps:$4 sm:$0x77]  }
  0x33   : > { %v2125_v1 = vld [vmem:[%s2570_s3 + $0xe0] sm:$0xff]   ;;  %v1393_v5 = vshll.u32 %v2128_v0, 16  ;;  %v1391_v8 = vshrl.u32 %v2128_v0, 16 }
  0x34   : > { %v1325_v63 = vor.u32 %v1324_v62, %v1320_v61  ;;  %v956_v3 = vld [vmem:[%s2268_s27] sm:$0x3] }
  0x35   : > { %v2124_v4 = vld [vmem:[%s2570_s3 + $0xa0] sm:$0xff]   ;;  %v1395_v9 = vrot.slane %v1393_v5, 1 }
  0x36   : > { %1884 = vmatmul.mubr.msk.bf16.vlgmr.msra.gmra.mrb[0].mxu0 %vm402_vm2, %v369_v24  ;;  %v2133_v12 = vld [vmem:[%s2273_s24] ss:$0 sps:$4 sm:$0x77]  }
  0x37   : > { %1916 = vmatmul.mubr.msk.bf16.vlgmr.msra.gmra.mrb[0].mxu1 %vm402_vm2, %v739_v22  ;;  %1888 = vmatpush3.bf16.msra.mxu0 %v2102_v25  ;;  %v1396_v10 = vor.u32 %v1395_v9, %v1391_v8  ;;  %v1088_v13 = vld [vmem:[%s2273_s24] sm:$0x3]  ;;  %v1162_v16 = vshll.u32 %v2133_v12, 16  ;;  %v1160_v19 = vshrl.u32 %v2133_v12, 16 }
  0x38   : > { %1920 = vmatpush3.bf16.msra.mxu1 %v2103_v23  ;;  %1923 = vmatprep.mubr.msk.bf16.mxu1 %vm2177_vm1, %v2176_v2  ;;  %v2134_v18 = vld [vmem:[%s2273_s24] ss:$0 sps:$4 sm:$0x66]  }
  0x39   : > { %1921 = vmatprep.subr.bf16.mxu1 %v2176_v2  ;;  %1891 = vmatprep.mubr.msk.bf16.mxu0 %vm2177_vm1, %v2176_v2  ;;  %v1164_v20 = vrot.slane %v1162_v16, 1  ;;  %v1462_v21 = vrot.slane %v2134_v18, 1  ;;  %v637_v50 = vld [vmem:[%s2572_s5] sm:$0x1] }
  0x3a   : > { %1889 = vmatprep.subr.bf16.mxu0 %v2176_v2  ;;  %v648_v54 = vld [vmem:[%s2573_s6] sm:$0x1] }
  0x3b   : > { %1890 = vmatpush3.bf16.msra.mxu0 %v2104_v28  ;;  %v1165_v22 = vor.u32 %v1164_v20, %v1160_v19 }
  0x3c   : > { %1922 = vmatpush3.bf16.msra.mxu1 %v2105_v27  ;;  %1895 = vmatprep.subr.bf16.mxu0 %v2176_v2 }
  0x3d   : > { %1927 = vmatprep.subr.bf16.mxu1 %v2176_v2 }
  0x42   : > { %1892 = vmatmul.mubr.msk.bf16.vlgmr.msra.gmra.mrb[0].mxu0 %vm402_vm2, %v501_v34 }
  0x43   : > { %1924 = vmatmul.mubr.msk.bf16.vlgmr.msra.gmra.mrb[0].mxu1 %vm402_vm2, %v810_v32  ;;  %1896 = vmatpush3.bf16.msra.mxu0 %v2107_v35 }
  0x44   : > { %1928 = vmatpush3.bf16.msra.mxu1 %v2108_v33  ;;  %1931 = vmatprep.mubr.msk.bf16.mxu1 %vm2177_vm1, %v2176_v2 }
  0x45   : > { %1929 = vmatprep.subr.bf16.mxu1 %v2176_v2  ;;  %1899 = vmatprep.mubr.msk.bf16.mxu0 %vm2177_vm1, %v2176_v2 }
  0x46   : > { %1897 = vmatprep.subr.bf16.mxu0 %v2176_v2 }
  0x47   : > { %1898 = vmatpush3.bf16.msra.mxu0 %v2109_v38 }
  0x48   : > { %1930 = vmatpush3.bf16.msra.mxu1 %v2110_v36  ;;  %1935 = vmatprep.subr.bf16.mxu0 %v2176_v2 }
  0x49   : > { %1967 = vmatprep.subr.bf16.mxu1 %v2176_v2 }
  0x4e   : > { %1900 = vmatmul.mubr.msk.bf16.vlgmr.msra.gmra.mrb[0].mxu0 %vm402_vm2, %v578_v45 }
  0x4f   : > { %1932 = vmatmul.mubr.msk.bf16.vlgmr.msra.gmra.mrb[0].mxu1 %vm402_vm2, %v876_v43  ;;  %1936 = vmatpush3.bf16.msra.mxu0 %v2113_v47 }
  0x50   : > { %1968 = vmatpush3.bf16.msra.mxu1 %v2114_v44  ;;  %1971 = vmatprep.mubr.msk.bf16.mxu1 %vm2177_vm1, %v2176_v2 }
  0x51   : > { %1969 = vmatprep.subr.bf16.mxu1 %v2176_v2  ;;  %1939 = vmatprep.mubr.msk.bf16.mxu0 %vm2177_vm1, %v2176_v2 }
  0x52   : > { %1937 = vmatprep.subr.bf16.mxu0 %v2176_v2 }
  0x53   : > { %1938 = vmatpush3.bf16.msra.mxu0 %v2115_v52 }
  0x54   : > { %1970 = vmatpush3.bf16.msra.mxu1 %v2116_v49  ;;  %1943 = vmatprep.subr.bf16.mxu0 %v2176_v2 }
  0x55   : > { %1975 = vmatprep.subr.bf16.mxu1 %v2176_v2 }
  0x56   : > { %1940 = vmatmul.mubr.msk.bf16.vlgmr.msra.gmra.mrb[4].mxu0 %vm402_vm2, %v977_v56 }
  0x57   : > { %1972 = vmatmul.mubr.msk.bf16.vlgmr.msra.gmra.mrb[4].mxu1 %vm402_vm2, %v1260_v53  ;;  %1944 = vmatpush3.bf16.msra.mxu0 %v2119_v57 }
  0x58   : > { %1976 = vmatpush3.bf16.msra.mxu1 %v2120_v55  ;;  %1979 = vmatprep.mubr.msk.bf16.mxu1 %vm2177_vm1, %v2176_v2 }
  0x59   : > { %1977 = vmatprep.subr.bf16.mxu1 %v2176_v2  ;;  %1947 = vmatprep.mubr.msk.bf16.mxu0 %vm2177_vm1, %v2176_v2 }
  0x5a   : > { %1945 = vmatprep.subr.bf16.mxu0 %v2176_v2 }
  0x5b   : > { %1946 = vmatpush3.bf16.msra.mxu0 %v2121_v60 }
  0x5c   : > { %1978 = vmatpush3.bf16.msra.mxu1 %v2122_v59  ;;  %1951 = vmatprep.subr.bf16.mxu0 %v2176_v2 }
  0x5d   : > { %1983 = vmatprep.subr.bf16.mxu1 %v2176_v2 }
  0x62   : > { %1948 = vmatmul.mubr.msk.bf16.vlgmr.msra.gmra.mrb[4].mxu0 %vm402_vm2, %v956_v3 }
  0x63   : > { %1980 = vmatmul.mubr.msk.bf16.vlgmr.msra.gmra.mrb[4].mxu1 %vm402_vm2, %v1325_v63  ;;  %1952 = vmatpush3.bf16.msra.mxu0 %v2124_v4 }
  0x64   : > { %1984 = vmatpush3.bf16.msra.mxu1 %v2125_v1  ;;  %1987 = vmatprep.mubr.msk.bf16.mxu1 %vm2177_vm1, %v2176_v2 }
  0x65   : > { %1985 = vmatprep.subr.bf16.mxu1 %v2176_v2  ;;  %1955 = vmatprep.mubr.msk.bf16.mxu0 %vm2177_vm1, %v2176_v2 }
  0x66   : > { %1953 = vmatprep.subr.bf16.mxu0 %v2176_v2 }
  0x67   : > { %1954 = vmatpush3.bf16.msra.mxu0 %v2126_v7 }
  0x68   : > { %1986 = vmatpush3.bf16.msra.mxu1 %v2127_v6  ;;  %1959 = vmatprep.subr.bf16.mxu0 %v2176_v2 }
  0x69   : > { %1991 = vmatprep.subr.bf16.mxu1 %v2176_v2 }
  0x6e   : > { %1956 = vmatmul.mubr.msk.bf16.vlgmr.msra.gmra.mrb[4].mxu0 %vm402_vm2, %v1088_v13 }
  0x6f   : > { %1988 = vmatmul.mubr.msk.bf16.vlgmr.msra.gmra.mrb[4].mxu1 %vm402_vm2, %v1396_v10  ;;  %1960 = vmatpush3.bf16.msra.mxu0 %v2129_v14 }
  0x70   : > { %1992 = vmatpush3.bf16.msra.mxu1 %v2130_v11  ;;  %1995 = vmatprep.mubr.msk.bf16.mxu1 %vm2177_vm1, %v2176_v2 }
  0x71   : > { %1993 = vmatprep.subr.bf16.mxu1 %v2176_v2  ;;  %1963 = vmatprep.mubr.msk.bf16.mxu0 %vm2177_vm1, %v2176_v2 }
  0x72   : > { %1961 = vmatprep.subr.bf16.mxu0 %v2176_v2 }
  0x73   : > { %1962 = vmatpush3.bf16.msra.mxu0 %v2131_v17 }
  0x74   : > { %1994 = vmatpush3.bf16.msra.mxu1 %v2132_v15 }
  0x7a   : > { %1964 = vmatmul.mubr.msk.bf16.vlgmr.msra.gmra.mrb[4].mxu0 %vm402_vm2, %v1165_v22 }
  0x7b   : > { %1996 = vmatmul.mubr.msk.bf16.vlgmr.msra.gmra.mrb[4].mxu1 %vm402_vm2, %v1462_v21 }
 0x121   : > { %v628_v26 = vpop.f32.mrb[0].mxu0 }
 0x122   : > { %v926_v23 = vpop.f32.mrb[0].mxu1  ;;  %636 = vst.msk [vmem:[%s2280_s29] sm:$0xf] %vm635_vm3, %v628_v26  ;;  %v638_v28 = vsel %vm635_vm3, %v628_v26, 0.0  ;;  %v649_v29 = vmul.f32 %v628_v26, %v628_v26  ;;  %v1901_v31 = vpop.f32.mrb[1].mxu0 }
 0x123   : > { %1756 = vst.msk [vmem:[%s2280_s29 + $0x4] sm:$0xf] %vm635_vm3, %v926_v23  ;;  %v936_v24 = vsel %vm635_vm3, %v926_v23, 0.0  ;;  %v946_v25 = vmul.f32 %v926_v23, %v926_v23  ;;  %v1933_v2 = vpop.f32.mrb[1].mxu1  ;;  %v639_v33 = vrot.slane %v638_v28, 4  ;;  %v631_v35 = vpop.f32.mrb[2].mxu0 }
 0x124   : > { %v929_v27 = vpop.f32.mrb[2].mxu1  ;;  %v937_v34 = vrot.slane %v936_v24, 4  ;;  %v650_v36 = vsel %vm635_vm3, %v649_v29, 0.0  ;;  %v1902_v37 = vpop.f32.mrb[3].mxu0 }
 0x125   : > { %v947_v30 = vsel %vm635_vm3, %v946_v25, 0.0  ;;  %v1934_v32 = vpop.f32.mrb[3].mxu1  ;;  %v640_v38 = vadd.f32 %v639_v33, %v638_v28  ;;  %v651_v39 = vrot.slane %v650_v36, 4 }
 0x126   : > { %v948_v40 = vrot.slane %v947_v30, 4  ;;  %v938_v43 = vadd.f32 %v937_v34, %v936_v24 }
 0x127   : > { %v641_v41 = vrot.slane %v640_v38, 2  ;;  %v652_v42 = vadd.f32 %v651_v39, %v650_v36 }
 0x128   : > { %v949_v46 = vadd.f32 %v948_v40, %v947_v30  ;;  %v939_v49 = vrot.slane %v938_v43, 2 }
 0x129   : > { %v642_v44 = vadd.f32 %v641_v41, %v640_v38  ;;  %v653_v45 = vrot.slane %v652_v42, 2 }
 0x12a   : > { %v950_v53 = vrot.slane %v949_v46, 2  ;;  %v940_v57 = vadd.f32 %v939_v49, %v938_v43 }
 0x12b   : > { %v643_v47 = vrot.slane %v642_v44, 1  ;;  %v654_v48 = vadd.f32 %v653_v45, %v652_v42 }
 0x12c   : > { %v951_v59 = vadd.f32 %v950_v53, %v949_v46  ;;  %v941_v60 = vrot.slane %v940_v57, 1 }
 0x12d   : > { %v644_v51 = vadd.f32 %v643_v47, %v642_v44  ;;  %v655_v52 = vrot.slane %v654_v48, 1 }
 0x12e   : > { %v952_v61 = vrot.slane %v951_v59, 1  ;;  %v942_v62 = vadd.f32 %v941_v60, %v940_v57 }
 0x12f   : > { %v645_v55 = vadd.f32 %v644_v51, %v637_v50  ;;  %v656_v56 = vadd.f32 %v655_v52, %v654_v48 }
 0x130   : > { %v953_v1 = vadd.f32 %v952_v61, %v951_v59 }
 0x131   : > { %647 = vst.msk [vmem:[%s2572_s5] sm:$0x1] %vm646_vm4, %v645_v55  ;;  %v657_v58 = vadd.f32 %v656_v56, %v648_v54 }
 0x133   : > { %658 = vst.msk [vmem:[%s2573_s6] sm:$0x1] %vm646_vm4, %v657_v58 }
 0x138   : > { %v935_v63 = vld [vmem:[%s2572_s5] sm:$0x1] }
 0x139   : > { %v943_v0 = vadd.f32 %v942_v62, %v935_v63 }
 0x13a   : > { %v945_v3 = vld [vmem:[%s2573_s6] sm:$0x1] }
 0x13b   : > { %944 = vst.msk [vmem:[%s2572_s5] sm:$0x1] %vm646_vm4, %v943_v0  ;;  %v954_v4 = vadd.f32 %v953_v1, %v945_v3 }
 0x13d   : > { %955 = vst.msk [vmem:[%s2573_s6] sm:$0x1] %vm646_vm4, %v954_v4 }
 0x142   : > { %v1224_v35 = vld [vmem:[%s2572_s5] sm:$0x1] }
 0x144   : > { %v1234_v39 = vld [vmem:[%s2573_s6] sm:$0x1] }
 0x14d   : > { %v1215_v9 = vpop.f32.mrb[4].mxu0 }
 0x14e   : > { %v1512_v5 = vpop.f32.mrb[4].mxu1  ;;  %1787 = vst.msk [vmem:[%s2280_s29 + $0x8] sm:$0xf] %vm635_vm3, %v1215_v9  ;;  %v1225_v11 = vsel %vm635_vm3, %v1215_v9, 0.0  ;;  %v1235_v12 = vmul.f32 %v1215_v9, %v1215_v9  ;;  %v1965_v14 = vpop.f32.mrb[5].mxu0 }
 0x14f   : > { %1820 = vst.msk [vmem:[%s2280_s29 + $0xc] sm:$0xf] %vm635_vm3, %v1512_v5  ;;  %v1522_v6 = vsel %vm635_vm3, %v1512_v5, 0.0  ;;  %v1532_v7 = vmul.f32 %v1512_v5, %v1512_v5  ;;  %v1997_v8 = vpop.f32.mrb[5].mxu1  ;;  %v1226_v16 = vrot.slane %v1225_v11, 4  ;;  %v1218_v18 = vpop.f32.mrb[6].mxu0 }
 0x150   : > { %v1515_v10 = vpop.f32.mrb[6].mxu1  ;;  %v1523_v17 = vrot.slane %v1522_v6, 4  ;;  %v1236_v19 = vsel %vm635_vm3, %v1235_v12, 0.0  ;;  %v1966_v20 = vpop.f32.mrb[7].mxu0 }
 0x151   : > { %v1533_v13 = vsel %vm635_vm3, %v1532_v7, 0.0  ;;  %v1998_v15 = vpop.f32.mrb[7].mxu1  ;;  %v1227_v21 = vadd.f32 %v1226_v16, %v1225_v11  ;;  %v1237_v22 = vrot.slane %v1236_v19, 4 }
 0x152   : > { %v1534_v23 = vrot.slane %v1533_v13, 4  ;;  %v1524_v2 = vadd.f32 %v1523_v17, %v1522_v6 }
 0x153   : > { %v1228_v24 = vrot.slane %v1227_v21, 2  ;;  %v1238_v25 = vadd.f32 %v1237_v22, %v1236_v19 }
 0x154   : > { %v1535_v28 = vadd.f32 %v1534_v23, %v1533_v13  ;;  %v1525_v31 = vrot.slane %v1524_v2, 2 }
 0x155   : > { %v1229_v26 = vadd.f32 %v1228_v24, %v1227_v21  ;;  %v1239_v27 = vrot.slane %v1238_v25, 2 }
 0x156   : > { %v1536_v34 = vrot.slane %v1535_v28, 2  ;;  %v1526_v38 = vadd.f32 %v1525_v31, %v1524_v2 }
 0x157   : > { %v1230_v29 = vrot.slane %v1229_v26, 1  ;;  %v1240_v30 = vadd.f32 %v1239_v27, %v1238_v25 }
 0x158   : > { %v1537_v41 = vadd.f32 %v1536_v34, %v1535_v28  ;;  %v1527_v42 = vrot.slane %v1526_v38, 1 }
 0x159   : > { %v1231_v32 = vadd.f32 %v1230_v29, %v1229_v26  ;;  %v1241_v33 = vrot.slane %v1240_v30, 1 }
 0x15a   : > { %v1538_v43 = vrot.slane %v1537_v41, 1  ;;  %v1528_v44 = vadd.f32 %v1527_v42, %v1526_v38 }
 0x15b   : > { %v1232_v36 = vadd.f32 %v1231_v32, %v1224_v35  ;;  %v1242_v37 = vadd.f32 %v1241_v33, %v1240_v30 }
 0x15c   : > { %v1539_v47 = vadd.f32 %v1538_v43, %v1537_v41 }
 0x15d   : > { %1233 = vst.msk [vmem:[%s2572_s5] sm:$0x1] %vm646_vm4, %v1232_v36  ;;  %v1243_v40 = vadd.f32 %v1242_v37, %v1234_v39 }
 0x15f   : > { %1244 = vst.msk [vmem:[%s2573_s6] sm:$0x1] %vm646_vm4, %v1243_v40 }
 0x164   : > { %v1521_v45 = vld [vmem:[%s2572_s5] sm:$0x1] }
 0x165   : > { %v1529_v46 = vadd.f32 %v1528_v44, %v1521_v45 }
 0x166   : > { %v1531_v48 = vld [vmem:[%s2573_s6] sm:$0x1] }
 0x167   : > { %1530 = vst.msk [vmem:[%s2572_s5] sm:$0x1] %vm646_vm4, %v1529_v46  ;;  %v1540_v49 = vadd.f32 %v1539_v47, %v1531_v48 }
 0x169   : > { %1541 = vst.msk [vmem:[%s2573_s6] sm:$0x1] %vm646_vm4, %v1540_v49 }
 0x16a PF: > { %s17_s25 = sadd.s32 1, %s2173_s25   ;;  %s2579_s22 = sld [smem:[#allocation2_spill]] }
 0x16b   : > { %p14_p13 = scmp.ge.s32.totalorder %s17_s25, 10   ;;  %s2580_s15 = sld [smem:[#allocation3_spill]] }
 0x16c   : > { %s2581_s24 = sld [smem:[#allocation4_spill]]  ;;  %s2582_s21 = smov %s2165_s23 }
 0x16d   :  { %16 = sbr.rel (!%p14_p13) target bundleno = 3 (0x3), region = 110 }
 0x171   : > { %s2583_s23 = smov %s2580_s15 }

// kernel: generator_forward.15
= control target key start
LH: loop header
LB: loop body
LE: loop exit
PB: predicated region body
PF: predicated region fallthrough
CT: control target
= control target key end

     0   :  { %s2071_s21 = smov 0   ;;  %s2073_s22 = smov 0   ;;  %s2420_s0 = inlined_call_operand.vmem [shape: bf16[2,18,18,8], index: 0, kind: input, shape index: {}, may-alias: {0,1,2}]   ;;  %s2421_s1 = inlined_call_operand.vmem [shape: bf16[2,18,18,8], index: 1, kind: input, shape index: {}, may-alias: {0,1,2}]   ;;  %s2422_s2 = inlined_call_operand.vmem [shape: bf16[2,18,18,8], index: 2, kind: input, shape index: {}, may-alias: {0,1,2}]   ;;  %s2423_s3 = inlined_call_operand.vmem [shape: bf16[16,8,4], index: 3, kind: input, shape index: {}]   ;;  %s2424_s4 = inlined_call_operand.vmem [shape: f32[2,32,2,16,4], index: 4, kind: output, shape index: {0}]   ;;  %s2425_s5 = inlined_call_operand.vmem [shape: f32[1,4], index: 5, kind: output, shape index: {1}]   ;;  %s2426_s6 = inlined_call_operand.vmem [shape: f32[1,4], index: 6, kind: output, shape index: {2}]  }
   0x1   :  { %s2075_s23 = smov 0   ;;  %s2077_s24 = smov 0  }
   0x2   :  { %s2079_s25 = smov 0  }
   0x3 LB: > { %s26_s26 = sadd.s32 1, %s2023_s23  ;;  %s29_s27 = sadd.s32 1, %s2027_s24  ;;  %s2031_s25 = sphi %s2079_s25, %s17_s25   ;;  %s2027_s24 = sphi %s2077_s24, %s2435_s24   ;;  %s2023_s23 = sphi %s2075_s23, %s2434_s23   ;;  %s2019_s22 = sphi %s2073_s22, %s2433_s22   ;;  %s2015_s21 = sphi %s2071_s21, %s2432_s21  }
   0x4   : > { %p27_p0 = scmp.ge.s32.totalorder %s26_s26, 16  ;;  %p1679_p1 = scmp.ge.s32.totalorder %s2031_s25, 1 }
   0x5   : > { %p267_p2 = scmp.lt.s32.totalorder %s2031_s25, 33 }
   0x6   : > { %s2437_s26 = smov (%p27_p0, %s26_s26), 0  ;;  %s2439_s27 = smov (!%p27_p0, %s29_s27), %s2027_s24 }
   0x7   : > { %2427 = sst [smem:[#allocation2_spill]] %s2437_s26  ;;  %p268_p3 = pnand %p1679_p1, %p267_p2 }
   0x8   : > { %p31_p4 = scmp.ge.s32.totalorder %s2439_s27, 2  ;;  %p326_p5 = scmp.lt.s32.totalorder (!%p268_p3), %s2019_s22, 1 }
   0x9   : > { %271 = sbr.rel (%p268_p3) target bundleno = 371 (0x173), region = 36  ;;  %p328_p6 = scmp.lt.s32.totalorder (!%p268_p3), %s2015_s21, 17 }
   0xa   : > { %s2441_s27 = smov (%p31_p4, %s2439_s27), 0  ;;  %s335_s28 = sadd.s32 (!%p268_p3), 1, %s2015_s21 }
   0xb   : > { %2428 = sst [smem:[#allocation3_spill]] %s2441_s27  ;;  %s346_s29 = sadd.s32 (!%p268_p3), 2, %s2015_s21 }
   0xc   : > { %p338_p7 = scmp.lt.s32.totalorder (!%p268_p3), %s335_s28, 17  ;;  %p2111_p8 = scmp.lt.s32.totalorder (!%p268_p3), %s346_s29, 17 }
   0xd   : > { %s1683_s12 = sshll.u32 (!%p268_p3), %s2015_s21, 1  ;;  %p369_p10 = scmp.eq.s32.totalorder (!%p268_p3), %s2019_s22, 0 }
   0xe   : > { %p360_p9 = scmp.lt.s32.totalorder (!%p268_p3), %s1683_s12, 31  ;;  %p370_p11 = scmp.eq.s32.totalorder (!%p268_p3), %s2015_s21, 0 }
  0x10   : > { %s327_s30 = scalar_select %p326_p5, %s2019_s22, 1 }
  0x11   : > { %s329_s7 = scalar_select %p328_p6, %s2015_s21, 17 }
  0x12   : > { %s1925_s8 = smul.u32 54, %s327_s30  ;;  %s2443_s28 = smov (!%p338_p7, %s335_s28), 17 }
  0x13   : > { %s1924_s9 = smul.u32 3, %s329_s7  ;;  %s1685_s19 = sshll.u32 %s327_s30, 7 }
  0x14   : > { %s1926_s14 = smul.u32 3, %s2443_s28  ;;  %s2445_s29 = smov (!%p2111_p8, %s346_s29), 17 }
  0x15   : > { %s332_s11 = sadd.s32 %s1925_s8, %s1924_s9  ;;  %s2447_s12 = smov (!%p360_p9, %s1683_s12), 31 }
  0x16   : > { %s1680_s13 = sshll.u32 %s332_s11, 2  ;;  %s342_s18 = sadd.s32 %s1926_s14, %s1925_s8 }
  0x17   : > { %s2119_s17 = scalar_lea.vmem %s2420_s0, %s1680_s13  ;;  %s1681_s20 = sshll.u32 %s342_s18, 2 }
  0x18   : > { %s2125_s26 = scalar_lea.vmem %s2421_s1, %s1681_s20  ;;  %s1927_s28 = smul.u32 3, %s2445_s29 }
  0x19   : > { %p371_p12 = pnand %p370_p11, %p369_p10  ;;  %s1684_s9 = sshll.u32 %s2447_s12, 2 }
  0x1a   : > { %s353_s11 = sadd.s32 %s1927_s28, %s1925_s8  ;;  %s364_s13 = sadd.s32 %s1685_s19, %s1684_s9  ;;  %vm375_vm0 = vcmask (!%p371_p12), 24576   ;;  %v2033_v0 = vmov (!%p371_p12), 0.0  }
  0x1b   : > { %s1682_s15 = sshll.u32 %s353_s11, 2  ;;  %s1686_s16 = sshll.u32 %s364_s13, 3  ;;  %376 = vst.msk [vmem:[%s2425_s5] sm:$0x1] (!%p371_p12), %vm375_vm0, %v2033_v0  ;;  %377 = vst.msk [vmem:[%s2426_s6] sm:$0x1] (!%p371_p12), %vm375_vm0, %v2033_v0 }
  0x1c   : > { %s2133_s22 = scalar_lea.vmem %s2422_s2, %s1682_s15  ;;  %s2138_s20 = scalar_lea.vmem %s2424_s4, %s1686_s16 }
  0x1d   : > { %374 = sbr.rel (%p371_p12) target bundleno = 36 (0x24), region = 40 }
  0x24 PF: > { %vm409_vm1 = vcmask 1043456   ;;  %v1700_v1 = vld [vmem:[%s2423_s3 + $0x14] sm:$0xf]  ;;  %v2034_v2 = vmov 0.0   ;;  %v1687_v4 = vld [vmem:[%s2423_s3 + $0x4] sm:$0xf] }
  0x25   : > { %1804 = vmatprep.subr.bf16.mxu1 %v2034_v2  ;;  %v686_v3 = vsel %vm409_vm1, %v1700_v1, 0  ;;  %1780 = vmatprep.subr.bf16.mxu0 %v2034_v2  ;;  %v662_v5 = vld [vmem:[%s2119_s17] sm:$0xf]  ;;  %vm2035_vm2 = vmmov 0   ;;  %v411_v6 = vsel %vm409_vm1, %v1687_v4, 0  ;;  %vm405_vm3 = vcmask 64512  }
  0x26   : > { %1805 = vmatpush3.bf16.msra.mxu1 %v686_v3  ;;  %1806 = vmatprep.mubr.msk.bf16.mxu1 %vm2035_vm2, %v2034_v2  ;;  %v663_v7 = vld [vmem:[%s2119_s17 + $0x4] sm:$0xf]  ;;  %v667_v9 = vld [vmem:[%s2119_s17] sm:$0xe]  ;;  %vm678_vm4 = vcmask 1046528   ;;  %vm632_vm6 = vcmask 31744  }
  0x27   : > { %v1974_v8 = vld [vmem:[%s2119_s17] sm:$0xff]   ;;  %1781 = vmatpush3.bf16.msra.mxu0 %v411_v6  ;;  %v1972_v10 = vld [vmem:[%s2119_s17 + $0x8] ss:$0 sps:$4 sm:$0x11]   ;;  %v1704_v11 = vcombine.low %v662_v5, %v663_v7  ;;  %1782 = vmatprep.mubr.msk.bf16.mxu0 %vm2035_vm2, %v2034_v2  ;;  %v1701_v12 = vcombine.low %v667_v9, %v663_v7  ;;  %v1699_v21 = vld [vmem:[%s2423_s3 + $0x10] sm:$0xf] }
  0x28   : > { %1786 = vmatprep.subr.bf16.mxu0 %v2034_v2  ;;  %1810 = vmatprep.subr.bf16.mxu1 %v2034_v2  ;;  %v680_v13 = vrot.slane %v1972_v10, 1  ;;  %v1975_v14 = vld [vmem:[%s2119_s17 + $0x8] ss:$0 sps:$4 sm:$0x11]   ;;  %v394_v17 = vshrl.u32 %v1974_v8, 16  ;;  %v396_v18 = vshll.u32 %v1974_v8, 16 }
  0x29   : > { %v679_v15 = vrot.slane %v1701_v12, 1  ;;  %v735_v16 = vshll.u32 %v1704_v11, 16  ;;  %v380_v19 = vld [vmem:[%s2423_s3] sm:$0xf]  ;;  %v401_v20 = vshll.u32 %v1975_v14, 16  ;;  %v748_v24 = vsel %vm409_vm1, %v1699_v21, 0 }
  0x2a   : > { %v398_v23 = vrot.slane %v396_v18, 1  ;;  %vm392_vm5 = vsmask.f32 7424  ;;  %v457_v26 = vsel %vm409_vm1, %v380_v19, 0  ;;  %v733_v28 = vshrl.u32 %v1704_v11, 16  ;;  %v1980_v50 = vld [vmem:[%s2125_s26] sm:$0xff]  }
  0x2b   : > { %v681_v22 = vsel %vm678_vm4, %v679_v15, %v680_v13  ;;  %v403_v25 = vrot.slane %v401_v20, 1  ;;  %v737_v29 = vrot.slane %v735_v16, 1  ;;  %v740_v30 = vshll.u32 %v1972_v10, 16  ;;  %v791_v31 = vld [vmem:[%s2125_s26] sm:$0xf] }
  0x2c   : > { %1807 = vmatmul.mubr.msk.bf16.vlgmr.msra.gmra.mrb[0].mxu1 %vm405_vm3, %v681_v22  ;;  %v399_v27 = vor.u32 %v398_v23, %v394_v17  ;;  %v792_v32 = vld [vmem:[%s2125_s26 + $0x4] sm:$0xf]  ;;  %v1706_v37 = vld [vmem:[%s2423_s3 + $0x18] sm:$0xf]  ;;  %v1692_v42 = vld [vmem:[%s2423_s3 + $0x8] sm:$0xf] }
  0x2d   : > { %1811 = vmatpush3.bf16.msra.mxu1 %v748_v24  ;;  %1812 = vmatprep.mubr.msk.bf16.mxu1 %vm2035_vm2, %v2034_v2  ;;  %v738_v34 = vor.u32 %v737_v29, %v733_v28  ;;  %v742_v35 = vrot.slane %v740_v30, 1  ;;  %v1707_v36 = vcombine.low %v791_v31, %v792_v32  ;;  %v1977_v39 = vld [vmem:[%s2125_s26 + $0x8] ss:$0 sps:$4 sm:$0x11]   ;;  %v820_v41 = vsel %vm409_vm1, %v1706_v37, 0  ;;  %v1978_v55 = vld [vmem:[%s2125_s26] sm:$0xff]  }
  0x2e   : > { %1816 = vmatprep.subr.bf16.mxu1 %v2034_v2  ;;  %v404_v33 = vsel %vm392_vm5, %v399_v27, %v403_v25  ;;  %v812_v45 = vshll.u32 %v1977_v39, 16  ;;  %v513_v46 = vsel %vm409_vm1, %v1692_v42, 0  ;;  %v1710_v49 = vld [vmem:[%s2423_s3 + $0x1c] sm:$0xf]  ;;  %v865_v52 = vld [vmem:[%s2125_s26] sm:$0xe] }
  0x2f   : > { %1783 = vmatmul.mubr.msk.bf16.vlgmr.msra.gmra.mrb[0].mxu0 %vm405_vm3, %v404_v33  ;;  %v743_v38 = vsel %vm392_vm5, %v738_v34, %v742_v35  ;;  %v807_v40 = vshll.u32 %v1707_v36, 16  ;;  %v805_v43 = vshrl.u32 %v1707_v36, 16  ;;  %v878_v53 = vsel %vm409_vm1, %v1710_v49, 0  ;;  %v1695_v54 = vld [vmem:[%s2423_s3 + $0xc] sm:$0xf]  ;;  %v2227_v1 = vld [vmem:[%s2125_s26] sm:$0xff]  }
  0x30   : > { %1787 = vmatpush3.bf16.msra.mxu0 %v457_v26  ;;  %1788 = vmatprep.mubr.msk.bf16.mxu0 %vm2035_vm2, %v2034_v2  ;;  %v814_v48 = vrot.slane %v812_v45, 1  ;;  %v1711_v56 = vcombine.low %v865_v52, %v792_v32  ;;  %v1981_v57 = vld [vmem:[%s2125_s26 + $0x8] ss:$0 sps:$4 sm:$0x11]   ;;  %v574_v58 = vshll.u32 %v1980_v50, 16  ;;  %v587_v59 = vsel %vm409_vm1, %v1695_v54, 0 }
  0x31   : > { %1792 = vmatprep.subr.bf16.mxu0 %v2034_v2  ;;  %v809_v44 = vrot.slane %v807_v40, 1  ;;  %v872_v61 = vrot.slane %v1977_v39, 1  ;;  %v572_v62 = vshrl.u32 %v1980_v50, 16  ;;  %v579_v0 = vshll.u32 %v1981_v57, 16  ;;  %v1234_v3 = vld [vmem:[%s2125_s26 + $0x4] sm:$0xf] }
  0x32   : > { %v871_v60 = vrot.slane %v1711_v56, 1  ;;  %v576_v63 = vrot.slane %v574_v58, 1  ;;  %v1238_v4 = vld [vmem:[%s2125_s26] sm:$0xe]  ;;  %v1731_v5 = vld [vmem:[%s2423_s3 + $0x34] sm:$0xf] }
  0x33   : > { %v810_v47 = vor.u32 %v809_v44, %v805_v43  ;;  %v1233_v7 = vld [vmem:[%s2125_s26] sm:$0xf]  ;;  %v581_v10 = vrot.slane %v579_v0, 1  ;;  %v1732_v11 = vcombine.low %v1238_v4, %v1234_v3  ;;  %v1986_v12 = vld [vmem:[%s2125_s26 + $0x8] ss:$0 sps:$4 sm:$0x11]  }
  0x34   : > { %v873_v6 = vsel %vm678_vm4, %v871_v60, %v872_v61  ;;  %v577_v9 = vor.u32 %v576_v63, %v572_v62  ;;  %v970_v13 = vshll.u32 %v2227_v1, 16  ;;  %v1256_v14 = vsel %vm409_vm1, %v1731_v5, 0  ;;  %v1716_v15 = vld [vmem:[%s2423_s3 + $0x24] sm:$0xf]  ;;  %v1730_v24 = vld [vmem:[%s2423_s3 + $0x30] sm:$0xf] }
  0x35   : > { %v815_v51 = vsel %vm392_vm5, %v810_v47, %v814_v48  ;;  %v1735_v17 = vcombine.low %v1233_v7, %v1234_v3  ;;  %v968_v18 = vshrl.u32 %v2227_v1, 16  ;;  %v1249_v20 = vrot.slane %v1732_v11, 1  ;;  %v1715_v30 = vld [vmem:[%s2423_s3 + $0x20] sm:$0xf]  ;;  %v1362_v37 = vld [vmem:[%s2133_s22 + $0x4] sm:$0xf] }
  0x36   : > { %v582_v19 = vsel %vm392_vm5, %v577_v9, %v581_v10  ;;  %v972_v21 = vrot.slane %v970_v13, 1  ;;  %v975_v22 = vshll.u32 %v1986_v12, 16  ;;  %v983_v23 = vsel %vm409_vm1, %v1716_v15, 0  ;;  %v1361_v36 = vld [vmem:[%s2133_s22] sm:$0xf] }
  0x37   : > { %v1305_v28 = vshll.u32 %v1735_v17, 16  ;;  %v1318_v29 = vsel %vm409_vm1, %v1730_v24, 0  ;;  %v1303_v32 = vshrl.u32 %v1735_v17, 16  ;;  %v1029_v35 = vsel %vm409_vm1, %v1715_v30, 0  ;;  %v1435_v57 = vld [vmem:[%s2133_s22] sm:$0xe] }
  0x38   : > { %1813 = vmatmul.mubr.msk.bf16.vlgmr.msra.gmra.mrb[0].mxu1 %vm405_vm3, %v743_v38  ;;  %v973_v26 = vor.u32 %v972_v21, %v968_v18  ;;  %v977_v27 = vrot.slane %v975_v22, 1  ;;  %v1738_v40 = vcombine.low %v1361_v36, %v1362_v37  ;;  %v1988_v43 = vld [vmem:[%s2133_s22 + $0x8] ss:$0 sps:$4 sm:$0x11]   ;;  %v1724_v58 = vld [vmem:[%s2423_s3 + $0x2c] sm:$0xf]  ;;  %v1742_v60 = vcombine.low %v1435_v57, %v1362_v37 }
  0x39   : > { %1817 = vmatpush3.bf16.msra.mxu1 %v820_v41  ;;  %1818 = vmatprep.mubr.msk.bf16.mxu1 %vm2035_vm2, %v2034_v2  ;;  %v1307_v33 = vrot.slane %v1305_v28, 1  ;;  %v1737_v41 = vld [vmem:[%s2423_s3 + $0x38] sm:$0xf]  ;;  %v1382_v49 = vshll.u32 %v1988_v43, 16  ;;  %v1159_v63 = vsel %vm409_vm1, %v1724_v58, 0  ;;  %v1442_v0 = vrot.slane %v1988_v43, 1 }
  0x3a   : > { %1822 = vmatprep.subr.bf16.mxu1 %v2034_v2  ;;  %v978_v31 = vsel %vm392_vm5, %v973_v26, %v977_v27  ;;  %v1377_v44 = vshll.u32 %v1738_v40, 16  ;;  %v1390_v45 = vsel %vm409_vm1, %v1737_v41, 0  ;;  %v1375_v47 = vshrl.u32 %v1738_v40, 16  ;;  %v1992_v61 = vld [vmem:[%s2133_s22 + $0x8] ss:$0 sps:$4 sm:$0x11]  }
  0x3b   : > { %1789 = vmatmul.mubr.msk.bf16.vlgmr.msra.gmra.mrb[0].mxu0 %vm405_vm3, %v1974_v8  ;;  %v1983_v8 = vld [vmem:[%s2125_s26 + $0x8] ss:$0 sps:$4 sm:$0x11]   ;;  %v1308_v38 = vor.u32 %v1307_v33, %v1303_v32  ;;  %v1384_v52 = vrot.slane %v1382_v49, 1  ;;  %v1151_v5 = vshll.u32 %v1992_v61, 16  ;;  %vm646_vm7 = vcmask 24576  }
  0x3c   : > { %1793 = vmatpush3.bf16.msra.mxu0 %v513_v46  ;;  %1794 = vmatprep.mubr.msk.bf16.mxu0 %vm2035_vm2, %v2034_v2  ;;  %v1250_v16 = vrot.slane %v1983_v8, 1  ;;  %v1310_v34 = vshll.u32 %v1983_v8, 16  ;;  %v1721_v46 = vld [vmem:[%s2423_s3 + $0x28] sm:$0xf]  ;;  %v1379_v48 = vrot.slane %v1377_v44, 1 }
  0x3d   : > { %1798 = vmatprep.subr.bf16.mxu0 %v2034_v2  ;;  %v1085_v50 = vsel %vm409_vm1, %v1721_v46, 0  ;;  %v1153_v8 = vrot.slane %v1151_v5, 1 }
  0x3e   : > { %v1251_v25 = vsel %vm678_vm4, %v1249_v20, %v1250_v16  ;;  %v1312_v39 = vrot.slane %v1310_v34, 1 }
  0x40   : > { %v1313_v42 = vsel %vm392_vm5, %v1308_v38, %v1312_v39 }
  0x44   : > { %1819 = vmatmul.mubr.msk.bf16.vlgmr.msra.gmra.mrb[0].mxu1 %vm405_vm3, %v815_v51  ;;  %v1380_v51 = vor.u32 %v1379_v48, %v1375_v47  ;;  %v635_v47 = vld [vmem:[%s2425_s5] sm:$0x1] }
  0x45   : > { %1823 = vmatpush3.bf16.msra.mxu1 %v878_v53  ;;  %1824 = vmatprep.mubr.msk.bf16.mxu1 %vm2035_vm2, %v2034_v2  ;;  %v1741_v53 = vld [vmem:[%s2423_s3 + $0x3c] sm:$0xf] }
  0x46   : > { %1852 = vmatprep.subr.bf16.mxu1 %v2034_v2  ;;  %v1385_v54 = vsel %vm392_vm5, %v1380_v51, %v1384_v52  ;;  %v1448_v56 = vsel %vm409_vm1, %v1741_v53, 0  ;;  %v648_v51 = vld [vmem:[%s2426_s6] sm:$0x1] }
  0x47   : > { %1795 = vmatmul.mubr.msk.bf16.vlgmr.msra.gmra.mrb[0].mxu0 %vm405_vm3, %v1978_v55  ;;  %v1991_v55 = vld [vmem:[%s2133_s22] sm:$0xff]  }
  0x48   : > { %1799 = vmatpush3.bf16.msra.mxu0 %v587_v59  ;;  %1800 = vmatprep.mubr.msk.bf16.mxu0 %vm2035_vm2, %v2034_v2  ;;  %v1989_v59 = vld [vmem:[%s2133_s22] sm:$0xff]   ;;  %v1146_v62 = vshll.u32 %v1991_v55, 16  ;;  %v1144_v3 = vshrl.u32 %v1991_v55, 16 }
  0x49   : > { %1828 = vmatprep.subr.bf16.mxu0 %v2034_v2 }
  0x4a   : > { %v1148_v4 = vrot.slane %v1146_v62, 1 }
  0x4c   : > { %v1149_v7 = vor.u32 %v1148_v4, %v1144_v3 }
  0x4e   : > { %v1154_v9 = vsel %vm392_vm5, %v1149_v7, %v1153_v8 }
  0x50   : > { %1825 = vmatmul.mubr.msk.bf16.vlgmr.msra.gmra.mrb[0].mxu1 %vm405_vm3, %v873_v6 }
  0x51   : > { %1853 = vmatpush3.bf16.msra.mxu1 %v1256_v14  ;;  %1854 = vmatprep.mubr.msk.bf16.mxu1 %vm2035_vm2, %v2034_v2 }
  0x52   : > { %1858 = vmatprep.subr.bf16.mxu1 %v2034_v2 }
  0x53   : > { %1801 = vmatmul.mubr.msk.bf16.vlgmr.msra.gmra.mrb[0].mxu0 %vm405_vm3, %v582_v19 }
  0x54   : > { %1829 = vmatpush3.bf16.msra.mxu0 %v983_v23  ;;  %1830 = vmatprep.mubr.msk.bf16.mxu0 %vm2035_vm2, %v2034_v2 }
  0x55   : > { %1834 = vmatprep.subr.bf16.mxu0 %v2034_v2 }
  0x58   : > { %1855 = vmatmul.mubr.msk.bf16.vlgmr.msra.gmra.mrb[4].mxu1 %vm405_vm3, %v1251_v25 }
  0x59   : > { %1859 = vmatpush3.bf16.msra.mxu1 %v1318_v29  ;;  %1860 = vmatprep.mubr.msk.bf16.mxu1 %vm2035_vm2, %v2034_v2 }
  0x5a   : > { %1864 = vmatprep.subr.bf16.mxu1 %v2034_v2 }
  0x5b   : > { %1831 = vmatmul.mubr.msk.bf16.vlgmr.msra.gmra.mrb[4].mxu0 %vm405_vm3, %v978_v31 }
  0x5c   : > { %1835 = vmatpush3.bf16.msra.mxu0 %v1029_v35  ;;  %1836 = vmatprep.mubr.msk.bf16.mxu0 %vm2035_vm2, %v2034_v2 }
  0x5d   : > { %1840 = vmatprep.subr.bf16.mxu0 %v2034_v2 }
  0x64   : > { %1861 = vmatmul.mubr.msk.bf16.vlgmr.msra.gmra.mrb[4].mxu1 %vm405_vm3, %v1313_v42 }
  0x65   : > { %1865 = vmatpush3.bf16.msra.mxu1 %v1390_v45  ;;  %1866 = vmatprep.mubr.msk.bf16.mxu1 %vm2035_vm2, %v2034_v2 }
  0x66   : > { %1870 = vmatprep.subr.bf16.mxu1 %v2034_v2 }
  0x67   : > { %1837 = vmatmul.mubr.msk.bf16.vlgmr.msra.gmra.mrb[4].mxu0 %vm405_vm3, %v2227_v1  ;;  %v1441_v1 = vrot.slane %v1742_v60, 1 }
  0x68   : > { %1841 = vmatpush3.bf16.msra.mxu0 %v1085_v50  ;;  %1842 = vmatprep.mubr.msk.bf16.mxu0 %vm2035_vm2, %v2034_v2 }
  0x69   : > { %1846 = vmatprep.subr.bf16.mxu0 %v2034_v2  ;;  %v1443_v6 = vsel %vm678_vm4, %v1441_v1, %v1442_v0 }
  0x70   : > { %1867 = vmatmul.mubr.msk.bf16.vlgmr.msra.gmra.mrb[4].mxu1 %vm405_vm3, %v1385_v54 }
  0x71   : > { %1871 = vmatpush3.bf16.msra.mxu1 %v1448_v56  ;;  %1872 = vmatprep.mubr.msk.bf16.mxu1 %vm2035_vm2, %v2034_v2 }
  0x73   : > { %1843 = vmatmul.mubr.msk.bf16.vlgmr.msra.gmra.mrb[4].mxu0 %vm405_vm3, %v1989_v59 }
  0x74   : > { %1847 = vmatpush3.bf16.msra.mxu0 %v1159_v63  ;;  %1848 = vmatprep.mubr.msk.bf16.mxu0 %vm2035_vm2, %v2034_v2 }
  0x7c   : > { %1873 = vmatmul.mubr.msk.bf16.vlgmr.msra.gmra.mrb[4].mxu1 %vm405_vm3, %v1443_v6 }
  0x7f   : > { %1849 = vmatmul.mubr.msk.bf16.vlgmr.msra.gmra.mrb[4].mxu0 %vm405_vm3, %v1154_v9 }
 0x123   : > { %v914_v10 = vpop.f32.mrb[0].mxu1 }
 0x124   : > { %1713 = vst.msk [vmem:[%s2138_s20 + $0x10] sm:$0xff] %vm632_vm6, %v914_v10  ;;  %v939_v2 = vmul.f32 %v914_v10, %v914_v10  ;;  %v1826_v11 = vpop.f32.mrb[1].mxu1  ;;  %v927_v13 = vsel %vm632_vm6, %v914_v10, 0.0 }
 0x125   : > { %v917_v12 = vpop.f32.mrb[2].mxu1 }
 0x126   : > { %1714 = vst.msk [vmem:[%s2138_s20 + $0x18] sm:$0xff] %vm632_vm6, %v917_v12  ;;  %v928_v14 = vsel %vm632_vm6, %v917_v12, 0.0  ;;  %v940_v15 = vmul.f32 %v917_v12, %v917_v12  ;;  %v1827_v16 = vpop.f32.mrb[3].mxu1  ;;  %v623_v18 = vpop.f32.mrb[0].mxu0  ;;  %v941_v19 = vsel %vm632_vm6, %v939_v2, 0.0 }
 0x127   : > { %v929_v17 = vadd.f32 %v928_v14, %v927_v13  ;;  %633 = vst.msk [vmem:[%s2138_s20] sm:$0xff] %vm632_vm6, %v623_v18  ;;  %v649_v21 = vmul.f32 %v623_v18, %v623_v18  ;;  %v1802_v22 = vpop.f32.mrb[1].mxu0  ;;  %v636_v25 = vsel %vm632_vm6, %v623_v18, 0.0 }
 0x128   : > { %v942_v20 = vsel %vm632_vm6, %v940_v15, 0.0  ;;  %v626_v24 = vpop.f32.mrb[2].mxu0 }
 0x129   : > { %v943_v23 = vadd.f32 %v942_v20, %v941_v19  ;;  %634 = vst.msk [vmem:[%s2138_s20 + $0x8] sm:$0xff] %vm632_vm6, %v626_v24  ;;  %v637_v26 = vsel %vm632_vm6, %v626_v24, 0.0  ;;  %v650_v27 = vmul.f32 %v626_v24, %v626_v24  ;;  %v1803_v28 = vpop.f32.mrb[3].mxu0  ;;  %v651_v30 = vsel %vm632_vm6, %v649_v21, 0.0 }
 0x12a   : > { %v638_v29 = vadd.f32 %v637_v26, %v636_v25  ;;  %v930_v32 = vrot.slane %v929_v17, 4 }
 0x12b   : > { %v652_v31 = vsel %vm632_vm6, %v650_v27, 0.0  ;;  %v944_v35 = vrot.slane %v943_v23, 4 }
 0x12c   : > { %v639_v33 = vrot.slane %v638_v29, 4  ;;  %v653_v34 = vadd.f32 %v652_v31, %v651_v30  ;;  %v931_v38 = vadd.f32 %v930_v32, %v929_v17 }
 0x12d   : > { %v945_v41 = vadd.f32 %v944_v35, %v943_v23 }
 0x12e   : > { %v640_v36 = vadd.f32 %v639_v33, %v638_v29  ;;  %v654_v37 = vrot.slane %v653_v34, 4  ;;  %v932_v44 = vrot.slane %v931_v38, 2 }
 0x12f   : > { %v946_v48 = vrot.slane %v945_v41, 2 }
 0x130   : > { %v641_v39 = vrot.slane %v640_v36, 2  ;;  %v655_v40 = vadd.f32 %v654_v37, %v653_v34  ;;  %v933_v52 = vadd.f32 %v932_v44, %v931_v38 }
 0x131   : > { %v947_v55 = vadd.f32 %v946_v48, %v945_v41 }
 0x132   : > { %v642_v42 = vadd.f32 %v641_v39, %v640_v36  ;;  %v656_v43 = vrot.slane %v655_v40, 2  ;;  %v934_v57 = vrot.slane %v933_v52, 1 }
 0x133   : > { %v948_v58 = vrot.slane %v947_v55, 1 }
 0x134   : > { %v643_v45 = vrot.slane %v642_v42, 1  ;;  %v657_v46 = vadd.f32 %v656_v43, %v655_v40  ;;  %v935_v59 = vadd.f32 %v934_v57, %v933_v52 }
 0x135   : > { %v949_v61 = vadd.f32 %v948_v58, %v947_v55 }
 0x136   : > { %v644_v49 = vadd.f32 %v643_v45, %v642_v42  ;;  %v658_v50 = vrot.slane %v657_v46, 1 }
 0x138   : > { %v645_v53 = vadd.f32 %v644_v49, %v635_v47  ;;  %v659_v54 = vadd.f32 %v658_v50, %v657_v46 }
 0x13a   : > { %647 = vst.msk [vmem:[%s2425_s5] sm:$0x1] %vm646_vm7, %v645_v53  ;;  %v660_v56 = vadd.f32 %v659_v54, %v648_v51 }
 0x13c   : > { %661 = vst.msk [vmem:[%s2426_s6] sm:$0x1] %vm646_vm7, %v660_v56 }
 0x141   : > { %v926_v60 = vld [vmem:[%s2425_s5] sm:$0x1] }
 0x142   : > { %v936_v62 = vadd.f32 %v935_v59, %v926_v60 }
 0x143   : > { %v938_v63 = vld [vmem:[%s2426_s6] sm:$0x1] }
 0x144   : > { %937 = vst.msk [vmem:[%s2425_s5] sm:$0x1] %vm646_vm7, %v936_v62  ;;  %v950_v0 = vadd.f32 %v949_v61, %v938_v63 }
 0x146   : > { %951 = vst.msk [vmem:[%s2426_s6] sm:$0x1] %vm646_vm7, %v950_v0 }
 0x14b   : > { %v1207_v42 = vld [vmem:[%s2425_s5] sm:$0x1] }
 0x14d   : > { %v1219_v46 = vld [vmem:[%s2426_s6] sm:$0x1] }
 0x14f   : > { %v1484_v1 = vpop.f32.mrb[4].mxu1 }
 0x150   : > { %1744 = vst.msk [vmem:[%s2138_s20 + $0x30] sm:$0xff] %vm632_vm6, %v1484_v1  ;;  %v1509_v3 = vmul.f32 %v1484_v1, %v1484_v1  ;;  %v1874_v4 = vpop.f32.mrb[5].mxu1  ;;  %v1497_v6 = vsel %vm632_vm6, %v1484_v1, 0.0 }
 0x151   : > { %v1487_v5 = vpop.f32.mrb[6].mxu1 }
 0x152   : > { %1745 = vst.msk [vmem:[%s2138_s20 + $0x38] sm:$0xff] %vm632_vm6, %v1487_v5  ;;  %v1498_v7 = vsel %vm632_vm6, %v1487_v5, 0.0  ;;  %v1510_v8 = vmul.f32 %v1487_v5, %v1487_v5  ;;  %v1875_v9 = vpop.f32.mrb[7].mxu1  ;;  %v1195_v2 = vpop.f32.mrb[4].mxu0  ;;  %v1511_v11 = vsel %vm632_vm6, %v1509_v3, 0.0 }
 0x153   : > { %v1499_v10 = vadd.f32 %v1498_v7, %v1497_v6  ;;  %1728 = vst.msk [vmem:[%s2138_s20 + $0x20] sm:$0xff] %vm632_vm6, %v1195_v2  ;;  %v1220_v13 = vmul.f32 %v1195_v2, %v1195_v2  ;;  %v1850_v14 = vpop.f32.mrb[5].mxu0  ;;  %v1208_v17 = vsel %vm632_vm6, %v1195_v2, 0.0 }
 0x154   : > { %v1512_v12 = vsel %vm632_vm6, %v1510_v8, 0.0  ;;  %v1198_v16 = vpop.f32.mrb[6].mxu0 }
 0x155   : > { %v1513_v15 = vadd.f32 %v1512_v12, %v1511_v11  ;;  %1729 = vst.msk [vmem:[%s2138_s20 + $0x28] sm:$0xff] %vm632_vm6, %v1198_v16  ;;  %v1209_v18 = vsel %vm632_vm6, %v1198_v16, 0.0  ;;  %v1221_v19 = vmul.f32 %v1198_v16, %v1198_v16  ;;  %v1851_v20 = vpop.f32.mrb[7].mxu0  ;;  %v1222_v22 = vsel %vm632_vm6, %v1220_v13, 0.0 }
 0x156   : > { %v1210_v21 = vadd.f32 %v1209_v18, %v1208_v17  ;;  %v1500_v24 = vrot.slane %v1499_v10, 4 }
 0x157   : > { %v1223_v23 = vsel %vm632_vm6, %v1221_v19, 0.0  ;;  %v1514_v27 = vrot.slane %v1513_v15, 4 }
 0x158   : > { %v1211_v25 = vrot.slane %v1210_v21, 4  ;;  %v1224_v26 = vadd.f32 %v1223_v23, %v1222_v22  ;;  %v1501_v30 = vadd.f32 %v1500_v24, %v1499_v10 }
 0x159   : > { %v1515_v33 = vadd.f32 %v1514_v27, %v1513_v15 }
 0x15a   : > { %v1212_v28 = vadd.f32 %v1211_v25, %v1210_v21  ;;  %v1225_v29 = vrot.slane %v1224_v26, 4  ;;  %v1502_v36 = vrot.slane %v1501_v30, 2 }
 0x15b   : > { %v1516_v39 = vrot.slane %v1515_v33, 2 }
 0x15c   : > { %v1213_v31 = vrot.slane %v1212_v28, 2  ;;  %v1226_v32 = vadd.f32 %v1225_v29, %v1224_v26  ;;  %v1503_v43 = vadd.f32 %v1502_v36, %v1501_v30 }
 0x15d   : > { %v1517_v47 = vadd.f32 %v1516_v39, %v1515_v33 }
 0x15e   : > { %v1214_v34 = vadd.f32 %v1213_v31, %v1212_v28  ;;  %v1227_v35 = vrot.slane %v1226_v32, 2  ;;  %v1504_v49 = vrot.slane %v1503_v43, 1 }
 0x15f   : > { %v1518_v50 = vrot.slane %v1517_v47, 1 }
 0x160   : > { %v1215_v37 = vrot.slane %v1214_v34, 1  ;;  %v1228_v38 = vadd.f32 %v1227_v35, %v1226_v32  ;;  %v1505_v51 = vadd.f32 %v1504_v49, %v1503_v43 }
 0x161   : > { %v1519_v53 = vadd.f32 %v1518_v50, %v1517_v47 }
 0x162   : > { %v1216_v40 = vadd.f32 %v1215_v37, %v1214_v34  ;;  %v1229_v41 = vrot.slane %v1228_v38, 1 }
 0x164   : > { %v1217_v44 = vadd.f32 %v1216_v40, %v1207_v42  ;;  %v1230_v45 = vadd.f32 %v1229_v41, %v1228_v38 }
 0x166   : > { %1218 = vst.msk [vmem:[%s2425_s5] sm:$0x1] %vm646_vm7, %v1217_v44  ;;  %v1231_v48 = vadd.f32 %v1230_v45, %v1219_v46 }
 0x168   : > { %1232 = vst.msk [vmem:[%s2426_s6] sm:$0x1] %vm646_vm7, %v1231_v48 }
 0x16d   : > { %v1496_v52 = vld [vmem:[%s2425_s5] sm:$0x1] }
 0x16e   : > { %v1506_v54 = vadd.f32 %v1505_v51, %v1496_v52 }
 0x16f   : > { %v1508_v55 = vld [vmem:[%s2426_s6] sm:$0x1] }
 0x170   : > { %1507 = vst.msk [vmem:[%s2425_s5] sm:$0x1] %vm646_vm7, %v1506_v54  ;;  %v1520_v56 = vadd.f32 %v1519_v53, %v1508_v55 }
 0x172   : > { %1521 = vst.msk [vmem:[%s2426_s6] sm:$0x1] %vm646_vm7, %v1520_v56 }
 0x173 PF: > { %s17_s25 = sadd.s32 1, %s2031_s25   ;;  %s2430_s9 = sld [smem:[#allocation2_spill]] }
 0x174   : > { %p14_p13 = scmp.ge.s32.totalorder %s17_s25, 34   ;;  %s2431_s11 = sld [smem:[#allocation3_spill]] }
 0x175   : > { %s2432_s21 = smov %s2023_s23  ;;  %s2433_s22 = smov %s2027_s24 }
 0x176   :  { %16 = sbr.rel (!%p14_p13) target bundleno = 3 (0x3), region = 110 }
 0x179   : > { %s2434_s23 = smov %s2430_s9 }
 0x17a   : > { %s2435_s24 = smov %s2431_s11 }

// kernel: generator_forward.16
= control target key start
LH: loop header
LB: loop body
LE: loop exit
PB: predicated region body
PF: predicated region fallthrough
CT: control target
= control target key end

     0   :  { %s1704_s12 = smov 0   ;;  %s2389_s0 = inlined_call_operand.vmem [shape: f32[2048,4], index: 0, kind: input, shape index: {}]   ;;  %s2390_s1 = inlined_call_operand.vmem [shape: f32[1,4], index: 1, kind: input, shape index: {}]   ;;  %s2391_s2 = inlined_call_operand.vmem [shape: f32[1,4], index: 2, kind: input, shape index: {}]   ;;  %s2392_s3 = inlined_call_operand.vmem [shape: bf16[2048,4], index: 3, kind: output, shape index: {}]  }
   0x1 LB: > { %s1397_s13 = sadd.s32 4294967295, %s1682_s12   ;;  %p1401_p0 = scmp.ge.s32.totalorder %s1682_s12, 1  ;;  %s1682_s12 = sphi %s1704_s12, %s13_s12  }
   0x2   : > { %p138_p1 = scmp.lt.s32.totalorder %s1682_s12, 3 }
   0x4   : > { %p139_p2 = pnand %p1401_p0, %p138_p1 }
   0x5   : > { %s1402_s14 = sshll.u32 (!%p139_p2), %s1397_s13, 7  ;;  %v1718_v0 = vld [vmem:[%s2390_s1] ss:$0 sm:$0xff] (!%p139_p2)  ;;  %vm1212_vm0 = vcmask (!%p139_p2), 27648  }
   0x6   : > { %142 = sbr.rel (%p139_p2) target bundleno = 164 (0xa4), region = 32  ;;  %p163_p3 = scmp.lt.s32.totalorder (!%p139_p2), %s1402_s14, 255  ;;  %v1728_v1 = vld [vmem:[%s2391_s2] ss:$0 sm:$0xff] (!%p139_p2) }
   0xd   : > { %s2394_s14 = smov (!%p163_p3, %s1402_s14), 255 }
   0xe   : > { %s1403_s15 = sshll.u32 %s2394_s14, 3  ;;  %s1405_s23 = sshll.u32 %s2394_s14, 2 }
   0xf   : > { %s1723_s20 = scalar_lea.vmem %s2389_s0, %s1403_s15  ;;  %s1757_s26 = scalar_lea.vmem %s2392_s3, %s1405_s23 }
  0x10   : > { %v174_v2 = vld [vmem:[%s1723_s20] sm:$0xff]  ;;  %v175_v3 = vld [vmem:[%s1723_s20 + $0x8] sm:$0xff]  ;;  %v176_v4 = vld [vmem:[%s1723_s20 + $0x10] sm:$0xff] }
  0x11   : > { %v309_v5 = vmul.f32 %v1718_v0, %v174_v2  ;;  %v310_v6 = vmul.f32 %v1718_v0, %v175_v3  ;;  %v311_v7 = vmul.f32 %v1718_v0, %v176_v4  ;;  %v177_v8 = vld [vmem:[%s1723_s20 + $0x18] sm:$0xff]  ;;  %v178_v9 = vld [vmem:[%s1723_s20 + $0x20] sm:$0xff]  ;;  %v179_v10 = vld [vmem:[%s1723_s20 + $0x28] sm:$0xff] }
  0x12   : > { %v312_v11 = vmul.f32 %v1718_v0, %v177_v8  ;;  %v313_v12 = vmul.f32 %v1718_v0, %v178_v9  ;;  %v314_v13 = vmul.f32 %v1718_v0, %v179_v10  ;;  %v180_v14 = vld [vmem:[%s1723_s20 + $0x30] sm:$0xff]  ;;  %v181_v15 = vld [vmem:[%s1723_s20 + $0x38] sm:$0xff]  ;;  %v182_v32 = vld [vmem:[%s1723_s20 + $0x40] sm:$0xff] }
  0x13   : > { %v444_v16 = vadd.f32 %v1728_v1, %v309_v5  ;;  %v445_v17 = vadd.f32 %v1728_v1, %v310_v6  ;;  %v446_v18 = vadd.f32 %v1728_v1, %v311_v7  ;;  %v315_v19 = vmul.f32 %v1718_v0, %v180_v14  ;;  %v183_v33 = vld [vmem:[%s1723_s20 + $0x48] sm:$0xff]  ;;  %v184_v34 = vld [vmem:[%s1723_s20 + $0x50] sm:$0xff]  ;;  %v185_v39 = vld [vmem:[%s1723_s20 + $0x58] sm:$0xff] }
  0x14   : > { %v447_v20 = vadd.f32 %v1728_v1, %v312_v11  ;;  %v448_v21 = vadd.f32 %v1728_v1, %v313_v12  ;;  %v449_v22 = vadd.f32 %v1728_v1, %v314_v13  ;;  %v316_v23 = vmul.f32 %v1718_v0, %v181_v15  ;;  %v186_v40 = vld [vmem:[%s1723_s20 + $0x60] sm:$0xff]  ;;  %v187_v41 = vld [vmem:[%s1723_s20 + $0x68] sm:$0xff]  ;;  %v188_v46 = vld [vmem:[%s1723_s20 + $0x70] sm:$0xff] }
  0x15   : > { %v572_v24 = vmax.f32 %v444_v16, 0.0  ;;  %v573_v25 = vmax.f32 %v445_v17, 0.0  ;;  %v574_v26 = vmax.f32 %v446_v18, 0.0  ;;  %v450_v27 = vadd.f32 %v1728_v1, %v315_v19  ;;  %v189_v51 = vld [vmem:[%s1723_s20 + $0x78] sm:$0xff]  ;;  %v190_v10 = vld [vmem:[%s1723_s20 + $0x80] sm:$0xff]  ;;  %v191_v11 = vld [vmem:[%s1723_s20 + $0x88] sm:$0xff] }
  0x16   : > { %v575_v28 = vmax.f32 %v447_v20, 0.0  ;;  %v576_v29 = vmax.f32 %v448_v21, 0.0  ;;  %v577_v30 = vmax.f32 %v449_v22, 0.0  ;;  %v451_v31 = vadd.f32 %v1728_v1, %v316_v23  ;;  %v192_v12 = vld [vmem:[%s1723_s20 + $0x90] sm:$0xff]  ;;  %v193_v17 = vld [vmem:[%s1723_s20 + $0x98] sm:$0xff]  ;;  %v194_v18 = vld [vmem:[%s1723_s20 + $0xa0] sm:$0xff] }
  0x17   : > { %v1538_v35 = vpack.c.bf16 %v572_v24, %v572_v24  ;;  %v1539_v36 = vpack.c.bf16 %v573_v25, %v573_v25  ;;  %v1540_v37 = vpack.c.bf16 %v574_v26, %v574_v26  ;;  %v578_v38 = vmax.f32 %v450_v27, 0.0  ;;  %v195_v19 = vld [vmem:[%s1723_s20 + $0xa8] sm:$0xff]  ;;  %v196_v24 = vld [vmem:[%s1723_s20 + $0xb0] sm:$0xff] }
  0x18   : > { %v1541_v42 = vpack.c.bf16 %v575_v28, %v575_v28  ;;  %v1542_v43 = vpack.c.bf16 %v576_v29, %v576_v29  ;;  %v1543_v44 = vpack.c.bf16 %v577_v30, %v577_v30  ;;  %v579_v45 = vmax.f32 %v451_v31, 0.0  ;;  %v197_v29 = vld [vmem:[%s1723_s20 + $0xb8] sm:$0xff] }
  0x19   : > { %1213 = vst.msk [vmem:[%s1757_s26] sm:$0xf] %vm1212_vm0, %v1538_v35  ;;  %1214 = vst.msk [vmem:[%s1757_s26 + $0x4] sm:$0xf] %vm1212_vm0, %v1539_v36  ;;  %v1544_v47 = vpack.c.bf16 %v578_v38, %v578_v38  ;;  %v317_v48 = vmul.f32 %v1718_v0, %v182_v32  ;;  %v318_v49 = vmul.f32 %v1718_v0, %v183_v33 }
  0x1a   : > { %1215 = vst.msk [vmem:[%s1757_s26 + $0x8] sm:$0xf] %vm1212_vm0, %v1540_v37  ;;  %v319_v50 = vmul.f32 %v1718_v0, %v184_v34  ;;  %1216 = vst.msk [vmem:[%s1757_s26 + $0xc] sm:$0xf] %vm1212_vm0, %v1541_v42  ;;  %v1545_v52 = vpack.c.bf16 %v579_v45, %v579_v45  ;;  %v320_v53 = vmul.f32 %v1718_v0, %v185_v39 }
  0x1b   : > { %1217 = vst.msk [vmem:[%s1757_s26 + $0x10] sm:$0xf] %vm1212_vm0, %v1542_v43  ;;  %1218 = vst.msk [vmem:[%s1757_s26 + $0x14] sm:$0xf] %vm1212_vm0, %v1543_v44  ;;  %v321_v54 = vmul.f32 %v1718_v0, %v186_v40  ;;  %v322_v55 = vmul.f32 %v1718_v0, %v187_v41  ;;  %v452_v56 = vadd.f32 %v1728_v1, %v317_v48 }
  0x1c   : > { %1219 = vst.msk [vmem:[%s1757_s26 + $0x18] sm:$0xf] %vm1212_vm0, %v1544_v47  ;;  %v453_v57 = vadd.f32 %v1728_v1, %v318_v49  ;;  %v454_v58 = vadd.f32 %v1728_v1, %v319_v50  ;;  %v323_v59 = vmul.f32 %v1718_v0, %v188_v46  ;;  %1220 = vst.msk [vmem:[%s1757_s26 + $0x1c] sm:$0xf] %vm1212_vm0, %v1545_v52  ;;  %v198_v50 = vld [vmem:[%s1723_s20 + $0xc0] sm:$0xff]  ;;  %v200_v52 = vld [vmem:[%s1723_s20 + $0xd0] sm:$0xff] }
  0x1d   : > { %v455_v60 = vadd.f32 %v1728_v1, %v320_v53  ;;  %v456_v61 = vadd.f32 %v1728_v1, %v321_v54  ;;  %v457_v62 = vadd.f32 %v1728_v1, %v322_v55  ;;  %v324_v63 = vmul.f32 %v1718_v0, %v189_v51  ;;  %v199_v51 = vld [vmem:[%s1723_s20 + $0xc8] sm:$0xff] }
  0x1e   : > { %v580_v2 = vmax.f32 %v452_v56, 0.0  ;;  %v581_v3 = vmax.f32 %v453_v57, 0.0  ;;  %v582_v4 = vmax.f32 %v454_v58, 0.0  ;;  %v458_v5 = vadd.f32 %v1728_v1, %v323_v59  ;;  %v201_v57 = vld [vmem:[%s1723_s20 + $0xd8] sm:$0xff]  ;;  %v202_v58 = vld [vmem:[%s1723_s20 + $0xe0] sm:$0xff]  ;;  %v203_v59 = vld [vmem:[%s1723_s20 + $0xe8] sm:$0xff] }
  0x1f   : > { %v583_v6 = vmax.f32 %v455_v60, 0.0  ;;  %v584_v7 = vmax.f32 %v456_v61, 0.0  ;;  %v585_v8 = vmax.f32 %v457_v62, 0.0  ;;  %v459_v9 = vadd.f32 %v1728_v1, %v324_v63 }
  0x20   : > { %v1546_v13 = vpack.c.bf16 %v580_v2, %v580_v2  ;;  %v1547_v14 = vpack.c.bf16 %v581_v3, %v581_v3  ;;  %v1548_v15 = vpack.c.bf16 %v582_v4, %v582_v4  ;;  %v586_v16 = vmax.f32 %v458_v5, 0.0  ;;  %v204_v2 = vld [vmem:[%s1723_s20 + $0xf0] sm:$0xff] }
  0x21   : > { %v1549_v20 = vpack.c.bf16 %v583_v6, %v583_v6  ;;  %v1550_v21 = vpack.c.bf16 %v584_v7, %v584_v7  ;;  %v1551_v22 = vpack.c.bf16 %v585_v8, %v585_v8  ;;  %v587_v23 = vmax.f32 %v459_v9, 0.0  ;;  %v205_v7 = vld [vmem:[%s1723_s20 + $0xf8] sm:$0xff] }
  0x22   : > { %1221 = vst.msk [vmem:[%s1757_s26 + $0x20] sm:$0xf] %vm1212_vm0, %v1546_v13  ;;  %1222 = vst.msk [vmem:[%s1757_s26 + $0x24] sm:$0xf] %vm1212_vm0, %v1547_v14  ;;  %v1552_v25 = vpack.c.bf16 %v586_v16, %v586_v16  ;;  %v325_v26 = vmul.f32 %v1718_v0, %v190_v10  ;;  %v326_v27 = vmul.f32 %v1718_v0, %v191_v11 }
  0x23   : > { %1223 = vst.msk [vmem:[%s1757_s26 + $0x28] sm:$0xf] %vm1212_vm0, %v1548_v15  ;;  %v327_v28 = vmul.f32 %v1718_v0, %v192_v12  ;;  %1224 = vst.msk [vmem:[%s1757_s26 + $0x2c] sm:$0xf] %vm1212_vm0, %v1549_v20  ;;  %v1553_v30 = vpack.c.bf16 %v587_v23, %v587_v23  ;;  %v328_v31 = vmul.f32 %v1718_v0, %v193_v17 }
  0x24   : > { %1225 = vst.msk [vmem:[%s1757_s26 + $0x30] sm:$0xf] %vm1212_vm0, %v1550_v21  ;;  %1226 = vst.msk [vmem:[%s1757_s26 + $0x34] sm:$0xf] %vm1212_vm0, %v1551_v22  ;;  %v329_v32 = vmul.f32 %v1718_v0, %v194_v18  ;;  %v330_v33 = vmul.f32 %v1718_v0, %v195_v19  ;;  %v460_v34 = vadd.f32 %v1728_v1, %v325_v26 }
  0x25   : > { %1227 = vst.msk [vmem:[%s1757_s26 + $0x38] sm:$0xf] %vm1212_vm0, %v1552_v25  ;;  %v461_v35 = vadd.f32 %v1728_v1, %v326_v27  ;;  %v462_v36 = vadd.f32 %v1728_v1, %v327_v28  ;;  %v331_v37 = vmul.f32 %v1718_v0, %v196_v24  ;;  %1228 = vst.msk [vmem:[%s1757_s26 + $0x3c] sm:$0xf] %vm1212_vm0, %v1553_v30  ;;  %v206_v28 = vld [vmem:[%s1723_s20 + $0x100] sm:$0xff]  ;;  %v208_v30 = vld [vmem:[%s1723_s20 + $0x110] sm:$0xff] }
  0x26   : > { %v463_v38 = vadd.f32 %v1728_v1, %v328_v31  ;;  %v464_v39 = vadd.f32 %v1728_v1, %v329_v32  ;;  %v465_v40 = vadd.f32 %v1728_v1, %v330_v33  ;;  %v332_v41 = vmul.f32 %v1718_v0, %v197_v29  ;;  %v207_v29 = vld [vmem:[%s1723_s20 + $0x108] sm:$0xff] }
  0x27   : > { %v588_v42 = vmax.f32 %v460_v34, 0.0  ;;  %v589_v43 = vmax.f32 %v461_v35, 0.0  ;;  %v590_v44 = vmax.f32 %v462_v36, 0.0  ;;  %v466_v45 = vadd.f32 %v1728_v1, %v331_v37  ;;  %v209_v35 = vld [vmem:[%s1723_s20 + $0x118] sm:$0xff]  ;;  %v210_v36 = vld [vmem:[%s1723_s20 + $0x120] sm:$0xff]  ;;  %v211_v37 = vld [vmem:[%s1723_s20 + $0x128] sm:$0xff] }
  0x28   : > { %v591_v46 = vmax.f32 %v463_v38, 0.0  ;;  %v592_v47 = vmax.f32 %v464_v39, 0.0  ;;  %v593_v48 = vmax.f32 %v465_v40, 0.0  ;;  %v467_v49 = vadd.f32 %v1728_v1, %v332_v41 }
  0x29   : > { %v1554_v53 = vpack.c.bf16 %v588_v42, %v588_v42  ;;  %v1555_v54 = vpack.c.bf16 %v589_v43, %v589_v43  ;;  %v1556_v55 = vpack.c.bf16 %v590_v44, %v590_v44  ;;  %v594_v56 = vmax.f32 %v466_v45, 0.0  ;;  %v212_v42 = vld [vmem:[%s1723_s20 + $0x130] sm:$0xff] }
  0x2a   : > { %v1557_v60 = vpack.c.bf16 %v591_v46, %v591_v46  ;;  %v1558_v61 = vpack.c.bf16 %v592_v47, %v592_v47  ;;  %v1559_v62 = vpack.c.bf16 %v593_v48, %v593_v48  ;;  %v595_v63 = vmax.f32 %v467_v49, 0.0  ;;  %v213_v47 = vld [vmem:[%s1723_s20 + $0x138] sm:$0xff] }
  0x2b   : > { %1229 = vst.msk [vmem:[%s1757_s26 + $0x40] sm:$0xf] %vm1212_vm0, %v1554_v53  ;;  %1230 = vst.msk [vmem:[%s1757_s26 + $0x44] sm:$0xf] %vm1212_vm0, %v1555_v54  ;;  %v1560_v3 = vpack.c.bf16 %v594_v56, %v594_v56  ;;  %v333_v4 = vmul.f32 %v1718_v0, %v198_v50  ;;  %v334_v5 = vmul.f32 %v1718_v0, %v199_v51 }
  0x2c   : > { %1231 = vst.msk [vmem:[%s1757_s26 + $0x48] sm:$0xf] %vm1212_vm0, %v1556_v55  ;;  %v335_v6 = vmul.f32 %v1718_v0, %v200_v52  ;;  %1232 = vst.msk [vmem:[%s1757_s26 + $0x4c] sm:$0xf] %vm1212_vm0, %v1557_v60  ;;  %v1561_v8 = vpack.c.bf16 %v595_v63, %v595_v63  ;;  %v336_v9 = vmul.f32 %v1718_v0, %v201_v57 }
  0x2d   : > { %1233 = vst.msk [vmem:[%s1757_s26 + $0x50] sm:$0xf] %vm1212_vm0, %v1558_v61  ;;  %1234 = vst.msk [vmem:[%s1757_s26 + $0x54] sm:$0xf] %vm1212_vm0, %v1559_v62  ;;  %v337_v10 = vmul.f32 %v1718_v0, %v202_v58  ;;  %v338_v11 = vmul.f32 %v1718_v0, %v203_v59  ;;  %v468_v12 = vadd.f32 %v1728_v1, %v333_v4 }
  0x2e   : > { %1235 = vst.msk [vmem:[%s1757_s26 + $0x58] sm:$0xf] %vm1212_vm0, %v1560_v3  ;;  %v469_v13 = vadd.f32 %v1728_v1, %v334_v5  ;;  %v470_v14 = vadd.f32 %v1728_v1, %v335_v6  ;;  %v339_v15 = vmul.f32 %v1718_v0, %v204_v2  ;;  %1236 = vst.msk [vmem:[%s1757_s26 + $0x5c] sm:$0xf] %vm1212_vm0, %v1561_v8  ;;  %v214_v6 = vld [vmem:[%s1723_s20 + $0x140] sm:$0xff]  ;;  %v216_v8 = vld [vmem:[%s1723_s20 + $0x150] sm:$0xff] }
  0x2f   : > { %v471_v16 = vadd.f32 %v1728_v1, %v336_v9  ;;  %v472_v17 = vadd.f32 %v1728_v1, %v337_v10  ;;  %v473_v18 = vadd.f32 %v1728_v1, %v338_v11  ;;  %v340_v19 = vmul.f32 %v1718_v0, %v205_v7  ;;  %v215_v7 = vld [vmem:[%s1723_s20 + $0x148] sm:$0xff] }
  0x30   : > { %v596_v20 = vmax.f32 %v468_v12, 0.0  ;;  %v597_v21 = vmax.f32 %v469_v13, 0.0  ;;  %v598_v22 = vmax.f32 %v470_v14, 0.0  ;;  %v474_v23 = vadd.f32 %v1728_v1, %v339_v15  ;;  %v217_v13 = vld [vmem:[%s1723_s20 + $0x158] sm:$0xff]  ;;  %v218_v14 = vld [vmem:[%s1723_s20 + $0x160] sm:$0xff]  ;;  %v219_v15 = vld [vmem:[%s1723_s20 + $0x168] sm:$0xff] }
  0x31   : > { %v599_v24 = vmax.f32 %v471_v16, 0.0  ;;  %v600_v25 = vmax.f32 %v472_v17, 0.0  ;;  %v601_v26 = vmax.f32 %v473_v18, 0.0  ;;  %v475_v27 = vadd.f32 %v1728_v1, %v340_v19 }
  0x32   : > { %v1562_v31 = vpack.c.bf16 %v596_v20, %v596_v20  ;;  %v1563_v32 = vpack.c.bf16 %v597_v21, %v597_v21  ;;  %v1564_v33 = vpack.c.bf16 %v598_v22, %v598_v22  ;;  %v602_v34 = vmax.f32 %v474_v23, 0.0  ;;  %v220_v20 = vld [vmem:[%s1723_s20 + $0x170] sm:$0xff] }
  0x33   : > { %v1565_v38 = vpack.c.bf16 %v599_v24, %v599_v24  ;;  %v1566_v39 = vpack.c.bf16 %v600_v25, %v600_v25  ;;  %v1567_v40 = vpack.c.bf16 %v601_v26, %v601_v26  ;;  %v603_v41 = vmax.f32 %v475_v27, 0.0  ;;  %v221_v25 = vld [vmem:[%s1723_s20 + $0x178] sm:$0xff] }
  0x34   : > { %1237 = vst.msk [vmem:[%s1757_s26 + $0x60] sm:$0xf] %vm1212_vm0, %v1562_v31  ;;  %1238 = vst.msk [vmem:[%s1757_s26 + $0x64] sm:$0xf] %vm1212_vm0, %v1563_v32  ;;  %v1568_v43 = vpack.c.bf16 %v602_v34, %v602_v34  ;;  %v341_v44 = vmul.f32 %v1718_v0, %v206_v28  ;;  %v342_v45 = vmul.f32 %v1718_v0, %v207_v29 }
  0x35   : > { %1239 = vst.msk [vmem:[%s1757_s26 + $0x68] sm:$0xf] %vm1212_vm0, %v1564_v33  ;;  %v343_v46 = vmul.f32 %v1718_v0, %v208_v30  ;;  %1240 = vst.msk [vmem:[%s1757_s26 + $0x6c] sm:$0xf] %vm1212_vm0, %v1565_v38  ;;  %v1569_v48 = vpack.c.bf16 %v603_v41, %v603_v41  ;;  %v344_v49 = vmul.f32 %v1718_v0, %v209_v35 }
  0x36   : > { %1241 = vst.msk [vmem:[%s1757_s26 + $0x70] sm:$0xf] %vm1212_vm0, %v1566_v39  ;;  %1242 = vst.msk [vmem:[%s1757_s26 + $0x74] sm:$0xf] %vm1212_vm0, %v1567_v40  ;;  %v345_v50 = vmul.f32 %v1718_v0, %v210_v36  ;;  %v346_v51 = vmul.f32 %v1718_v0, %v211_v37  ;;  %v476_v52 = vadd.f32 %v1728_v1, %v341_v44 }
  0x37   : > { %1243 = vst.msk [vmem:[%s1757_s26 + $0x78] sm:$0xf] %vm1212_vm0, %v1568_v43  ;;  %v477_v53 = vadd.f32 %v1728_v1, %v342_v45  ;;  %v478_v54 = vadd.f32 %v1728_v1, %v343_v46  ;;  %v347_v55 = vmul.f32 %v1718_v0, %v212_v42  ;;  %1244 = vst.msk [vmem:[%s1757_s26 + $0x7c] sm:$0xf] %vm1212_vm0, %v1569_v48  ;;  %v222_v46 = vld [vmem:[%s1723_s20 + $0x180] sm:$0xff]  ;;  %v224_v48 = vld [vmem:[%s1723_s20 + $0x190] sm:$0xff] }
  0x38   : > { %v479_v56 = vadd.f32 %v1728_v1, %v344_v49  ;;  %v480_v57 = vadd.f32 %v1728_v1, %v345_v50  ;;  %v481_v58 = vadd.f32 %v1728_v1, %v346_v51  ;;  %v348_v59 = vmul.f32 %v1718_v0, %v213_v47  ;;  %v223_v47 = vld [vmem:[%s1723_s20 + $0x188] sm:$0xff] }
  0x39   : > { %v604_v60 = vmax.f32 %v476_v52, 0.0  ;;  %v605_v61 = vmax.f32 %v477_v53, 0.0  ;;  %v606_v62 = vmax.f32 %v478_v54, 0.0  ;;  %v482_v63 = vadd.f32 %v1728_v1, %v347_v55  ;;  %v225_v53 = vld [vmem:[%s1723_s20 + $0x198] sm:$0xff]  ;;  %v226_v54 = vld [vmem:[%s1723_s20 + $0x1a0] sm:$0xff]  ;;  %v227_v55 = vld [vmem:[%s1723_s20 + $0x1a8] sm:$0xff] }
  0x3a   : > { %v607_v2 = vmax.f32 %v479_v56, 0.0  ;;  %v608_v3 = vmax.f32 %v480_v57, 0.0  ;;  %v609_v4 = vmax.f32 %v481_v58, 0.0  ;;  %v483_v5 = vadd.f32 %v1728_v1, %v348_v59 }
  0x3b   : > { %v1570_v9 = vpack.c.bf16 %v604_v60, %v604_v60  ;;  %v1571_v10 = vpack.c.bf16 %v605_v61, %v605_v61  ;;  %v1572_v11 = vpack.c.bf16 %v606_v62, %v606_v62  ;;  %v610_v12 = vmax.f32 %v482_v63, 0.0  ;;  %v228_v60 = vld [vmem:[%s1723_s20 + $0x1b0] sm:$0xff] }
  0x3c   : > { %v1573_v16 = vpack.c.bf16 %v607_v2, %v607_v2  ;;  %v1574_v17 = vpack.c.bf16 %v608_v3, %v608_v3  ;;  %v1575_v18 = vpack.c.bf16 %v609_v4, %v609_v4  ;;  %v611_v19 = vmax.f32 %v483_v5, 0.0  ;;  %v229_v3 = vld [vmem:[%s1723_s20 + $0x1b8] sm:$0xff] }
  0x3d   : > { %1245 = vst.msk [vmem:[%s1757_s26 + $0x80] sm:$0xf] %vm1212_vm0, %v1570_v9  ;;  %1246 = vst.msk [vmem:[%s1757_s26 + $0x84] sm:$0xf] %vm1212_vm0, %v1571_v10  ;;  %v1576_v21 = vpack.c.bf16 %v610_v12, %v610_v12  ;;  %v349_v22 = vmul.f32 %v1718_v0, %v214_v6  ;;  %v350_v23 = vmul.f32 %v1718_v0, %v215_v7 }
  0x3e   : > { %1247 = vst.msk [vmem:[%s1757_s26 + $0x88] sm:$0xf] %vm1212_vm0, %v1572_v11  ;;  %v351_v24 = vmul.f32 %v1718_v0, %v216_v8  ;;  %1248 = vst.msk [vmem:[%s1757_s26 + $0x8c] sm:$0xf] %vm1212_vm0, %v1573_v16  ;;  %v1577_v26 = vpack.c.bf16 %v611_v19, %v611_v19  ;;  %v352_v27 = vmul.f32 %v1718_v0, %v217_v13 }
  0x3f   : > { %1249 = vst.msk [vmem:[%s1757_s26 + $0x90] sm:$0xf] %vm1212_vm0, %v1574_v17  ;;  %1250 = vst.msk [vmem:[%s1757_s26 + $0x94] sm:$0xf] %vm1212_vm0, %v1575_v18  ;;  %v353_v28 = vmul.f32 %v1718_v0, %v218_v14  ;;  %v354_v29 = vmul.f32 %v1718_v0, %v219_v15  ;;  %v484_v30 = vadd.f32 %v1728_v1, %v349_v22 }
  0x40   : > { %1251 = vst.msk [vmem:[%s1757_s26 + $0x98] sm:$0xf] %vm1212_vm0, %v1576_v21  ;;  %v485_v31 = vadd.f32 %v1728_v1, %v350_v23  ;;  %v486_v32 = vadd.f32 %v1728_v1, %v351_v24  ;;  %v355_v33 = vmul.f32 %v1718_v0, %v220_v20  ;;  %1252 = vst.msk [vmem:[%s1757_s26 + $0x9c] sm:$0xf] %vm1212_vm0, %v1577_v26  ;;  %v230_v24 = vld [vmem:[%s1723_s20 + $0x1c0] sm:$0xff]  ;;  %v232_v26 = vld [vmem:[%s1723_s20 + $0x1d0] sm:$0xff] }
  0x41   : > { %v487_v34 = vadd.f32 %v1728_v1, %v352_v27  ;;  %v488_v35 = vadd.f32 %v1728_v1, %v353_v28  ;;  %v489_v36 = vadd.f32 %v1728_v1, %v354_v29  ;;  %v356_v37 = vmul.f32 %v1718_v0, %v221_v25  ;;  %v231_v25 = vld [vmem:[%s1723_s20 + $0x1c8] sm:$0xff] }
  0x42   : > { %v612_v38 = vmax.f32 %v484_v30, 0.0  ;;  %v613_v39 = vmax.f32 %v485_v31, 0.0  ;;  %v614_v40 = vmax.f32 %v486_v32, 0.0  ;;  %v490_v41 = vadd.f32 %v1728_v1, %v355_v33  ;;  %v233_v31 = vld [vmem:[%s1723_s20 + $0x1d8] sm:$0xff]  ;;  %v234_v32 = vld [vmem:[%s1723_s20 + $0x1e0] sm:$0xff]  ;;  %v235_v33 = vld [vmem:[%s1723_s20 + $0x1e8] sm:$0xff] }
  0x43   : > { %v615_v42 = vmax.f32 %v487_v34, 0.0  ;;  %v616_v43 = vmax.f32 %v488_v35, 0.0  ;;  %v617_v44 = vmax.f32 %v489_v36, 0.0  ;;  %v491_v45 = vadd.f32 %v1728_v1, %v356_v37 }
  0x44   : > { %v1578_v49 = vpack.c.bf16 %v612_v38, %v612_v38  ;;  %v1579_v50 = vpack.c.bf16 %v613_v39, %v613_v39  ;;  %v1580_v51 = vpack.c.bf16 %v614_v40, %v614_v40  ;;  %v618_v52 = vmax.f32 %v490_v41, 0.0  ;;  %v236_v38 = vld [vmem:[%s1723_s20 + $0x1f0] sm:$0xff] }
  0x45   : > { %v1581_v56 = vpack.c.bf16 %v615_v42, %v615_v42  ;;  %v1582_v57 = vpack.c.bf16 %v616_v43, %v616_v43  ;;  %v1583_v58 = vpack.c.bf16 %v617_v44, %v617_v44  ;;  %v619_v59 = vmax.f32 %v491_v45, 0.0  ;;  %v237_v43 = vld [vmem:[%s1723_s20 + $0x1f8] sm:$0xff] }
  0x46   : > { %1253 = vst.msk [vmem:[%s1757_s26 + $0xa0] sm:$0xf] %vm1212_vm0, %v1578_v49  ;;  %1254 = vst.msk [vmem:[%s1757_s26 + $0xa4] sm:$0xf] %vm1212_vm0, %v1579_v50  ;;  %v1584_v61 = vpack.c.bf16 %v618_v52, %v618_v52  ;;  %v357_v62 = vmul.f32 %v1718_v0, %v222_v46  ;;  %v358_v63 = vmul.f32 %v1718_v0, %v223_v47 }
  0x47   : > { %1255 = vst.msk [vmem:[%s1757_s26 + $0xa8] sm:$0xf] %vm1212_vm0, %v1580_v51  ;;  %v359_v2 = vmul.f32 %v1718_v0, %v224_v48  ;;  %1256 = vst.msk [vmem:[%s1757_s26 + $0xac] sm:$0xf] %vm1212_vm0, %v1581_v56  ;;  %v1585_v4 = vpack.c.bf16 %v619_v59, %v619_v59  ;;  %v360_v5 = vmul.f32 %v1718_v0, %v225_v53 }
  0x48   : > { %1257 = vst.msk [vmem:[%s1757_s26 + $0xb0] sm:$0xf] %vm1212_vm0, %v1582_v57  ;;  %1258 = vst.msk [vmem:[%s1757_s26 + $0xb4] sm:$0xf] %vm1212_vm0, %v1583_v58  ;;  %v361_v6 = vmul.f32 %v1718_v0, %v226_v54  ;;  %v362_v7 = vmul.f32 %v1718_v0, %v227_v55  ;;  %v492_v8 = vadd.f32 %v1728_v1, %v357_v62 }
  0x49   : > { %1259 = vst.msk [vmem:[%s1757_s26 + $0xb8] sm:$0xf] %vm1212_vm0, %v1584_v61  ;;  %v493_v9 = vadd.f32 %v1728_v1, %v358_v63  ;;  %v494_v10 = vadd.f32 %v1728_v1, %v359_v2  ;;  %v363_v11 = vmul.f32 %v1718_v0, %v228_v60  ;;  %1260 = vst.msk [vmem:[%s1757_s26 + $0xbc] sm:$0xf] %vm1212_vm0, %v1585_v4  ;;  %v238_v2 = vld [vmem:[%s1723_s20 + $0x200] sm:$0xff]  ;;  %v240_v4 = vld [vmem:[%s1723_s20 + $0x210] sm:$0xff] }
  0x4a   : > { %v495_v12 = vadd.f32 %v1728_v1, %v360_v5  ;;  %v496_v13 = vadd.f32 %v1728_v1, %v361_v6  ;;  %v497_v14 = vadd.f32 %v1728_v1, %v362_v7  ;;  %v364_v15 = vmul.f32 %v1718_v0, %v229_v3  ;;  %v239_v3 = vld [vmem:[%s1723_s20 + $0x208] sm:$0xff] }
  0x4b   : > { %v620_v16 = vmax.f32 %v492_v8, 0.0  ;;  %v621_v17 = vmax.f32 %v493_v9, 0.0  ;;  %v622_v18 = vmax.f32 %v494_v10, 0.0  ;;  %v498_v19 = vadd.f32 %v1728_v1, %v363_v11  ;;  %v241_v9 = vld [vmem:[%s1723_s20 + $0x218] sm:$0xff]  ;;  %v242_v10 = vld [vmem:[%s1723_s20 + $0x220] sm:$0xff]  ;;  %v243_v11 = vld [vmem:[%s1723_s20 + $0x228] sm:$0xff] }
  0x4c   : > { %v623_v20 = vmax.f32 %v495_v12, 0.0  ;;  %v624_v21 = vmax.f32 %v496_v13, 0.0  ;;  %v625_v22 = vmax.f32 %v497_v14, 0.0  ;;  %v499_v23 = vadd.f32 %v1728_v1, %v364_v15 }
  0x4d   : > { %v1586_v27 = vpack.c.bf16 %v620_v16, %v620_v16  ;;  %v1587_v28 = vpack.c.bf16 %v621_v17, %v621_v17  ;;  %v1588_v29 = vpack.c.bf16 %v622_v18, %v622_v18  ;;  %v626_v30 = vmax.f32 %v498_v19, 0.0  ;;  %v244_v16 = vld [vmem:[%s1723_s20 + $0x230] sm:$0xff] }
  0x4e   : > { %v1589_v34 = vpack.c.bf16 %v623_v20, %v623_v20  ;;  %v1590_v35 = vpack.c.bf16 %v624_v21, %v624_v21  ;;  %v1591_v36 = vpack.c.bf16 %v625_v22, %v625_v22  ;;  %v627_v37 = vmax.f32 %v499_v23, 0.0  ;;  %v245_v21 = vld [vmem:[%s1723_s20 + $0x238] sm:$0xff] }
  0x4f   : > { %1261 = vst.msk [vmem:[%s1757_s26 + $0xc0] sm:$0xf] %vm1212_vm0, %v1586_v27  ;;  %1262 = vst.msk [vmem:[%s1757_s26 + $0xc4] sm:$0xf] %vm1212_vm0, %v1587_v28  ;;  %v1592_v39 = vpack.c.bf16 %v626_v30, %v626_v30  ;;  %v365_v40 = vmul.f32 %v1718_v0, %v230_v24  ;;  %v366_v41 = vmul.f32 %v1718_v0, %v231_v25 }
  0x50   : > { %1263 = vst.msk [vmem:[%s1757_s26 + $0xc8] sm:$0xf] %vm1212_vm0, %v1588_v29  ;;  %v367_v42 = vmul.f32 %v1718_v0, %v232_v26  ;;  %1264 = vst.msk [vmem:[%s1757_s26 + $0xcc] sm:$0xf] %vm1212_vm0, %v1589_v34  ;;  %v1593_v44 = vpack.c.bf16 %v627_v37, %v627_v37  ;;  %v368_v45 = vmul.f32 %v1718_v0, %v233_v31 }
  0x51   : > { %1265 = vst.msk [vmem:[%s1757_s26 + $0xd0] sm:$0xf] %vm1212_vm0, %v1590_v35  ;;  %1266 = vst.msk [vmem:[%s1757_s26 + $0xd4] sm:$0xf] %vm1212_vm0, %v1591_v36  ;;  %v369_v46 = vmul.f32 %v1718_v0, %v234_v32  ;;  %v370_v47 = vmul.f32 %v1718_v0, %v235_v33  ;;  %v500_v48 = vadd.f32 %v1728_v1, %v365_v40 }
  0x52   : > { %1267 = vst.msk [vmem:[%s1757_s26 + $0xd8] sm:$0xf] %vm1212_vm0, %v1592_v39  ;;  %v501_v49 = vadd.f32 %v1728_v1, %v366_v41  ;;  %v502_v50 = vadd.f32 %v1728_v1, %v367_v42  ;;  %v371_v51 = vmul.f32 %v1718_v0, %v236_v38  ;;  %1268 = vst.msk [vmem:[%s1757_s26 + $0xdc] sm:$0xf] %vm1212_vm0, %v1593_v44  ;;  %v246_v42 = vld [vmem:[%s1723_s20 + $0x240] sm:$0xff]  ;;  %v248_v44 = vld [vmem:[%s1723_s20 + $0x250] sm:$0xff] }
  0x53   : > { %v503_v52 = vadd.f32 %v1728_v1, %v368_v45  ;;  %v504_v53 = vadd.f32 %v1728_v1, %v369_v46  ;;  %v505_v54 = vadd.f32 %v1728_v1, %v370_v47  ;;  %v372_v55 = vmul.f32 %v1718_v0, %v237_v43  ;;  %v247_v43 = vld [vmem:[%s1723_s20 + $0x248] sm:$0xff] }
  0x54   : > { %v628_v56 = vmax.f32 %v500_v48, 0.0  ;;  %v629_v57 = vmax.f32 %v501_v49, 0.0  ;;  %v630_v58 = vmax.f32 %v502_v50, 0.0  ;;  %v506_v59 = vadd.f32 %v1728_v1, %v371_v51  ;;  %v249_v49 = vld [vmem:[%s1723_s20 + $0x258] sm:$0xff]  ;;  %v250_v50 = vld [vmem:[%s1723_s20 + $0x260] sm:$0xff]  ;;  %v251_v51 = vld [vmem:[%s1723_s20 + $0x268] sm:$0xff] }
  0x55   : > { %v631_v60 = vmax.f32 %v503_v52, 0.0  ;;  %v632_v61 = vmax.f32 %v504_v53, 0.0  ;;  %v633_v62 = vmax.f32 %v505_v54, 0.0  ;;  %v507_v63 = vadd.f32 %v1728_v1, %v372_v55 }
  0x56   : > { %v1594_v5 = vpack.c.bf16 %v628_v56, %v628_v56  ;;  %v1595_v6 = vpack.c.bf16 %v629_v57, %v629_v57  ;;  %v1596_v7 = vpack.c.bf16 %v630_v58, %v630_v58  ;;  %v634_v8 = vmax.f32 %v506_v59, 0.0  ;;  %v252_v56 = vld [vmem:[%s1723_s20 + $0x270] sm:$0xff] }
  0x57   : > { %v1597_v12 = vpack.c.bf16 %v631_v60, %v631_v60  ;;  %v1598_v13 = vpack.c.bf16 %v632_v61, %v632_v61  ;;  %v1599_v14 = vpack.c.bf16 %v633_v62, %v633_v62  ;;  %v635_v15 = vmax.f32 %v507_v63, 0.0  ;;  %v253_v61 = vld [vmem:[%s1723_s20 + $0x278] sm:$0xff] }
  0x58   : > { %1269 = vst.msk [vmem:[%s1757_s26 + $0xe0] sm:$0xf] %vm1212_vm0, %v1594_v5  ;;  %1270 = vst.msk [vmem:[%s1757_s26 + $0xe4] sm:$0xf] %vm1212_vm0, %v1595_v6  ;;  %v1600_v17 = vpack.c.bf16 %v634_v8, %v634_v8  ;;  %v373_v18 = vmul.f32 %v1718_v0, %v238_v2  ;;  %v374_v19 = vmul.f32 %v1718_v0, %v239_v3 }
  0x59   : > { %1271 = vst.msk [vmem:[%s1757_s26 + $0xe8] sm:$0xf] %vm1212_vm0, %v1596_v7  ;;  %v375_v20 = vmul.f32 %v1718_v0, %v240_v4  ;;  %1272 = vst.msk [vmem:[%s1757_s26 + $0xec] sm:$0xf] %vm1212_vm0, %v1597_v12  ;;  %v1601_v22 = vpack.c.bf16 %v635_v15, %v635_v15  ;;  %v376_v23 = vmul.f32 %v1718_v0, %v241_v9 }
  0x5a   : > { %1273 = vst.msk [vmem:[%s1757_s26 + $0xf0] sm:$0xf] %vm1212_vm0, %v1598_v13  ;;  %1274 = vst.msk [vmem:[%s1757_s26 + $0xf4] sm:$0xf] %vm1212_vm0, %v1599_v14  ;;  %v377_v24 = vmul.f32 %v1718_v0, %v242_v10  ;;  %v378_v25 = vmul.f32 %v1718_v0, %v243_v11  ;;  %v508_v26 = vadd.f32 %v1728_v1, %v373_v18 }
  0x5b   : > { %1275 = vst.msk [vmem:[%s1757_s26 + $0xf8] sm:$0xf] %vm1212_vm0, %v1600_v17  ;;  %v509_v27 = vadd.f32 %v1728_v1, %v374_v19  ;;  %v510_v28 = vadd.f32 %v1728_v1, %v375_v20  ;;  %v379_v29 = vmul.f32 %v1718_v0, %v244_v16  ;;  %1276 = vst.msk [vmem:[%s1757_s26 + $0xfc] sm:$0xf] %vm1212_vm0, %v1601_v22  ;;  %v254_v20 = vld [vmem:[%s1723_s20 + $0x280] sm:$0xff]  ;;  %v256_v22 = vld [vmem:[%s1723_s20 + $0x290] sm:$0xff] }
  0x5c   : > { %v511_v30 = vadd.f32 %v1728_v1, %v376_v23  ;;  %v512_v31 = vadd.f32 %v1728_v1, %v377_v24  ;;  %v513_v32 = vadd.f32 %v1728_v1, %v378_v25  ;;  %v380_v33 = vmul.f32 %v1718_v0, %v245_v21  ;;  %v255_v21 = vld [vmem:[%s1723_s20 + $0x288] sm:$0xff] }
  0x5d   : > { %v636_v34 = vmax.f32 %v508_v26, 0.0  ;;  %v637_v35 = vmax.f32 %v509_v27, 0.0  ;;  %v638_v36 = vmax.f32 %v510_v28, 0.0  ;;  %v514_v37 = vadd.f32 %v1728_v1, %v379_v29  ;;  %v257_v27 = vld [vmem:[%s1723_s20 + $0x298] sm:$0xff]  ;;  %v258_v28 = vld [vmem:[%s1723_s20 + $0x2a0] sm:$0xff]  ;;  %v259_v29 = vld [vmem:[%s1723_s20 + $0x2a8] sm:$0xff] }
  0x5e   : > { %v639_v38 = vmax.f32 %v511_v30, 0.0  ;;  %v640_v39 = vmax.f32 %v512_v31, 0.0  ;;  %v641_v40 = vmax.f32 %v513_v32, 0.0  ;;  %v515_v41 = vadd.f32 %v1728_v1, %v380_v33 }
  0x5f   : > { %v1602_v45 = vpack.c.bf16 %v636_v34, %v636_v34  ;;  %v1603_v46 = vpack.c.bf16 %v637_v35, %v637_v35  ;;  %v1604_v47 = vpack.c.bf16 %v638_v36, %v638_v36  ;;  %v642_v48 = vmax.f32 %v514_v37, 0.0  ;;  %v260_v34 = vld [vmem:[%s1723_s20 + $0x2b0] sm:$0xff] }
  0x60   : > { %v1605_v52 = vpack.c.bf16 %v639_v38, %v639_v38  ;;  %v1606_v53 = vpack.c.bf16 %v640_v39, %v640_v39  ;;  %v1607_v54 = vpack.c.bf16 %v641_v40, %v641_v40  ;;  %v643_v55 = vmax.f32 %v515_v41, 0.0  ;;  %v261_v39 = vld [vmem:[%s1723_s20 + $0x2b8] sm:$0xff] }
  0x61   : > { %1277 = vst.msk [vmem:[%s1757_s26 + $0x100] sm:$0xf] %vm1212_vm0, %v1602_v45  ;;  %1278 = vst.msk [vmem:[%s1757_s26 + $0x104] sm:$0xf] %vm1212_vm0, %v1603_v46  ;;  %v1608_v57 = vpack.c.bf16 %v642_v48, %v642_v48  ;;  %v381_v58 = vmul.f32 %v1718_v0, %v246_v42  ;;  %v382_v59 = vmul.f32 %v1718_v0, %v247_v43 }
  0x62   : > { %1279 = vst.msk [vmem:[%s1757_s26 + $0x108] sm:$0xf] %vm1212_vm0, %v1604_v47  ;;  %v383_v60 = vmul.f32 %v1718_v0, %v248_v44  ;;  %1280 = vst.msk [vmem:[%s1757_s26 + $0x10c] sm:$0xf] %vm1212_vm0, %v1605_v52  ;;  %v1609_v62 = vpack.c.bf16 %v643_v55, %v643_v55  ;;  %v384_v63 = vmul.f32 %v1718_v0, %v249_v49 }
  0x63   : > { %1281 = vst.msk [vmem:[%s1757_s26 + $0x110] sm:$0xf] %vm1212_vm0, %v1606_v53  ;;  %1282 = vst.msk [vmem:[%s1757_s26 + $0x114] sm:$0xf] %vm1212_vm0, %v1607_v54  ;;  %v385_v2 = vmul.f32 %v1718_v0, %v250_v50  ;;  %v386_v3 = vmul.f32 %v1718_v0, %v251_v51  ;;  %v516_v4 = vadd.f32 %v1728_v1, %v381_v58 }
  0x64   : > { %1283 = vst.msk [vmem:[%s1757_s26 + $0x118] sm:$0xf] %vm1212_vm0, %v1608_v57  ;;  %v517_v5 = vadd.f32 %v1728_v1, %v382_v59  ;;  %v518_v6 = vadd.f32 %v1728_v1, %v383_v60  ;;  %v387_v7 = vmul.f32 %v1718_v0, %v252_v56  ;;  %1284 = vst.msk [vmem:[%s1757_s26 + $0x11c] sm:$0xf] %vm1212_vm0, %v1609_v62  ;;  %v2162_v59 = vld [vmem:[%s2391_s2] ss:$0 sm:$0xff] }
  0x65   : > { %v519_v8 = vadd.f32 %v1728_v1, %v384_v63  ;;  %v520_v9 = vadd.f32 %v1728_v1, %v385_v2  ;;  %v521_v10 = vadd.f32 %v1728_v1, %v386_v3  ;;  %v388_v11 = vmul.f32 %v1718_v0, %v253_v61  ;;  %v263_v61 = vld [vmem:[%s1723_s20 + $0x2c8] sm:$0xff]  ;;  %v264_v62 = vld [vmem:[%s1723_s20 + $0x2d0] sm:$0xff] }
  0x66   : > { %v644_v12 = vmax.f32 %v516_v4, 0.0  ;;  %v645_v13 = vmax.f32 %v517_v5, 0.0  ;;  %v646_v14 = vmax.f32 %v518_v6, 0.0  ;;  %v522_v15 = vadd.f32 %v1728_v1, %v387_v7  ;;  %v265_v4 = vld [vmem:[%s1723_s20 + $0x2d8] sm:$0xff]  ;;  %v266_v5 = vld [vmem:[%s1723_s20 + $0x2e0] sm:$0xff]  ;;  %v267_v6 = vld [vmem:[%s1723_s20 + $0x2e8] sm:$0xff] }
  0x67   : > { %v647_v16 = vmax.f32 %v519_v8, 0.0  ;;  %v648_v17 = vmax.f32 %v520_v9, 0.0  ;;  %v649_v18 = vmax.f32 %v521_v10, 0.0  ;;  %v523_v19 = vadd.f32 %v1728_v1, %v388_v11  ;;  %v268_v11 = vld [vmem:[%s1723_s20 + $0x2f0] sm:$0xff] }
  0x68   : > { %v1610_v23 = vpack.c.bf16 %v644_v12, %v644_v12  ;;  %v1611_v24 = vpack.c.bf16 %v645_v13, %v645_v13  ;;  %v1612_v25 = vpack.c.bf16 %v646_v14, %v646_v14  ;;  %v650_v26 = vmax.f32 %v522_v15, 0.0  ;;  %v2181_v13 = vld [vmem:[%s2390_s1] ss:$0 sm:$0xff] }
  0x69   : > { %v1613_v30 = vpack.c.bf16 %v647_v16, %v647_v16  ;;  %v1614_v31 = vpack.c.bf16 %v648_v17, %v648_v17  ;;  %v1615_v32 = vpack.c.bf16 %v649_v18, %v649_v18  ;;  %v651_v33 = vmax.f32 %v523_v19, 0.0  ;;  %v269_v17 = vld [vmem:[%s1723_s20 + $0x2f8] sm:$0xff] }
  0x6a   : > { %1285 = vst.msk [vmem:[%s1757_s26 + $0x120] sm:$0xf] %vm1212_vm0, %v1610_v23  ;;  %1286 = vst.msk [vmem:[%s1757_s26 + $0x124] sm:$0xf] %vm1212_vm0, %v1611_v24  ;;  %v1616_v35 = vpack.c.bf16 %v650_v26, %v650_v26  ;;  %v389_v36 = vmul.f32 %v1718_v0, %v254_v20  ;;  %v390_v37 = vmul.f32 %v1718_v0, %v255_v21 }
  0x6b   : > { %1287 = vst.msk [vmem:[%s1757_s26 + $0x128] sm:$0xf] %vm1212_vm0, %v1612_v25  ;;  %v391_v38 = vmul.f32 %v1718_v0, %v256_v22  ;;  %1288 = vst.msk [vmem:[%s1757_s26 + $0x12c] sm:$0xf] %vm1212_vm0, %v1613_v30  ;;  %v1617_v40 = vpack.c.bf16 %v651_v33, %v651_v33  ;;  %v392_v41 = vmul.f32 %v1718_v0, %v257_v27 }
  0x6c   : > { %1289 = vst.msk [vmem:[%s1757_s26 + $0x130] sm:$0xf] %vm1212_vm0, %v1614_v31  ;;  %1290 = vst.msk [vmem:[%s1757_s26 + $0x134] sm:$0xf] %vm1212_vm0, %v1615_v32  ;;  %v393_v42 = vmul.f32 %v1718_v0, %v258_v28  ;;  %v394_v43 = vmul.f32 %v1718_v0, %v259_v29  ;;  %v524_v44 = vadd.f32 %v1728_v1, %v389_v36 }
  0x6d   : > { %1291 = vst.msk [vmem:[%s1757_s26 + $0x138] sm:$0xf] %vm1212_vm0, %v1616_v35  ;;  %v525_v45 = vadd.f32 %v1728_v1, %v390_v37  ;;  %v526_v46 = vadd.f32 %v1728_v1, %v391_v38  ;;  %v395_v47 = vmul.f32 %v1718_v0, %v260_v34  ;;  %1292 = vst.msk [vmem:[%s1757_s26 + $0x13c] sm:$0xf] %vm1212_vm0, %v1617_v40  ;;  %v270_v38 = vld [vmem:[%s1723_s20 + $0x300] sm:$0xff]  ;;  %v272_v40 = vld [vmem:[%s1723_s20 + $0x310] sm:$0xff] }
  0x6e   : > { %v527_v48 = vadd.f32 %v1728_v1, %v392_v41  ;;  %v528_v49 = vadd.f32 %v1728_v1, %v393_v42  ;;  %v529_v50 = vadd.f32 %v1728_v1, %v394_v43  ;;  %v396_v51 = vmul.f32 %v1718_v0, %v261_v39  ;;  %v262_v0 = vld [vmem:[%s1723_s20 + $0x2c0] sm:$0xff]  ;;  %v271_v39 = vld [vmem:[%s1723_s20 + $0x308] sm:$0xff] }
  0x6f   : > { %v652_v52 = vmax.f32 %v524_v44, 0.0  ;;  %v653_v53 = vmax.f32 %v525_v45, 0.0  ;;  %v654_v54 = vmax.f32 %v526_v46, 0.0  ;;  %v530_v55 = vadd.f32 %v1728_v1, %v395_v47  ;;  %v273_v45 = vld [vmem:[%s1723_s20 + $0x318] sm:$0xff]  ;;  %v274_v46 = vld [vmem:[%s1723_s20 + $0x320] sm:$0xff]  ;;  %v275_v47 = vld [vmem:[%s1723_s20 + $0x328] sm:$0xff] }
  0x70   : > { %v655_v56 = vmax.f32 %v527_v48, 0.0  ;;  %v656_v57 = vmax.f32 %v528_v49, 0.0  ;;  %v657_v58 = vmax.f32 %v529_v50, 0.0  ;;  %v531_v60 = vadd.f32 %v2162_v59, %v396_v51 }
  0x71   : > { %v1618_v63 = vpack.c.bf16 %v652_v52, %v652_v52  ;;  %v1619_v2 = vpack.c.bf16 %v653_v53, %v653_v53  ;;  %v1620_v1 = vpack.c.bf16 %v654_v54, %v654_v54  ;;  %v658_v3 = vmax.f32 %v530_v55, 0.0  ;;  %v276_v52 = vld [vmem:[%s1723_s20 + $0x330] sm:$0xff] }
  0x72   : > { %v1621_v7 = vpack.c.bf16 %v655_v56, %v655_v56  ;;  %v1622_v8 = vpack.c.bf16 %v656_v57, %v656_v57  ;;  %v1623_v9 = vpack.c.bf16 %v657_v58, %v657_v58  ;;  %v659_v10 = vmax.f32 %v531_v60, 0.0  ;;  %v277_v57 = vld [vmem:[%s1723_s20 + $0x338] sm:$0xff] }
  0x73   : > { %1293 = vst.msk [vmem:[%s1757_s26 + $0x140] sm:$0xf] %vm1212_vm0, %v1618_v63  ;;  %1294 = vst.msk [vmem:[%s1757_s26 + $0x144] sm:$0xf] %vm1212_vm0, %v1619_v2  ;;  %v1624_v12 = vpack.c.bf16 %v658_v3, %v658_v3  ;;  %v397_v14 = vmul.f32 %v2181_v13, %v262_v0  ;;  %v398_v15 = vmul.f32 %v2181_v13, %v263_v61 }
  0x74   : > { %1295 = vst.msk [vmem:[%s1757_s26 + $0x148] sm:$0xf] %vm1212_vm0, %v1620_v1  ;;  %v399_v16 = vmul.f32 %v2181_v13, %v264_v62  ;;  %1296 = vst.msk [vmem:[%s1757_s26 + $0x14c] sm:$0xf] %vm1212_vm0, %v1621_v7  ;;  %v1625_v18 = vpack.c.bf16 %v659_v10, %v659_v10  ;;  %v400_v19 = vmul.f32 %v2181_v13, %v265_v4 }
  0x75   : > { %1297 = vst.msk [vmem:[%s1757_s26 + $0x150] sm:$0xf] %vm1212_vm0, %v1622_v8  ;;  %1298 = vst.msk [vmem:[%s1757_s26 + $0x154] sm:$0xf] %vm1212_vm0, %v1623_v9  ;;  %v401_v20 = vmul.f32 %v2181_v13, %v266_v5  ;;  %v402_v21 = vmul.f32 %v2181_v13, %v267_v6  ;;  %v532_v22 = vadd.f32 %v2162_v59, %v397_v14 }
  0x76   : > { %1299 = vst.msk [vmem:[%s1757_s26 + $0x158] sm:$0xf] %vm1212_vm0, %v1624_v12  ;;  %v533_v23 = vadd.f32 %v2162_v59, %v398_v15  ;;  %v534_v24 = vadd.f32 %v2162_v59, %v399_v16  ;;  %v403_v25 = vmul.f32 %v2181_v13, %v268_v11  ;;  %1300 = vst.msk [vmem:[%s1757_s26 + $0x15c] sm:$0xf] %vm1212_vm0, %v1625_v18  ;;  %v278_v16 = vld [vmem:[%s1723_s20 + $0x340] sm:$0xff]  ;;  %v280_v18 = vld [vmem:[%s1723_s20 + $0x350] sm:$0xff] }
  0x77   : > { %v535_v26 = vadd.f32 %v2162_v59, %v400_v19  ;;  %v536_v27 = vadd.f32 %v2162_v59, %v401_v20  ;;  %v537_v28 = vadd.f32 %v2162_v59, %v402_v21  ;;  %v404_v29 = vmul.f32 %v2181_v13, %v269_v17  ;;  %v279_v17 = vld [vmem:[%s1723_s20 + $0x348] sm:$0xff] }
  0x78   : > { %v660_v30 = vmax.f32 %v532_v22, 0.0  ;;  %v661_v31 = vmax.f32 %v533_v23, 0.0  ;;  %v662_v32 = vmax.f32 %v534_v24, 0.0  ;;  %v538_v33 = vadd.f32 %v2162_v59, %v403_v25  ;;  %v281_v23 = vld [vmem:[%s1723_s20 + $0x358] sm:$0xff]  ;;  %v282_v24 = vld [vmem:[%s1723_s20 + $0x360] sm:$0xff]  ;;  %v283_v25 = vld [vmem:[%s1723_s20 + $0x368] sm:$0xff] }
  0x79   : > { %v663_v34 = vmax.f32 %v535_v26, 0.0  ;;  %v664_v35 = vmax.f32 %v536_v27, 0.0  ;;  %v665_v36 = vmax.f32 %v537_v28, 0.0  ;;  %v539_v37 = vadd.f32 %v2162_v59, %v404_v29 }
  0x7a   : > { %v1626_v41 = vpack.c.bf16 %v660_v30, %v660_v30  ;;  %v1627_v42 = vpack.c.bf16 %v661_v31, %v661_v31  ;;  %v1628_v43 = vpack.c.bf16 %v662_v32, %v662_v32  ;;  %v666_v44 = vmax.f32 %v538_v33, 0.0  ;;  %v284_v30 = vld [vmem:[%s1723_s20 + $0x370] sm:$0xff] }
  0x7b   : > { %v1629_v48 = vpack.c.bf16 %v663_v34, %v663_v34  ;;  %v1630_v49 = vpack.c.bf16 %v664_v35, %v664_v35  ;;  %v1631_v50 = vpack.c.bf16 %v665_v36, %v665_v36  ;;  %v667_v51 = vmax.f32 %v539_v37, 0.0  ;;  %v285_v35 = vld [vmem:[%s1723_s20 + $0x378] sm:$0xff] }
  0x7c   : > { %1301 = vst.msk [vmem:[%s1757_s26 + $0x160] sm:$0xf] %vm1212_vm0, %v1626_v41  ;;  %1302 = vst.msk [vmem:[%s1757_s26 + $0x164] sm:$0xf] %vm1212_vm0, %v1627_v42  ;;  %v1632_v53 = vpack.c.bf16 %v666_v44, %v666_v44  ;;  %v405_v54 = vmul.f32 %v2181_v13, %v270_v38  ;;  %v406_v55 = vmul.f32 %v2181_v13, %v271_v39 }
  0x7d   : > { %1303 = vst.msk [vmem:[%s1757_s26 + $0x168] sm:$0xf] %vm1212_vm0, %v1628_v43  ;;  %v407_v56 = vmul.f32 %v2181_v13, %v272_v40  ;;  %1304 = vst.msk [vmem:[%s1757_s26 + $0x16c] sm:$0xf] %vm1212_vm0, %v1629_v48  ;;  %v1633_v58 = vpack.c.bf16 %v667_v51, %v667_v51  ;;  %v408_v60 = vmul.f32 %v2181_v13, %v273_v45 }
  0x7e   : > { %1305 = vst.msk [vmem:[%s1757_s26 + $0x170] sm:$0xf] %vm1212_vm0, %v1630_v49  ;;  %1306 = vst.msk [vmem:[%s1757_s26 + $0x174] sm:$0xf] %vm1212_vm0, %v1631_v50  ;;  %v409_v0 = vmul.f32 %v2181_v13, %v274_v46  ;;  %v410_v61 = vmul.f32 %v2181_v13, %v275_v47  ;;  %v540_v62 = vadd.f32 %v2162_v59, %v405_v54 }
  0x7f   : > { %1307 = vst.msk [vmem:[%s1757_s26 + $0x178] sm:$0xf] %vm1212_vm0, %v1632_v53  ;;  %v541_v63 = vadd.f32 %v2162_v59, %v406_v55  ;;  %v542_v2 = vadd.f32 %v2162_v59, %v407_v56  ;;  %v411_v1 = vmul.f32 %v2181_v13, %v276_v52  ;;  %1308 = vst.msk [vmem:[%s1757_s26 + $0x17c] sm:$0xf] %vm1212_vm0, %v1633_v58  ;;  %v286_v56 = vld [vmem:[%s1723_s20 + $0x380] sm:$0xff]  ;;  %v288_v58 = vld [vmem:[%s1723_s20 + $0x390] sm:$0xff] }
  0x80   : > { %v543_v3 = vadd.f32 %v2162_v59, %v408_v60  ;;  %v544_v4 = vadd.f32 %v2162_v59, %v409_v0  ;;  %v545_v5 = vadd.f32 %v2162_v59, %v410_v61  ;;  %v412_v6 = vmul.f32 %v2181_v13, %v277_v57  ;;  %v287_v57 = vld [vmem:[%s1723_s20 + $0x388] sm:$0xff] }
  0x81   : > { %v668_v7 = vmax.f32 %v540_v62, 0.0  ;;  %v669_v8 = vmax.f32 %v541_v63, 0.0  ;;  %v670_v9 = vmax.f32 %v542_v2, 0.0  ;;  %v546_v10 = vadd.f32 %v2162_v59, %v411_v1  ;;  %v289_v63 = vld [vmem:[%s1723_s20 + $0x398] sm:$0xff]  ;;  %v290_v2 = vld [vmem:[%s1723_s20 + $0x3a0] sm:$0xff]  ;;  %v291_v1 = vld [vmem:[%s1723_s20 + $0x3a8] sm:$0xff] }
  0x82   : > { %v671_v11 = vmax.f32 %v543_v3, 0.0  ;;  %v672_v12 = vmax.f32 %v544_v4, 0.0  ;;  %v673_v14 = vmax.f32 %v545_v5, 0.0  ;;  %v547_v15 = vadd.f32 %v2162_v59, %v412_v6 }
  0x83   : > { %v1634_v19 = vpack.c.bf16 %v668_v7, %v668_v7  ;;  %v1635_v20 = vpack.c.bf16 %v669_v8, %v669_v8  ;;  %v1636_v21 = vpack.c.bf16 %v670_v9, %v670_v9  ;;  %v674_v22 = vmax.f32 %v546_v10, 0.0  ;;  %v292_v7 = vld [vmem:[%s1723_s20 + $0x3b0] sm:$0xff] }
  0x84   : > { %v1637_v26 = vpack.c.bf16 %v671_v11, %v671_v11  ;;  %v1638_v27 = vpack.c.bf16 %v672_v12, %v672_v12  ;;  %v1639_v28 = vpack.c.bf16 %v673_v14, %v673_v14  ;;  %v675_v29 = vmax.f32 %v547_v15, 0.0  ;;  %v293_v12 = vld [vmem:[%s1723_s20 + $0x3b8] sm:$0xff] }
  0x85   : > { %1309 = vst.msk [vmem:[%s1757_s26 + $0x180] sm:$0xf] %vm1212_vm0, %v1634_v19  ;;  %1310 = vst.msk [vmem:[%s1757_s26 + $0x184] sm:$0xf] %vm1212_vm0, %v1635_v20  ;;  %v1640_v31 = vpack.c.bf16 %v674_v22, %v674_v22  ;;  %v413_v32 = vmul.f32 %v2181_v13, %v278_v16  ;;  %v414_v33 = vmul.f32 %v2181_v13, %v279_v17 }
  0x86   : > { %1311 = vst.msk [vmem:[%s1757_s26 + $0x188] sm:$0xf] %vm1212_vm0, %v1636_v21  ;;  %v415_v34 = vmul.f32 %v2181_v13, %v280_v18  ;;  %1312 = vst.msk [vmem:[%s1757_s26 + $0x18c] sm:$0xf] %vm1212_vm0, %v1637_v26  ;;  %v1641_v36 = vpack.c.bf16 %v675_v29, %v675_v29  ;;  %v416_v37 = vmul.f32 %v2181_v13, %v281_v23 }
  0x87   : > { %1313 = vst.msk [vmem:[%s1757_s26 + $0x190] sm:$0xf] %vm1212_vm0, %v1638_v27  ;;  %1314 = vst.msk [vmem:[%s1757_s26 + $0x194] sm:$0xf] %vm1212_vm0, %v1639_v28  ;;  %v417_v38 = vmul.f32 %v2181_v13, %v282_v24  ;;  %v418_v39 = vmul.f32 %v2181_v13, %v283_v25  ;;  %v548_v40 = vadd.f32 %v2162_v59, %v413_v32 }
  0x88   : > { %1315 = vst.msk [vmem:[%s1757_s26 + $0x198] sm:$0xf] %vm1212_vm0, %v1640_v31  ;;  %v549_v41 = vadd.f32 %v2162_v59, %v414_v33  ;;  %v550_v42 = vadd.f32 %v2162_v59, %v415_v34  ;;  %v419_v43 = vmul.f32 %v2181_v13, %v284_v30  ;;  %1316 = vst.msk [vmem:[%s1757_s26 + $0x19c] sm:$0xf] %vm1212_vm0, %v1641_v36  ;;  %v294_v34 = vld [vmem:[%s1723_s20 + $0x3c0] sm:$0xff]  ;;  %v296_v36 = vld [vmem:[%s1723_s20 + $0x3d0] sm:$0xff] }
  0x89   : > { %v551_v44 = vadd.f32 %v2162_v59, %v416_v37  ;;  %v552_v45 = vadd.f32 %v2162_v59, %v417_v38  ;;  %v553_v46 = vadd.f32 %v2162_v59, %v418_v39  ;;  %v420_v47 = vmul.f32 %v2181_v13, %v285_v35  ;;  %v295_v35 = vld [vmem:[%s1723_s20 + $0x3c8] sm:$0xff] }
  0x8a   : > { %v676_v48 = vmax.f32 %v548_v40, 0.0  ;;  %v677_v49 = vmax.f32 %v549_v41, 0.0  ;;  %v678_v50 = vmax.f32 %v550_v42, 0.0  ;;  %v554_v51 = vadd.f32 %v2162_v59, %v419_v43  ;;  %v297_v41 = vld [vmem:[%s1723_s20 + $0x3d8] sm:$0xff]  ;;  %v298_v42 = vld [vmem:[%s1723_s20 + $0x3e0] sm:$0xff]  ;;  %v299_v43 = vld [vmem:[%s1723_s20 + $0x3e8] sm:$0xff] }
  0x8b   : > { %v679_v52 = vmax.f32 %v551_v44, 0.0  ;;  %v680_v53 = vmax.f32 %v552_v45, 0.0  ;;  %v681_v54 = vmax.f32 %v553_v46, 0.0  ;;  %v555_v55 = vadd.f32 %v2162_v59, %v420_v47 }
  0x8c   : > { %v1642_v60 = vpack.c.bf16 %v676_v48, %v676_v48  ;;  %v1643_v0 = vpack.c.bf16 %v677_v49, %v677_v49  ;;  %v1644_v61 = vpack.c.bf16 %v678_v50, %v678_v50  ;;  %v682_v62 = vmax.f32 %v554_v51, 0.0  ;;  %v300_v48 = vld [vmem:[%s1723_s20 + $0x3f0] sm:$0xff] }
  0x8d   : > { %v1645_v3 = vpack.c.bf16 %v679_v52, %v679_v52  ;;  %v1646_v4 = vpack.c.bf16 %v680_v53, %v680_v53  ;;  %v1647_v5 = vpack.c.bf16 %v681_v54, %v681_v54  ;;  %v683_v6 = vmax.f32 %v555_v55, 0.0  ;;  %v301_v53 = vld [vmem:[%s1723_s20 + $0x3f8] sm:$0xff] }
  0x8e   : > { %1317 = vst.msk [vmem:[%s1757_s26 + $0x1a0] sm:$0xf] %vm1212_vm0, %v1642_v60  ;;  %1318 = vst.msk [vmem:[%s1757_s26 + $0x1a4] sm:$0xf] %vm1212_vm0, %v1643_v0  ;;  %v1648_v8 = vpack.c.bf16 %v682_v62, %v682_v62  ;;  %v421_v9 = vmul.f32 %v2181_v13, %v286_v56  ;;  %v422_v10 = vmul.f32 %v2181_v13, %v287_v57 }
  0x8f   : > { %1319 = vst.msk [vmem:[%s1757_s26 + $0x1a8] sm:$0xf] %vm1212_vm0, %v1644_v61  ;;  %v423_v11 = vmul.f32 %v2181_v13, %v288_v58  ;;  %1320 = vst.msk [vmem:[%s1757_s26 + $0x1ac] sm:$0xf] %vm1212_vm0, %v1645_v3  ;;  %v1649_v14 = vpack.c.bf16 %v683_v6, %v683_v6  ;;  %v424_v15 = vmul.f32 %v2181_v13, %v289_v63 }
  0x90   : > { %1321 = vst.msk [vmem:[%s1757_s26 + $0x1b0] sm:$0xf] %vm1212_vm0, %v1646_v4  ;;  %1322 = vst.msk [vmem:[%s1757_s26 + $0x1b4] sm:$0xf] %vm1212_vm0, %v1647_v5  ;;  %v425_v16 = vmul.f32 %v2181_v13, %v290_v2  ;;  %v426_v17 = vmul.f32 %v2181_v13, %v291_v1  ;;  %v556_v18 = vadd.f32 %v2162_v59, %v421_v9 }
  0x91   : > { %1323 = vst.msk [vmem:[%s1757_s26 + $0x1b8] sm:$0xf] %vm1212_vm0, %v1648_v8  ;;  %v557_v19 = vadd.f32 %v2162_v59, %v422_v10  ;;  %v558_v20 = vadd.f32 %v2162_v59, %v423_v11  ;;  %v427_v21 = vmul.f32 %v2181_v13, %v292_v7  ;;  %1324 = vst.msk [vmem:[%s1757_s26 + $0x1bc] sm:$0xf] %vm1212_vm0, %v1649_v14 }
  0x92   : > { %v559_v22 = vadd.f32 %v2162_v59, %v424_v15  ;;  %v560_v23 = vadd.f32 %v2162_v59, %v425_v16  ;;  %v561_v24 = vadd.f32 %v2162_v59, %v426_v17  ;;  %v428_v25 = vmul.f32 %v2181_v13, %v293_v12 }
  0x93   : > { %v684_v26 = vmax.f32 %v556_v18, 0.0  ;;  %v685_v27 = vmax.f32 %v557_v19, 0.0  ;;  %v686_v28 = vmax.f32 %v558_v20, 0.0  ;;  %v562_v29 = vadd.f32 %v2162_v59, %v427_v21 }
  0x94   : > { %v687_v30 = vmax.f32 %v559_v22, 0.0  ;;  %v688_v31 = vmax.f32 %v560_v23, 0.0  ;;  %v689_v32 = vmax.f32 %v561_v24, 0.0  ;;  %v563_v33 = vadd.f32 %v2162_v59, %v428_v25 }
  0x95   : > { %v1650_v37 = vpack.c.bf16 %v684_v26, %v684_v26  ;;  %v1651_v38 = vpack.c.bf16 %v685_v27, %v685_v27  ;;  %v1652_v39 = vpack.c.bf16 %v686_v28, %v686_v28  ;;  %v690_v40 = vmax.f32 %v562_v29, 0.0 }
  0x96   : > { %v1653_v44 = vpack.c.bf16 %v687_v30, %v687_v30  ;;  %v1654_v45 = vpack.c.bf16 %v688_v31, %v688_v31  ;;  %v1655_v46 = vpack.c.bf16 %v689_v32, %v689_v32  ;;  %v691_v47 = vmax.f32 %v563_v33, 0.0 }
  0x97   : > { %1325 = vst.msk [vmem:[%s1757_s26 + $0x1c0] sm:$0xf] %vm1212_vm0, %v1650_v37  ;;  %1326 = vst.msk [vmem:[%s1757_s26 + $0x1c4] sm:$0xf] %vm1212_vm0, %v1651_v38  ;;  %v1656_v49 = vpack.c.bf16 %v690_v40, %v690_v40  ;;  %v429_v50 = vmul.f32 %v2181_v13, %v294_v34  ;;  %v430_v51 = vmul.f32 %v2181_v13, %v295_v35 }
  0x98   : > { %1327 = vst.msk [vmem:[%s1757_s26 + $0x1c8] sm:$0xf] %vm1212_vm0, %v1652_v39  ;;  %v431_v52 = vmul.f32 %v2181_v13, %v296_v36  ;;  %1328 = vst.msk [vmem:[%s1757_s26 + $0x1cc] sm:$0xf] %vm1212_vm0, %v1653_v44  ;;  %v1657_v54 = vpack.c.bf16 %v691_v47, %v691_v47  ;;  %v432_v55 = vmul.f32 %v2181_v13, %v297_v41 }
  0x99   : > { %1329 = vst.msk [vmem:[%s1757_s26 + $0x1d0] sm:$0xf] %vm1212_vm0, %v1654_v45  ;;  %1330 = vst.msk [vmem:[%s1757_s26 + $0x1d4] sm:$0xf] %vm1212_vm0, %v1655_v46  ;;  %v433_v56 = vmul.f32 %v2181_v13, %v298_v42  ;;  %v434_v57 = vmul.f32 %v2181_v13, %v299_v43  ;;  %v564_v58 = vadd.f32 %v2162_v59, %v429_v50 }
  0x9a   : > { %1331 = vst.msk [vmem:[%s1757_s26 + $0x1d8] sm:$0xf] %vm1212_vm0, %v1656_v49  ;;  %v565_v60 = vadd.f32 %v2162_v59, %v430_v51  ;;  %v566_v0 = vadd.f32 %v2162_v59, %v431_v52  ;;  %v435_v61 = vmul.f32 %v2181_v13, %v300_v48  ;;  %1332 = vst.msk [vmem:[%s1757_s26 + $0x1dc] sm:$0xf] %vm1212_vm0, %v1657_v54 }
  0x9b   : > { %v567_v62 = vadd.f32 %v2162_v59, %v432_v55  ;;  %v568_v63 = vadd.f32 %v2162_v59, %v433_v56  ;;  %v569_v2 = vadd.f32 %v2162_v59, %v434_v57  ;;  %v436_v1 = vmul.f32 %v2181_v13, %v301_v53 }
  0x9c   : > { %v692_v3 = vmax.f32 %v564_v58, 0.0  ;;  %v693_v4 = vmax.f32 %v565_v60, 0.0  ;;  %v694_v5 = vmax.f32 %v566_v0, 0.0  ;;  %v570_v6 = vadd.f32 %v2162_v59, %v435_v61 }
  0x9d   : > { %v695_v7 = vmax.f32 %v567_v62, 0.0  ;;  %v696_v8 = vmax.f32 %v568_v63, 0.0  ;;  %v697_v9 = vmax.f32 %v569_v2, 0.0  ;;  %v571_v10 = vadd.f32 %v2162_v59, %v436_v1 }
  0x9e   : > { %v1658_v11 = vpack.c.bf16 %v692_v3, %v692_v3  ;;  %v1659_v12 = vpack.c.bf16 %v693_v4, %v693_v4  ;;  %v1660_v13 = vpack.c.bf16 %v694_v5, %v694_v5  ;;  %v698_v14 = vmax.f32 %v570_v6, 0.0 }
  0x9f   : > { %v1661_v15 = vpack.c.bf16 %v695_v7, %v695_v7  ;;  %v1662_v16 = vpack.c.bf16 %v696_v8, %v696_v8  ;;  %v1663_v17 = vpack.c.bf16 %v697_v9, %v697_v9  ;;  %v699_v18 = vmax.f32 %v571_v10, 0.0 }
  0xa0   : > { %1333 = vst.msk [vmem:[%s1757_s26 + $0x1e0] sm:$0xf] %vm1212_vm0, %v1658_v11  ;;  %1334 = vst.msk [vmem:[%s1757_s26 + $0x1e4] sm:$0xf] %vm1212_vm0, %v1659_v12  ;;  %v1664_v19 = vpack.c.bf16 %v698_v14, %v698_v14 }
  0xa1   : > { %1335 = vst.msk [vmem:[%s1757_s26 + $0x1e8] sm:$0xf] %vm1212_vm0, %v1660_v13  ;;  %1336 = vst.msk [vmem:[%s1757_s26 + $0x1ec] sm:$0xf] %vm1212_vm0, %v1661_v15  ;;  %v1665_v59 = vpack.c.bf16 %v699_v18, %v699_v18 }
  0xa2   : > { %1337 = vst.msk [vmem:[%s1757_s26 + $0x1f0] sm:$0xf] %vm1212_vm0, %v1662_v16  ;;  %1338 = vst.msk [vmem:[%s1757_s26 + $0x1f4] sm:$0xf] %vm1212_vm0, %v1663_v17 }
  0xa3   : > { %1339 = vst.msk [vmem:[%s1757_s26 + $0x1f8] sm:$0xf] %vm1212_vm0, %v1664_v19  ;;  %1340 = vst.msk [vmem:[%s1757_s26 + $0x1fc] sm:$0xf] %vm1212_vm0, %v1665_v59 }
  0xa4 PF: > { %s13_s12 = sadd.s32 1, %s1682_s12  }
  0xa5   : > { %p10_p4 = scmp.ge.s32.totalorder %s13_s12, 4  }
  0xa7   :  { %12 = sbr.rel (!%p10_p4) target bundleno = 1 (0x1), region = 62 }

// kernel: generator_forward.17
= control target key start
LH: loop header
LB: loop body
LE: loop exit
PB: predicated region body
PF: predicated region fallthrough
CT: control target
= control target key end

     0   :  { %s2398_s18 = smov 0   ;;  %s2400_s19 = smov 0   ;;  %s2746_s0 = inlined_call_operand.vmem [shape: bf16[2,34,34,4], index: 0, kind: input, shape index: {}, may-alias: {0,1,2}]   ;;  %s2747_s1 = inlined_call_operand.vmem [shape: bf16[2,34,34,4], index: 1, kind: input, shape index: {}, may-alias: {0,1,2}]   ;;  %s2748_s2 = inlined_call_operand.vmem [shape: bf16[2,34,34,4], index: 2, kind: input, shape index: {}, may-alias: {0,1,2}]   ;;  %s2749_s3 = inlined_call_operand.vmem [shape: bf16[16,4,3], index: 3, kind: input, shape index: {}]   ;;  %s2750_s4 = inlined_call_operand.vmem [shape: f32[1,3], index: 4, kind: input, shape index: {}]   ;;  %s2751_s5 = inlined_call_operand.vmem [shape: f32[2,64,2,32,3], index: 5, kind: output, shape index: {}]  }
   0x1   :  { %s2402_s20 = smov 0   ;;  %s2404_s21 = smov 0  }
   0x2   :  { %s2406_s22 = smov 0  }
   0x3 LB: > { %s24_s23 = sadd.s32 1, %s2358_s20  ;;  %s27_s24 = sadd.s32 1, %s2362_s21  ;;  %s2366_s22 = sphi %s2406_s22, %s15_s22   ;;  %s2362_s21 = sphi %s2404_s21, %s2756_s21   ;;  %s2358_s20 = sphi %s2402_s20, %s2755_s20   ;;  %s2354_s19 = sphi %s2400_s19, %s2754_s19   ;;  %s2350_s18 = sphi %s2398_s18, %s2753_s18  }
   0x4   : > { %p25_p0 = scmp.ge.s32.totalorder %s24_s23, 32  ;;  %p1910_p1 = scmp.ge.s32.totalorder %s2366_s22, 1 }
   0x5   : > { %p247_p2 = scmp.lt.s32.totalorder %s2366_s22, 65 }
   0x6   : > { %s2758_s23 = smov (%p25_p0, %s24_s23), 0  ;;  %s2760_s24 = smov (!%p25_p0, %s27_s24), %s2362_s21 }
   0x7   : > { %p248_p3 = pnand %p1910_p1, %p247_p2  ;;  %p29_p4 = scmp.ge.s32.totalorder %s2760_s24, 2 }
   0x8   : > { %vm397_vm0 = vcmask (!%p248_p3), 1041408   ;;  %v1939_v0 = vld [vmem:[%s2749_s3 + $0xa] sm:$0x3] (!%p248_p3)  ;;  %v1918_v1 = vld [vmem:[%s2749_s3 + $0x2] sm:$0x3] (!%p248_p3)  ;;  %p304_p5 = scmp.lt.s32.totalorder (!%p248_p3), %s2354_s19, 1 }
   0x9   : > { %s2762_s24 = smov (%p29_p4, %s2760_s24), 0  ;;  %251 = sbr.rel (%p248_p3) target bundleno = 345 (0x159), region = 40 }
   0xa   : > { %2208 = vmatprep.subr.msk.bf16.mxu1 (!%p248_p3), %vm397_vm0, %v1939_v0  ;;  %v741_v2 = vsel (!%p248_p3), %vm397_vm0, %v1939_v0, 0  ;;  %2204 = vmatprep.subr.msk.bf16.mxu0 (!%p248_p3), %vm397_vm0, %v1918_v1  ;;  %p306_p6 = scmp.lt.s32.totalorder (!%p248_p3), %s2350_s18, 33  ;;  %s313_s29 = sadd.s32 (!%p248_p3), 1, %s2350_s18  ;;  %v399_v3 = vsel (!%p248_p3), %vm397_vm0, %v1918_v1, 0  ;;  %v2447_v4 = vld [vmem:[%s2749_s3] sm:$0x3] (!%p248_p3) }
   0xb   : > { %2085 = vmatpush3.bf16.msra.mxu1 (!%p248_p3), %v741_v2  ;;  %2061 = vmatpush3.bf16.msra.mxu0 (!%p248_p3), %v399_v3  ;;  %v1938_v5 = vld [vmem:[%s2749_s3 + $0x8] sm:$0x3] (!%p248_p3)  ;;  %p316_p7 = scmp.lt.s32.totalorder (!%p248_p3), %s313_s29, 33  ;;  %vm390_vm1 = vcmask (!%p248_p3), 31744   ;;  %vm369_vm2 = vsmask.f32 (!%p248_p3), 7424 }
   0xc   : > { %2205 = vmatprep.subr.msk.bf16.mxu0 (!%p248_p3), %vm397_vm0, %v2447_v4  ;;  %2209 = vmatprep.subr.msk.bf16.mxu1 (!%p248_p3), %vm397_vm0, %v1938_v5  ;;  %vm728_vm3 = vcmask (!%p248_p3), 1046528   ;;  %v822_v17 = vsel (!%p248_p3), %vm397_vm0, %v1938_v5, 0  ;;  %s324_s27 = sadd.s32 (!%p248_p3), 2, %s2350_s18  ;;  %v1948_v25 = vld [vmem:[%s2749_s3 + $0xc] sm:$0x3] (!%p248_p3)  ;;  %v455_v46 = vsel (!%p248_p3), %vm397_vm0, %v2447_v4, 0 }
   0xd   : > { %p2482_p8 = scmp.lt.s32.totalorder (!%p248_p3), %s324_s27, 33  ;;  %v1926_v48 = vld [vmem:[%s2749_s3 + $0x4] sm:$0x3] (!%p248_p3)  ;;  %v920_v60 = vsel (!%p248_p3), %vm397_vm0, %v1948_v25, 0  ;;  %v1954_v62 = vld [vmem:[%s2749_s3 + $0xe] sm:$0x3] (!%p248_p3) }
   0xe   : > { %v529_v5 = vsel (!%p248_p3), %vm397_vm0, %v1926_v48, 0  ;;  %vm700_vm4 = vcmask (!%p248_p3), 23552  }
  0x10   : > { %s2764_s19 = smov (!%p304_p5, %s2354_s19), 1  ;;  %s2766_s29 = smov (!%p316_p7, %s313_s29), 33 }
  0x11   : > { %s307_s7 = scalar_select %p306_p6, %s2350_s18, 33 }
  0x12   : > { %s2456_s10 = smul.u32 170, %s2764_s19  ;;  %s2768_s27 = smov (!%p2482_p8, %s324_s27), 33 }
  0x13   : > { %s2220_s11 = smul.u32 5, %s307_s7  ;;  %s1916_s6 = sshll.u32 %s2764_s19, 9 }
  0x14   : > { %s2222_s14 = smul.u32 5, %s2766_s29 }
  0x15   : > { %s310_s12 = sadd.s32 %s2456_s10, %s2220_s11 }
  0x16   : > { %s1911_s13 = sshll.u32 %s310_s12, 2  ;;  %s320_s25 = sadd.s32 %s2222_s14, %s2456_s10 }
  0x17   : > { %s312_s17 = scalar_lea.vmem %s2746_s0, %s1911_s13  ;;  %s1912_s26 = sshll.u32 %s320_s25, 2 }
  0x18   : > { %v705_v6 = vld [vmem:[%s312_s17] sm:$0xf]  ;;  %v706_v7 = vld [vmem:[%s312_s17 + $0x4] sm:$0xf]  ;;  %v2265_v8 = vld [vmem:[%s312_s17 + $0x8] sm:$0xff]   ;;  %s2471_s30 = scalar_lea.vmem %s2747_s1, %s1912_s26  ;;  %s2223_s12 = smul.u32 5, %s2768_s27 }
  0x19   : > { %v1945_v9 = vcombine.low %v705_v6, %v706_v7  ;;  %v712_v10 = vld [vmem:[%s312_s17] sm:$0xe]  ;;  %v730_v13 = vrot.slane %v2265_v8, 1  ;;  %v2267_v15 = vld [vmem:[%s312_s17 + $0x10] ss:$0 sps:$4 sm:$0x11]  }
  0x1a   : > { %v2268_v11 = vld [vmem:[%s312_s17] sm:$0xff]   ;;  %v1940_v12 = vcombine.low %v712_v10, %v706_v7  ;;  %v2464_v16 = vld [vmem:[%s312_s17 + $0x8] sm:$0xff]   ;;  %v732_v20 = vrot.slane %v2267_v15, 1  ;;  %v2270_v28 = vld [vmem:[%s312_s17 + $0x10] ss:$0 sps:$4 sm:$0x11]   ;;  %s331_s15 = sadd.s32 %s2223_s12, %s2456_s10 }
  0x1b   : > { %v798_v14 = vshll.u32 %v1945_v9, 16  ;;  %v796_v19 = vshrl.u32 %v1945_v9, 16  ;;  %v371_v21 = vshrl.u32 %v2268_v11, 16  ;;  %v373_v22 = vshll.u32 %v2268_v11, 16  ;;  %v873_v37 = vld [vmem:[%s2471_s30] sm:$0xf] }
  0x1c   : > { %v729_v18 = vrot.slane %v1940_v12, 1  ;;  %v378_v23 = vshll.u32 %v2464_v16, 16  ;;  %v382_v24 = vshrl.u32 %v2464_v16, 16  ;;  %v733_v27 = vsel %vm728_vm3, %v730_v13, %v732_v20  ;;  %v874_v38 = vld [vmem:[%s2471_s30 + $0x4] sm:$0xf]  ;;  %v2491_v43 = vld [vmem:[%s2471_s30 + $0x8] sm:$0xff]  }
  0x1d   : > { %v800_v29 = vrot.slane %v798_v14, 1  ;;  %v375_v30 = vrot.slane %v373_v22, 1  ;;  %v803_v32 = vshll.u32 %v2265_v8, 16  ;;  %v807_v33 = vshrl.u32 %v2265_v8, 16  ;;  %v975_v63 = vld [vmem:[%s2471_s30] sm:$0xe] }
  0x1e   : > { %v731_v26 = vsel %vm728_vm3, %v729_v18, %v730_v13  ;;  %v380_v31 = vrot.slane %v378_v23, 1  ;;  %v386_v34 = vshll.u32 %v2270_v28, 16  ;;  %v811_v36 = vshll.u32 %v2267_v15, 16  ;;  %v2514_v59 = vld [vmem:[%s2471_s30 + $0x10] ss:$0 sps:$4 sm:$0x11]  }
  0x1f   : > { %2086 = vmatprep.mubr.msk.bf16.mxu1 %vm390_vm1, %v731_v26  ;;  %v801_v35 = vor.u32 %v800_v29, %v796_v19  ;;  %v376_v39 = vor.u32 %v375_v30, %v371_v21  ;;  %v805_v41 = vrot.slane %v803_v32, 1  ;;  %v1949_v42 = vcombine.low %v873_v37, %v874_v38  ;;  %v2277_v0 = vld [vmem:[%s2471_s30] sm:$0xff]   ;;  %v2278_v6 = vld [vmem:[%s2471_s30 + $0x8] sm:$0xff]   ;;  %s1913_s16 = sshll.u32 %s331_s15, 2  ;;  %v1987_v18 = vld [vmem:[%s2749_s3 + $0x1a] sm:$0x3] }
  0x20   : > { %2087 = vmatmul.mubr.msk.bf16.vlgmr.msra.gmra.mrb[0].mxu1 %vm390_vm1, %v733_v27  ;;  %v384_v40 = vor.u32 %v382_v24, %v380_v31  ;;  %v388_v44 = vrot.slane %v386_v34, 1  ;;  %v901_v52 = vshll.u32 %v2491_v43, 16  ;;  %v813_v54 = vrot.slane %v811_v36, 1  ;;  %v2274_v3 = vld [vmem:[%s2471_s30] sm:$0xff]   ;;  %s2542_s27 = scalar_lea.vmem %s2748_s2, %s1913_s16  ;;  %v2275_v26 = vld [vmem:[%s2471_s30 + $0x8] sm:$0xff]   ;;  %s1914_s26 = sshll.u32 %s2350_s18, 1 }
  0x21   : > { %2091 = vmatpush3.bf16.msra.mxu1 %v822_v17  ;;  %v381_v45 = vsel %vm369_vm2, %v376_v39, %v380_v31  ;;  %v806_v47 = vsel %vm369_vm2, %v801_v35, %v805_v41  ;;  %v894_v50 = vshrl.u32 %v1949_v42, 16  ;;  %v896_v51 = vshll.u32 %v1949_v42, 16  ;;  %v1931_v8 = vld [vmem:[%s2749_s3 + $0x6] sm:$0x3]  ;;  %v1410_v20 = vld [vmem:[%s2471_s30] sm:$0xf] }
  0x22   : > { %2210 = vmatprep.subr.msk.bf16.mxu1 %vm397_vm0, %v1948_v25  ;;  %2062 = vmatprep.mubr.msk.bf16.mxu0 %vm390_vm1, %v381_v45  ;;  %v389_v49 = vsel %vm369_vm2, %v384_v40, %v388_v44  ;;  %v809_v53 = vor.u32 %v807_v33, %v805_v41  ;;  %v903_v56 = vrot.slane %v901_v52, 1  ;;  %v905_v1 = vshrl.u32 %v2491_v43, 16  ;;  %v1411_v21 = vld [vmem:[%s2471_s30 + $0x4] sm:$0xf]  ;;  %v1417_v24 = vld [vmem:[%s2471_s30] sm:$0xe] }
  0x23   : > { %2092 = vmatprep.mubr.msk.bf16.mxu1 %vm390_vm1, %v806_v47  ;;  %2063 = vmatmul.mubr.msk.bf16.vlgmr.msra.gmra.mrb[0].mxu0 %vm390_vm1, %v389_v49  ;;  %v898_v55 = vrot.slane %v896_v51, 1  ;;  %v909_v2 = vshll.u32 %v2514_v59, 16  ;;  %v1955_v4 = vcombine.low %v975_v63, %v874_v38  ;;  %v607_v7 = vshll.u32 %v2277_v0, 16  ;;  %v2555_v25 = vld [vmem:[%s2471_s30] sm:$0xff]   ;;  %v2564_v30 = vld [vmem:[%s2471_s30 + $0x8] sm:$0xff]   ;;  %p338_p9 = scmp.lt.s32.totalorder %s1914_s26, 63 }
  0x24   : > { %2067 = vmatpush3.bf16.msra.mxu0 %v455_v46  ;;  %2068 = vmatprep.mubr.msk.bf16.mxu0 %vm390_vm1, %v2268_v11  ;;  %v814_v58 = vsel %vm369_vm2, %v809_v53, %v813_v54  ;;  %v907_v9 = vor.u32 %v905_v1, %v903_v56  ;;  %v982_v12 = vrot.slane %v2491_v43, 1  ;;  %v605_v13 = vshrl.u32 %v2277_v0, 16  ;;  %v2279_v27 = vld [vmem:[%s2471_s30 + $0x10] ss:$0 sps:$4 sm:$0x11]   ;;  %v2568_v33 = vld [vmem:[%s2471_s30 + $0x8] sm:$0xff]  }
  0x25   : > { %2206 = vmatprep.subr.msk.bf16.mxu0 %vm397_vm0, %v1926_v48  ;;  %v899_v57 = vor.u32 %v898_v55, %v894_v50  ;;  %v911_v10 = vrot.slane %v909_v2, 1  ;;  %v981_v11 = vrot.slane %v1955_v4, 1  ;;  %v609_v14 = vrot.slane %v607_v7, 1  ;;  %v1963_v35 = vld [vmem:[%s2749_s3 + $0x12] sm:$0x3]  ;;  %s2770_s26 = smov (!%p338_p9, %s1914_s26), 63 }
  0x26   : > { %v612_v15 = vshll.u32 %v2278_v6, 16  ;;  %v993_v17 = vsel %vm397_vm0, %v1954_v62, 0  ;;  %v631_v28 = vsel %vm397_vm0, %v1931_v8, 0  ;;  %v1988_v29 = vcombine.low %v1417_v24, %v1411_v21  ;;  %v2283_v49 = vld [vmem:[%s2471_s30 + $0x10] ss:$0 sps:$4 sm:$0x11]  }
  0x27   : > { %v904_v61 = vsel %vm369_vm2, %v899_v57, %v903_v56  ;;  %v983_v19 = vsel %vm728_vm3, %v981_v11, %v982_v12  ;;  %v610_v22 = vor.u32 %v609_v14, %v605_v13  ;;  %v1993_v31 = vcombine.low %v1410_v20, %v1411_v21  ;;  %v1986_v50 = vld [vmem:[%s2749_s3 + $0x18] sm:$0x3]  ;;  %v2286_v52 = vld [vmem:[%s2471_s30 + $0x10] ss:$0 sps:$4 sm:$0x11]   ;;  %v2611_v11 = vld [vmem:[%s2542_s27 + $0x8] sm:$0xff]  }
  0x28   : > { %v614_v23 = vrot.slane %v612_v15, 1  ;;  %v1086_v34 = vshll.u32 %v2555_v25, 16  ;;  %v984_v36 = vrot.slane %v2514_v59, 1  ;;  %v616_v37 = vshrl.u32 %v2278_v6, 16  ;;  %v2592_v59 = vld [vmem:[%s2542_s27 + $0x4] sm:$0xf] }
  0x29   : > { %v620_v38 = vshll.u32 %v2279_v27, 16  ;;  %v1433_v39 = vrot.slane %v1988_v29, 1  ;;  %v1434_v40 = vrot.slane %v2564_v30, 1  ;;  %v1502_v41 = vshll.u32 %v1993_v31, 16  ;;  %v1996_v13 = vld [vmem:[%s2749_s3 + $0x1c] sm:$0x3] }
  0x2a   : > { %v615_v32 = vsel %vm369_vm2, %v610_v22, %v614_v23  ;;  %v1084_v42 = vshrl.u32 %v2555_v25, 16  ;;  %v1088_v43 = vrot.slane %v1086_v34, 1  ;;  %v1091_v44 = vshll.u32 %v2568_v33, 16  ;;  %v1971_v21 = vld [vmem:[%s2749_s3 + $0x14] sm:$0x3]  ;;  %v2293_v34 = vld [vmem:[%s2542_s27] sm:$0xff]  }
  0x2b   : > { %v1445_v45 = vsel %vm397_vm0, %v1987_v18, 0  ;;  %v985_v46 = vsel %vm728_vm3, %v982_v12, %v984_v36  ;;  %v618_v47 = vor.u32 %v616_v37, %v614_v23  ;;  %v622_v48 = vrot.slane %v620_v38, 1  ;;  %v2290_v36 = vld [vmem:[%s2542_s27] sm:$0xff]   ;;  %s1915_s29 = sshll.u32 %s2770_s26, 3 }
  0x2c   : > { %2093 = vmatmul.mubr.msk.bf16.vlgmr.msra.gmra.mrb[0].mxu1 %vm390_vm1, %v814_v58  ;;  %v1435_v51 = vsel %vm728_vm3, %v1433_v39, %v1434_v40  ;;  %v1500_v53 = vshrl.u32 %v1993_v31, 16  ;;  %v1504_v54 = vrot.slane %v1502_v41, 1  ;;  %v1507_v55 = vshll.u32 %v2564_v30, 16  ;;  %v1577_v58 = vld [vmem:[%s2542_s27] sm:$0xf]  ;;  %v2294_v39 = vld [vmem:[%s2542_s27 + $0x8] sm:$0xff]   ;;  %s342_s18 = sadd.s32 %s1916_s6, %s1915_s29 }
  0x2d   : > { %2097 = vmatpush3.bf16.msra.mxu1 %v920_v60  ;;  %2098 = vmatprep.mubr.msk.bf16.mxu1 %vm390_vm1, %v904_v61  ;;  %v1089_v56 = vor.u32 %v1088_v43, %v1084_v42  ;;  %v1093_v57 = vrot.slane %v1091_v44, 1  ;;  %v623_v60 = vsel %vm369_vm2, %v618_v47, %v622_v48  ;;  %v1436_v61 = vrot.slane %v2283_v49, 1  ;;  %v2002_v31 = vld [vmem:[%s2749_s3 + $0x1e] sm:$0x3]  ;;  %v1976_v41 = vld [vmem:[%s2749_s3 + $0x16] sm:$0x3] }
  0x2e   : > { %2211 = vmatprep.subr.msk.bf16.mxu1 %vm397_vm0, %v1954_v62  ;;  %v1095_v62 = vshrl.u32 %v2568_v33, 16  ;;  %v1099_v63 = vshll.u32 %v2286_v52, 16  ;;  %v1505_v0 = vor.u32 %v1504_v54, %v1500_v53  ;;  %v1509_v1 = vrot.slane %v1507_v55, 1  ;;  %v2291_v53 = vld [vmem:[%s2542_s27 + $0x8] sm:$0xff]   ;;  %s1917_s19 = sshll.u32 %s342_s18, 3 }
  0x2f   : > { %2069 = vmatmul.mubr.msk.bf16.vlgmr.msra.gmra.mrb[0].mxu0 %vm390_vm1, %v2464_v16  ;;  %v912_v16 = vsel %vm369_vm2, %v907_v9, %v911_v10  ;;  %v1997_v2 = vcombine.low %v1577_v58, %v2592_v59  ;;  %v1094_v4 = vsel %vm369_vm2, %v1089_v56, %v1093_v57  ;;  %v1437_v6 = vsel %vm728_vm3, %v1434_v40, %v1436_v61  ;;  %v2295_v54 = vld [vmem:[%s2542_s27 + $0x10] ss:$0 sps:$4 sm:$0x11]   ;;  %s2689_s9 = scalar_lea.vmem %s2751_s5, %s1917_s19 }
  0x30   : > { %2073 = vmatpush3.bf16.msra.mxu0 %v529_v5  ;;  %2074 = vmatprep.mubr.msk.bf16.mxu0 %vm390_vm1, %v2274_v3  ;;  %v1110_v3 = vsel %vm397_vm0, %v1963_v35, 0  ;;  %v1962_v5 = vld [vmem:[%s2749_s3 + $0x10] sm:$0x3]  ;;  %v1526_v7 = vsel %vm397_vm0, %v1986_v50, 0  ;;  %v1101_v9 = vrot.slane %v1099_v63, 1  ;;  %v1510_v10 = vsel %vm369_vm2, %v1505_v0, %v1509_v1 }
  0x31   : > { %2207 = vmatprep.subr.msk.bf16.mxu0 %vm397_vm0, %v1931_v8  ;;  %v1097_v8 = vor.u32 %v1095_v62, %v1093_v57  ;;  %v1600_v12 = vshll.u32 %v1997_v2, 16  ;;  %v1511_v14 = vshrl.u32 %v2564_v30, 16  ;;  %v1515_v15 = vshll.u32 %v2283_v49, 16  ;;  %v2675_v0 = vld [vmem:[%s2750_s4] ss:$0 sm:$0xff] }
  0x32   : > { %v1166_v20 = vsel %vm397_vm0, %v1962_v5, 0  ;;  %v1624_v29 = vsel %vm397_vm0, %v1996_v13, 0  ;;  %v1240_v38 = vsel %vm397_vm0, %v1971_v21, 0  ;;  %v1318_v40 = vshll.u32 %v2293_v34, 16 }
  0x33   : > { %v1513_v22 = vor.u32 %v1511_v14, %v1509_v1  ;;  %v1517_v23 = vrot.slane %v1515_v15, 1  ;;  %v1323_v48 = vshll.u32 %v2294_v39, 16  ;;  %v1342_v55 = vsel %vm397_vm0, %v1976_v41, 0 }
  0x34   : > { %v1320_v47 = vrot.slane %v1318_v40, 1  ;;  %v1327_v58 = vshrl.u32 %v2294_v39, 16 }
  0x35   : > { %v1518_v27 = vsel %vm369_vm2, %v1513_v22, %v1517_v23  ;;  %v1325_v52 = vrot.slane %v1323_v48, 1 }
  0x37   : > { %v1329_v61 = vor.u32 %v1327_v58, %v1325_v52 }
  0x38   : > { %2099 = vmatmul.mubr.msk.bf16.vlgmr.msra.gmra.mrb[0].mxu1 %vm390_vm1, %v912_v16  ;;  %v1102_v16 = vsel %vm369_vm2, %v1097_v8, %v1101_v9 }
  0x39   : > { %2103 = vmatpush3.bf16.msra.mxu1 %v993_v17  ;;  %2104 = vmatprep.mubr.msk.bf16.mxu1 %vm390_vm1, %v983_v19  ;;  %v1598_v17 = vshrl.u32 %v1997_v2, 16  ;;  %v1605_v19 = vshll.u32 %v2611_v11, 16 }
  0x3a   : > { %2216 = vmatprep.subr.msk.bf16.mxu1 %vm397_vm0, %v1987_v18  ;;  %v1602_v18 = vrot.slane %v1600_v12, 1 }
  0x3b   : > { %2075 = vmatmul.mubr.msk.bf16.vlgmr.msra.gmra.mrb[0].mxu0 %vm390_vm1, %v2275_v26  ;;  %v1607_v26 = vrot.slane %v1605_v19, 1 }
  0x3c   : > { %2079 = vmatpush3.bf16.msra.mxu0 %v631_v28  ;;  %2080 = vmatprep.mubr.msk.bf16.mxu0 %vm390_vm1, %v615_v32  ;;  %v1603_v24 = vor.u32 %v1602_v18, %v1598_v17  ;;  %v2289_v28 = vld [vmem:[%s2542_s27 + $0x10] ss:$0 sps:$4 sm:$0x11]   ;;  %v1679_v32 = vld [vmem:[%s2542_s27] sm:$0xe] }
  0x3d   : > { %2212 = vmatprep.subr.msk.bf16.mxu0 %vm397_vm0, %v1963_v35  ;;  %v1613_v35 = vshll.u32 %v2289_v28, 16  ;;  %v2003_v37 = vcombine.low %v1679_v32, %v2592_v59  ;;  %v1688_v57 = vrot.slane %v2289_v28, 1  ;;  %v1331_v59 = vshll.u32 %v2295_v54, 16 }
  0x3e   : > { %v1608_v30 = vsel %vm369_vm2, %v1603_v24, %v1607_v26 }
  0x3f   : > { %v1615_v43 = vrot.slane %v1613_v35, 1  ;;  %v1685_v44 = vrot.slane %v2003_v37, 1  ;;  %v1333_v62 = vrot.slane %v1331_v59, 1 }
  0x41   : > { %v1334_v63 = vsel %vm369_vm2, %v1329_v61, %v1333_v62 }
  0x44   : > { %2105 = vmatmul.mubr.msk.bf16.vlgmr.msra.gmra.mrb[0].mxu1 %vm390_vm1, %v985_v46  ;;  %v1316_v46 = vshrl.u32 %v2293_v34, 16 }
  0x45   : > { %2133 = vmatpush3.bf16.msra.mxu1 %v1445_v45  ;;  %2134 = vmatprep.mubr.msk.bf16.mxu1 %vm390_vm1, %v1435_v51  ;;  %v1686_v45 = vrot.slane %v2611_v11, 1 }
  0x46   : > { %2217 = vmatprep.subr.msk.bf16.mxu1 %vm397_vm0, %v1986_v50  ;;  %v1697_v50 = vsel %vm397_vm0, %v2002_v31, 0  ;;  %v1321_v51 = vor.u32 %v1320_v47, %v1316_v46 }
  0x47   : > { %2081 = vmatmul.mubr.msk.bf16.vlgmr.msra.gmra.mrb[0].mxu0 %vm390_vm1, %v623_v60  ;;  %v1689_v60 = vsel %vm728_vm3, %v1686_v45, %v1688_v57 }
  0x48   : > { %2109 = vmatpush3.bf16.msra.mxu0 %v1110_v3  ;;  %2110 = vmatprep.mubr.msk.bf16.mxu0 %vm390_vm1, %v1094_v4  ;;  %v1326_v56 = vsel %vm369_vm2, %v1321_v51, %v1325_v52 }
  0x49   : > { %2213 = vmatprep.subr.msk.bf16.mxu0 %vm397_vm0, %v1962_v5 }
  0x4c   : > { %2135 = vmatmul.mubr.msk.bf16.vlgmr.msra.gmra.mrb[4].mxu1 %vm390_vm1, %v1437_v6 }
  0x4d   : > { %2139 = vmatpush3.bf16.msra.mxu1 %v1526_v7  ;;  %2140 = vmatprep.mubr.msk.bf16.mxu1 %vm390_vm1, %v1510_v10 }
  0x4e   : > { %2218 = vmatprep.subr.msk.bf16.mxu1 %vm397_vm0, %v1996_v13 }
  0x4f   : > { %2111 = vmatmul.mubr.msk.bf16.vlgmr.msra.gmra.mrb[4].mxu0 %vm390_vm1, %v1102_v16 }
  0x50   : > { %2115 = vmatpush3.bf16.msra.mxu0 %v1166_v20  ;;  %2116 = vmatprep.mubr.msk.bf16.mxu0 %vm390_vm1, %v2555_v25  ;;  %v1609_v25 = vshrl.u32 %v2611_v11, 16 }
  0x51   : > { %2214 = vmatprep.subr.msk.bf16.mxu0 %vm397_vm0, %v1971_v21 }
  0x52   : > { %v1611_v42 = vor.u32 %v1609_v25, %v1607_v26 }
  0x54   : > { %v1616_v49 = vsel %vm369_vm2, %v1611_v42, %v1615_v43 }
  0x58   : > { %2141 = vmatmul.mubr.msk.bf16.vlgmr.msra.gmra.mrb[4].mxu1 %vm390_vm1, %v1518_v27 }
  0x59   : > { %2145 = vmatpush3.bf16.msra.mxu1 %v1624_v29  ;;  %2146 = vmatprep.mubr.msk.bf16.mxu1 %vm390_vm1, %v1608_v30 }
  0x5a   : > { %2219 = vmatprep.subr.msk.bf16.mxu1 %vm397_vm0, %v2002_v31 }
  0x5b   : > { %2117 = vmatmul.mubr.msk.bf16.vlgmr.msra.gmra.mrb[4].mxu0 %vm390_vm1, %v2568_v33  ;;  %v1687_v33 = vsel %vm728_vm3, %v1685_v44, %v1686_v45 }
  0x5c   : > { %2121 = vmatpush3.bf16.msra.mxu0 %v1240_v38  ;;  %2122 = vmatprep.mubr.msk.bf16.mxu0 %vm390_vm1, %v2290_v36 }
  0x5d   : > { %2215 = vmatprep.subr.msk.bf16.mxu0 %vm397_vm0, %v1976_v41 }
  0x64   : > { %2147 = vmatmul.mubr.msk.bf16.vlgmr.msra.gmra.mrb[4].mxu1 %vm390_vm1, %v1616_v49 }
  0x65   : > { %2151 = vmatpush3.bf16.msra.mxu1 %v1697_v50  ;;  %2152 = vmatprep.mubr.msk.bf16.mxu1 %vm390_vm1, %v1687_v33 }
  0x67   : > { %2123 = vmatmul.mubr.msk.bf16.vlgmr.msra.gmra.mrb[4].mxu0 %vm390_vm1, %v2291_v53 }
  0x68   : > { %2127 = vmatpush3.bf16.msra.mxu0 %v1342_v55  ;;  %2128 = vmatprep.mubr.msk.bf16.mxu0 %vm390_vm1, %v1326_v56 }
  0x70   : > { %2153 = vmatmul.mubr.msk.bf16.vlgmr.msra.gmra.mrb[4].mxu1 %vm390_vm1, %v1689_v60 }
  0x73   : > { %2129 = vmatmul.mubr.msk.bf16.vlgmr.msra.gmra.mrb[4].mxu0 %vm390_vm1, %v1334_v63 }
 0x117   : > { %v2106_v1 = vpop.f32.mrb[0].mxu1 }
 0x118   : > { %v1050_v2 = vadd.f32 %v2106_v1, %v2675_v0  ;;  %v1029_v3 = vpop.f32.mrb[1].mxu1 }
 0x119   : > { %v1048_v4 = vadd.f32 %v2675_v0, %v1029_v3  ;;  %v2107_v5 = vpop.f32.mrb[2].mxu1 }
 0x11a   : > { %2296 = vtanh.f32 %v1050_v2  ;;  %v1051_v6 = vadd.f32 %v2107_v5, %v2675_v0  ;;  %v1032_v7 = vpop.f32.mrb[3].mxu1  ;;  %v2082_v9 = vpop.f32.mrb[0].mxu0 }
 0x11b   : > { %2298 = vtanh.f32 %v1048_v4  ;;  %v1049_v8 = vadd.f32 %v2675_v0, %v1032_v7  ;;  %v694_v10 = vadd.f32 %v2082_v9, %v2675_v0  ;;  %v667_v11 = vpop.f32.mrb[1].mxu0 }
 0x11c   : > { %2300 = vtanh.f32 %v1051_v6  ;;  %v692_v12 = vadd.f32 %v2675_v0, %v667_v11  ;;  %v2083_v13 = vpop.f32.mrb[2].mxu0 }
 0x11d   : > { %2302 = vtanh.f32 %v1049_v8  ;;  %v695_v14 = vadd.f32 %v2083_v13, %v2675_v0  ;;  %v670_v15 = vpop.f32.mrb[3].mxu0 }
 0x11e   : > { %2304 = vtanh.f32 %v694_v10  ;;  %v693_v16 = vadd.f32 %v2675_v0, %v670_v15 }
 0x11f   : > { %2306 = vtanh.f32 %v692_v12 }
 0x120   : > { %2308 = vtanh.f32 %v695_v14 }
 0x121   : > { %2310 = vtanh.f32 %v693_v16 }
 0x124   : > { %v2297_v17 = vpop.eup %2296 }
 0x125   : > { %v2299_v18 = vpop.eup %2298  ;;  %1960 = vst.msk [vmem:[%s2689_s9 + $0x30] sm:$0xff] %vm700_vm4, %v2297_v17 }
 0x126   : > { %v2301_v19 = vpop.eup %2300  ;;  %1958 = vst.msk [vmem:[%s2689_s9 + $0x20] sm:$0xff] %vm700_vm4, %v2299_v18 }
 0x127   : > { %v2303_v20 = vpop.eup %2302  ;;  %1961 = vst.msk [vmem:[%s2689_s9 + $0x38] sm:$0xff] %vm700_vm4, %v2301_v19 }
 0x128   : > { %1959 = vst.msk [vmem:[%s2689_s9 + $0x28] sm:$0xff] %vm700_vm4, %v2303_v20  ;;  %v2305_v21 = vpop.eup %2304 }
 0x129   : > { %v2307_v22 = vpop.eup %2306  ;;  %703 = vst.msk [vmem:[%s2689_s9 + $0x10] sm:$0xff] %vm700_vm4, %v2305_v21 }
 0x12a   : > { %v2309_v23 = vpop.eup %2308  ;;  %701 = vst.msk [vmem:[%s2689_s9] sm:$0xff] %vm700_vm4, %v2307_v22 }
 0x12b   : > { %v2311_v24 = vpop.eup %2310  ;;  %704 = vst.msk [vmem:[%s2689_s9 + $0x18] sm:$0xff] %vm700_vm4, %v2309_v23 }
 0x12c   : > { %702 = vst.msk [vmem:[%s2689_s9 + $0x8] sm:$0xff] %vm700_vm4, %v2311_v24 }
 0x143   : > { %v2154_v26 = vpop.f32.mrb[4].mxu1 }
 0x144   : > { %v1754_v27 = vadd.f32 %v2154_v26, %v2675_v0  ;;  %v1733_v28 = vpop.f32.mrb[5].mxu1 }
 0x145   : > { %v1752_v29 = vadd.f32 %v2675_v0, %v1733_v28  ;;  %v2155_v30 = vpop.f32.mrb[6].mxu1 }
 0x146   : > { %2312 = vtanh.f32 %v1754_v27  ;;  %v1755_v31 = vadd.f32 %v2155_v30, %v2675_v0  ;;  %v1736_v32 = vpop.f32.mrb[7].mxu1  ;;  %v2130_v25 = vpop.f32.mrb[4].mxu0 }
 0x147   : > { %2314 = vtanh.f32 %v1752_v29  ;;  %v1753_v34 = vadd.f32 %v2675_v0, %v1736_v32  ;;  %v1399_v35 = vadd.f32 %v2130_v25, %v2675_v0  ;;  %v1378_v36 = vpop.f32.mrb[5].mxu0 }
 0x148   : > { %2316 = vtanh.f32 %v1755_v31  ;;  %v1397_v37 = vadd.f32 %v2675_v0, %v1378_v36  ;;  %v2131_v38 = vpop.f32.mrb[6].mxu0 }
 0x149   : > { %2318 = vtanh.f32 %v1753_v34  ;;  %v1400_v39 = vadd.f32 %v2131_v38, %v2675_v0  ;;  %v1381_v40 = vpop.f32.mrb[7].mxu0 }
 0x14a   : > { %2320 = vtanh.f32 %v1399_v35  ;;  %v1398_v41 = vadd.f32 %v2675_v0, %v1381_v40 }
 0x14b   : > { %2322 = vtanh.f32 %v1397_v37 }
 0x14c   : > { %2324 = vtanh.f32 %v1400_v39 }
 0x14d   : > { %2326 = vtanh.f32 %v1398_v41 }
 0x150   : > { %v2313_v42 = vpop.eup %2312 }
 0x151   : > { %v2315_v43 = vpop.eup %2314  ;;  %2008 = vst.msk [vmem:[%s2689_s9 + $0x70] sm:$0xff] %vm700_vm4, %v2313_v42 }
 0x152   : > { %v2317_v44 = vpop.eup %2316  ;;  %2006 = vst.msk [vmem:[%s2689_s9 + $0x60] sm:$0xff] %vm700_vm4, %v2315_v43 }
 0x153   : > { %v2319_v45 = vpop.eup %2318  ;;  %2009 = vst.msk [vmem:[%s2689_s9 + $0x78] sm:$0xff] %vm700_vm4, %v2317_v44 }
 0x154   : > { %2007 = vst.msk [vmem:[%s2689_s9 + $0x68] sm:$0xff] %vm700_vm4, %v2319_v45  ;;  %v2321_v46 = vpop.eup %2320 }
 0x155   : > { %v2323_v47 = vpop.eup %2322  ;;  %1984 = vst.msk [vmem:[%s2689_s9 + $0x50] sm:$0xff] %vm700_vm4, %v2321_v46 }
 0x156   : > { %v2325_v48 = vpop.eup %2324  ;;  %1982 = vst.msk [vmem:[%s2689_s9 + $0x40] sm:$0xff] %vm700_vm4, %v2323_v47 }
 0x157   : > { %v2327_v49 = vpop.eup %2326  ;;  %1985 = vst.msk [vmem:[%s2689_s9 + $0x58] sm:$0xff] %vm700_vm4, %v2325_v48 }
 0x158   : > { %1983 = vst.msk [vmem:[%s2689_s9 + $0x48] sm:$0xff] %vm700_vm4, %v2327_v49 }
 0x159 PF: > { %s15_s22 = sadd.s32 1, %s2366_s22   ;;  %s2753_s18 = smov %s2358_s20 }
 0x15a   : > { %p12_p10 = scmp.ge.s32.totalorder %s15_s22, 66   ;;  %s2754_s19 = smov %s2362_s21 }
 0x15b   : > { %s2755_s20 = smov %s2758_s23  ;;  %s2756_s21 = smov %s2762_s24 }
 0x15c   :  { %14 = sbr.rel (!%p12_p10) target bundleno = 3 (0x3), region = 94 }

</bundles_post_ra>
